<compile_context>
chip_gen: v7x
topology: tpu7x:2x2x1
jax: 0.10.0
libtpu: 0.0.40
codegen_flags: <defaults>
</compile_context>

<pallas_src>
import functools
import math

import jax
import jax.numpy as jnp
from jax.experimental import pallas as pl
from jax.experimental.pallas import tpu as pltpu

_LAB_BITS = 16  # labels are packed into the low 16 bits of the selection code


def _knn_kernel(x_ref, memt_ref, lab_ref, o_ref, xn_ref, topv_ref, topl_ref,
                *, k, inv_temp, q_valid, unroll):
    # x_ref:    (TB, D)    raw input feature tile (f32)
    # memt_ref: (D, TQ)    memory bank tile, pre-transposed, bf16
    # lab_ref:  (1, TQ)    memory label tile (int32)
    # o_ref:    (TB, CP)   lane-padded prediction tile (f32), written last step
    # xn_ref:   (TB, D)    scratch: normalized x (bf16, reused across q tiles)
    # topv_ref: (TB, 128)  scratch: running top-k values (f32, -inf padded)
    # topl_ref: (TB, 128)  scratch: running top-k labels (int32)
    qj = pl.program_id(1)
    nq = pl.num_programs(1)
    tb = x_ref.shape[0]
    tq = memt_ref.shape[1]
    kpad = topv_ref.shape[1]
    c_pad = o_ref.shape[1]
    neg_inf = jnp.float32(-jnp.inf)
    int_max = jnp.iinfo(jnp.int32).max

    # --- per batch tile init (first q step): normalize x, reset running top-k.
    @pl.when(qj == 0)
    def _():
        x = x_ref[...].astype(jnp.float32)
        ssq = jnp.sum(x * x, axis=-1, keepdims=True)
        xn = x * jax.lax.rsqrt(jnp.maximum(ssq, jnp.float32(1e-24)))
        xn_ref[...] = xn.astype(xn_ref.dtype)
        topv_ref[...] = jnp.full((tb, kpad), neg_inf, jnp.float32)
        topl_ref[...] = jnp.zeros((tb, kpad), jnp.int32)

    # --- similarity tile on the MXU: (TB, D) @ (D, TQ), bf16 in / f32 out.
    dist = jnp.dot(xn_ref[...], memt_ref[...],
                   preferred_element_type=jnp.float32)

    lane_q = jax.lax.broadcasted_iota(jnp.int32, (tb, tq), 1)
    if q_valid is not None:  # static: queue was padded to a multiple of TQ
        dist = jnp.where(qj * tq + lane_q < q_valid, dist, neg_inf)

    labels = lab_ref[...].astype(jnp.int32)                    # (1, TQ)
    lane_k = jax.lax.broadcasted_iota(jnp.int32, (tb, kpad), 1)
    code_tile = (lane_q << _LAB_BITS) + labels                 # (TB, TQ)
    code_top = ((tq + lane_k) << _LAB_BITS) + topl_ref[...]    # (TB, KPAD)

    # Candidates = this tile's distances ++ running top-k from previous tiles.
    cand_v = jnp.concatenate([dist, topv_ref[...]], axis=-1)   # (TB, TQ+KPAD)
    cand_c = jnp.concatenate([code_tile, code_top], axis=-1)
    cand_iota = jax.lax.broadcasted_iota(jnp.int32, (tb, tq + kpad), 1)

    def select_one(j, carry):
        cv, nv, nl = carry
        mj = jnp.max(cv, axis=-1, keepdims=True)                      # (TB, 1)
        sel = jnp.min(jnp.where(cv == mj, cand_c, int_max),
                      axis=-1, keepdims=True)                         # (TB, 1)
        idx = sel >> _LAB_BITS
        lab = sel & ((1 << _LAB_BITS) - 1)
        cv = jnp.where(cand_iota == idx, neg_inf, cv)  # knock out the winner
        nv = jnp.where(lane_k == j, mj, nv)
        nl = jnp.where(lane_k == j, lab, nl)
        return cv, nv, nl

    init = (cand_v,
            jnp.full((tb, kpad), neg_inf, jnp.float32),
            jnp.zeros((tb, kpad), jnp.int32))
    _, new_v, new_l = jax.lax.fori_loop(0, k, select_one, init, unroll=unroll)

    topv_ref[...] = new_v
    topl_ref[...] = new_l

    # --- last q step: softmax over the global top-k + one-hot aggregation.
    @pl.when(qj == nq - 1)
    def _():
        s = new_v * jnp.float32(inv_temp)        # sorted descending; col 0 max
        w = jnp.exp(s - s[:, 0:1])               # -inf padding -> weight 0
        den = jnp.sum(w, axis=-1, keepdims=True)
        c_iota = jax.lax.broadcasted_iota(jnp.int32, (tb, c_pad), 1)
        pred = jnp.zeros((tb, c_pad), jnp.float32)
        for j in range(k):                       # static, k is small
            pred = pred + jnp.where(c_iota == new_l[:, j:j + 1],
                                    w[:, j:j + 1], 0.0)
        pred = pred / den
        o_ref[...] = jnp.minimum(pred + 1e-5, 1.0).astype(o_ref.dtype)


def _round_up(n, m):
    return ((n + m - 1) // m) * m


def momentum_queue_class_forward(x, memory, memory_label, *, k, temperature,
                                 classes, test=False, batch_tile=128,
                                 q_tile=256, mxu_dtype=jnp.bfloat16):
    """Pallas TPU implementation of MomentumQueueClass.forward."""
    temp = 0.1 if test else temperature
    b, d = x.shape
    q, d2 = memory.shape
    assert d2 == d
    assert 1 <= k <= q, "k must be in [1, queue_size]"
    assert k <= 128, "running top-k scratch holds at most 128 entries"
    assert classes < (1 << _LAB_BITS), "labels must fit in 16 bits"

    # Lane-dense, 128-padded class dim (sliced back below).
    c_pad = _round_up(max(classes, 128), 128)

    # Batch tiling (padded rows are zeros -> harmless, sliced away).
    bt = min(batch_tile, _round_up(b, 8))
    b_pad = _round_up(b, bt)

    # Queue tiling (padded columns are masked to -inf inside the kernel).
    tq = min(q_tile, _round_up(q, 128))
    q_pad = _round_up(q, tq)

    x_p = x.astype(jnp.float32)
    if b_pad != b:
        x_p = jnp.pad(x_p, ((0, b_pad - b), (0, 0)))

    # Pre-transpose the bank to (D, Q) and cast once to the MXU dtype; in a
    # real module the queue would simply be stored this way.
    mem_t = memory.astype(mxu_dtype).T                       # (D, Q)
    labels = memory_label.astype(jnp.int32).reshape(1, q)
    if q_pad != q:
        mem_t = jnp.pad(mem_t, ((0, 0), (0, q_pad - q)))
        labels = jnp.pad(labels, ((0, 0), (0, q_pad - q)))

    kernel = functools.partial(
        _knn_kernel, k=k, inv_temp=1.0 / float(temp),
        q_valid=(q if q_pad != q else None), unroll=(k <= 8))

    out = pl.pallas_call(
        kernel,
        out_shape=jax.ShapeDtypeStruct((b_pad, c_pad), jnp.float32),
        grid_spec=pltpu.PrefetchScalarGridSpec(
            num_scalar_prefetch=0,
            grid=(b_pad // bt, q_pad // tq),        # reduction (q) axis last
            in_specs=[
                pl.BlockSpec((bt, d), lambda i, j: (i, 0)),    # x tile
                pl.BlockSpec((d, tq), lambda i, j: (0, j)),    # memory.T tile
                pl.BlockSpec((1, tq), lambda i, j: (0, j)),    # label tile
            ],
            out_specs=pl.BlockSpec((bt, c_pad), lambda i, j: (i, 0)),
            scratch_shapes=[
                pltpu.VMEM((bt, d), mxu_dtype),      # normalized x
                pltpu.VMEM((bt, 128), jnp.float32),  # running top-k values
                pltpu.VMEM((bt, 128), jnp.int32),    # running top-k labels
            ],
        ),
        compiler_params=pltpu.CompilerParams(
            dimension_semantics=("parallel", "arbitrary")),
    )(x_p, mem_t, labels)

    return out[:b, :classes]


def _reference_forward(x, memory, memory_label, *, k, temperature, classes,
                       test=False, mxu_dtype=jnp.bfloat16):
    """Pure-JAX reference (mirrors the PyTorch forward) for validation."""
    temp = 0.1 if test else temperature
    x = x.astype(jnp.float32)
    ssq = jnp.sum(x * x, axis=-1, keepdims=True)
    xn = x * jax.lax.rsqrt(jnp.maximum(ssq, 1e-24))          # F.normalize
    dist = jnp.dot(xn.astype(mxu_dtype), memory.astype(mxu_dtype).T,
                   preferred_element_type=jnp.float32)
    sim_weight, sim_indices = jax.lax.top_k(dist, k)
    sim_labels = memory_label[sim_indices]                   # (B, k)
    sim_weight = jax.nn.softmax(sim_weight / temp, axis=-1)  # (B, k)
    one_hot = jax.nn.one_hot(sim_labels, classes, dtype=jnp.float32)
    pred = jnp.sum(one_hot * sim_weight[..., None], axis=1)
    return jnp.minimum(pred + 1e-5, 1.0)


if __name__ == "__main__":
    # Module hyper-parameters (small, consistent with __init__ signature).
    feature_dim = 128
    queue_size = 640     # exercises queue padding (640 -> 768 with TQ=256)
    temperature = 0.07
    k = 4
    classes = 16
    batch = 200          # exercises batch padding (200 -> 256 with TB=128)

    key = jax.random.PRNGKey(0)
    kx, kmem, klab = jax.random.split(key, 3)

    # __init__: memory ~ U(-stdv, stdv) with stdv = 1/sqrt(feature_dim/3).
    stdv = 1.0 / math.sqrt(feature_dim / 3)
    memory = jax.random.uniform(kmem, (queue_size, feature_dim),
                                dtype=jnp.float32, minval=-stdv, maxval=stdv)
    # __init__ zeros the labels; use random labels so the one-hot aggregation
    # path is exercised (queue would be filled via update_queue in practice).
    memory_label = jax.random.randint(klab, (queue_size,), 0, classes,
                                      dtype=jnp.int32)
    x = jax.random.normal(kx, (batch, feature_dim), dtype=jnp.float32)

    out = momentum_queue_class_forward(
        x, memory, memory_label,
        k=k, temperature=temperature, classes=classes, test=False)
    out = jax.block_until_ready(out)

    ref = _reference_forward(
        x, memory, memory_label,
        k=k, temperature=temperature, classes=classes, test=False)

    assert out.shape == (batch, classes)
    assert bool(jnp.all(jnp.isfinite(out)))
    assert jnp.allclose(out, ref, atol=1e-4, rtol=1e-4), (
        f"mismatch vs reference, max abs diff "
        f"{float(jnp.max(jnp.abs(out - ref)))}")

    print("KERNEL_OK")
</pallas_src>

<mosaic_0001>
module attributes {stable_mosaic.version = 11 : i64} {
  func.func @_knn_kernel(%arg0: i32, %arg1: i32, %arg2: memref<128x128xf32, #tpu.memory_space<vmem>>, %arg3: memref<128x256xbf16, #tpu.memory_space<vmem>>, %arg4: memref<1x256xi32, #tpu.memory_space<vmem>>, %arg5: memref<128x128xf32, #tpu.memory_space<vmem>>, %arg6: memref<128x128xbf16, #tpu.memory_space<vmem>>, %arg7: memref<128x128xf32, #tpu.memory_space<vmem>>, %arg8: memref<128x128xi32, #tpu.memory_space<vmem>>) attributes {dimension_semantics = [#tpu.dimension_semantics<parallel>, #tpu.dimension_semantics<arbitrary>], iteration_bounds = array<i64: 2, 3>, scalar_prefetch = 0 : i64, scratch_operands = 3 : i64, tpu.core_type = #tpu.core_type<tc>, window_params = [{transform_indices = @transform_0, window_bounds = array<i64: 128, 128>}, {transform_indices = @transform_1, window_bounds = array<i64: 128, 256>}, {transform_indices = @transform_2, window_bounds = array<i64: 1, 256>}, {transform_indices = @transform_3, window_bounds = array<i64: 128, 128>}]} {
    %c0_i32 = arith.constant 0 : i32
    %0 = arith.cmpi eq, %arg1, %c0_i32 : i32
    %1 = arith.extui %0 : i1 to i32
    %cst = arith.constant 0xFF800000 : f32
    %c0_i32_0 = arith.constant 0 : i32
    %2 = arith.cmpi ne, %1, %c0_i32_0 : i32
    scf.if %2 {
      %c0_42 = arith.constant 0 : index
      %c0_43 = arith.constant 0 : index
      %141 = vector.load %arg2[%c0_42, %c0_43] : memref<128x128xf32, #tpu.memory_space<vmem>>, vector<128x128xf32>
      %142 = arith.mulf %141, %141 : vector<128x128xf32>
      %cst_44 = arith.constant dense<0.000000e+00> : vector<128xf32>
      %143 = vector.multi_reduction <add>, %142, %cst_44 [1] : vector<128x128xf32> to vector<128xf32>
      %144 = vector.shape_cast %143 : vector<128xf32> to vector<128x1xf32>
      %cst_45 = arith.constant 1.000000e-24 : f32
      %145 = vector.broadcast %cst_45 : f32 to vector<128x1xf32>
      %146 = arith.maximumf %144, %145 : vector<128x1xf32>
      %147 = math.rsqrt %146 : vector<128x1xf32>
      %148 = vector.broadcast %147 : vector<128x1xf32> to vector<128x128xf32>
      %149 = arith.mulf %141, %148 : vector<128x128xf32>
      %150 = arith.truncf %149 : vector<128x128xf32> to vector<128x128xbf16>
      %c0_46 = arith.constant 0 : index
      %c0_47 = arith.constant 0 : index
      %151 = vector.load %arg6[%c0_46, %c0_47] : memref<128x128xbf16, #tpu.memory_space<vmem>>, vector<128x128xbf16>
      tpu.vector_store %arg6[%c0_46, %c0_47], %150 {strides = array<i32>} : memref<128x128xbf16, #tpu.memory_space<vmem>>, vector<128x128xbf16>,
      %152 = vector.broadcast %cst : f32 to vector<128x128xf32>
      %c0_48 = arith.constant 0 : index
      %c0_49 = arith.constant 0 : index
      %153 = vector.load %arg7[%c0_48, %c0_49] : memref<128x128xf32, #tpu.memory_space<vmem>>, vector<128x128xf32>
      tpu.vector_store %arg7[%c0_48, %c0_49], %152 {strides = array<i32>} : memref<128x128xf32, #tpu.memory_space<vmem>>, vector<128x128xf32>,
      %c0_i32_50 = arith.constant 0 : i32
      %154 = vector.broadcast %c0_i32_50 : i32 to vector<128x128xi32>
      %c0_51 = arith.constant 0 : index
      %c0_52 = arith.constant 0 : index
      %155 = vector.load %arg8[%c0_51, %c0_52] : memref<128x128xi32, #tpu.memory_space<vmem>>, vector<128x128xi32>
      tpu.vector_store %arg8[%c0_51, %c0_52], %154 {strides = array<i32>} : memref<128x128xi32, #tpu.memory_space<vmem>>, vector<128x128xi32>,
    } else {
    }
    %c0 = arith.constant 0 : index
    %c0_1 = arith.constant 0 : index
    %3 = vector.load %arg6[%c0, %c0_1] : memref<128x128xbf16, #tpu.memory_space<vmem>>, vector<128x128xbf16>
    %c0_2 = arith.constant 0 : index
    %c0_3 = arith.constant 0 : index
    %4 = vector.load %arg3[%c0_2, %c0_3] : memref<128x256xbf16, #tpu.memory_space<vmem>>, vector<128x256xbf16>
    %cst_4 = arith.constant dense<0.000000e+00> : vector<128x256xf32>
    %5 = tpu.matmul %3, %4, %cst_4 {dimension_numbers = #tpu.dot_dimension_numbers<[1], [0], [0], [1], [0, 0, 1, 1], [], []>} : vector<128x128xbf16>, vector<128x256xbf16>, vector<128x256xf32> -> vector<128x256xf32>
    %6 = tpu.iota {dimensions = array<i32: 1>} : vector<128x256xi32>
    %c256_i32 = arith.constant 256 : i32
    %7 = arith.muli %arg1, %c256_i32 : i32
    %8 = vector.broadcast %7 : i32 to vector<128x256xi32>
    %9 = arith.addi %8, %6 : vector<128x256xi32>
    %c640_i32 = arith.constant 640 : i32
    %10 = vector.broadcast %c640_i32 : i32 to vector<128x256xi32>
    %11 = arith.cmpi slt, %9, %10 : vector<128x256xi32>
    %cst_5 = arith.constant 0xFF800000 : f32
    %12 = vector.broadcast %cst_5 : f32 to vector<128x256xf32>
    %13 = arith.select %11, %5, %12 : vector<128x256xi1>, vector<128x256xf32>
    %c0_6 = arith.constant 0 : index
    %c0_7 = arith.constant 0 : index
    %14 = vector.load %arg4[%c0_6, %c0_7] : memref<1x256xi32, #tpu.memory_space<vmem>>, vector<1x256xi32>
    %15 = tpu.iota {dimensions = array<i32: 1>} : vector<128x128xi32>
    %c16_i32 = arith.constant 16 : i32
    %16 = vector.broadcast %c16_i32 : i32 to vector<128x256xi32>
    %17 = arith.shli %6, %16 : vector<128x256xi32>
    %18 = vector.broadcast %14 : vector<1x256xi32> to vector<128x256xi32>
    %19 = arith.addi %17, %18 : vector<128x256xi32>
    %c256_i32_8 = arith.constant 256 : i32
    %20 = vector.broadcast %c256_i32_8 : i32 to vector<128x128xi32>
    %21 = arith.addi %20, %15 : vector<128x128xi32>
    %c16_i32_9 = arith.constant 16 : i32
    %22 = vector.broadcast %c16_i32_9 : i32 to vector<128x128xi32>
    %23 = arith.shli %21, %22 : vector<128x128xi32>
    %c0_10 = arith.constant 0 : index
    %c0_11 = arith.constant 0 : index
    %24 = vector.load %arg8[%c0_10, %c0_11] : memref<128x128xi32, #tpu.memory_space<vmem>>, vector<128x128xi32>
    %25 = arith.addi %23, %24 : vector<128x128xi32>
    %c0_12 = arith.constant 0 : index
    %c0_13 = arith.constant 0 : index
    %26 = vector.load %arg7[%c0_12, %c0_13] : memref<128x128xf32, #tpu.memory_space<vmem>>, vector<128x128xf32>
    %27 = tpu.concatenate %13, %26 in 1 : vector<128x256xf32>, vector<128x128xf32> -> vector<128x384xf32>
    %28 = tpu.concatenate %19, %25 in 1 : vector<128x256xi32>, vector<128x128xi32> -> vector<128x384xi32>
    %29 = tpu.iota {dimensions = array<i32: 1>} : vector<128x384xi32>
    %cst_14 = arith.constant 0xFF800000 : f32
    %30 = vector.broadcast %cst_14 : f32 to vector<128x128xf32>
    %c0_i32_15 = arith.constant 0 : i32
    %31 = vector.broadcast %c0_i32_15 : i32 to vector<128x128xi32>
    %cst_16 = arith.constant 0xFF800000 : f32
    %c0_i32_17 = arith.constant 0 : i32
    %cst_18 = arith.constant dense<0xFF800000> : vector<128xf32>
    %32 = vector.multi_reduction <maximumf>, %27, %cst_18 [1] : vector<128x384xf32> to vector<128xf32>
    %33 = vector.shape_cast %32 : vector<128xf32> to vector<128x1xf32>
    %34 = vector.broadcast %33 : vector<128x1xf32> to vector<128x384xf32>
    %35 = arith.cmpf oeq, %27, %34 : vector<128x384xf32>
    %c2147483647_i32 = arith.constant 2147483647 : i32
    %36 = vector.broadcast %c2147483647_i32 : i32 to vector<128x384xi32>
    %37 = arith.select %35, %28, %36 : vector<128x384xi1>, vector<128x384xi32>
    %cst_19 = arith.constant dense<2147483647> : vector<128xi32>
    %38 = vector.multi_reduction <minsi>, %37, %cst_19 [1] : vector<128x384xi32> to vector<128xi32>
    %39 = vector.shape_cast %38 : vector<128xi32> to vector<128x1xi32>
    %c16_i32_20 = arith.constant 16 : i32
    %40 = vector.broadcast %c16_i32_20 : i32 to vector<128x1xi32>
    %41 = arith.shrsi %39, %40 : vector<128x1xi32>
    %c65535_i32 = arith.constant 65535 : i32
    %42 = vector.broadcast %c65535_i32 : i32 to vector<128x1xi32>
    %43 = arith.andi %39, %42 : vector<128x1xi32>
    %44 = vector.broadcast %41 : vector<128x1xi32> to vector<128x384xi32>
    %45 = arith.cmpi eq, %29, %44 : vector<128x384xi32>
    %46 = vector.broadcast %cst_16 : f32 to vector<128x384xf32>
    %47 = arith.select %45, %46, %27 : vector<128x384xi1>, vector<128x384xf32>
    %48 = vector.broadcast %c0_i32_17 : i32 to vector<128x128xi32>
    %49 = arith.cmpi eq, %15, %48 : vector<128x128xi32>
    %50 = vector.shape_cast %33 : vector<128x1xf32> to vector<128x1xf32>
    %51 = vector.broadcast %50 : vector<128x1xf32> to vector<128x128xf32>
    %52 = arith.select %49, %51, %30 : vector<128x128xi1>, vector<128x128xf32>
    %53 = vector.broadcast %c0_i32_17 : i32 to vector<128x128xi32>
    %54 = arith.cmpi eq, %15, %53 : vector<128x128xi32>
    %55 = vector.shape_cast %43 : vector<128x1xi32> to vector<128x1xi32>
    %56 = vector.broadcast %55 : vector<128x1xi32> to vector<128x128xi32>
    %57 = arith.select %54, %56, %31 : vector<128x128xi1>, vector<128x128xi32>
    %c1_i32 = arith.constant 1 : i32
    %cst_21 = arith.constant dense<0xFF800000> : vector<128xf32>
    %58 = vector.multi_reduction <maximumf>, %47, %cst_21 [1] : vector<128x384xf32> to vector<128xf32>
    %59 = vector.shape_cast %58 : vector<128xf32> to vector<128x1xf32>
    %60 = vector.broadcast %59 : vector<128x1xf32> to vector<128x384xf32>
    %61 = arith.cmpf oeq, %47, %60 : vector<128x384xf32>
    %c2147483647_i32_22 = arith.constant 2147483647 : i32
    %62 = vector.broadcast %c2147483647_i32_22 : i32 to vector<128x384xi32>
    %63 = arith.select %61, %28, %62 : vector<128x384xi1>, vector<128x384xi32>
    %cst_23 = arith.constant dense<2147483647> : vector<128xi32>
    %64 = vector.multi_reduction <minsi>, %63, %cst_23 [1] : vector<128x384xi32> to vector<128xi32>
    %65 = vector.shape_cast %64 : vector<128xi32> to vector<128x1xi32>
    %c16_i32_24 = arith.constant 16 : i32
    %66 = vector.broadcast %c16_i32_24 : i32 to vector<128x1xi32>
    %67 = arith.shrsi %65, %66 : vector<128x1xi32>
    %c65535_i32_25 = arith.constant 65535 : i32
    %68 = vector.broadcast %c65535_i32_25 : i32 to vector<128x1xi32>
    %69 = arith.andi %65, %68 : vector<128x1xi32>
    %70 = vector.broadcast %67 : vector<128x1xi32> to vector<128x384xi32>
    %71 = arith.cmpi eq, %29, %70 : vector<128x384xi32>
    %72 = vector.broadcast %cst_16 : f32 to vector<128x384xf32>
    %73 = arith.select %71, %72, %47 : vector<128x384xi1>, vector<128x384xf32>
    %74 = vector.broadcast %c1_i32 : i32 to vector<128x128xi32>
    %75 = arith.cmpi eq, %15, %74 : vector<128x128xi32>
    %76 = vector.shape_cast %59 : vector<128x1xf32> to vector<128x1xf32>
    %77 = vector.broadcast %76 : vector<128x1xf32> to vector<128x128xf32>
    %78 = arith.select %75, %77, %52 : vector<128x128xi1>, vector<128x128xf32>
    %79 = vector.broadcast %c1_i32 : i32 to vector<128x128xi32>
    %80 = arith.cmpi eq, %15, %79 : vector<128x128xi32>
    %81 = vector.shape_cast %69 : vector<128x1xi32> to vector<128x1xi32>
    %82 = vector.broadcast %81 : vector<128x1xi32> to vector<128x128xi32>
    %83 = arith.select %80, %82, %57 : vector<128x128xi1>, vector<128x128xi32>
    %c2_i32 = arith.constant 2 : i32
    %cst_26 = arith.constant dense<0xFF800000> : vector<128xf32>
    %84 = vector.multi_reduction <maximumf>, %73, %cst_26 [1] : vector<128x384xf32> to vector<128xf32>
    %85 = vector.shape_cast %84 : vector<128xf32> to vector<128x1xf32>
    %86 = vector.broadcast %85 : vector<128x1xf32> to vector<128x384xf32>
    %87 = arith.cmpf oeq, %73, %86 : vector<128x384xf32>
    %c2147483647_i32_27 = arith.constant 2147483647 : i32
    %88 = vector.broadcast %c2147483647_i32_27 : i32 to vector<128x384xi32>
    %89 = arith.select %87, %28, %88 : vector<128x384xi1>, vector<128x384xi32>
    %cst_28 = arith.constant dense<2147483647> : vector<128xi32>
    %90 = vector.multi_reduction <minsi>, %89, %cst_28 [1] : vector<128x384xi32> to vector<128xi32>
    %91 = vector.shape_cast %90 : vector<128xi32> to vector<128x1xi32>
    %c16_i32_29 = arith.constant 16 : i32
    %92 = vector.broadcast %c16_i32_29 : i32 to vector<128x1xi32>
    %93 = arith.shrsi %91, %92 : vector<128x1xi32>
    %c65535_i32_30 = arith.constant 65535 : i32
    %94 = vector.broadcast %c65535_i32_30 : i32 to vector<128x1xi32>
    %95 = arith.andi %91, %94 : vector<128x1xi32>
    %96 = vector.broadcast %93 : vector<128x1xi32> to vector<128x384xi32>
    %97 = arith.cmpi eq, %29, %96 : vector<128x384xi32>
    %98 = vector.broadcast %cst_16 : f32 to vector<128x384xf32>
    %99 = arith.select %97, %98, %73 : vector<128x384xi1>, vector<128x384xf32>
    %100 = vector.broadcast %c2_i32 : i32 to vector<128x128xi32>
    %101 = arith.cmpi eq, %15, %100 : vector<128x128xi32>
    %102 = vector.shape_cast %85 : vector<128x1xf32> to vector<128x1xf32>
    %103 = vector.broadcast %102 : vector<128x1xf32> to vector<128x128xf32>
    %104 = arith.select %101, %103, %78 : vector<128x128xi1>, vector<128x128xf32>
    %105 = vector.broadcast %c2_i32 : i32 to vector<128x128xi32>
    %106 = arith.cmpi eq, %15, %105 : vector<128x128xi32>
    %107 = vector.shape_cast %95 : vector<128x1xi32> to vector<128x1xi32>
    %108 = vector.broadcast %107 : vector<128x1xi32> to vector<128x128xi32>
    %109 = arith.select %106, %108, %83 : vector<128x128xi1>, vector<128x128xi32>
    %c3_i32 = arith.constant 3 : i32
    %cst_31 = arith.constant dense<0xFF800000> : vector<128xf32>
    %110 = vector.multi_reduction <maximumf>, %99, %cst_31 [1] : vector<128x384xf32> to vector<128xf32>
    %111 = vector.shape_cast %110 : vector<128xf32> to vector<128x1xf32>
    %112 = vector.broadcast %111 : vector<128x1xf32> to vector<128x384xf32>
    %113 = arith.cmpf oeq, %99, %112 : vector<128x384xf32>
    %c2147483647_i32_32 = arith.constant 2147483647 : i32
    %114 = vector.broadcast %c2147483647_i32_32 : i32 to vector<128x384xi32>
    %115 = arith.select %113, %28, %114 : vector<128x384xi1>, vector<128x384xi32>
    %cst_33 = arith.constant dense<2147483647> : vector<128xi32>
    %116 = vector.multi_reduction <minsi>, %115, %cst_33 [1] : vector<128x384xi32> to vector<128xi32>
    %117 = vector.shape_cast %116 : vector<128xi32> to vector<128x1xi32>
    %c16_i32_34 = arith.constant 16 : i32
    %118 = vector.broadcast %c16_i32_34 : i32 to vector<128x1xi32>
    %119 = arith.shrsi %117, %118 : vector<128x1xi32>
    %c65535_i32_35 = arith.constant 65535 : i32
    %120 = vector.broadcast %c65535_i32_35 : i32 to vector<128x1xi32>
    %121 = arith.andi %117, %120 : vector<128x1xi32>
    %122 = vector.broadcast %119 : vector<128x1xi32> to vector<128x384xi32>
    %123 = arith.cmpi eq, %29, %122 : vector<128x384xi32>
    %124 = vector.broadcast %cst_16 : f32 to vector<128x384xf32>
    %125 = arith.select %123, %124, %99 : vector<128x384xi1>, vector<128x384xf32>
    %126 = vector.broadcast %c3_i32 : i32 to vector<128x128xi32>
    %127 = arith.cmpi eq, %15, %126 : vector<128x128xi32>
    %128 = vector.shape_cast %111 : vector<128x1xf32> to vector<128x1xf32>
    %129 = vector.broadcast %128 : vector<128x1xf32> to vector<128x128xf32>
    %130 = arith.select %127, %129, %104 : vector<128x128xi1>, vector<128x128xf32>
    %131 = vector.broadcast %c3_i32 : i32 to vector<128x128xi32>
    %132 = arith.cmpi eq, %15, %131 : vector<128x128xi32>
    %133 = vector.shape_cast %121 : vector<128x1xi32> to vector<128x1xi32>
    %134 = vector.broadcast %133 : vector<128x1xi32> to vector<128x128xi32>
    %135 = arith.select %132, %134, %109 : vector<128x128xi1>, vector<128x128xi32>
    %c4_i32 = arith.constant 4 : i32
    %c0_36 = arith.constant 0 : index
    %c0_37 = arith.constant 0 : index
    %136 = vector.load %arg7[%c0_36, %c0_37] : memref<128x128xf32, #tpu.memory_space<vmem>>, vector<128x128xf32>
    tpu.vector_store %arg7[%c0_36, %c0_37], %130 {strides = array<i32>} : memref<128x128xf32, #tpu.memory_space<vmem>>, vector<128x128xf32>,
    %c0_38 = arith.constant 0 : index
    %c0_39 = arith.constant 0 : index
    %137 = vector.load %arg8[%c0_38, %c0_39] : memref<128x128xi32, #tpu.memory_space<vmem>>, vector<128x128xi32>
    tpu.vector_store %arg8[%c0_38, %c0_39], %135 {strides = array<i32>} : memref<128x128xi32, #tpu.memory_space<vmem>>, vector<128x128xi32>,
    %c2_i32_40 = arith.constant 2 : i32
    %138 = arith.cmpi eq, %arg1, %c2_i32_40 : i32
    %139 = arith.extui %138 : i1 to i32
    %c0_i32_41 = arith.constant 0 : i32
    %140 = arith.cmpi ne, %139, %c0_i32_41 : i32
    scf.if %140 {
      %cst_42 = arith.constant 14.2857141 : f32
      %141 = vector.broadcast %cst_42 : f32 to vector<128x128xf32>
      %142 = arith.mulf %130, %141 : vector<128x128xf32>
      %143 = vector.extract_strided_slice %142 {offsets = [0, 0], sizes = [128, 1], strides = [1, 1]} : vector<128x128xf32> to vector<128x1xf32>
      %144 = vector.broadcast %143 : vector<128x1xf32> to vector<128x128xf32>
      %145 = arith.subf %142, %144 : vector<128x128xf32>
      %146 = math.exp %145 : vector<128x128xf32>
      %cst_43 = arith.constant dense<0.000000e+00> : vector<128xf32>
      %147 = vector.multi_reduction <add>, %146, %cst_43 [1] : vector<128x128xf32> to vector<128xf32>
      %148 = vector.shape_cast %147 : vector<128xf32> to vector<128x1xf32>
      %149 = tpu.iota {dimensions = array<i32: 1>} : vector<128x128xi32>
      %cst_44 = arith.constant 0.000000e+00 : f32
      %150 = vector.broadcast %cst_44 : f32 to vector<128x128xf32>
      %151 = vector.extract_strided_slice %135 {offsets = [0, 0], sizes = [128, 1], strides = [1, 1]} : vector<128x128xi32> to vector<128x1xi32>
      %152 = vector.broadcast %151 : vector<128x1xi32> to vector<128x128xi32>
      %153 = arith.cmpi eq, %149, %152 : vector<128x128xi32>
      %154 = vector.extract_strided_slice %146 {offsets = [0, 0], sizes = [128, 1], strides = [1, 1]} : vector<128x128xf32> to vector<128x1xf32>
      %cst_45 = arith.constant 0.000000e+00 : f32
      %155 = vector.shape_cast %154 : vector<128x1xf32> to vector<128x1xf32>
      %156 = vector.broadcast %155 : vector<128x1xf32> to vector<128x128xf32>
      %157 = vector.broadcast %cst_45 : f32 to vector<128x128xf32>
      %158 = arith.select %153, %156, %157 : vector<128x128xi1>, vector<128x128xf32>
      %159 = arith.addf %150, %158 : vector<128x128xf32>
      %160 = vector.extract_strided_slice %135 {offsets = [0, 1], sizes = [128, 1], strides = [1, 1]} : vector<128x128xi32> to vector<128x1xi32>
      %161 = vector.broadcast %160 : vector<128x1xi32> to vector<128x128xi32>
      %162 = arith.cmpi eq, %149, %161 : vector<128x128xi32>
      %163 = vector.extract_strided_slice %146 {offsets = [0, 1], sizes = [128, 1], strides = [1, 1]} : vector<128x128xf32> to vector<128x1xf32>
      %cst_46 = arith.constant 0.000000e+00 : f32
      %164 = vector.shape_cast %163 : vector<128x1xf32> to vector<128x1xf32>
      %165 = vector.broadcast %164 : vector<128x1xf32> to vector<128x128xf32>
      %166 = vector.broadcast %cst_46 : f32 to vector<128x128xf32>
      %167 = arith.select %162, %165, %166 : vector<128x128xi1>, vector<128x128xf32>
      %168 = arith.addf %159, %167 : vector<128x128xf32>
      %169 = vector.extract_strided_slice %135 {offsets = [0, 2], sizes = [128, 1], strides = [1, 1]} : vector<128x128xi32> to vector<128x1xi32>
      %170 = vector.broadcast %169 : vector<128x1xi32> to vector<128x128xi32>
      %171 = arith.cmpi eq, %149, %170 : vector<128x128xi32>
      %172 = vector.extract_strided_slice %146 {offsets = [0, 2], sizes = [128, 1], strides = [1, 1]} : vector<128x128xf32> to vector<128x1xf32>
      %cst_47 = arith.constant 0.000000e+00 : f32
      %173 = vector.shape_cast %172 : vector<128x1xf32> to vector<128x1xf32>
      %174 = vector.broadcast %173 : vector<128x1xf32> to vector<128x128xf32>
      %175 = vector.broadcast %cst_47 : f32 to vector<128x128xf32>
      %176 = arith.select %171, %174, %175 : vector<128x128xi1>, vector<128x128xf32>
      %177 = arith.addf %168, %176 : vector<128x128xf32>
      %178 = vector.extract_strided_slice %135 {offsets = [0, 3], sizes = [128, 1], strides = [1, 1]} : vector<128x128xi32> to vector<128x1xi32>
      %179 = vector.broadcast %178 : vector<128x1xi32> to vector<128x128xi32>
      %180 = arith.cmpi eq, %149, %179 : vector<128x128xi32>
      %181 = vector.extract_strided_slice %146 {offsets = [0, 3], sizes = [128, 1], strides = [1, 1]} : vector<128x128xf32> to vector<128x1xf32>
      %cst_48 = arith.constant 0.000000e+00 : f32
      %182 = vector.shape_cast %181 : vector<128x1xf32> to vector<128x1xf32>
      %183 = vector.broadcast %182 : vector<128x1xf32> to vector<128x128xf32>
      %184 = vector.broadcast %cst_48 : f32 to vector<128x128xf32>
      %185 = arith.select %180, %183, %184 : vector<128x128xi1>, vector<128x128xf32>
      %186 = arith.addf %177, %185 : vector<128x128xf32>
      %187 = vector.broadcast %148 : vector<128x1xf32> to vector<128x128xf32>
      %188 = arith.divf %186, %187 : vector<128x128xf32>
      %cst_49 = arith.constant 9.99999974E-6 : f32
      %189 = vector.broadcast %cst_49 : f32 to vector<128x128xf32>
      %190 = arith.addf %188, %189 : vector<128x128xf32>
      %cst_50 = arith.constant 1.000000e+00 : f32
      %191 = vector.broadcast %cst_50 : f32 to vector<128x128xf32>
      %192 = arith.minimumf %190, %191 : vector<128x128xf32>
      %c0_51 = arith.constant 0 : index
      %c0_52 = arith.constant 0 : index
      %193 = vector.load %arg5[%c0_51, %c0_52] : memref<128x128xf32, #tpu.memory_space<vmem>>, vector<128x128xf32>
      tpu.vector_store %arg5[%c0_51, %c0_52], %192 {strides = array<i32>} : memref<128x128xf32, #tpu.memory_space<vmem>>, vector<128x128xf32>,
    } else {
    }
    return
  }
  func.func @transform_0(%arg0: i32, %arg1: i32) -> (i32, i32) {
    %c0_i32 = arith.constant 0 : i32
    %c0_i32_0 = arith.constant 0 : i32
    return %arg0, %c0_i32 : i32, i32
  }
  func.func @transform_1(%arg0: i32, %arg1: i32) -> (i32, i32) {
    %c0_i32 = arith.constant 0 : i32
    %c0_i32_0 = arith.constant 0 : i32
    return %c0_i32, %arg1 : i32, i32
  }
  func.func @transform_2(%arg0: i32, %arg1: i32) -> (i32, i32) {
    %c0_i32 = arith.constant 0 : i32
    %c0_i32_0 = arith.constant 0 : i32
    return %c0_i32, %arg1 : i32, i32
  }
  func.func @transform_3(%arg0: i32, %arg1: i32) -> (i32, i32) {
    %c0_i32 = arith.constant 0 : i32
    %c0_i32_0 = arith.constant 0 : i32
    return %arg0, %c0_i32 : i32, i32
  }
}

</mosaic_0001>

<bundles_post_ra>
// kernel: tpu_custom_call.1
= control target key start
LH: loop header
LB: loop body
LE: loop exit
PB: predicated region body
PF: predicated region fallthrough
CT: control target
= control target key end

     0   :  { %s8838_s0 = inlined_call_operand.hbm [shape: f32[256,128], index: 0, kind: input, shape index: {}]   ;;  %s8839_s1 = inlined_call_operand.hbm [shape: bf16[128,768], index: 1, kind: input, shape index: {}]   ;;  %s8840_s2 = inlined_call_operand.vmem [shape: s32[1,768], index: 2, kind: input, shape index: {}]   ;;  %s8841_s3 = inlined_call_operand.hbm [shape: f32[256,128], index: 3, kind: output, shape index: {}]  }
   0x1   :  { %9049 = sst [smem:[#allocation154_spill]] %s8838_s0 }
   0x2   :  { %8 = vsyncpa [#allocation6], 0 }
   0x3   :  { %10 = vsyncpa [#allocation6 + $0x1], 0 }
   0x4   :  { %11 = vsyncpa [#allocation9], 0 }
   0x5   :  { %13 = vsyncpa [#allocation9 + $0x1], 0 }
   0x6   :  { %14 = vsyncpa [#allocation7], 0 }
   0x7   :  { %16 = vsyncpa [#allocation7 + $0x1], 0  ;;  %s4694_s12 = smov 0   ;;  %s4696_s13 = smov 0  }
   0x8   :  { %s4698_s14 = smov 0   ;;  %s4700_s15 = smov 0  }
   0x9   :  { %s4702_s16 = smov 0   ;;  %s4704_s17 = smov 0  }
   0xa   :  { %s4706_s18 = smov 0   ;;  %s4708_s19 = smov 0  }
   0xb   :  { %s4710_s20 = smov 0   ;;  %s4712_s21 = smov 0  }
   0xc   :  { %s4714_s22 = smov 0  }
   0xd LB: > { %9050 = sst [smem:[#allocation14_spill]] %s4629_s15  ;;  %s4151_s23 = sadd.s32 4294967295, %s4657_s22   ;;  %s4657_s22 = sphi %s4714_s22, %s22_s22   ;;  %s4653_s21 = sphi %s4712_s21, %s9577_s21   ;;  %s4649_s20 = sphi %s4710_s20, %s9576_s20   ;;  %s4645_s19 = sphi %s4708_s19, %s9575_s19   ;;  %s4641_s18 = sphi %s4706_s18, %s9574_s18   ;;  %s4637_s17 = sphi %s4704_s17, %s9573_s17   ;;  %s4633_s16 = sphi %s4702_s16, %s9572_s16   ;;  %s4629_s15 = sphi %s4700_s15, %s9571_s15   ;;  %s4625_s14 = sphi %s4698_s14, %s9570_s14   ;;  %s4621_s13 = sphi %s4696_s13, %s9569_s13   ;;  %s4617_s12 = sphi %s4694_s12, %s9568_s12  }
   0xe   : > { %s4152_s24 = sadd.s32 4294967294, %s4657_s22   ;;  %s34_s25 = sadd.s32 1, %s4653_s21 }
   0xf   : > { %p48_p0 = scmp.ne.s32.totalorder %s4637_s17, %s4633_s16  ;;  %p8843_p1 = scmp.eq.s32.totalorder %s4657_s22, 0 }
  0x10   : > { %p54_p2 = scmp.ne.s32.totalorder %s4633_s16, %s4629_s15  ;;  %p4758_p3 = scmp.eq.s32.totalorder %s4151_s23, 0 }
  0x11   : > { %p4764_p4 = por %p8843_p1, %p48_p0  ;;  %p130_p5 = scmp.eq.s32.totalorder %s4151_s23, 5 }
  0x12   : > { %p4770_p6 = por %p4758_p3, %p54_p2  ;;  %p136_p7 = scmp.eq.s32.totalorder %s4152_s24, 5 }
  0x13   : > { %p4774_p8 = por %p130_p5, %p48_p0  ;;  %p8842_p10 = scmp.lt.s32.totalorder %s4657_s22, 6 }
  0x14   : > { %s9053_s29 = scalar_select %p4770_p6, 1, 0 }
  0x15   : > { %s9054_s30 = scalar_select %p4774_p8, 1, 0 }
  0x16   : > { %p4778_p9 = por %p136_p7, %p54_p2  ;;  %s156_s5 = sand.u32 1, %s4637_s17  }
  0x17   : > { %s4190_s6 = sshll.u32 %s4653_s21, 11  ;;  %s4155_s7 = sshll.u32 %s156_s5, 7 }
  0x18   : > { %s9055_s4 = scalar_select %p4778_p9, 1, 0 }
  0x19   : > { %s9057_s0 = sld [smem:[#allocation154_spill]]  ;;  %s160_s11 = scalar_lea.vmem [#allocation5], %s4155_s7 }
  0x1a   : > { %9056 = sst [smem:[#allocation15_spill]] %s9055_s4  ;;  %s167_s23 = sshll.u32 %s160_s11, 4  ;;  %s4798_s23 = int_to_ptr.vmem [resolvable:$true] %s167_s23 }
  0x1b   : > { %p4794_p11 = pnand %p8842_p10, %p4764_p4  ;;  %s4800_s26 = scalar_lea.sflag [#allocation6], %s156_s5 }
  0x1d   : > { %p4473_p13 = pneg %p4794_p11 }
  0x1f   : > { %s4788_s10 = scalar_lea.hbm %s9057_s0, %s4190_s6  ;;  %s4476_s8 = scalar_lea.hbm %s9057_s0, 4096 }
  0x20   : > { %s4471_s6 = scalar_lea.hbm %s4788_s10, 2048  ;;  %p4477_p4 = scmp.lt.u32.totalorder %s4788_s10, %s9057_s0 }
  0x21   : > { %p4472_p12 = scmp.ne.s32.totalorder %s4788_s10, %s4471_s6  ;;  %p4478_p5 = scmp.lt.u32.totalorder %s4476_s8, %s4471_s6 }
  0x22   : > { %p4480_p10 = scmp.lt.u32.totalorder %s4471_s6, %s4788_s10 }
  0x23   : > { %p4474_p0 = pnand %p4473_p13, %p4472_p12  ;;  %p4479_p7 = por %p4478_p5, %p4477_p4 }
  0x25   : > { %p4475_p2 = pneg %p4474_p0  ;;  %p4481_p1 = por %p4480_p10, %p4479_p7 }
  0x27   : > { %p4482_p9 = pnand %p4481_p1, %p4475_p2 }
  0x29   : > { %4485 = shalt.err (!%p4482_p9)
}
  0x2a   : > { %s4486_s5 = scalar_lea.vmem %s4798_s23, 2048  ;;  %s4659_s28 = smov [#allocation5]  }
  0x2b   : > { %p4487_p12 = scmp.ne.s32.totalorder %s4798_s23, %s4486_s5  ;;  %s4491_s7 = sshll.u32 %s4659_s28, 4  ;;  %s4492_s7 = int_to_ptr.vmem [resolvable:$false] %s4491_s7 }
  0x2c   : > { %s4493_s9 = scalar_lea.vmem %s4492_s7, 4096  ;;  %p4494_p6 = scmp.lt.s32.totalorder %s4798_s23, %s4492_s7 }
  0x2d   : > { %p4489_p0 = pnand %p4487_p12, %p4473_p13  ;;  %p4495_p4 = scmp.lt.s32.totalorder %s4493_s9, %s4486_s5 }
  0x2f   : > { %p4490_p8 = pneg %p4489_p0  ;;  %p4496_p5 = por %p4495_p4, %p4494_p6 }
  0x31   : > { %p4497_p10 = pnand %p4496_p5, %p4490_p8 }
  0x33   : > { %4500 = shalt.err (!%p4497_p10)
}
  0x34   : > { %s8846_s6 = smov 128   ;;  %s8847_s8 = smov 8  }
  0x35   : > { %4218 = dma.hbm_to_vmem [thread:$0]  (!%p4794_p11), %s4788_s10, 2048, %s4798_s23, %s4800_s26, %s8846_s6, %s8846_s6, %s8847_s8  }
  0x36   : > { %p4161_p1 = scmp.ge.s32.totalorder %s4657_s22, 1  ;;  %p204_p6 = scmp.lt.s32.totalorder %s4657_s22, 7 }
  0x37   : > { %s31_s5 = sadd.s32 1, %s4649_s20  ;;  %s67_s28 = sadd.s32 1, %s4625_s14 }
  0x38   : > { %p4833_p8 = pnand %p4161_p1, %p204_p6  ;;  %p32_p9 = scmp.ge.s32.totalorder %s31_s5, 3 }
  0x39   : > { %p74_p13 = scmp.ne.s32.totalorder %s4625_s14, %s4621_s13  ;;  %p80_p2 = scmp.ne.s32.totalorder %s4621_s13, %s4617_s12 }
  0x3a   : > { %s9579_s5 = smov (%p32_p9, %s31_s5), 0  ;;  %s9581_s25 = smov (!%p32_p9, %s34_s25), %s4653_s21 }
  0x3b   : > { %9060 = sst [smem:[#allocation16_spill]] %s9579_s5  ;;  %s64_s26 = ssub.s32 %s4649_s20, %s9579_s5 }
  0x3c   : > { %p9061_p11 = scmp.eq.s32.totalorder %s4657_s22, 0  ;;  %p36_p12 = scmp.ge.s32.totalorder %s9581_s25, 2 }
  0x3d   : > { %p65_p0 = scmp.eq.s32.totalorder %s64_s26, 0  ;;  %p4858_p4 = por %p80_p2, %p4758_p3 }
  0x3e   : > { %p4852_p7 = por %p74_p13, %p9061_p11  ;;  %s177_s12 = sand.u32 1, %s4625_s14  }
  0x3f   : > { %s9063_s23 = scalar_select %p4858_p4, 1, 0 }
  0x40   : > { %s9583_s25 = smov (%p36_p12, %s9581_s25), 0  ;;  %s4158_s9 = sshll.u32 %s177_s12, 7 }
  0x41   : > { %s4866_s24 = scalar_select %p65_p0, %s4625_s14, %s67_s28  }
  0x42   : > { %s38_s7 = ssub.s32 %s4653_s21, %s9583_s25  ;;  %s4191_s6 = sshll.u32 %s4649_s20, 7 }
  0x43   : > { %p39_p5 = scmp.eq.s32.totalorder %s38_s7, 0  ;;  %s9064_s8 = sadd.s32 1, %s4637_s17 }
  0x44   : > { %s4879_s27 = scalar_lea.hbm %s8839_s1, %s4191_s6  ;;  %s181_s4 = scalar_lea.vmem [#allocation8], %s4158_s9 }
  0x45   : > { %s4874_s0 = scalar_select %p39_p5, %s4637_s17, %s9064_s8  }
  0x46   : > { %s188_s15 = sshll.u32 %s181_s4, 4  ;;  %p9065_p3 = scmp.lt.s32.totalorder %s4657_s22, 6  ;;  %s4881_s15 = int_to_ptr.vmem [resolvable:$true] %s188_s15 }
  0x47   : > { %s4891_s8 = scalar_lea.sflag [#allocation9], %s177_s12  ;;  %s4501_s6 = scalar_lea.hbm %s4879_s27, 2048 }
  0x48   : > { %p4887_p10 = pnand %p9065_p3, %p4852_p7  ;;  %p4502_p1 = scmp.ne.s32.totalorder %s4879_s27, %s4501_s6 }
  0x49   : > { %s4506_s10 = scalar_lea.hbm %s8839_s1, 6144  ;;  %p4507_p2 = scmp.lt.u32.totalorder %s4879_s27, %s8839_s1 }
  0x4a   : > { %p4503_p6 = pneg %p4887_p10  ;;  %p4508_p11 = scmp.lt.u32.totalorder %s4506_s10, %s4501_s6 }
  0x4b   : > { %p4510_p12 = scmp.lt.u32.totalorder %s4501_s6, %s4879_s27 }
  0x4c   : > { %p4504_p9 = pnand %p4503_p6, %p4502_p1  ;;  %p4509_p7 = por %p4508_p11, %p4507_p2 }
  0x4e   : > { %p4505_p13 = pneg %p4504_p9  ;;  %p4511_p0 = por %p4510_p12, %p4509_p7 }
  0x50   : > { %p4512_p5 = pnand %p4511_p0, %p4505_p13 }
  0x52   : > { %4515 = shalt.err (!%p4512_p5)
}
  0x53   : > { %s4516_s12 = scalar_lea.vmem %s4881_s15, 2048  ;;  %s4662_s26 = smov [#allocation8]  }
  0x54   : > { %p4517_p3 = scmp.ne.s32.totalorder %s4881_s15, %s4516_s12  ;;  %s4521_s4 = sshll.u32 %s4662_s26, 4  ;;  %s4522_s4 = int_to_ptr.vmem [resolvable:$false] %s4521_s4 }
  0x55   : > { %s4523_s5 = scalar_lea.vmem %s4522_s4, 4096  ;;  %p4524_p4 = scmp.lt.s32.totalorder %s4881_s15, %s4522_s4 }
  0x56   : > { %p4519_p1 = pnand %p4517_p3, %p4503_p6  ;;  %p4525_p2 = scmp.lt.s32.totalorder %s4523_s5, %s4516_s12 }
  0x58   : > { %p4520_p9 = pneg %p4519_p1  ;;  %p4526_p11 = por %p4525_p2, %p4524_p4 }
  0x5a   : > { %p4527_p7 = pnand %p4526_p11, %p4520_p9 }
  0x5c   : > { %4530 = shalt.err (!%p4527_p7)
}
  0x5d   : > { %s4663_s6 = smov 384   ;;  %s9067_s10 = smov 8  }
  0x5e   : > { %s9068_s7 = smov 128   ;;  %208 = sbr.rel (%p4833_p8) target bundleno = 3002 (0xbba), region = 32 }
  0x5f   : > { %4221 = dma.hbm_to_vmem [thread:$0]  (!%p4887_p10), %s4879_s27, 2048, %s4881_s15, %s4891_s8, %s4663_s6, %s9068_s7, %s9067_s10  }
  0x65   : > { %s4924_s9 = sand.u32 1, %s4633_s16   ;;  %p9069_p4 = scmp.ne.s32.totalorder %s9053_s29, 0 }
  0x66   : > { %s4162_s12 = sshll.u32 %s4924_s9, 7  ;;  %s211_s26 = scalar_lea.sflag [#allocation6], %s4924_s9 }
  0x67   : > { %s4928_s4 = scalar_lea.vmem [#allocation5], %s4162_s12 }
  0x68   : > { %4604 = dma.done.wait (%p9069_p4), %s211_s26, 2048  }
  0x69   : > { %4606 = vsyncadd (%p9069_p4), %s211_s26, 4294965248  ;;  %s219_s15 = sand.u32 1, %s4621_s13   ;;  %p9070_p8 = scmp.ne.s32.totalorder %s9063_s23, 0 }
  0x6a   : > { %s4163_s11 = sshll.u32 %s219_s15, 7  ;;  %s220_s27 = scalar_lea.sflag [#allocation9], %s219_s15 }
  0x6b   : > { %s4935_s28 = scalar_lea.vmem [#allocation8], %s4163_s11 }
  0x6c   : > { %4608 = dma.done.wait (%p9070_p8), %s220_s27, 2048  }
  0x6d   : > { %4610 = vsyncadd (%p9070_p8), %s220_s27, 4294965248  ;;  %s4165_s8 = sshll.u32 %s4641_s18, 1  ;;  %s4948_s10 = scalar_lea.vmem [#allocation10], %s4162_s12 }
  0x6e   : > { %p258_p10 = scmp.lt.s32.totalorder %s4165_s8, 5  ;;  %p4166_p6 = scmp.ne.s32.totalorder %s4641_s18, 0 }
  0x6f   : > { %v4952_v0 = vld [vmem:[%s4928_s4 + $0x10] sm:$0xff] (!%p4166_p6)  ;;  %v4955_v1 = vld [vmem:[%s4928_s4] sm:$0xff] (!%p4166_p6)  ;;  %v4958_v2 = vld [vmem:[%s4928_s4 + $0x18] sm:$0xff] (!%p4166_p6)  ;;  %v4664_v32 = vmov (!%p4166_p6), -inf   ;;  %v4665_v33 = vmov (!%p4166_p6), 0  }
  0x70   : > { %s9585_s8 = smov (!%p258_p10, %s4165_s8), 5  ;;  %267 = sbr.rel (%p4166_p6) target bundleno = 304 (0x130), region = 44 }
  0x71   : > { %s260_s6 = scalar_lea.vmem %s8840_s2, %s9585_s8  ;;  %v286_v3 = vmul.f32 (!%p4166_p6), %v4952_v0, %v4952_v0  ;;  %v284_v4 = vmul.f32 (!%p4166_p6), %v4955_v1, %v4955_v1  ;;  %v4965_v5 = vld [vmem:[%s4928_s4 + $0x8] sm:$0xff] (!%p4166_p6)  ;;  %v287_v6 = vmul.f32 (!%p4166_p6), %v4958_v2, %v4958_v2  ;;  %v4975_v9 = vld [vmem:[%s4928_s4 + $0x20] sm:$0xff] (!%p4166_p6)  ;;  %v4982_v12 = vld [vmem:[%s4928_s4 + $0x38] sm:$0xff] (!%p4166_p6)  ;;  %396 = vst [vmem:[#allocation3] sm:$0xff] (!%p4166_p6), %v4664_v32 }
  0x72   : > { %v285_v7 = vmul.f32 (!%p4166_p6), %v4965_v5, %v4965_v5  ;;  %v4972_v8 = vld [vmem:[%s4928_s4 + $0x28] sm:$0xff] (!%p4166_p6)  ;;  %v288_v11 = vmul.f32 (!%p4166_p6), %v4975_v9, %v4975_v9  ;;  %v4985_v13 = vld [vmem:[%s4928_s4 + $0x30] sm:$0xff] (!%p4166_p6)  ;;  %v291_v14 = vmul.f32 (!%p4166_p6), %v4982_v12, %v4982_v12  ;;  %v4995_v17 = vld [vmem:[%s4928_s4 + $0x40] sm:$0xff] (!%p4166_p6)  ;;  %397 = vst [vmem:[#allocation3 + $0x8] sm:$0xff] (!%p4166_p6), %v4664_v32 }
  0x73   : > { %304 = vadd.xlane.f32.xlu1 (!%p4166_p6), %v286_v3  ;;  %300 = vadd.xlane.f32.xlu0 (!%p4166_p6), %v284_v4  ;;  %v289_v10 = vmul.f32 (!%p4166_p6), %v4972_v8, %v4972_v8  ;;  %v290_v15 = vmul.f32 (!%p4166_p6), %v4985_v13, %v4985_v13  ;;  %v4992_v16 = vld [vmem:[%s4928_s4 + $0x48] sm:$0xff] (!%p4166_p6)  ;;  %v292_v19 = vmul.f32 (!%p4166_p6), %v4995_v17, %v4995_v17  ;;  %v5002_v20 = vld [vmem:[%s4928_s4 + $0x58] sm:$0xff] (!%p4166_p6)  ;;  %v5005_v21 = vld [vmem:[%s4928_s4 + $0x50] sm:$0xff] (!%p4166_p6) }
  0x74   : > { %v293_v18 = vmul.f32 (!%p4166_p6), %v4992_v16, %v4992_v16  ;;  %v295_v22 = vmul.f32 (!%p4166_p6), %v5002_v20, %v5002_v20  ;;  %v294_v23 = vmul.f32 (!%p4166_p6), %v5005_v21, %v5005_v21  ;;  %v5012_v24 = vld [vmem:[%s4928_s4 + $0x68] sm:$0xff] (!%p4166_p6)  ;;  %v5015_v25 = vld [vmem:[%s4928_s4 + $0x60] sm:$0xff] (!%p4166_p6)  ;;  %v5022_v28 = vld [vmem:[%s4928_s4 + $0x78] sm:$0xff] (!%p4166_p6)  ;;  %398 = vst [vmem:[#allocation3 + $0x10] sm:$0xff] (!%p4166_p6), %v4664_v32 }
  0x75   : > { %v297_v26 = vmul.f32 (!%p4166_p6), %v5012_v24, %v5012_v24  ;;  %v296_v27 = vmul.f32 (!%p4166_p6), %v5015_v25, %v5015_v25  ;;  %v5025_v29 = vld [vmem:[%s4928_s4 + $0x70] sm:$0xff] (!%p4166_p6)  ;;  %v299_v30 = vmul.f32 (!%p4166_p6), %v5022_v28, %v5022_v28  ;;  %399 = vst [vmem:[#allocation3 + $0x18] sm:$0xff] (!%p4166_p6), %v4664_v32  ;;  %400 = vst [vmem:[#allocation3 + $0x20] sm:$0xff] (!%p4166_p6), %v4664_v32 }
  0x76   : > { %v298_v31 = vmul.f32 (!%p4166_p6), %v5025_v29, %v5025_v29  ;;  %401 = vst [vmem:[#allocation3 + $0x28] sm:$0xff] (!%p4166_p6), %v4664_v32  ;;  %402 = vst [vmem:[#allocation3 + $0x30] sm:$0xff] (!%p4166_p6), %v4664_v32 }
  0x77   : > { %306 = vadd.xlane.f32.xlu1 %v287_v6  ;;  %302 = vadd.xlane.f32.xlu0 %v285_v7  ;;  %403 = vst [vmem:[#allocation3 + $0x38] sm:$0xff] %v4664_v32  ;;  %404 = vst [vmem:[#allocation3 + $0x40] sm:$0xff] %v4664_v32 }
  0x78   : > { %405 = vst [vmem:[#allocation3 + $0x48] sm:$0xff] %v4664_v32  ;;  %406 = vst [vmem:[#allocation3 + $0x50] sm:$0xff] %v4664_v32 }
  0x79   : > { %407 = vst [vmem:[#allocation3 + $0x58] sm:$0xff] %v4664_v32  ;;  %408 = vst [vmem:[#allocation3 + $0x60] sm:$0xff] %v4664_v32 }
  0x7a   : > { %409 = vst [vmem:[#allocation3 + $0x68] sm:$0xff] %v4664_v32  ;;  %410 = vst [vmem:[#allocation3 + $0x70] sm:$0xff] %v4664_v32 }
  0x7b   : > { %310 = vadd.xlane.f32.xlu1 %v289_v10  ;;  %308 = vadd.xlane.f32.xlu0 %v288_v11  ;;  %411 = vst [vmem:[#allocation3 + $0x78] sm:$0xff] %v4664_v32  ;;  %412 = vst [vmem:[#allocation4] sm:$0xff] %v4665_v33 }
  0x7c   : > { %413 = vst [vmem:[#allocation4 + $0x8] sm:$0xff] %v4665_v33  ;;  %414 = vst [vmem:[#allocation4 + $0x10] sm:$0xff] %v4665_v33 }
  0x7d   : > { %415 = vst [vmem:[#allocation4 + $0x18] sm:$0xff] %v4665_v33  ;;  %416 = vst [vmem:[#allocation4 + $0x20] sm:$0xff] %v4665_v33 }
  0x7e   : > { %417 = vst [vmem:[#allocation4 + $0x28] sm:$0xff] %v4665_v33  ;;  %418 = vst [vmem:[#allocation4 + $0x30] sm:$0xff] %v4665_v33 }
  0x7f   : > { %314 = vadd.xlane.f32.xlu1 %v291_v14  ;;  %312 = vadd.xlane.f32.xlu0 %v290_v15  ;;  %419 = vst [vmem:[#allocation4 + $0x38] sm:$0xff] %v4665_v33  ;;  %420 = vst [vmem:[#allocation4 + $0x40] sm:$0xff] %v4665_v33 }
  0x80   : > { %421 = vst [vmem:[#allocation4 + $0x48] sm:$0xff] %v4665_v33  ;;  %422 = vst [vmem:[#allocation4 + $0x50] sm:$0xff] %v4665_v33 }
  0x81   : > { %423 = vst [vmem:[#allocation4 + $0x58] sm:$0xff] %v4665_v33  ;;  %424 = vst [vmem:[#allocation4 + $0x60] sm:$0xff] %v4665_v33 }
  0x82   : > { %425 = vst [vmem:[#allocation4 + $0x68] sm:$0xff] %v4665_v33  ;;  %426 = vst [vmem:[#allocation4 + $0x70] sm:$0xff] %v4665_v33 }
  0x83   : > { %318 = vadd.xlane.f32.xlu1 %v293_v18  ;;  %316 = vadd.xlane.f32.xlu0 %v292_v19  ;;  %427 = vst [vmem:[#allocation4 + $0x78] sm:$0xff] %v4665_v33 }
  0x87   : > { %322 = vadd.xlane.f32.xlu1 %v295_v22  ;;  %320 = vadd.xlane.f32.xlu0 %v294_v23 }
  0x8b   : > { %326 = vadd.xlane.f32.xlu1 %v297_v26  ;;  %324 = vadd.xlane.f32.xlu0 %v296_v27 }
  0x8f   : > { %330 = vadd.xlane.f32.xlu1 %v299_v30  ;;  %328 = vadd.xlane.f32.xlu0 %v298_v31 }
 0x100   : > { %v305_v34 = vpop.xlane.xlu1 %304  ;;  %v301_v35 = vpop.xlane.xlu0 %300 }
 0x101   : > { %v334_v36 = vmax.f32 %v305_v34, 1e-24  ;;  %v332_v37 = vmax.f32 %v301_v35, 1e-24 }
 0x103   : > { %4328 = vrsqrt.f32 %v334_v36 }
 0x104   : > { %v307_v38 = vpop.xlane.xlu1 %306  ;;  %v303_v39 = vpop.xlane.xlu0 %302  ;;  %4330 = vrsqrt.f32 %v332_v37 }
 0x105   : > { %v335_v40 = vmax.f32 %v307_v38, 1e-24  ;;  %v333_v41 = vmax.f32 %v303_v39, 1e-24 }
 0x107   : > { %4332 = vrsqrt.f32 %v335_v40 }
 0x108   : > { %4334 = vrsqrt.f32 %v333_v41  ;;  %v311_v42 = vpop.xlane.xlu1 %310  ;;  %v309_v43 = vpop.xlane.xlu0 %308 }
 0x109   : > { %v337_v44 = vmax.f32 %v311_v42, 1e-24  ;;  %v336_v45 = vmax.f32 %v309_v43, 1e-24 }
 0x10b   : > { %4336 = vrsqrt.f32 %v337_v44 }
 0x10c   : > { %4338 = vrsqrt.f32 %v336_v45  ;;  %v315_v46 = vpop.xlane.xlu1 %314  ;;  %v313_v47 = vpop.xlane.xlu0 %312 }
 0x10d   : > { %v339_v48 = vmax.f32 %v315_v46, 1e-24  ;;  %v338_v49 = vmax.f32 %v313_v47, 1e-24  ;;  %v4329_v50 = vpop.eup %4328 }
 0x10e   : > { %v4331_v51 = vpop.eup %4330  ;;  %v366_v58 = vmul.f32 %v4329_v50, %v4952_v0 }
 0x10f   : > { %4340 = vrsqrt.f32 %v339_v48  ;;  %v364_v60 = vmul.f32 %v4331_v51, %v4955_v1 }
 0x110   : > { %4342 = vrsqrt.f32 %v338_v49  ;;  %v319_v52 = vpop.xlane.xlu1 %318  ;;  %v317_v53 = vpop.xlane.xlu0 %316 }
 0x111   : > { %v4333_v54 = vpop.eup %4332  ;;  %v341_v55 = vmax.f32 %v319_v52, 1e-24  ;;  %v340_v56 = vmax.f32 %v317_v53, 1e-24 }
 0x112   : > { %v4335_v57 = vpop.eup %4334  ;;  %v367_v59 = vmul.f32 %v4333_v54, %v4958_v2 }
 0x113   : > { %v365_v61 = vmul.f32 %v4335_v57, %v4965_v5  ;;  %4344 = vrsqrt.f32 %v341_v55 }
 0x114   : > { %v381_v62 = vpack.c.bf16 %v367_v59, %v366_v58  ;;  %4346 = vrsqrt.f32 %v340_v56  ;;  %v323_v63 = vpop.xlane.xlu1 %322  ;;  %v321_v3 = vpop.xlane.xlu0 %320 }
 0x115   : > { %v4337_v4 = vpop.eup %4336  ;;  %v380_v6 = vpack.c.bf16 %v365_v61, %v364_v60  ;;  %v343_v7 = vmax.f32 %v323_v63, 1e-24  ;;  %v342_v10 = vmax.f32 %v321_v3, 1e-24 }
 0x116   : > { %v4339_v11 = vpop.eup %4338  ;;  %389 = vst [vmem:[#allocation2 + $0x8] sm:$0xff] %v381_v62  ;;  %v369_v14 = vmul.f32 %v4337_v4, %v4972_v8 }
 0x117   : > { %388 = vst [vmem:[#allocation2] sm:$0xff] %v380_v6  ;;  %v368_v0 = vmul.f32 %v4339_v11, %v4975_v9  ;;  %4348 = vrsqrt.f32 %v343_v7 }
 0x118   : > { %4350 = vrsqrt.f32 %v342_v10  ;;  %v327_v1 = vpop.xlane.xlu1 %326  ;;  %v325_v2 = vpop.xlane.xlu0 %324 }
 0x119   : > { %v4341_v5 = vpop.eup %4340  ;;  %v382_v15 = vpack.c.bf16 %v369_v14, %v368_v0  ;;  %v345_v18 = vmax.f32 %v327_v1, 1e-24  ;;  %v344_v19 = vmax.f32 %v325_v2, 1e-24 }
 0x11a   : > { %v4343_v22 = vpop.eup %4342  ;;  %v371_v23 = vmul.f32 %v4341_v5, %v4982_v12 }
 0x11b   : > { %390 = vst [vmem:[#allocation2 + $0x10] sm:$0xff] %v382_v15  ;;  %v370_v26 = vmul.f32 %v4343_v22, %v4985_v13  ;;  %4352 = vrsqrt.f32 %v345_v18 }
 0x11c   : > { %4354 = vrsqrt.f32 %v344_v19  ;;  %v331_v8 = vpop.xlane.xlu1 %330  ;;  %v329_v27 = vpop.xlane.xlu0 %328 }
 0x11d   : > { %v4345_v30 = vpop.eup %4344  ;;  %v383_v9 = vpack.c.bf16 %v371_v23, %v370_v26  ;;  %v347_v31 = vmax.f32 %v331_v8, 1e-24  ;;  %v346_v32 = vmax.f32 %v329_v27, 1e-24 }
 0x11e   : > { %v4347_v33 = vpop.eup %4346  ;;  %v373_v34 = vmul.f32 %v4345_v30, %v4992_v16 }
 0x11f   : > { %391 = vst [vmem:[#allocation2 + $0x18] sm:$0xff] %v383_v9  ;;  %v372_v35 = vmul.f32 %v4347_v33, %v4995_v17  ;;  %4356 = vrsqrt.f32 %v347_v31 }
 0x120   : > { %4358 = vrsqrt.f32 %v346_v32 }
 0x121   : > { %v4349_v12 = vpop.eup %4348  ;;  %v384_v36 = vpack.c.bf16 %v373_v34, %v372_v35 }
 0x122   : > { %v4351_v37 = vpop.eup %4350  ;;  %v375_v13 = vmul.f32 %v4349_v12, %v5002_v20 }
 0x123   : > { %392 = vst [vmem:[#allocation2 + $0x20] sm:$0xff] %v384_v36  ;;  %v374_v38 = vmul.f32 %v4351_v37, %v5005_v21 }
 0x125   : > { %v4353_v39 = vpop.eup %4352  ;;  %v385_v40 = vpack.c.bf16 %v375_v13, %v374_v38 }
 0x126   : > { %v4355_v41 = vpop.eup %4354  ;;  %v377_v42 = vmul.f32 %v4353_v39, %v5012_v24 }
 0x127   : > { %393 = vst [vmem:[#allocation2 + $0x28] sm:$0xff] %v385_v40  ;;  %v376_v16 = vmul.f32 %v4355_v41, %v5015_v25 }
 0x129   : > { %v4357_v43 = vpop.eup %4356  ;;  %v386_v17 = vpack.c.bf16 %v377_v42, %v376_v16 }
 0x12a   : > { %v4359_v44 = vpop.eup %4358  ;;  %v379_v45 = vmul.f32 %v4357_v43, %v5022_v28 }
 0x12b   : > { %394 = vst [vmem:[#allocation2 + $0x30] sm:$0xff] %v386_v17  ;;  %v378_v46 = vmul.f32 %v4359_v44, %v5025_v29 }
 0x12d   : > { %v387_v20 = vpack.c.bf16 %v379_v45, %v378_v46 }
 0x12f   : > { %395 = vst [vmem:[#allocation2 + $0x38] sm:$0xff] %v387_v20 }
 0x130 PF: > { %v4360_v21 = vld [vmem:[%s4935_s28 + $0x4] ss:$8 sps:$4 sm:$0xff]   ;;  %v4362_v24 = vld [vmem:[%s4935_s28] ss:$8 sps:$4 sm:$0xff]   ;;  %v4666_v25 = vmov 0   ;;  %v430_v63 = vld [vmem:[#allocation2 + $0x10] sm:$0xff]  ;;  %v645_v7 = vlaneseq }
 0x131   : > { %564 = vmatprep.mubr.bf16.mxu0 %v4666_v25  ;;  %604 = vmatprep.mubr.bf16.mxu1 %v4666_v25  ;;  %v4363_v28 = vld [vmem:[%s4935_s28 + $0x14] ss:$8 sps:$4 sm:$0xff]   ;;  %v4365_v29 = vld [vmem:[%s4935_s28 + $0x10] ss:$8 sps:$4 sm:$0xff]   ;;  %v4366_v47 = vld [vmem:[%s4935_s28 + $0x24] ss:$8 sps:$4 sm:$0xff]  }
 0x132   : > { %532 = vmatprep.subr.bf16.mxu0 %v4360_v21  ;;  %4193 = vmatprep.subr.bf16.mxu1 %v4360_v21  ;;  %v4368_v48 = vld [vmem:[%s4935_s28 + $0x20] ss:$8 sps:$4 sm:$0xff]   ;;  %v4369_v49 = vld [vmem:[%s4935_s28 + $0x34] ss:$8 sps:$4 sm:$0xff]   ;;  %v4371_v50 = vld [vmem:[%s4935_s28 + $0x30] ss:$8 sps:$4 sm:$0xff]  }
 0x133   : > { %533 = vmatpush1.bf16.msra.mxu0 %v4362_v24  ;;  %4201 = vmatpush1.bf16.msra.mxu1 %v4362_v24  ;;  %v4372_v51 = vld [vmem:[%s4935_s28 + $0x44] ss:$8 sps:$4 sm:$0xff]   ;;  %v4374_v52 = vld [vmem:[%s4935_s28 + $0x40] ss:$8 sps:$4 sm:$0xff]   ;;  %v4375_v53 = vld [vmem:[%s4935_s28 + $0x54] ss:$8 sps:$4 sm:$0xff]  }
 0x134   : > { %534 = vmatprep.subr.bf16.mxu0 %v4363_v28  ;;  %4194 = vmatprep.subr.bf16.mxu1 %v4363_v28  ;;  %v4377_v54 = vld [vmem:[%s4935_s28 + $0x50] ss:$8 sps:$4 sm:$0xff]   ;;  %v4378_v55 = vld [vmem:[%s4935_s28 + $0x64] ss:$8 sps:$4 sm:$0xff]   ;;  %v4380_v56 = vld [vmem:[%s4935_s28 + $0x60] ss:$8 sps:$4 sm:$0xff]  }
 0x135   : > { %v4381_v57 = vld [vmem:[%s4935_s28 + $0x74] ss:$8 sps:$4 sm:$0xff]   ;;  %v4383_v58 = vld [vmem:[%s4935_s28 + $0x70] ss:$8 sps:$4 sm:$0xff]   ;;  %v428_v59 = vld [vmem:[#allocation2] sm:$0xff]  ;;  %v5072_v10 = vand.u32 127, %v645_v7 }
 0x136   : > { %v432_v60 = vld [vmem:[#allocation2 + $0x20] sm:$0xff]  ;;  %v429_v61 = vld [vmem:[#allocation2 + $0x8] sm:$0xff]  ;;  %v434_v3 = vld [vmem:[#allocation2 + $0x30] sm:$0xff]  ;;  %s4183_s23 = sshll.u32 %s4641_s18, 8  ;;  %p4184_p13 = scmp.ne.s32.totalorder %s4641_s18, 2 }
 0x137   : > { %535 = vmatpush1.bf16.msra.mxu0 %v4365_v29  ;;  %4202 = vmatpush1.bf16.msra.mxu1 %v4365_v29  ;;  %v433_v62 = vld [vmem:[#allocation2 + $0x28] sm:$0xff]  ;;  %v431_v4 = vld [vmem:[#allocation2 + $0x18] sm:$0xff]  ;;  %9071 = vst [vmem:[#allocation17_spill] sm:$0xff] %v5072_v10  ;;  %v649_v11 = vstv %s4183_s23  ;;  %v5076_v14 = vadd.s32 128, %v5072_v10  ;;  %v5102_v30 = vld [vmem:[#allocation3] sm:$0xff] }
 0x138   : > { %536 = vmatprep.subr.bf16.mxu0 %v4366_v47  ;;  %4195 = vmatprep.subr.bf16.mxu1 %v4366_v47  ;;  %v435_v6 = vld [vmem:[#allocation2 + $0x38] sm:$0xff]  ;;  %v5079_v0 = vadd.s32 %v649_v11, %v5072_v10  ;;  %9077 = vst [vmem:[#allocation23_spill] sm:$0xff] %v5102_v30  ;;  %v5116_v12 = vld [vmem:[#allocation3 + $0x48] sm:$0xff]  ;;  %v5118_v36 = vld [vmem:[#allocation3 + $0x40] sm:$0xff] }
 0x139   : > { %9072 = vst [vmem:[#allocation18_spill] sm:$0xff] %v5076_v14  ;;  %v5082_v1 = vadd.s32 %v649_v11, %v5076_v14  ;;  %v5153_v28 = vld [vmem:[#allocation3 + $0x10] sm:$0xff] }
 0x13a   : > { %vm652_vm0 = vcmp.lt.s32.totalorder %v5079_v0, 640 }
 0x13b   : > { %537 = vmatpush1.bf16.msra.mxu0 %v4368_v48  ;;  %4203 = vmatpush1.bf16.msra.mxu1 %v4368_v48  ;;  %vm653_vm1 = vcmp.lt.s32.totalorder %v5082_v1, 640 }
 0x13c   : > { %538 = vmatprep.subr.bf16.mxu0 %v4369_v49  ;;  %4196 = vmatprep.subr.bf16.mxu1 %v4369_v49 }
 0x13f   : > { %539 = vmatpush1.bf16.msra.mxu0 %v4371_v50  ;;  %4204 = vmatpush1.bf16.msra.mxu1 %v4371_v50 }
 0x140   : > { %540 = vmatprep.subr.bf16.mxu0 %v4372_v51  ;;  %4197 = vmatprep.subr.bf16.mxu1 %v4372_v51 }
 0x143   : > { %541 = vmatpush1.bf16.msra.mxu0 %v4374_v52  ;;  %4205 = vmatpush1.bf16.msra.mxu1 %v4374_v52 }
 0x144   : > { %542 = vmatprep.subr.bf16.mxu0 %v4375_v53  ;;  %4198 = vmatprep.subr.bf16.mxu1 %v4375_v53 }
 0x147   : > { %543 = vmatpush1.bf16.msra.mxu0 %v4377_v54  ;;  %4206 = vmatpush1.bf16.msra.mxu1 %v4377_v54 }
 0x148   : > { %544 = vmatprep.subr.bf16.mxu0 %v4378_v55  ;;  %4199 = vmatprep.subr.bf16.mxu1 %v4378_v55  ;;  %v5175_v55 = vld [vmem:[#allocation3 + $0x50] sm:$0xff] }
 0x14b   : > { %545 = vmatpush1.bf16.msra.mxu0 %v4380_v56  ;;  %4207 = vmatpush1.bf16.msra.mxu1 %v4380_v56  ;;  %v5177_v56 = vld [vmem:[#allocation3 + $0x18] sm:$0xff] }
 0x14c   : > { %546 = vmatprep.subr.bf16.mxu0 %v4381_v57  ;;  %4200 = vmatprep.subr.bf16.mxu1 %v4381_v57 }
 0x14f   : > { %547 = vmatpush1.bf16.msra.mxu0 %v4383_v58  ;;  %4208 = vmatpush1.bf16.msra.mxu1 %v4383_v58 }
 0x152   : > { %565 = vmatmul.mubr.bf16.vlgmr.msra.gmra.mrb[0].mxu0 %v428_v59  ;;  %605 = vmatmul.mubr.bf16.vlgmr.msra.gmra.mrb[0].mxu1 %v432_v60 }
 0x153   : > { %574 = vmatprep.mubr.bf16.mxu0 %v4666_v25  ;;  %614 = vmatprep.mubr.bf16.mxu1 %v4666_v25 }
 0x15a   : > { %575 = vmatmul.mubr.bf16.gmra.mrb[4].mxu0 %v429_v61  ;;  %615 = vmatmul.mubr.bf16.gmra.mrb[4].mxu1 %v433_v62 }
 0x15b   : > { %584 = vmatprep.mubr.bf16.mxu0 %v4666_v25  ;;  %624 = vmatprep.mubr.bf16.mxu1 %v4666_v25 }
 0x162   : > { %585 = vmatmul.mubr.bf16.gmra.mrb[8].mxu0 %v430_v63  ;;  %625 = vmatmul.mubr.bf16.gmra.mrb[8].mxu1 %v434_v3 }
 0x163   : > { %594 = vmatprep.mubr.bf16.mxu0 %v4666_v25  ;;  %634 = vmatprep.mubr.bf16.mxu1 %v4666_v25  ;;  %v5151_v25 = vld [vmem:[#allocation3 + $0x8] sm:$0xff] }
 0x16a   : > { %595 = vmatmul.mubr.bf16.gmra.mrb[12].mxu0 %v431_v4  ;;  %635 = vmatmul.mubr.bf16.gmra.mrb[12].mxu1 %v435_v6  ;;  %v5187_v4 = vld [vmem:[#allocation3 + $0x58] sm:$0xff] }
 0x225   : > { %v566_v2 = vpop.f32.mrb[0].mxu0  ;;  %v606_v5 = vpop.f32.mrb[0].mxu1 }
 0x226   : > { %v5088_v15 = vsel %vm652_vm0, %v566_v2, -inf  ;;  %v5092_v18 = vsel %vm652_vm0, %v606_v5, -inf  ;;  %v568_v19 = vpop.f32.mrb[1].mxu0  ;;  %v608_v22 = vpop.f32.mrb[1].mxu1 }
 0x227   : > { %9073 = vst [vmem:[#allocation19_spill] sm:$0xff] %v5088_v15  ;;  %9074 = vst [vmem:[#allocation20_spill] sm:$0xff] %v5092_v18  ;;  %v5096_v23 = vsel %vm653_vm1, %v568_v19, -inf  ;;  %v5100_v26 = vsel %vm653_vm1, %v608_v22, -inf  ;;  %v570_v8 = vpop.f32.mrb[2].mxu0  ;;  %v610_v27 = vpop.f32.mrb[2].mxu1 }
 0x228   : > { %9075 = vst [vmem:[#allocation21_spill] sm:$0xff] %v5096_v23  ;;  %9076 = vst [vmem:[#allocation22_spill] sm:$0xff] %v5100_v26  ;;  %v781_v9 = vmax.f32 %v5092_v18, %v5100_v26  ;;  %v5108_v31 = vsel %vm652_vm0, %v610_v27, -inf  ;;  %v572_v32 = vpop.f32.mrb[3].mxu0  ;;  %v612_v33 = vpop.f32.mrb[3].mxu1  ;;  %v749_v34 = vmax.f32 %v5088_v15, %v5096_v23  ;;  %v5125_v38 = vsel %vm652_vm0, %v570_v8, -inf }
 0x229   : > { %9078 = vst [vmem:[#allocation24_spill] sm:$0xff] %v5108_v31  ;;  %v5114_v35 = vsel %vm653_vm1, %v612_v33, -inf  ;;  %9080 = vst [vmem:[#allocation26_spill] sm:$0xff] %v5125_v38  ;;  %v5129_v39 = vsel %vm653_vm1, %v572_v32, -inf  ;;  %v5205_v27 = vld [vmem:[#allocation3 + $0x20] sm:$0xff] }
 0x22a   : > { %9079 = vst [vmem:[#allocation25_spill] sm:$0xff] %v5114_v35  ;;  %v750_v37 = vmax.f32 %v749_v34, %v5102_v30  ;;  %v785_v13 = vmax.f32 %v5108_v31, %v5114_v35  ;;  %9081 = vst [vmem:[#allocation27_spill] sm:$0xff] %v5129_v39  ;;  %v782_v41 = vmax.f32 %v781_v9, %v5118_v36 }
 0x22b   : > { %v753_v43 = vmax.f32 %v5125_v38, %v5129_v39 }
 0x22c   : > { %751 = vmax.xlane.f32.xlu0 %v750_v37  ;;  %v786_v40 = vmax.f32 %v785_v13, %v5116_v12 }
 0x22d   : > { %v576_v42 = vpop.f32.mrb[4].mxu0  ;;  %v616_v16 = vpop.f32.mrb[4].mxu1  ;;  %v754_v58 = vmax.f32 %v753_v43, %v5151_v25  ;;  %v5228_v43 = vld [vmem:[#allocation3 + $0x60] sm:$0xff] }
 0x22e   : > { %v5137_v17 = vsel %vm652_vm0, %v576_v42, -inf  ;;  %787 = vmax.xlane.f32.xlu1 %v786_v40  ;;  %v578_v44 = vpop.f32.mrb[5].mxu0  ;;  %v5141_v45 = vsel %vm652_vm0, %v616_v16, -inf  ;;  %v618_v46 = vpop.f32.mrb[5].mxu1 }
 0x22f   : > { %9082 = vst [vmem:[#allocation28_spill] sm:$0xff] %v5141_v45  ;;  %v5145_v20 = vsel %vm653_vm1, %v578_v44, -inf  ;;  %v580_v21 = vpop.f32.mrb[6].mxu0  ;;  %v5149_v24 = vsel %vm653_vm1, %v618_v46, -inf  ;;  %v620_v29 = vpop.f32.mrb[6].mxu1  ;;  %v5230_v44 = vld [vmem:[#allocation3 + $0x28] sm:$0xff] }
 0x230   : > { %9083 = vst [vmem:[#allocation29_spill] sm:$0xff] %v5149_v24  ;;  %v757_v47 = vmax.f32 %v5137_v17, %v5145_v20  ;;  %783 = vmax.xlane.f32.xlu0 %v782_v41  ;;  %v5159_v48 = vsel %vm652_vm0, %v580_v21, -inf  ;;  %v582_v49 = vpop.f32.mrb[7].mxu0  ;;  %v789_v50 = vmax.f32 %v5141_v45, %v5149_v24  ;;  %v622_v51 = vpop.f32.mrb[7].mxu1  ;;  %v5169_v53 = vsel %vm652_vm0, %v620_v29, -inf }
 0x231   : > { %v5165_v52 = vsel %vm653_vm1, %v582_v49, -inf  ;;  %v5173_v54 = vsel %vm653_vm1, %v622_v51, -inf }
 0x232   : > { %9084 = vst [vmem:[#allocation30_spill] sm:$0xff] %v5173_v54  ;;  %v761_v57 = vmax.f32 %v5159_v48, %v5165_v52  ;;  %v758_v59 = vmax.f32 %v757_v47, %v5153_v28  ;;  %v793_v60 = vmax.f32 %v5169_v53, %v5173_v54  ;;  %v790_v61 = vmax.f32 %v789_v50, %v5175_v55 }
 0x234   : > { %755 = vmax.xlane.f32.xlu0 %v754_v58  ;;  %759 = vmax.xlane.f32.xlu1 %v758_v59  ;;  %v762_v62 = vmax.f32 %v761_v57, %v5177_v56  ;;  %v794_v13 = vmax.f32 %v793_v60, %v5187_v4  ;;  %v5239_v57 = vld [vmem:[#allocation3 + $0x68] sm:$0xff] }
 0x235   : > { %v586_v63 = vpop.f32.mrb[8].mxu0  ;;  %v626_v3 = vpop.f32.mrb[8].mxu1 }
 0x236   : > { %v5191_v6 = vsel %vm652_vm0, %v586_v63, -inf  ;;  %v588_v11 = vpop.f32.mrb[9].mxu0  ;;  %v5195_v2 = vsel %vm652_vm0, %v626_v3, -inf  ;;  %v628_v5 = vpop.f32.mrb[9].mxu1 }
 0x237   : > { %v5199_v19 = vsel %vm653_vm1, %v588_v11, -inf  ;;  %v590_v22 = vpop.f32.mrb[10].mxu0  ;;  %v5203_v8 = vsel %vm653_vm1, %v628_v5, -inf  ;;  %v630_v9 = vpop.f32.mrb[10].mxu1  ;;  %v5257_v11 = vld [vmem:[#allocation3 + $0x30] sm:$0xff] }
 0x238   : > { %9085 = vst [vmem:[#allocation31_spill] sm:$0xff] %v5203_v8  ;;  %v765_v32 = vmax.f32 %v5191_v6, %v5199_v19  ;;  %791 = vmax.xlane.f32.xlu0 %v790_v61  ;;  %763 = vmax.xlane.f32.xlu1 %v762_v62  ;;  %v5211_v33 = vsel %vm652_vm0, %v590_v22, -inf  ;;  %v592_v34 = vpop.f32.mrb[11].mxu0  ;;  %v797_v37 = vmax.f32 %v5195_v2, %v5203_v8  ;;  %v632_v40 = vpop.f32.mrb[11].mxu1  ;;  %v5222_v42 = vsel %vm652_vm0, %v630_v9, -inf }
 0x239   : > { %v5218_v41 = vsel %vm653_vm1, %v592_v34, -inf  ;;  %v5226_v16 = vsel %vm653_vm1, %v632_v40, -inf }
 0x23a   : > { %v769_v46 = vmax.f32 %v5211_v33, %v5218_v41  ;;  %v766_v21 = vmax.f32 %v765_v32, %v5205_v27  ;;  %v801_v29 = vmax.f32 %v5222_v42, %v5226_v16  ;;  %v798_v47 = vmax.f32 %v797_v37, %v5228_v43 }
 0x23c   : > { %795 = vmax.xlane.f32.xlu1 %v794_v13  ;;  %767 = vmax.xlane.f32.xlu0 %v766_v21  ;;  %v770_v49 = vmax.f32 %v769_v46, %v5230_v44  ;;  %v802_v37 = vmax.f32 %v801_v29, %v5239_v57 }
 0x23d   : > { %v596_v50 = vpop.f32.mrb[12].mxu0  ;;  %v636_v51 = vpop.f32.mrb[12].mxu1 }
 0x23e   : > { %v5243_v58 = vsel %vm652_vm0, %v596_v50, -inf  ;;  %v598_v59 = vpop.f32.mrb[13].mxu0  ;;  %v5247_v60 = vsel %vm652_vm0, %v636_v51, -inf  ;;  %v638_v61 = vpop.f32.mrb[13].mxu1 }
 0x23f   : > { %v5251_v62 = vsel %vm653_vm1, %v598_v59, -inf  ;;  %v600_v63 = vpop.f32.mrb[14].mxu0  ;;  %v5255_v3 = vsel %vm653_vm1, %v638_v61, -inf  ;;  %v640_v5 = vpop.f32.mrb[14].mxu1  ;;  %v5291_v59 = vld [vmem:[#allocation3 + $0x78] sm:$0xff] }
 0x240   : > { %v773_v22 = vmax.f32 %v5243_v58, %v5251_v62  ;;  %799 = vmax.xlane.f32.xlu0 %v798_v47  ;;  %771 = vmax.xlane.f32.xlu1 %v770_v49  ;;  %v5263_v9 = vsel %vm652_vm0, %v600_v63, -inf  ;;  %v602_v32 = vpop.f32.mrb[15].mxu0  ;;  %v805_v34 = vmax.f32 %v5247_v60, %v5255_v3  ;;  %v642_v13 = vpop.f32.mrb[15].mxu1  ;;  %v5274_v46 = vsel %vm652_vm0, %v640_v5, -inf  ;;  %v5280_v47 = vld [vmem:[#allocation3 + $0x70] sm:$0xff]  ;;  %v5282_v49 = vld [vmem:[#allocation3 + $0x38] sm:$0xff] }
 0x241   : > { %v5270_v40 = vsel %vm653_vm1, %v602_v32, -inf  ;;  %v5278_v21 = vsel %vm653_vm1, %v642_v13, -inf  ;;  %9087 = vst [vmem:[#allocation33_spill] sm:$0xff] %v5291_v59  ;;  %v690_v63 = vshrl.u32 %v645_v7, 7  ;;  %v686_v32 = vld [vmem:[%s260_s6] sm:$0x3] }
 0x242   : > { %9086 = vst [vmem:[#allocation32_spill] sm:$0xff] %v5278_v21  ;;  %v777_v29 = vmax.f32 %v5263_v9, %v5270_v40  ;;  %v774_v50 = vmax.f32 %v773_v22, %v5257_v11  ;;  %v809_v0 = vmax.f32 %v5274_v46, %v5278_v21  ;;  %v806_v51 = vmax.f32 %v805_v34, %v5280_v47  ;;  %v701_v7 = vld [vmem:[#allocation4] sm:$0xff]  ;;  %v710_v21 = vld [vmem:[#allocation4 + $0x48] sm:$0xff] }
 0x243   : > { %v691_v5 = vsub.s32 0, %v690_v63  ;;  %v695_v22 = vsub.s32 1, %v690_v63  ;;  %v5301_v34 = vadd.s32 256, %v5072_v10  ;;  %v688_v13 = vshll.u32 %v5076_v14, 16 }
 0x244   : > { %803 = vmax.xlane.f32.xlu1 %v802_v37  ;;  %775 = vmax.xlane.f32.xlu0 %v774_v50  ;;  %v778_v1 = vmax.f32 %v777_v29, %v5282_v49  ;;  %v810_v61 = vmax.f32 %v809_v0, %v5291_v59  ;;  %v687_v37 = vshll.u32 %v5072_v10, 16  ;;  %v709_v59 = vld [vmem:[#allocation4 + $0x40] sm:$0xff] }
 0x245   : > { %9088 = vst [vmem:[#allocation34_spill] sm:$0xff] %v5301_v34  ;;  %v692_v29 = vrot.slane %v686_v32, %v691_v5  ;;  %v696_v50 = vrot.slane %v686_v32, %v695_v22  ;;  %v5306_v0 = vshll.u32 %v5301_v34, 16  ;;  %v702_v5 = vld [vmem:[#allocation4 + $0x8] sm:$0xff] }
 0x247   : > { %v5315_v63 = vadd.s32 %v701_v7, %v5306_v0 }
 0x248   : > { %807 = vmax.xlane.f32.xlu0 %v806_v51  ;;  %779 = vmax.xlane.f32.xlu1 %v778_v1  ;;  %v5308_v51 = vadd.s32 %v692_v29, %v687_v37  ;;  %v5310_v1 = vadd.s32 %v696_v50, %v688_v13  ;;  %v5328_v13 = vadd.s32 %v709_v59, %v5306_v0  ;;  %v704_v59 = vld [vmem:[#allocation4 + $0x18] sm:$0xff] }
 0x249   : > { %9092 = vst [vmem:[#allocation38_spill] sm:$0xff] %v5315_v63  ;;  %v5331_v29 = vadd.s32 %v710_v21, %v5306_v0  ;;  %v705_v21 = vld [vmem:[#allocation4 + $0x20] sm:$0xff]  ;;  %v5369_v14 = vadd.s32 %v704_v59, %v5306_v0 }
 0x24a   : > { %9089 = vst [vmem:[#allocation35_spill] sm:$0xff] %v5308_v51  ;;  %9090 = vst [vmem:[#allocation36_spill] sm:$0xff] %v5310_v1 }
 0x24b   : > { %9094 = vst [vmem:[#allocation40_spill] sm:$0xff] %v5328_v13  ;;  %9095 = vst [vmem:[#allocation41_spill] sm:$0xff] %v5331_v29 }
 0x24c   : > { %811 = vmax.xlane.f32.xlu1 %v810_v61  ;;  %9103 = vst [vmem:[#allocation49_spill] sm:$0xff] %v5369_v14 }
 0x2b9   : > { %v5312_v61 = vpop.xlane.xlu0 %751 }
 0x2ba   : > { %9091 = vst [vmem:[#allocation37_spill] sm:$0xff] %v5312_v61  ;;  %vm813_vm2 = vcmp.eq.f32.partialorder %v5088_v15, %v5312_v61  ;;  %vm814_vm3 = vcmp.eq.f32.partialorder %v5096_v23, %v5312_v61  ;;  %vm815_vm4 = vcmp.eq.f32.partialorder %v5102_v30, %v5312_v61  ;;  %v703_v61 = vld [vmem:[#allocation4 + $0x10] sm:$0xff]  ;;  %v5337_v30 = vadd.s32 %v702_v5, %v5306_v0 }
 0x2bb   : > { %v5323_v22 = vpop.xlane.xlu1 %787  ;;  %v861_v32 = vsel %vm813_vm2, %v5308_v51, 2147483647  ;;  %v862_v37 = vsel %vm814_vm3, %v5310_v1, 2147483647  ;;  %v863_v7 = vsel %vm815_vm4, %v5315_v63, 2147483647 }
 0x2bc   : > { %9093 = vst [vmem:[#allocation39_spill] sm:$0xff] %v5323_v22  ;;  %vm909_vm5 = vcmp.lt.s32.totalorder %v861_v32, %v862_v37  ;;  %9097 = vst [vmem:[#allocation43_spill] sm:$0xff] %v5337_v30  ;;  %v711_v15 = vld [vmem:[#allocation4 + $0x50] sm:$0xff]  ;;  %vm840_vm6 = vcmp.eq.f32.partialorder %v5108_v31, %v5323_v22  ;;  %vm841_vm10 = vcmp.eq.f32.partialorder %v5114_v35, %v5323_v22 }
 0x2bd   : > { %v5333_v50 = vpop.xlane.xlu0 %783  ;;  %v910_v23 = vsel %vm909_vm5, %v861_v32, %v862_v37  ;;  %vm842_vm5 = vcmp.eq.f32.partialorder %v5116_v12, %v5323_v22  ;;  %v715_v22 = vld [vmem:[#allocation4 + $0x70] sm:$0xff] }
 0x2be   : > { %9096 = vst [vmem:[#allocation42_spill] sm:$0xff] %v5333_v50  ;;  %vm911_vm7 = vcmp.lt.s32.totalorder %v910_v23, %v863_v7  ;;  %vm837_vm8 = vcmp.eq.f32.partialorder %v5092_v18, %v5333_v50  ;;  %vm838_vm9 = vcmp.eq.f32.partialorder %v5100_v26, %v5333_v50  ;;  %vm839_vm11 = vcmp.eq.f32.partialorder %v5118_v36, %v5333_v50 }
 0x2bf   : > { %v5347_v32 = vsel %vm911_vm7, %v910_v23, %v863_v7  ;;  %v885_v5 = vsel %vm837_vm8, %v5308_v51, 2147483647  ;;  %v886_v37 = vsel %vm838_vm9, %v5310_v1, 2147483647  ;;  %v5355_v18 = vadd.s32 %v703_v61, %v5306_v0 }
 0x2c0   : > { %v914_v63 = vshra.s32 %v5347_v32, 16  ;;  %vm1053_vm12 = vcmp.lt.s32.totalorder %v885_v5, %v886_v37  ;;  %v5358_v26 = vadd.s32 %v711_v15, %v5306_v0  ;;  %v887_v7 = vsel %vm839_vm11, %v5328_v13, 2147483647 }
 0x2c1   : > { %9098 = vst [vmem:[#allocation44_spill] sm:$0xff] %v5355_v18  ;;  %v5360_v34 = vpop.xlane.xlu0 %755  ;;  %v5362_v23 = vpop.xlane.xlu1 %759  ;;  %v1054_v36 = vsel %vm1053_vm12, %v885_v5, %v886_v37  ;;  %v5366_v50 = vadd.s32 %v705_v21, %v5306_v0  ;;  %v888_v15 = vsel %vm840_vm6, %v5308_v51, 2147483647  ;;  %v889_v61 = vsel %vm841_vm10, %v5310_v1, 2147483647 }
 0x2c2   : > { %9099 = vst [vmem:[#allocation45_spill] sm:$0xff] %v5358_v26  ;;  %9100 = vst [vmem:[#allocation46_spill] sm:$0xff] %v5360_v34  ;;  %v5371_v10 = vcvt.s32.f32 %v914_v63  ;;  %vm1055_vm13 = vcmp.lt.s32.totalorder %v1054_v36, %v887_v7  ;;  %vm819_vm14 = vcmp.eq.f32.partialorder %v5137_v17, %v5362_v23  ;;  %vm820_vm15 = vcmp.eq.f32.partialorder %v5145_v20, %v5362_v23 }
 0x2c3   : > { %9101 = vst [vmem:[#allocation47_spill] sm:$0xff] %v5362_v23  ;;  %9102 = vst [vmem:[#allocation48_spill] sm:$0xff] %v5366_v50  ;;  %v5381_v5 = vsel %vm1055_vm13, %v1054_v36, %v887_v7  ;;  %vm821_vm0 = vcmp.eq.f32.partialorder %v5153_v28, %v5362_v23  ;;  %v867_v21 = vsel %vm819_vm14, %v5308_v51, 2147483647  ;;  %v868_v59 = vsel %vm820_vm15, %v5310_v1, 2147483647 }
 0x2c4   : > { %917 = vmin.xlane.f32.xlu0 %v5371_v10  ;;  %v1058_v63 = vshra.s32 %v5381_v5, 16  ;;  %vm816_vm1 = vcmp.eq.f32.partialorder %v5125_v38, %v5360_v34  ;;  %v869_v7 = vsel %vm821_vm0, %v5355_v18, 2147483647  ;;  %vm945_vm2 = vcmp.lt.s32.totalorder %v867_v21, %v868_v59  ;;  %v712_v23 = vld [vmem:[#allocation4 + $0x58] sm:$0xff] }
 0x2c5   : > { %v5395_v37 = vpop.xlane.xlu0 %791  ;;  %vm817_vm3 = vcmp.eq.f32.partialorder %v5129_v39, %v5360_v34  ;;  %vm818_vm4 = vcmp.eq.f32.partialorder %v5151_v25, %v5360_v34  ;;  %v946_v36 = vsel %vm945_vm2, %v867_v21, %v868_v59  ;;  %vm1071_vm6 = vcmp.lt.s32.totalorder %v888_v15, %v889_v61  ;;  %v5416_v25 = vpop.xlane.xlu1 %763 }
 0x2c6   : > { %9104 = vst [vmem:[#allocation50_spill] sm:$0xff] %v5395_v37  ;;  %v5402_v28 = vcvt.s32.f32 %v1058_v63  ;;  %vm947_vm7 = vcmp.lt.s32.totalorder %v946_v36, %v869_v7  ;;  %v864_v13 = vsel %vm816_vm1, %v5308_v51, 2147483647  ;;  %v865_v18 = vsel %vm817_vm3, %v5310_v1, 2147483647  ;;  %9105 = vst [vmem:[#allocation51_spill] sm:$0xff] %v5416_v25 }
 0x2c7   : > { %v866_v35 = vsel %vm818_vm4, %v5337_v30, 2147483647  ;;  %v5410_v31 = vsel %vm947_vm7, %v946_v36, %v869_v7  ;;  %vm927_vm8 = vcmp.lt.s32.totalorder %v864_v13, %v865_v18  ;;  %vm843_vm9 = vcmp.eq.f32.partialorder %v5141_v45, %v5395_v37 }
 0x2c8   : > { %1061 = vmin.xlane.f32.xlu0 %v5402_v28  ;;  %vm844_vm10 = vcmp.eq.f32.partialorder %v5149_v24, %v5395_v37  ;;  %v950_v21 = vshra.s32 %v5410_v31, 16  ;;  %v928_v59 = vsel %vm927_vm8, %v864_v13, %v865_v18  ;;  %vm845_vm11 = vcmp.eq.f32.partialorder %v5175_v55, %v5395_v37  ;;  %v713_v55 = vld [vmem:[#allocation4 + $0x60] sm:$0xff]  ;;  %v706_v13 = vld [vmem:[#allocation4 + $0x28] sm:$0xff] }
 0x2c9   : > { %v5418_v63 = vpop.xlane.xlu0 %767  ;;  %v891_v7 = vsel %vm843_vm9, %v5308_v51, 2147483647  ;;  %vm929_vm12 = vcmp.lt.s32.totalorder %v928_v59, %v866_v35  ;;  %v892_v36 = vsel %vm844_vm10, %v5310_v1, 2147483647  ;;  %v890_v34 = vsel %vm842_vm5, %v5331_v29, 2147483647 }
 0x2ca   : > { %9106 = vst [vmem:[#allocation52_spill] sm:$0xff] %v5418_v63  ;;  %v5430_v30 = vadd.s32 %v712_v23, %v5306_v0  ;;  %v5432_v24 = vcvt.s32.f32 %v950_v21  ;;  %v5434_v45 = vsel %vm929_vm12, %v928_v59, %v866_v35  ;;  %v893_v18 = vsel %vm845_vm11, %v5358_v26, 2147483647  ;;  %v5456_v21 = vpop.xlane.xlu1 %795  ;;  %v708_v29 = vld [vmem:[#allocation4 + $0x38] sm:$0xff] }
 0x2cb   : > { %vm1089_vm13 = vcmp.lt.s32.totalorder %v891_v7, %v892_v36  ;;  %v932_v37 = vshra.s32 %v5434_v45, 16  ;;  %v1072_v38 = vsel %vm1071_vm6, %v888_v15, %v889_v61  ;;  %vm825_vm14 = vcmp.eq.f32.partialorder %v5191_v6, %v5418_v63  ;;  %v707_v15 = vld [vmem:[#allocation4 + $0x30] sm:$0xff]  ;;  %9110 = vst [vmem:[#allocation56_spill] sm:$0xff] %v5456_v21 }
 0x2cc   : > { %9107 = vst [vmem:[#allocation53_spill] sm:$0xff] %v5430_v30  ;;  %v1090_v39 = vsel %vm1089_vm13, %v891_v7, %v892_v36  ;;  %953 = vmin.xlane.f32.xlu0 %v5432_v24  ;;  %vm1073_vm0 = vcmp.lt.s32.totalorder %v1072_v38, %v890_v34  ;;  %vm826_vm1 = vcmp.eq.f32.partialorder %v5199_v19, %v5418_v63  ;;  %v873_v36 = vsel %vm825_vm14, %v5308_v51, 2147483647 }
 0x2cd   : > { %vm1091_vm15 = vcmp.lt.s32.totalorder %v1090_v39, %v893_v18  ;;  %vm827_vm2 = vcmp.eq.f32.partialorder %v5205_v27, %v5418_v63  ;;  %v5446_v35 = vcvt.s32.f32 %v932_v37  ;;  %v5451_v23 = vadd.s32 %v713_v55, %v5306_v0  ;;  %v714_v37 = vld [vmem:[#allocation4 + $0x68] sm:$0xff]  ;;  %v5468_v55 = vpop.xlane.xlu0 %799 }
 0x2ce   : > { %v5448_v12 = vsel %vm1091_vm15, %v1090_v39, %v893_v18  ;;  %v5454_v61 = vadd.s32 %v706_v13, %v5306_v0  ;;  %v5459_v7 = vsel %vm1073_vm0, %v1072_v38, %v890_v34  ;;  %v874_v27 = vsel %vm826_vm1, %v5310_v1, 2147483647  ;;  %9111 = vst [vmem:[#allocation57_spill] sm:$0xff] %v5468_v55 }
 0x2cf   : > { %9108 = vst [vmem:[#allocation54_spill] sm:$0xff] %v5451_v23  ;;  %v1094_v59 = vshra.s32 %v5448_v12, 16  ;;  %935 = vmin.xlane.f32.xlu1 %v5446_v35  ;;  %v1076_v39 = vshra.s32 %v5459_v7, 16  ;;  %v875_v18 = vsel %vm827_vm2, %v5366_v50, 2147483647  ;;  %vm981_vm3 = vcmp.lt.s32.totalorder %v873_v36, %v874_v27 }
 0x2d0   : > { %9109 = vst [vmem:[#allocation55_spill] sm:$0xff] %v5454_v61  ;;  %vm822_vm4 = vcmp.eq.f32.partialorder %v5159_v48, %v5416_v25  ;;  %v982_v38 = vsel %vm981_vm3, %v873_v36, %v874_v27  ;;  %vm823_vm5 = vcmp.eq.f32.partialorder %v5165_v52, %v5416_v25  ;;  %vm824_vm6 = vcmp.eq.f32.partialorder %v5177_v56, %v5416_v25 }
 0x2d1   : > { %v5470_v13 = vcvt.s32.f32 %v1094_v59  ;;  %v5476_v34 = vcvt.s32.f32 %v1076_v39  ;;  %vm983_vm7 = vcmp.lt.s32.totalorder %v982_v38, %v875_v18  ;;  %v5479_v63 = vadd.s32 %v707_v15, %v5306_v0 }
 0x2d2   : > { %v5482_v50 = vadd.s32 %v714_v37, %v5306_v0  ;;  %v5485_v59 = vsel %vm983_vm7, %v982_v38, %v875_v18  ;;  %v870_v36 = vsel %vm822_vm4, %v5308_v51, 2147483647  ;;  %v871_v27 = vsel %vm823_vm5, %v5310_v1, 2147483647  ;;  %v5496_v37 = vpop.xlane.xlu1 %771 }
 0x2d3   : > { %9112 = vst [vmem:[#allocation58_spill] sm:$0xff] %v5479_v63  ;;  %1097 = vmin.xlane.f32.xlu0 %v5470_v13  ;;  %v872_v56 = vsel %vm824_vm6, %v5369_v14, 2147483647  ;;  %1079 = vmin.xlane.f32.xlu1 %v5476_v34  ;;  %v986_v15 = vshra.s32 %v5485_v59, 16  ;;  %vm963_vm8 = vcmp.lt.s32.totalorder %v870_v36, %v871_v27  ;;  %vm849_vm9 = vcmp.eq.f32.partialorder %v5195_v2, %v5468_v55 }
 0x2d4   : > { %9113 = vst [vmem:[#allocation59_spill] sm:$0xff] %v5482_v50  ;;  %vm850_vm10 = vcmp.eq.f32.partialorder %v5203_v8, %v5468_v55  ;;  %9114 = vst [vmem:[#allocation60_spill] sm:$0xff] %v5496_v37  ;;  %v964_v39 = vsel %vm963_vm8, %v870_v36, %v871_v27  ;;  %vm851_vm11 = vcmp.eq.f32.partialorder %v5228_v43, %v5468_v55  ;;  %v897_v18 = vsel %vm849_vm9, %v5308_v51, 2147483647  ;;  %v716_v43 = vld [vmem:[#allocation4 + $0x78] sm:$0xff]  ;;  %v5515_v27 = vpop.xlane.xlu0 %775 }
 0x2d5   : > { %v898_v38 = vsel %vm850_vm10, %v5310_v1, 2147483647  ;;  %v5502_v25 = vcvt.s32.f32 %v986_v15  ;;  %vm965_vm12 = vcmp.lt.s32.totalorder %v964_v39, %v872_v56  ;;  %v5505_v14 = vadd.s32 %v715_v22, %v5306_v0  ;;  %9117 = vst [vmem:[#allocation63_spill] sm:$0xff] %v5515_v27 }
 0x2d6   : > { %v5508_v26 = vadd.s32 %v708_v29, %v5306_v0  ;;  %v5510_v8 = vsel %vm965_vm12, %v964_v39, %v872_v56  ;;  %v899_v36 = vsel %vm851_vm11, %v5451_v23, 2147483647  ;;  %vm1125_vm13 = vcmp.lt.s32.totalorder %v897_v18, %v898_v38 }
 0x2d7   : > { %9115 = vst [vmem:[#allocation61_spill] sm:$0xff] %v5505_v14  ;;  %vm846_vm14 = vcmp.eq.f32.partialorder %v5169_v53, %v5456_v21  ;;  %989 = vmin.xlane.f32.xlu0 %v5502_v25  ;;  %v968_v15 = vshra.s32 %v5510_v8, 16  ;;  %v1126_v22 = vsel %vm1125_vm13, %v897_v18, %v898_v38  ;;  %vm847_vm15 = vcmp.eq.f32.partialorder %v5173_v54, %v5456_v21  ;;  %v5533_v38 = vpop.xlane.xlu1 %803 }
 0x2d8   : > { %9116 = vst [vmem:[#allocation62_spill] sm:$0xff] %v5508_v26  ;;  %vm848_vm0 = vcmp.eq.f32.partialorder %v5187_v4, %v5456_v21  ;;  %vm1127_vm1 = vcmp.lt.s32.totalorder %v1126_v22, %v899_v36  ;;  %v894_v29 = vsel %vm846_vm14, %v5308_v51, 2147483647  ;;  %v895_v56 = vsel %vm847_vm15, %v5310_v1, 2147483647  ;;  %9119 = vst [vmem:[#allocation65_spill] sm:$0xff] %v5533_v38 }
 0x2d9   : > { %v896_v39 = vsel %vm848_vm0, %v5430_v30, 2147483647  ;;  %v5526_v55 = vcvt.s32.f32 %v968_v15  ;;  %v5528_v23 = vsel %vm1127_vm1, %v1126_v22, %v899_v36  ;;  %vm1107_vm2 = vcmp.lt.s32.totalorder %v894_v29, %v895_v56 }
 0x2da   : > { %v5531_v18 = vadd.s32 %v716_v43, %v5306_v0  ;;  %v1130_v54 = vshra.s32 %v5528_v23, 16  ;;  %v1108_v4 = vsel %vm1107_vm2, %v894_v29, %v895_v56  ;;  %vm831_vm3 = vcmp.eq.f32.partialorder %v5243_v58, %v5515_v27  ;;  %v5550_v29 = vpop.xlane.xlu0 %807 }
 0x2db   : > { %vm832_vm4 = vcmp.eq.f32.partialorder %v5251_v62, %v5515_v27  ;;  %971 = vmin.xlane.f32.xlu1 %v5526_v55  ;;  %vm1109_vm5 = vcmp.lt.s32.totalorder %v1108_v4, %v896_v39  ;;  %vm833_vm6 = vcmp.eq.f32.partialorder %v5257_v11, %v5515_v27  ;;  %v879_v0 = vsel %vm831_vm3, %v5308_v51, 2147483647  ;;  %9120 = vst [vmem:[#allocation66_spill] sm:$0xff] %v5550_v29 }
 0x2dc   : > { %9118 = vst [vmem:[#allocation64_spill] sm:$0xff] %v5531_v18  ;;  %v880_v36 = vsel %vm832_vm4, %v5310_v1, 2147483647  ;;  %v5545_v43 = vcvt.s32.f32 %v1130_v54  ;;  %v5547_v15 = vsel %vm1109_vm5, %v1108_v4, %v896_v39  ;;  %v881_v22 = vsel %vm833_vm6, %v5479_v63, 2147483647 }
 0x2dd   : > { %vm1017_vm7 = vcmp.lt.s32.totalorder %v879_v0, %v880_v36  ;;  %v1112_v56 = vshra.s32 %v5547_v15, 16  ;;  %vm828_vm8 = vcmp.eq.f32.partialorder %v5211_v33, %v5496_v37  ;;  %vm829_vm9 = vcmp.eq.f32.partialorder %v5218_v41, %v5496_v37 }
 0x2de   : > { %v1018_v21 = vsel %vm1017_vm7, %v879_v0, %v880_v36  ;;  %1133 = vmin.xlane.f32.xlu0 %v5545_v43  ;;  %vm830_vm11 = vcmp.eq.f32.partialorder %v5230_v44, %v5496_v37  ;;  %v876_v54 = vsel %vm828_vm8, %v5308_v51, 2147483647  ;;  %v877_v11 = vsel %vm829_vm9, %v5310_v1, 2147483647  ;;  %v5567_v36 = vpop.xlane.xlu1 %779 }
 0x2df   : > { %vm1019_vm10 = vcmp.lt.s32.totalorder %v1018_v21, %v881_v22  ;;  %v5562_v39 = vcvt.s32.f32 %v1112_v56  ;;  %v878_v0 = vsel %vm830_vm11, %v5454_v61, 2147483647  ;;  %vm999_vm12 = vcmp.lt.s32.totalorder %v876_v54, %v877_v11  ;;  %9121 = vst [vmem:[#allocation67_spill] sm:$0xff] %v5567_v36 }
 0x2e0   : > { %v5564_v4 = vsel %vm1019_vm10, %v1018_v21, %v881_v22  ;;  %v1000_v63 = vsel %vm999_vm12, %v876_v54, %v877_v11  ;;  %vm855_vm13 = vcmp.eq.f32.partialorder %v5247_v60, %v5550_v29  ;;  %vm856_vm14 = vcmp.eq.f32.partialorder %v5255_v3, %v5550_v29 }
 0x2e1   : > { %v1022_v27 = vshra.s32 %v5564_v4, 16  ;;  %1115 = vmin.xlane.f32.xlu1 %v5562_v39  ;;  %vm1001_vm15 = vcmp.lt.s32.totalorder %v1000_v63, %v878_v0  ;;  %vm857_vm0 = vcmp.eq.f32.partialorder %v5280_v47, %v5550_v29  ;;  %v903_v44 = vsel %vm855_vm13, %v5308_v51, 2147483647 }
 0x2e2   : > { %v904_v21 = vsel %vm856_vm14, %v5310_v1, 2147483647  ;;  %v5581_v56 = vsel %vm1001_vm15, %v1000_v63, %v878_v0  ;;  %v905_v54 = vsel %vm857_vm0, %v5505_v14, 2147483647  ;;  %vm852_vm2 = vcmp.eq.f32.partialorder %v5222_v42, %v5533_v38 }
 0x2e3   : > { %v5579_v22 = vcvt.s32.f32 %v1022_v27  ;;  %vm1161_vm1 = vcmp.lt.s32.totalorder %v903_v44, %v904_v21  ;;  %v1004_v11 = vshra.s32 %v5581_v56, 16  ;;  %vm853_vm3 = vcmp.eq.f32.partialorder %v5226_v16, %v5533_v38 }
 0x2e4   : > { %v1162_v37 = vsel %vm1161_vm1, %v903_v44, %v904_v21  ;;  %vm854_vm5 = vcmp.eq.f32.partialorder %v5239_v57, %v5533_v38  ;;  %v900_v47 = vsel %vm852_vm2, %v5308_v51, 2147483647  ;;  %v901_v63 = vsel %vm853_vm3, %v5310_v1, 2147483647  ;;  %v5599_v21 = vpop.xlane.xlu1 %811 }
 0x2e5   : > { %1025 = vmin.xlane.f32.xlu0 %v5579_v22  ;;  %vm1163_vm4 = vcmp.lt.s32.totalorder %v1162_v37, %v905_v54  ;;  %v5594_v27 = vcvt.s32.f32 %v1004_v11  ;;  %v902_v44 = vsel %vm854_vm5, %v5482_v50, 2147483647  ;;  %vm1143_vm6 = vcmp.lt.s32.totalorder %v900_v47, %v901_v63  ;;  %9122 = vst [vmem:[#allocation68_spill] sm:$0xff] %v5599_v21  ;;  %v9123_v50 = vld [vmem:[#allocation32_spill] sm:$0xff] }
 0x2e6   : > { %v5596_v0 = vsel %vm1163_vm4, %v1162_v37, %v905_v54  ;;  %v1144_v14 = vsel %vm1143_vm6, %v900_v47, %v901_v63  ;;  %vm834_vm7 = vcmp.eq.f32.partialorder %v5263_v9, %v5567_v36  ;;  %vm835_vm8 = vcmp.eq.f32.partialorder %v5270_v40, %v5567_v36 }
 0x2e7   : > { %v1166_v29 = vshra.s32 %v5596_v0, 16  ;;  %1007 = vmin.xlane.f32.xlu1 %v5594_v27  ;;  %vm1145_vm9 = vcmp.lt.s32.totalorder %v1144_v14, %v902_v44  ;;  %vm836_vm10 = vcmp.eq.f32.partialorder %v5282_v49, %v5567_v36  ;;  %v882_v57 = vsel %vm834_vm7, %v5308_v51, 2147483647  ;;  %v9124_v49 = vld [vmem:[#allocation33_spill] sm:$0xff] }
 0x2e8   : > { %v883_v37 = vsel %vm835_vm8, %v5310_v1, 2147483647  ;;  %v5613_v11 = vsel %vm1145_vm9, %v1144_v14, %v902_v44  ;;  %v884_v47 = vsel %vm836_vm10, %v5508_v26, 2147483647  ;;  %vm858_vm12 = vcmp.eq.f32.partialorder %v5274_v46, %v5599_v21 }
 0x2e9   : > { %v5611_v54 = vcvt.s32.f32 %v1166_v29  ;;  %vm1035_vm11 = vcmp.lt.s32.totalorder %v882_v57, %v883_v37  ;;  %v1148_v63 = vshra.s32 %v5613_v11, 16  ;;  %vm859_vm13 = vcmp.eq.f32.partialorder %v9123_v50, %v5599_v21 }
 0x2ea   : > { %v1036_v38 = vsel %vm1035_vm11, %v882_v57, %v883_v37  ;;  %vm860_vm15 = vcmp.eq.f32.partialorder %v9124_v49, %v5599_v21  ;;  %v906_v14 = vsel %vm858_vm12, %v5308_v51, 2147483647  ;;  %v907_v29 = vsel %vm859_vm13, %v5310_v1, 2147483647 }
 0x2eb   : > { %1169 = vmin.xlane.f32.xlu0 %v5611_v54  ;;  %vm1037_vm14 = vcmp.lt.s32.totalorder %v1036_v38, %v884_v47  ;;  %v5626_v44 = vcvt.s32.f32 %v1148_v63  ;;  %v908_v57 = vsel %vm860_vm15, %v5531_v18, 2147483647  ;;  %vm1179_vm0 = vcmp.lt.s32.totalorder %v906_v14, %v907_v29 }
 0x2ec   : > { %v5628_v36 = vsel %vm1037_vm14, %v1036_v38, %v884_v47  ;;  %v1180_v26 = vsel %vm1179_vm0, %v906_v14, %v907_v29  ;;  %v913_v38 = vand.u32 65535, %v5347_v32  ;;  %v1057_v29 = vand.u32 65535, %v5381_v5 }
 0x2ed   : > { %v1040_v37 = vshra.s32 %v5628_v36, 16  ;;  %1151 = vmin.xlane.f32.xlu1 %v5626_v44  ;;  %vm1181_vm1 = vcmp.lt.s32.totalorder %v1180_v26, %v908_v57  ;;  %v931_v32 = vand.u32 65535, %v5434_v45 }
 0x2ee   : > { %v5633_v61 = vsel %vm1181_vm1, %v1180_v26, %v908_v57  ;;  %v915_v14 = vcvt.s32.f32 %v913_v38 }
 0x2ef   : > { %v5635_v49 = vcvt.s32.f32 %v1040_v37  ;;  %v1184_v21 = vshra.s32 %v5633_v61, 16  ;;  %v1059_v37 = vcvt.s32.f32 %v1057_v29  ;;  %v933_v29 = vcvt.s32.f32 %v931_v32 }
 0x2f1   : > { %1043 = vmin.xlane.f32.xlu1 %v5635_v49  ;;  %v5639_v63 = vcvt.s32.f32 %v1184_v21  ;;  %v949_v21 = vand.u32 65535, %v5410_v31 }
 0x2f3   : > { %v951_v5 = vcvt.s32.f32 %v949_v21 }
 0x2f5   : > { %1187 = vmin.xlane.f32.xlu1 %v5639_v63 }
 0x351   : > { %v5643_v47 = vpop.xlane.xlu0 %917 }
 0x352   : > { %vm919_vm2 = vcmp.eq.f32.partialorder %v5371_v10, %v5643_v47 }
 0x353   : > { %v920_v26 = vsel %vm919_vm2, %v915_v14, inf  ;;  %v1093_v14 = vand.u32 65535, %v5448_v12  ;;  %v985_v12 = vand.u32 65535, %v5485_v59 }
 0x354   : > { %921 = vmin.xlane.f32.xlu0 %v920_v26 }
 0x355   : > { %v5648_v57 = vpop.xlane.xlu0 %1061  ;;  %v987_v32 = vcvt.s32.f32 %v985_v12 }
 0x356   : > { %vm1063_vm3 = vcmp.eq.f32.partialorder %v5402_v28, %v5648_v57  ;;  %v1075_v28 = vand.u32 65535, %v5459_v7 }
 0x357   : > { %v1064_v18 = vsel %vm1063_vm3, %v1059_v37, inf }
 0x358   : > { %1065 = vmin.xlane.f32.xlu0 %v1064_v18  ;;  %v1095_v18 = vcvt.s32.f32 %v1093_v14 }
 0x359   : > { %v5654_v38 = vpop.xlane.xlu0 %953 }
 0x35a   : > { %vm955_vm4 = vcmp.eq.f32.partialorder %v5432_v24, %v5654_v38  ;;  %v1077_v24 = vcvt.s32.f32 %v1075_v28 }
 0x35b   : > { %v956_v10 = vsel %vm955_vm4, %v951_v5, inf  ;;  %v967_v5 = vand.u32 65535, %v5510_v8 }
 0x35c   : > { %v5659_v26 = vpop.xlane.xlu1 %935  ;;  %957 = vmin.xlane.f32.xlu0 %v956_v10 }
 0x35d   : > { %vm937_vm5 = vcmp.eq.f32.partialorder %v5446_v35, %v5659_v26  ;;  %v969_v14 = vcvt.s32.f32 %v967_v5 }
 0x35e   : > { %v938_v31 = vsel %vm937_vm5, %v933_v29, inf  ;;  %v1111_v29 = vand.u32 65535, %v5547_v15  ;;  %v1003_v15 = vand.u32 65535, %v5581_v56  ;;  %v1147_v56 = vand.u32 65535, %v5613_v11 }
 0x35f   : > { %939 = vmin.xlane.f32.xlu1 %v938_v31  ;;  %v1021_v31 = vand.u32 65535, %v5564_v4  ;;  %v1165_v4 = vand.u32 65535, %v5596_v0 }
 0x360   : > { %v5664_v45 = vpop.xlane.xlu0 %1097  ;;  %v5666_v37 = vpop.xlane.xlu1 %1079  ;;  %v1149_v0 = vcvt.s32.f32 %v1147_v56  ;;  %v9130_v56 = vld [vmem:[#allocation19_spill] sm:$0xff] }
 0x361   : > { %vm1099_vm6 = vcmp.eq.f32.partialorder %v5470_v13, %v5664_v45  ;;  %vm1081_vm7 = vcmp.eq.f32.partialorder %v5476_v34, %v5666_v37  ;;  %v1129_v13 = vand.u32 65535, %v5528_v23  ;;  %v1023_v12 = vcvt.s32.f32 %v1021_v31 }
 0x362   : > { %v1100_v21 = vsel %vm1099_vm6, %v1095_v18, inf  ;;  %v1082_v7 = vsel %vm1081_vm7, %v1077_v24, inf  ;;  %v1113_v18 = vcvt.s32.f32 %v1111_v29  ;;  %v1167_v5 = vcvt.s32.f32 %v1165_v4 }
 0x363   : > { %1101 = vmin.xlane.f32.xlu0 %v1100_v21  ;;  %1083 = vmin.xlane.f32.xlu1 %v1082_v7  ;;  %v1131_v8 = vcvt.s32.f32 %v1129_v13  ;;  %v1005_v7 = vcvt.s32.f32 %v1003_v15  ;;  %v1039_v13 = vand.u32 65535, %v5628_v36  ;;  %v960_v4 = vcvt.f32.s32 %v5654_v38 }
 0x364   : > { %v5673_v35 = vpop.xlane.xlu0 %989 }
 0x365   : > { %vm991_vm8 = vcmp.eq.f32.partialorder %v5502_v25, %v5673_v35 }
 0x366   : > { %v992_v10 = vsel %vm991_vm8, %v987_v32, inf }
 0x367   : > { %993 = vmin.xlane.f32.xlu0 %v992_v10 }
 0x368   : > { %v5679_v59 = vpop.xlane.xlu1 %971 }
 0x369   : > { %vm973_vm9 = vcmp.eq.f32.partialorder %v5526_v55, %v5679_v59 }
 0x36a   : > { %v974_v34 = vsel %vm973_vm9, %v969_v14, inf  ;;  %v1041_v14 = vcvt.s32.f32 %v1039_v13 }
 0x36b   : > { %975 = vmin.xlane.f32.xlu1 %v974_v34  ;;  %v5684_v28 = vpop.xlane.xlu0 %1133  ;;  %v1183_v34 = vand.u32 65535, %v5633_v61 }
 0x36c   : > { %vm1135_vm10 = vcmp.eq.f32.partialorder %v5545_v43, %v5684_v28 }
 0x36d   : > { %v1136_v25 = vsel %vm1135_vm10, %v1131_v8, inf  ;;  %v1185_v8 = vcvt.s32.f32 %v1183_v34 }
 0x36e   : > { %v5689_v23 = vpop.xlane.xlu1 %1115  ;;  %1137 = vmin.xlane.f32.xlu0 %v1136_v25 }
 0x36f   : > { %vm1117_vm11 = vcmp.eq.f32.partialorder %v5562_v39, %v5689_v23 }
 0x370   : > { %v1118_v55 = vsel %vm1117_vm11, %v1113_v18, inf  ;;  %v1068_v18 = vcvt.f32.s32 %v5648_v57 }
 0x371   : > { %1119 = vmin.xlane.f32.xlu1 %v1118_v55 }
 0x372   : > { %v5694_v24 = vpop.xlane.xlu0 %1025  ;;  %v1069_v15 = vshll.u32 %v1068_v18, 16 }
 0x373   : > { %vm1027_vm12 = vcmp.eq.f32.partialorder %v5579_v22, %v5694_v24 }
 0x374   : > { %v1028_v43 = vsel %vm1027_vm12, %v1023_v12, inf  ;;  %v5699_v21 = vpop.xlane.xlu1 %1007 }
 0x375   : > { %1029 = vmin.xlane.f32.xlu0 %v1028_v43  ;;  %vm1009_vm13 = vcmp.eq.f32.partialorder %v5594_v27, %v5699_v21 }
 0x376   : > { %v1010_v39 = vsel %vm1009_vm13, %v1005_v7, inf }
 0x377   : > { %1011 = vmin.xlane.f32.xlu1 %v1010_v39  ;;  %v9128_v39 = vld [vmem:[#allocation18_spill] sm:$0xff] }
 0x378   : > { %v5704_v32 = vpop.xlane.xlu0 %1169 }
 0x379   : > { %vm1171_vm14 = vcmp.eq.f32.partialorder %v5611_v54, %v5704_v32 }
 0x37a   : > { %v1172_v22 = vsel %vm1171_vm14, %v1167_v5, inf  ;;  %v5708_v10 = vpop.xlane.xlu1 %1151  ;;  %v9131_v5 = vld [vmem:[#allocation21_spill] sm:$0xff] }
 0x37b   : > { %1173 = vmin.xlane.f32.xlu0 %v1172_v22  ;;  %vm1153_vm15 = vcmp.eq.f32.partialorder %v5626_v44, %v5708_v10  ;;  %v924_v44 = vcvt.f32.s32 %v5643_v47  ;;  %v9129_v47 = vld [vmem:[#allocation34_spill] sm:$0xff] }
 0x37c   : > { %v1154_v27 = vsel %vm1153_vm15, %v1149_v0, inf  ;;  %v942_v0 = vcvt.f32.s32 %v5659_v26 }
 0x37d   : > { %1155 = vmin.xlane.f32.xlu1 %v1154_v27  ;;  %v925_v31 = vshll.u32 %v924_v44, 16 }
 0x37e   : > { %v5713_v11 = vpop.xlane.xlu1 %1043 }
 0x37f   : > { %vm1045_vm0 = vcmp.eq.f32.partialorder %v5635_v49, %v5713_v11 }
 0x380   : > { %v1046_v54 = vsel %vm1045_vm0, %v1041_v14, inf  ;;  %v961_v14 = vshll.u32 %v960_v4, 16 }
 0x381   : > { %1047 = vmin.xlane.f32.xlu1 %v1046_v54  ;;  %v9133_v54 = vld [vmem:[#allocation23_spill] sm:$0xff] }
 0x382   : > { %v5718_v29 = vpop.xlane.xlu1 %1187 }
 0x383   : > { %vm1189_vm1 = vcmp.eq.f32.partialorder %v5639_v63, %v5718_v29  ;;  %v9127_v63 = vld [vmem:[#allocation17_spill] sm:$0xff] }
 0x384   : > { %v1190_v36 = vsel %vm1189_vm1, %v1185_v8, inf }
 0x385   : > { %1191 = vmin.xlane.f32.xlu1 %v1190_v36  ;;  %v1104_v36 = vcvt.f32.s32 %v5664_v45  ;;  %v1086_v45 = vcvt.f32.s32 %v5666_v37 }
 0x3e1   : > { %v922_v25 = vpop.xlane.xlu0 %921 }
 0x3e2   : > { %v923_v61 = vcvt.f32.s32 %v922_v25 }
 0x3e4   : > { %v5724_v55 = vadd.s32 %v925_v31, %v923_v61  ;;  %v9136_v31 = vld [vmem:[#allocation20_spill] sm:$0xff]  ;;  %v9138_v61 = vld [vmem:[#allocation22_spill] sm:$0xff] }
 0x3e5   : > { %v1066_v49 = vpop.xlane.xlu0 %1065 }
 0x3e6   : > { %9125 = vst [vmem:[#allocation32_spill] sm:$0xff] %v5724_v55  ;;  %v1197_v12 = vshra.s32 %v5724_v55, 16  ;;  %v1067_v43 = vcvt.f32.s32 %v1066_v49 }
 0x3e8   : > { %v5728_v7 = vadd.s32 %v1069_v15, %v1067_v43  ;;  %vm1229_vm2 = vcmp.eq.s32.totalorder %v9127_v63, %v1197_v12  ;;  %vm1230_vm3 = vcmp.eq.s32.totalorder %v9128_v39, %v1197_v12  ;;  %vm1231_vm4 = vcmp.eq.s32.totalorder %v9129_v47, %v1197_v12 }
 0x3e9   : > { %v5734_v57 = vsel %vm1229_vm2, -inf, %v9130_v56  ;;  %v5737_v22 = vsel %vm1230_vm3, -inf, %v9131_v5  ;;  %v958_v27 = vpop.xlane.xlu0 %957  ;;  %v5744_v8 = vsel %vm1231_vm4, -inf, %v9133_v54  ;;  %v943_v15 = vshll.u32 %v942_v0, 16  ;;  %v4384_v56 = vld [vmem:[#allocation3 + $0x40] sm:$0xff] }
 0x3ea   : > { %9126 = vst [vmem:[#allocation33_spill] sm:$0xff] %v5728_v7  ;;  %9132 = vst [vmem:[#allocation18_spill] sm:$0xff] %v5737_v22  ;;  %v1205_v13 = vshra.s32 %v5728_v7, 16  ;;  %v1358_v38 = vmax.f32 %v5734_v57, %v5737_v22  ;;  %v959_v34 = vcvt.f32.s32 %v958_v27  ;;  %v996_v0 = vcvt.f32.s32 %v5673_v35 }
 0x3eb   : > { %9134 = vst [vmem:[#allocation34_spill] sm:$0xff] %v5744_v8  ;;  %v1087_v54 = vshll.u32 %v1086_v45, 16 }
 0x3ec   : > { %v1359_v44 = vmax.f32 %v1358_v38, %v5744_v8  ;;  %vm1253_vm5 = vcmp.eq.s32.totalorder %v9127_v63, %v1205_v13  ;;  %vm1254_vm6 = vcmp.eq.s32.totalorder %v9128_v39, %v1205_v13  ;;  %v5750_v26 = vadd.s32 %v961_v14, %v959_v34  ;;  %v940_v25 = vpop.xlane.xlu1 %939 }
 0x3ed   : > { %vm1255_vm7 = vcmp.eq.s32.totalorder %v9129_v47, %v1205_v13  ;;  %v5754_v18 = vsel %vm1253_vm5, -inf, %v9136_v31  ;;  %v5757_v49 = vsel %vm1254_vm6, -inf, %v9138_v61  ;;  %v941_v12 = vcvt.f32.s32 %v940_v25 }
 0x3ee   : > { %9135 = vst [vmem:[#allocation19_spill] sm:$0xff] %v5750_v26  ;;  %9137 = vst [vmem:[#allocation21_spill] sm:$0xff] %v5754_v18  ;;  %1360 = vmax.xlane.f32.xlu0 %v1359_v44  ;;  %v1390_v43 = vmax.f32 %v5754_v18, %v5757_v49  ;;  %v1199_v4 = vshra.s32 %v5750_v26, 16  ;;  %v5763_v5 = vsel %vm1255_vm7, -inf, %v4384_v56  ;;  %v1105_v13 = vshll.u32 %v1104_v36, 16  ;;  %v4385_v56 = vld [vmem:[#allocation3 + $0x10] sm:$0xff] }
 0x3ef   : > { %9139 = vst [vmem:[#allocation23_spill] sm:$0xff] %v5757_v49  ;;  %v5765_v27 = vadd.s32 %v943_v15, %v941_v12  ;;  %v978_v36 = vcvt.f32.s32 %v5679_v59  ;;  %v1140_v15 = vcvt.f32.s32 %v5684_v28 }
 0x3f0   : > { %v1102_v38 = vpop.xlane.xlu0 %1101  ;;  %v1391_v14 = vmax.f32 %v1390_v43, %v5763_v5  ;;  %v1084_v37 = vpop.xlane.xlu1 %1083  ;;  %vm1235_vm8 = vcmp.eq.s32.totalorder %v9127_v63, %v1199_v4  ;;  %vm1236_vm9 = vcmp.eq.s32.totalorder %v9128_v39, %v1199_v4  ;;  %vm1237_vm10 = vcmp.eq.s32.totalorder %v9129_v47, %v1199_v4 }
 0x3f1   : > { %9140 = vst [vmem:[#allocation20_spill] sm:$0xff] %v5765_v27  ;;  %v1103_v34 = vcvt.f32.s32 %v1102_v38  ;;  %v1198_v44 = vshra.s32 %v5765_v27, 16  ;;  %v1085_v25 = vcvt.f32.s32 %v1084_v37  ;;  %v5777_v61 = vsel %vm1235_vm8, -inf, %v5137_v17  ;;  %v9147_v37 = vld [vmem:[#allocation27_spill] sm:$0xff]  ;;  %v9157_v27 = vld [vmem:[#allocation25_spill] sm:$0xff] }
 0x3f2   : > { %1392 = vmax.xlane.f32.xlu0 %v1391_v14  ;;  %v5780_v35 = vsel %vm1236_vm9, -inf, %v5145_v20  ;;  %v997_v43 = vshll.u32 %v996_v0, 16  ;;  %v979_v38 = vshll.u32 %v978_v36, 16  ;;  %v1122_v14 = vcvt.f32.s32 %v5689_v23  ;;  %v9150_v23 = vld [vmem:[#allocation28_spill] sm:$0xff] }
 0x3f3   : > { %v5774_v31 = vadd.s32 %v1105_v13, %v1103_v34  ;;  %9142 = vst [vmem:[#allocation69_spill] sm:$0xff] %v5780_v35  ;;  %v5783_v12 = vadd.s32 %v1087_v54, %v1085_v25  ;;  %v1366_v45 = vmax.f32 %v5777_v61, %v5780_v35  ;;  %vm1232_vm11 = vcmp.eq.s32.totalorder %v9127_v63, %v1198_v44  ;;  %v9145_v34 = vld [vmem:[#allocation26_spill] sm:$0xff] }
 0x3f4   : > { %v994_v4 = vpop.xlane.xlu0 %993  ;;  %v5789_v13 = vsel %vm1237_vm10, -inf, %v4385_v56  ;;  %vm1233_vm12 = vcmp.eq.s32.totalorder %v9128_v39, %v1198_v44  ;;  %vm1234_vm13 = vcmp.eq.s32.totalorder %v9129_v47, %v1198_v44  ;;  %v5797_v0 = vsel %vm1232_vm11, -inf, %v9145_v34  ;;  %v4386_v44 = vld [vmem:[#allocation3 + $0x8] sm:$0xff] }
 0x3f5   : > { %9141 = vst [vmem:[#allocation22_spill] sm:$0xff] %v5774_v31  ;;  %9143 = vst [vmem:[#allocation70_spill] sm:$0xff] %v5783_v12  ;;  %v1207_v59 = vshra.s32 %v5774_v31, 16  ;;  %v1206_v17 = vshra.s32 %v5783_v12, 16  ;;  %v995_v20 = vcvt.f32.s32 %v994_v4  ;;  %v1367_v28 = vmax.f32 %v1366_v45, %v5789_v13 }
 0x3f6   : > { %9144 = vst [vmem:[#allocation71_spill] sm:$0xff] %v5789_v13  ;;  %9146 = vst [vmem:[#allocation26_spill] sm:$0xff] %v5797_v0  ;;  %v5800_v54 = vsel %vm1233_vm12, -inf, %v9147_v37  ;;  %v1141_v25 = vshll.u32 %v1140_v15, 16  ;;  %v5807_v36 = vsel %vm1234_vm13, -inf, %v4386_v44  ;;  %v9152_v37 = vld [vmem:[#allocation29_spill] sm:$0xff]  ;;  %v1032_v44 = vcvt.f32.s32 %v5694_v24 }
 0x3f7   : > { %v5802_v56 = vadd.s32 %v997_v43, %v995_v20  ;;  %1368 = vmax.xlane.f32.xlu0 %v1367_v28  ;;  %v1362_v4 = vmax.f32 %v5797_v0, %v5800_v54  ;;  %vm1259_vm14 = vcmp.eq.s32.totalorder %v9127_v63, %v1207_v59  ;;  %9149 = vst [vmem:[#allocation72_spill] sm:$0xff] %v5807_v36  ;;  %v1123_v28 = vshll.u32 %v1122_v14, 16  ;;  %v4387_v14 = vld [vmem:[#allocation3 + $0x50] sm:$0xff] }
 0x3f8   : > { %v976_v45 = vpop.xlane.xlu1 %975  ;;  %vm1260_vm15 = vcmp.eq.s32.totalorder %v9128_v39, %v1207_v59  ;;  %v5811_v34 = vsel %vm1259_vm14, -inf, %v9150_v23  ;;  %vm1256_vm0 = vcmp.eq.s32.totalorder %v9127_v63, %v1206_v17  ;;  %vm1261_vm1 = vcmp.eq.s32.totalorder %v9129_v47, %v1207_v59 }
 0x3f9   : > { %9148 = vst [vmem:[#allocation27_spill] sm:$0xff] %v5802_v56  ;;  %9151 = vst [vmem:[#allocation28_spill] sm:$0xff] %v5811_v34  ;;  %v1201_v15 = vshra.s32 %v5802_v56, 16  ;;  %v977_v43 = vcvt.f32.s32 %v976_v45  ;;  %v1363_v20 = vmax.f32 %v1362_v4, %v5807_v36  ;;  %v5818_v12 = vsel %vm1260_vm15, -inf, %v9152_v37  ;;  %v9155_v4 = vld [vmem:[#allocation24_spill] sm:$0xff] }
 0x3fa   : > { %9153 = vst [vmem:[#allocation29_spill] sm:$0xff] %v5818_v12  ;;  %vm1257_vm2 = vcmp.eq.s32.totalorder %v9128_v39, %v1206_v17  ;;  %vm1258_vm3 = vcmp.eq.s32.totalorder %v9129_v47, %v1206_v17  ;;  %v1398_v45 = vmax.f32 %v5811_v34, %v5818_v12  ;;  %v5828_v56 = vsel %vm1256_vm0, -inf, %v9155_v4 }
 0x3fb   : > { %v5823_v23 = vadd.s32 %v979_v38, %v977_v43  ;;  %v1138_v31 = vpop.xlane.xlu0 %1137  ;;  %1364 = vmax.xlane.f32.xlu1 %v1363_v20  ;;  %v5830_v37 = vsel %vm1261_vm1, -inf, %v4387_v14  ;;  %v5833_v26 = vsel %vm1257_vm2, -inf, %v9157_v27  ;;  %vm1241_vm4 = vcmp.eq.s32.totalorder %v9127_v63, %v1201_v15  ;;  %v4388_v38 = vld [vmem:[#allocation3 + $0x48] sm:$0xff] }
 0x3fc   : > { %v1139_v59 = vcvt.f32.s32 %v1138_v31  ;;  %9156 = vst [vmem:[#allocation24_spill] sm:$0xff] %v5830_v37  ;;  %v1399_v17 = vmax.f32 %v1398_v45, %v5830_v37  ;;  %v5838_v43 = vsel %vm1258_vm3, -inf, %v4388_v38  ;;  %v1394_v20 = vmax.f32 %v5828_v56, %v5833_v26 }
 0x3fd   : > { %9154 = vst [vmem:[#allocation73_spill] sm:$0xff] %v5823_v23  ;;  %v1200_v24 = vshra.s32 %v5823_v23, 16  ;;  %9158 = vst [vmem:[#allocation25_spill] sm:$0xff] %v5838_v43  ;;  %vm1242_vm5 = vcmp.eq.s32.totalorder %v9128_v39, %v1201_v15  ;;  %vm1243_vm6 = vcmp.eq.s32.totalorder %v9129_v47, %v1201_v15  ;;  %v5847_v27 = vsel %vm1241_vm4, -inf, %v5191_v6  ;;  %v4389_v6 = vld [vmem:[#allocation3 + $0x20] sm:$0xff] }
 0x3fe   : > { %v5842_v4 = vadd.s32 %v1141_v25, %v1139_v59  ;;  %v1120_v31 = vpop.xlane.xlu1 %1119  ;;  %9160 = vst [vmem:[#allocation75_spill] sm:$0xff] %v5847_v27  ;;  %v1014_v14 = vcvt.f32.s32 %v5699_v21  ;;  %1400 = vmax.xlane.f32.xlu0 %v1399_v17  ;;  %v1395_v45 = vmax.f32 %v1394_v20, %v5838_v43  ;;  %v5852_v38 = vsel %vm1242_vm5, -inf, %v5199_v19 }
 0x3ff   : > { %v1121_v23 = vcvt.f32.s32 %v1120_v31  ;;  %9161 = vst [vmem:[#allocation76_spill] sm:$0xff] %v5852_v38  ;;  %v1033_v7 = vshll.u32 %v1032_v44, 16  ;;  %v1374_v59 = vmax.f32 %v5847_v27, %v5852_v38  ;;  %v5859_v30 = vsel %vm1243_vm6, -inf, %v4389_v6 }
 0x400   : > { %9159 = vst [vmem:[#allocation74_spill] sm:$0xff] %v5842_v4  ;;  %v1209_v25 = vshra.s32 %v5842_v4, 16  ;;  %1396 = vmax.xlane.f32.xlu1 %v1395_v45  ;;  %vm1238_vm7 = vcmp.eq.s32.totalorder %v9127_v63, %v1200_v24  ;;  %vm1239_vm8 = vcmp.eq.s32.totalorder %v9128_v39, %v1200_v24  ;;  %vm1240_vm9 = vcmp.eq.s32.totalorder %v9129_v47, %v1200_v24  ;;  %v4390_v24 = vld [vmem:[#allocation3 + $0x18] sm:$0xff] }
 0x401   : > { %v5857_v55 = vadd.s32 %v1123_v28, %v1121_v23  ;;  %v1375_v19 = vmax.f32 %v1374_v59, %v5859_v30  ;;  %v5866_v44 = vsel %vm1238_vm7, -inf, %v5159_v48  ;;  %v1015_v17 = vshll.u32 %v1014_v14, 16 }
 0x402   : > { %v1030_v15 = vpop.xlane.xlu0 %1029  ;;  %v1176_v28 = vcvt.f32.s32 %v5704_v32  ;;  %v5871_v20 = vsel %vm1239_vm8, -inf, %v5165_v52  ;;  %vm1265_vm10 = vcmp.eq.s32.totalorder %v9127_v63, %v1209_v25  ;;  %vm1266_vm11 = vcmp.eq.s32.totalorder %v9128_v39, %v1209_v25 }
 0x403   : > { %9162 = vst [vmem:[#allocation77_spill] sm:$0xff] %v5857_v55  ;;  %v1031_v21 = vcvt.f32.s32 %v1030_v15  ;;  %v1208_v23 = vshra.s32 %v5857_v55, 16  ;;  %9163 = vst [vmem:[#allocation78_spill] sm:$0xff] %v5871_v20  ;;  %1376 = vmax.xlane.f32.xlu0 %v1375_v19  ;;  %v1370_v59 = vmax.f32 %v5866_v44, %v5871_v20  ;;  %v5879_v14 = vsel %vm1240_vm9, -inf, %v4390_v24  ;;  %v9166_v15 = vld [vmem:[#allocation31_spill] sm:$0xff]  ;;  %v4391_v55 = vld [vmem:[#allocation3 + $0x60] sm:$0xff] }
 0x404   : > { %v1012_v45 = vpop.xlane.xlu1 %1011  ;;  %vm1267_vm12 = vcmp.eq.s32.totalorder %v9129_v47, %v1209_v25  ;;  %v5883_v52 = vsel %vm1265_vm10, -inf, %v5195_v2  ;;  %v5888_v6 = vsel %vm1266_vm11, -inf, %v9166_v15  ;;  %v1177_v25 = vshll.u32 %v1176_v28, 16 }
 0x405   : > { %v5873_v31 = vadd.s32 %v1033_v7, %v1031_v21  ;;  %v1013_v48 = vcvt.f32.s32 %v1012_v45  ;;  %9165 = vst [vmem:[#allocation80_spill] sm:$0xff] %v5883_v52  ;;  %v1371_v7 = vmax.f32 %v1370_v59, %v5879_v14  ;;  %9167 = vst [vmem:[#allocation31_spill] sm:$0xff] %v5888_v6  ;;  %v1158_v21 = vcvt.f32.s32 %v5708_v10 }
 0x406   : > { %v1406_v24 = vmax.f32 %v5883_v52, %v5888_v6  ;;  %vm1262_vm13 = vcmp.eq.s32.totalorder %v9127_v63, %v1208_v23  ;;  %vm1263_vm14 = vcmp.eq.s32.totalorder %v9128_v39, %v1208_v23  ;;  %v1050_v59 = vcvt.f32.s32 %v5713_v11 }
 0x407   : > { %9164 = vst [vmem:[#allocation79_spill] sm:$0xff] %v5873_v31  ;;  %v1203_v32 = vshra.s32 %v5873_v31, 16  ;;  %v5891_v19 = vadd.s32 %v1015_v17, %v1013_v48  ;;  %1372 = vmax.xlane.f32.xlu1 %v1371_v7  ;;  %v5896_v31 = vsel %vm1267_vm12, -inf, %v4391_v55  ;;  %vm1264_vm15 = vcmp.eq.s32.totalorder %v9129_v47, %v1208_v23  ;;  %v9171_v7 = vld [vmem:[#allocation30_spill] sm:$0xff]  ;;  %v4392_v23 = vld [vmem:[#allocation3 + $0x58] sm:$0xff] }
 0x408   : > { %v1174_v45 = vpop.xlane.xlu0 %1173  ;;  %v1407_v10 = vmax.f32 %v1406_v24, %v5896_v31  ;;  %v5903_v17 = vsel %vm1262_vm13, -inf, %v5169_v53  ;;  %v1159_v55 = vshll.u32 %v1158_v21, 16  ;;  %v1194_v53 = vcvt.f32.s32 %v5718_v29 }
 0x409   : > { %9168 = vst [vmem:[#allocation81_spill] sm:$0xff] %v5891_v19  ;;  %v1175_v2 = vcvt.f32.s32 %v1174_v45  ;;  %9169 = vst [vmem:[#allocation82_spill] sm:$0xff] %v5903_v17  ;;  %v1202_v48 = vshra.s32 %v5891_v19, 16  ;;  %v5909_v45 = vsel %vm1263_vm14, -inf, %v9171_v7  ;;  %vm1247_vm0 = vcmp.eq.s32.totalorder %v9127_v63, %v1203_v32 }
 0x40a   : > { %v1156_v28 = vpop.xlane.xlu1 %1155  ;;  %9172 = vst [vmem:[#allocation30_spill] sm:$0xff] %v5909_v45  ;;  %1408 = vmax.xlane.f32.xlu0 %v1407_v10  ;;  %v1402_v11 = vmax.f32 %v5903_v17, %v5909_v45  ;;  %vm1248_vm1 = vcmp.eq.s32.totalorder %v9128_v39, %v1203_v32  ;;  %v5916_v24 = vsel %vm1264_vm15, -inf, %v4392_v23  ;;  %vm1249_vm2 = vcmp.eq.s32.totalorder %v9129_v47, %v1203_v32 }
 0x40b   : > { %v5906_v15 = vadd.s32 %v1177_v25, %v1175_v2  ;;  %v1157_v4 = vcvt.f32.s32 %v1156_v28  ;;  %v5920_v25 = vsel %vm1247_vm0, -inf, %v5243_v58  ;;  %v5927_v28 = vsel %vm1248_vm1, -inf, %v5251_v62 }
 0x40c   : > { %9173 = vst [vmem:[#allocation84_spill] sm:$0xff] %v5920_v25  ;;  %v1403_v10 = vmax.f32 %v1402_v11, %v5916_v24  ;;  %9174 = vst [vmem:[#allocation85_spill] sm:$0xff] %v5927_v28  ;;  %v1051_v7 = vshll.u32 %v1050_v59, 16  ;;  %v1382_v29 = vmax.f32 %v5920_v25, %v5927_v28  ;;  %vm1244_vm3 = vcmp.eq.s32.totalorder %v9127_v63, %v1202_v48 }
 0x40d   : > { %9170 = vst [vmem:[#allocation83_spill] sm:$0xff] %v5906_v15  ;;  %v1211_v2 = vshra.s32 %v5906_v15, 16  ;;  %v5923_v21 = vadd.s32 %v1159_v55, %v1157_v4  ;;  %vm1245_vm4 = vcmp.eq.s32.totalorder %v9128_v39, %v1202_v48  ;;  %v4393_v4 = vld [vmem:[#allocation3 + $0x30] sm:$0xff]  ;;  %vm1246_vm5 = vcmp.eq.s32.totalorder %v9129_v47, %v1202_v48 }
 0x40e   : > { %v1048_v19 = vpop.xlane.xlu1 %1047  ;;  %1404 = vmax.xlane.f32.xlu1 %v1403_v10  ;;  %v5934_v55 = vsel %vm1249_vm2, -inf, %v4393_v4  ;;  %v5939_v59 = vsel %vm1244_vm3, -inf, %v5211_v33  ;;  %v5942_v11 = vsel %vm1245_vm4, -inf, %v5218_v41  ;;  %v1195_v23 = vshll.u32 %v1194_v53, 16  ;;  %v4394_v4 = vld [vmem:[#allocation3 + $0x28] sm:$0xff] }
 0x40f   : > { %v1210_v58 = vshra.s32 %v5923_v21, 16  ;;  %v1049_v32 = vcvt.f32.s32 %v1048_v19  ;;  %v1383_v62 = vmax.f32 %v1382_v29, %v5934_v55  ;;  %9175 = vst [vmem:[#allocation86_spill] sm:$0xff] %v5939_v59  ;;  %9176 = vst [vmem:[#allocation87_spill] sm:$0xff] %v5942_v11  ;;  %v1378_v19 = vmax.f32 %v5939_v59, %v5942_v11 }
 0x410   : > { %vm1271_vm6 = vcmp.eq.s32.totalorder %v9127_v63, %v1211_v2  ;;  %v5949_v48 = vsel %vm1246_vm5, -inf, %v4394_v4  ;;  %vm1272_vm7 = vcmp.eq.s32.totalorder %v9128_v39, %v1211_v2  ;;  %vm1273_vm9 = vcmp.eq.s32.totalorder %v9129_v47, %v1211_v2  ;;  %v4396_v4 = vld [vmem:[#allocation3 + $0x68] sm:$0xff] }
 0x411   : > { %v5944_v15 = vadd.s32 %v1051_v7, %v1049_v32  ;;  %1384 = vmax.xlane.f32.xlu0 %v1383_v62  ;;  %v5953_v33 = vsel %vm1271_vm6, -inf, %v5247_v60  ;;  %vm1268_vm8 = vcmp.eq.s32.totalorder %v9127_v63, %v1210_v58  ;;  %v1379_v7 = vmax.f32 %v1378_v19, %v5949_v48 }
 0x412   : > { %v1192_v10 = vpop.xlane.xlu1 %1191  ;;  %9177 = vst [vmem:[#allocation88_spill] sm:$0xff] %v5953_v33  ;;  %v5960_v29 = vsel %vm1272_vm7, -inf, %v5255_v3  ;;  %vm1269_vm10 = vcmp.eq.s32.totalorder %v9128_v39, %v1210_v58  ;;  %vm1270_vm11 = vcmp.eq.s32.totalorder %v9129_v47, %v1210_v58  ;;  %v5969_v62 = vsel %vm1268_vm8, -inf, %v5222_v42 }
 0x413   : > { %v1204_v41 = vshra.s32 %v5944_v15, 16  ;;  %v1193_v53 = vcvt.f32.s32 %v1192_v10  ;;  %9178 = vst [vmem:[#allocation89_spill] sm:$0xff] %v5960_v29  ;;  %1380 = vmax.xlane.f32.xlu1 %v1379_v7  ;;  %v1414_v60 = vmax.f32 %v5953_v33, %v5960_v29  ;;  %9180 = vst [vmem:[#allocation91_spill] sm:$0xff] %v5969_v62  ;;  %v4395_v10 = vld [vmem:[#allocation3 + $0x70] sm:$0xff]  ;;  %v5974_v2 = vsel %vm1269_vm10, -inf, %v5226_v16 }
 0x414   : > { %v5971_v19 = vsel %vm1273_vm9, -inf, %v4395_v10  ;;  %v1410_v58 = vmax.f32 %v5969_v62, %v5974_v2  ;;  %v5982_v42 = vsel %vm1270_vm11, -inf, %v4396_v4  ;;  %v4397_v10 = vld [vmem:[#allocation3 + $0x38] sm:$0xff] }
 0x415   : > { %v5963_v32 = vadd.s32 %v1195_v23, %v1193_v53  ;;  %9181 = vst [vmem:[#allocation92_spill] sm:$0xff] %v5971_v19  ;;  %vm1250_vm12 = vcmp.eq.s32.totalorder %v9127_v63, %v1204_v41  ;;  %vm1251_vm13 = vcmp.eq.s32.totalorder %v9128_v39, %v1204_v41  ;;  %v1415_v23 = vmax.f32 %v1414_v60, %v5971_v19 }
 0x416   : > { %vm1252_vm14 = vcmp.eq.s32.totalorder %v9129_v47, %v1204_v41  ;;  %v5986_v53 = vsel %vm1250_vm12, -inf, %v5263_v9  ;;  %v5989_v16 = vsel %vm1251_vm13, -inf, %v5270_v40  ;;  %v1411_v7 = vmax.f32 %v1410_v58, %v5982_v42  ;;  %v4398_v58 = vld [vmem:[#allocation3 + $0x78] sm:$0xff] }
 0x417   : > { %9179 = vst [vmem:[#allocation90_spill] sm:$0xff] %v5963_v32  ;;  %v1212_v3 = vshra.s32 %v5963_v32, 16  ;;  %9182 = vst [vmem:[#allocation93_spill] sm:$0xff] %v5986_v53  ;;  %1416 = vmax.xlane.f32.xlu0 %v1415_v23  ;;  %v1386_v60 = vmax.f32 %v5986_v53, %v5989_v16  ;;  %v5994_v32 = vsel %vm1252_vm14, -inf, %v4397_v10 }
 0x418   : > { %9183 = vst [vmem:[#allocation94_spill] sm:$0xff] %v5989_v16  ;;  %1412 = vmax.xlane.f32.xlu1 %v1411_v7 }
 0x419   : > { %vm1274_vm15 = vcmp.eq.s32.totalorder %v9127_v63, %v1212_v3  ;;  %vm1275_vm0 = vcmp.eq.s32.totalorder %v9128_v39, %v1212_v3  ;;  %v1387_v9 = vmax.f32 %v1386_v60, %v5994_v32  ;;  %vm1276_vm1 = vcmp.eq.s32.totalorder %v9129_v47, %v1212_v3  ;;  %v9188_v60 = vld [vmem:[#allocation38_spill] sm:$0xff] }
 0x41a   : > { %v6001_v40 = vsel %vm1274_vm15, -inf, %v5274_v46  ;;  %v6004_v41 = vsel %vm1275_vm0, -inf, %v9123_v50  ;;  %v6008_v4 = vsel %vm1276_vm1, -inf, %v4398_v58 }
 0x41b   : > { %9184 = vst [vmem:[#allocation95_spill] sm:$0xff] %v6001_v40  ;;  %9185 = vst [vmem:[#allocation96_spill] sm:$0xff] %v6004_v41  ;;  %v1418_v23 = vmax.f32 %v6001_v40, %v6004_v41 }
 0x41c   : > { %1388 = vmax.xlane.f32.xlu1 %v1387_v9 }
 0x41d   : > { %v1419_v10 = vmax.f32 %v1418_v23, %v6008_v4 }
 0x420   : > { %1420 = vmax.xlane.f32.xlu1 %v1419_v10 }
 0x47b   : > { %v6011_v7 = vpop.xlane.xlu0 %1360 }
 0x47c   : > { %9186 = vst [vmem:[#allocation97_spill] sm:$0xff] %v6011_v7  ;;  %vm1422_vm2 = vcmp.eq.f32.partialorder %v5734_v57, %v6011_v7  ;;  %vm1423_vm3 = vcmp.eq.f32.partialorder %v5737_v22, %v6011_v7  ;;  %vm1424_vm4 = vcmp.eq.f32.partialorder %v5744_v8, %v6011_v7 }
 0x47d   : > { %v1470_v46 = vsel %vm1422_vm2, %v5308_v51, 2147483647  ;;  %v1471_v50 = vsel %vm1423_vm3, %v5310_v1, 2147483647  ;;  %v1472_v9 = vsel %vm1424_vm4, %v9188_v60, 2147483647 }
 0x47e   : > { %vm1518_vm5 = vcmp.lt.s32.totalorder %v1470_v46, %v1471_v50 }
 0x47f   : > { %v6021_v3 = vpop.xlane.xlu0 %1392  ;;  %v1519_v23 = vsel %vm1518_vm5, %v1470_v46, %v1471_v50  ;;  %v9189_v46 = vld [vmem:[#allocation40_spill] sm:$0xff] }
 0x480   : > { %9187 = vst [vmem:[#allocation98_spill] sm:$0xff] %v6021_v3  ;;  %vm1520_vm6 = vcmp.lt.s32.totalorder %v1519_v23, %v1472_v9  ;;  %vm1446_vm7 = vcmp.eq.f32.partialorder %v5754_v18, %v6021_v3  ;;  %vm1447_vm8 = vcmp.eq.f32.partialorder %v5757_v49, %v6021_v3  ;;  %vm1448_vm9 = vcmp.eq.f32.partialorder %v5763_v5, %v6021_v3 }
 0x481   : > { %v6030_v58 = vsel %vm1520_vm6, %v1519_v23, %v1472_v9  ;;  %v1494_v10 = vsel %vm1446_vm7, %v5308_v51, 2147483647  ;;  %v1495_v7 = vsel %vm1447_vm8, %v5310_v1, 2147483647  ;;  %v1496_v50 = vsel %vm1448_vm9, %v9189_v46, 2147483647 }
 0x482   : > { %v1523_v8 = vshra.s32 %v6030_v58, 16  ;;  %vm1662_vm10 = vcmp.lt.s32.totalorder %v1494_v10, %v1495_v7 }
 0x483   : > { %v1663_v60 = vsel %vm1662_vm10, %v1494_v10, %v1495_v7  ;;  %v9192_v10 = vld [vmem:[#allocation44_spill] sm:$0xff] }
 0x484   : > { %v6036_v22 = vcvt.s32.f32 %v1523_v8  ;;  %vm1664_vm11 = vcmp.lt.s32.totalorder %v1663_v60, %v1496_v50  ;;  %v6038_v18 = vpop.xlane.xlu0 %1368 }
 0x485   : > { %9190 = vst [vmem:[#allocation99_spill] sm:$0xff] %v6038_v18  ;;  %v6040_v49 = vsel %vm1664_vm11, %v1663_v60, %v1496_v50  ;;  %vm1428_vm12 = vcmp.eq.f32.partialorder %v5777_v61, %v6038_v18  ;;  %vm1429_vm13 = vcmp.eq.f32.partialorder %v5780_v35, %v6038_v18  ;;  %vm1430_vm14 = vcmp.eq.f32.partialorder %v5789_v13, %v6038_v18 }
 0x486   : > { %1526 = vmin.xlane.f32.xlu0 %v6036_v22  ;;  %v1667_v9 = vshra.s32 %v6040_v49, 16  ;;  %v1476_v8 = vsel %vm1428_vm12, %v5308_v51, 2147483647  ;;  %v1477_v7 = vsel %vm1429_vm13, %v5310_v1, 2147483647 }
 0x487   : > { %vm1554_vm15 = vcmp.lt.s32.totalorder %v1476_v8, %v1477_v7  ;;  %v1478_v50 = vsel %vm1430_vm14, %v9192_v10, 2147483647  ;;  %v9194_v10 = vld [vmem:[#allocation43_spill] sm:$0xff] }
 0x488   : > { %v6052_v23 = vcvt.s32.f32 %v1667_v9  ;;  %v6054_v60 = vpop.xlane.xlu1 %1364  ;;  %v1555_v3 = vsel %vm1554_vm15, %v1476_v8, %v1477_v7 }
 0x489   : > { %9191 = vst [vmem:[#allocation100_spill] sm:$0xff] %v6054_v60  ;;  %vm1556_vm0 = vcmp.lt.s32.totalorder %v1555_v3, %v1478_v50  ;;  %vm1425_vm1 = vcmp.eq.f32.partialorder %v5797_v0, %v6054_v60  ;;  %vm1426_vm2 = vcmp.eq.f32.partialorder %v5800_v54, %v6054_v60  ;;  %vm1427_vm3 = vcmp.eq.f32.partialorder %v5807_v36, %v6054_v60 }
 0x48a   : > { %1670 = vmin.xlane.f32.xlu0 %v6052_v23  ;;  %v6064_v9 = vsel %vm1556_vm0, %v1555_v3, %v1478_v50  ;;  %v1473_v18 = vsel %vm1425_vm1, %v5308_v51, 2147483647  ;;  %v1474_v46 = vsel %vm1426_vm2, %v5310_v1, 2147483647  ;;  %v1475_v13 = vsel %vm1427_vm3, %v9194_v10, 2147483647 }
 0x48b   : > { %v1559_v8 = vshra.s32 %v6064_v9, 16  ;;  %vm1536_vm4 = vcmp.lt.s32.totalorder %v1473_v18, %v1474_v46  ;;  %v6069_v7 = vpop.xlane.xlu0 %1400 }
 0x48c   : > { %9193 = vst [vmem:[#allocation101_spill] sm:$0xff] %v6069_v7  ;;  %v1537_v0 = vsel %vm1536_vm4, %v1473_v18, %v1474_v46  ;;  %vm1452_vm6 = vcmp.eq.f32.partialorder %v5811_v34, %v6069_v7  ;;  %vm1453_vm7 = vcmp.eq.f32.partialorder %v5818_v12, %v6069_v7  ;;  %vm1454_vm8 = vcmp.eq.f32.partialorder %v5830_v37, %v6069_v7  ;;  %v9198_v37 = vld [vmem:[#allocation41_spill] sm:$0xff] }
 0x48d   : > { %v6072_v35 = vcvt.s32.f32 %v1559_v8  ;;  %vm1538_vm5 = vcmp.lt.s32.totalorder %v1537_v0, %v1475_v13  ;;  %v6078_v3 = vpop.xlane.xlu1 %1396  ;;  %v1500_v60 = vsel %vm1452_vm6, %v5308_v51, 2147483647  ;;  %v1501_v18 = vsel %vm1453_vm7, %v5310_v1, 2147483647  ;;  %v9196_v8 = vld [vmem:[#allocation45_spill] sm:$0xff] }
 0x48e   : > { %9195 = vst [vmem:[#allocation102_spill] sm:$0xff] %v6078_v3  ;;  %v6080_v50 = vsel %vm1538_vm5, %v1537_v0, %v1475_v13  ;;  %v1502_v10 = vsel %vm1454_vm8, %v9196_v8, 2147483647  ;;  %vm1698_vm9 = vcmp.lt.s32.totalorder %v1500_v60, %v1501_v18  ;;  %vm1449_vm10 = vcmp.eq.f32.partialorder %v5828_v56, %v6078_v3 }
 0x48f   : > { %1562 = vmin.xlane.f32.xlu0 %v6072_v35  ;;  %v1541_v46 = vshra.s32 %v6080_v50, 16  ;;  %v1699_v12 = vsel %vm1698_vm9, %v1500_v60, %v1501_v18  ;;  %vm1450_vm11 = vcmp.eq.f32.partialorder %v5833_v26, %v6078_v3  ;;  %vm1451_vm12 = vcmp.eq.f32.partialorder %v5838_v43, %v6078_v3 }
 0x490   : > { %v1497_v13 = vsel %vm1449_vm10, %v5308_v51, 2147483647  ;;  %v6096_v0 = vpop.xlane.xlu0 %1376  ;;  %vm1700_vm13 = vcmp.lt.s32.totalorder %v1699_v12, %v1502_v10  ;;  %v1498_v8 = vsel %vm1450_vm11, %v5310_v1, 2147483647  ;;  %v1499_v34 = vsel %vm1451_vm12, %v9198_v37, 2147483647 }
 0x491   : > { %9197 = vst [vmem:[#allocation103_spill] sm:$0xff] %v6096_v0  ;;  %v6098_v7 = vcvt.s32.f32 %v1541_v46  ;;  %v6102_v36 = vsel %vm1700_vm13, %v1699_v12, %v1502_v10  ;;  %vm1680_vm14 = vcmp.lt.s32.totalorder %v1497_v13, %v1498_v8  ;;  %vm1434_vm15 = vcmp.eq.f32.partialorder %v5847_v27, %v6096_v0 }
 0x492   : > { %vm1435_vm0 = vcmp.eq.f32.partialorder %v5852_v38, %v6096_v0  ;;  %v1703_v60 = vshra.s32 %v6102_v36, 16  ;;  %v1681_v18 = vsel %vm1680_vm14, %v1497_v13, %v1498_v8  ;;  %vm1436_vm1 = vcmp.eq.f32.partialorder %v5859_v30, %v6096_v0  ;;  %v9200_v38 = vld [vmem:[#allocation48_spill] sm:$0xff] }
 0x493   : > { %1544 = vmin.xlane.f32.xlu1 %v6098_v7  ;;  %v1482_v46 = vsel %vm1434_vm15, %v5308_v51, 2147483647  ;;  %vm1682_vm2 = vcmp.lt.s32.totalorder %v1681_v18, %v1499_v34  ;;  %v1483_v12 = vsel %vm1435_vm0, %v5310_v1, 2147483647  ;;  %v1484_v27 = vsel %vm1436_vm1, %v9200_v38, 2147483647 }
 0x494   : > { %v6114_v10 = vpop.xlane.xlu1 %1372  ;;  %v6116_v3 = vcvt.s32.f32 %v1703_v60  ;;  %v6118_v37 = vsel %vm1682_vm2, %v1681_v18, %v1499_v34  ;;  %vm1590_vm3 = vcmp.lt.s32.totalorder %v1482_v46, %v1483_v12 }
 0x495   : > { %9199 = vst [vmem:[#allocation104_spill] sm:$0xff] %v6114_v10  ;;  %v1685_v43 = vshra.s32 %v6118_v37, 16  ;;  %v1591_v8 = vsel %vm1590_vm3, %v1482_v46, %v1483_v12  ;;  %vm1431_vm4 = vcmp.eq.f32.partialorder %v5866_v44, %v6114_v10  ;;  %vm1432_vm5 = vcmp.eq.f32.partialorder %v5871_v20, %v6114_v10  ;;  %v9202_v12 = vld [vmem:[#allocation49_spill] sm:$0xff] }
 0x496   : > { %1706 = vmin.xlane.f32.xlu0 %v6116_v3  ;;  %vm1592_vm6 = vcmp.lt.s32.totalorder %v1591_v8, %v1484_v27  ;;  %vm1433_vm7 = vcmp.eq.f32.partialorder %v5879_v14, %v6114_v10  ;;  %v1479_v34 = vsel %vm1431_vm4, %v5308_v51, 2147483647  ;;  %v1480_v13 = vsel %vm1432_vm5, %v5310_v1, 2147483647 }
 0x497   : > { %v6131_v60 = vpop.xlane.xlu0 %1408  ;;  %v6133_v18 = vcvt.s32.f32 %v1685_v43  ;;  %v6135_v46 = vsel %vm1592_vm6, %v1591_v8, %v1484_v27  ;;  %v1481_v0 = vsel %vm1433_vm7, %v9202_v12, 2147483647  ;;  %vm1572_vm8 = vcmp.lt.s32.totalorder %v1479_v34, %v1480_v13  ;;  %v9204_v12 = vld [vmem:[#allocation54_spill] sm:$0xff] }
 0x498   : > { %9201 = vst [vmem:[#allocation105_spill] sm:$0xff] %v6131_v60  ;;  %v1595_v38 = vshra.s32 %v6135_v46, 16  ;;  %v1573_v20 = vsel %vm1572_vm8, %v1479_v34, %v1480_v13  ;;  %vm1458_vm9 = vcmp.eq.f32.partialorder %v5883_v52, %v6131_v60  ;;  %vm1459_vm10 = vcmp.eq.f32.partialorder %v5888_v6, %v6131_v60 }
 0x499   : > { %1688 = vmin.xlane.f32.xlu1 %v6133_v18  ;;  %vm1574_vm11 = vcmp.lt.s32.totalorder %v1573_v20, %v1481_v0  ;;  %vm1460_vm12 = vcmp.eq.f32.partialorder %v5896_v31, %v6131_v60  ;;  %v1506_v43 = vsel %vm1458_vm9, %v5308_v51, 2147483647  ;;  %v1507_v27 = vsel %vm1459_vm10, %v5310_v1, 2147483647 }
 0x49a   : > { %v6148_v8 = vcvt.s32.f32 %v1595_v38  ;;  %v6150_v10 = vsel %vm1574_vm11, %v1573_v20, %v1481_v0  ;;  %vm1734_vm13 = vcmp.lt.s32.totalorder %v1506_v43, %v1507_v27  ;;  %v1508_v6 = vsel %vm1460_vm12, %v9204_v12, 2147483647  ;;  %v9206_v12 = vld [vmem:[#allocation53_spill] sm:$0xff] }
 0x49b   : > { %v6152_v34 = vpop.xlane.xlu1 %1404  ;;  %v1577_v13 = vshra.s32 %v6150_v10, 16  ;;  %v1735_v52 = vsel %vm1734_vm13, %v1506_v43, %v1507_v27 }
 0x49c   : > { %9203 = vst [vmem:[#allocation106_spill] sm:$0xff] %v6152_v34  ;;  %1598 = vmin.xlane.f32.xlu0 %v6148_v8  ;;  %vm1736_vm14 = vcmp.lt.s32.totalorder %v1735_v52, %v1508_v6  ;;  %vm1455_vm15 = vcmp.eq.f32.partialorder %v5903_v17, %v6152_v34  ;;  %vm1456_vm0 = vcmp.eq.f32.partialorder %v5909_v45, %v6152_v34 }
 0x49d   : > { %vm1457_vm1 = vcmp.eq.f32.partialorder %v5916_v24, %v6152_v34  ;;  %v6163_v38 = vcvt.s32.f32 %v1577_v13  ;;  %v6165_v20 = vsel %vm1736_vm14, %v1735_v52, %v1508_v6  ;;  %v1503_v0 = vsel %vm1455_vm15, %v5308_v51, 2147483647 }
 0x49e   : > { %v1504_v43 = vsel %vm1456_vm0, %v5310_v1, 2147483647  ;;  %v6169_v27 = vpop.xlane.xlu0 %1384  ;;  %v1739_v60 = vshra.s32 %v6165_v20, 16  ;;  %v1505_v17 = vsel %vm1457_vm1, %v9206_v12, 2147483647 }
 0x49f   : > { %9205 = vst [vmem:[#allocation107_spill] sm:$0xff] %v6169_v27  ;;  %vm1716_vm2 = vcmp.lt.s32.totalorder %v1503_v0, %v1504_v43  ;;  %1580 = vmin.xlane.f32.xlu1 %v6163_v38  ;;  %vm1440_vm3 = vcmp.eq.f32.partialorder %v5920_v25, %v6169_v27  ;;  %vm1441_vm4 = vcmp.eq.f32.partialorder %v5927_v28, %v6169_v27 }
 0x4a0   : > { %v1717_v45 = vsel %vm1716_vm2, %v1503_v0, %v1504_v43  ;;  %vm1442_vm5 = vcmp.eq.f32.partialorder %v5934_v55, %v6169_v27  ;;  %v6180_v52 = vcvt.s32.f32 %v1739_v60  ;;  %v1488_v6 = vsel %vm1440_vm3, %v5308_v51, 2147483647  ;;  %v6184_v34 = vpop.xlane.xlu1 %1380  ;;  %v9208_v0 = vld [vmem:[#allocation58_spill] sm:$0xff] }
 0x4a1   : > { %vm1718_vm6 = vcmp.lt.s32.totalorder %v1717_v45, %v1505_v17  ;;  %v1489_v13 = vsel %vm1441_vm4, %v5310_v1, 2147483647  ;;  %9207 = vst [vmem:[#allocation108_spill] sm:$0xff] %v6184_v34  ;;  %v1490_v43 = vsel %vm1442_vm5, %v9208_v0, 2147483647  ;;  %vm1437_vm8 = vcmp.eq.f32.partialorder %v5939_v59, %v6184_v34  ;;  %v9210_v0 = vld [vmem:[#allocation55_spill] sm:$0xff] }
 0x4a2   : > { %v6186_v12 = vsel %vm1718_vm6, %v1717_v45, %v1505_v17  ;;  %vm1626_vm7 = vcmp.lt.s32.totalorder %v1488_v6, %v1489_v13  ;;  %1742 = vmin.xlane.f32.xlu0 %v6180_v52  ;;  %vm1438_vm9 = vcmp.eq.f32.partialorder %v5942_v11, %v6184_v34  ;;  %vm1439_vm11 = vcmp.eq.f32.partialorder %v5949_v48, %v6184_v34 }
 0x4a3   : > { %v1721_v28 = vshra.s32 %v6186_v12, 16  ;;  %v1627_v25 = vsel %vm1626_vm7, %v1488_v6, %v1489_v13  ;;  %v1485_v17 = vsel %vm1437_vm8, %v5308_v51, 2147483647  ;;  %v1486_v45 = vsel %vm1438_vm9, %v5310_v1, 2147483647 }
 0x4a4   : > { %vm1628_vm10 = vcmp.lt.s32.totalorder %v1627_v25, %v1490_v43  ;;  %vm1608_vm12 = vcmp.lt.s32.totalorder %v1485_v17, %v1486_v45  ;;  %v6203_v6 = vpop.xlane.xlu0 %1416  ;;  %v1487_v59 = vsel %vm1439_vm11, %v9210_v0, 2147483647  ;;  %v9212_v0 = vld [vmem:[#allocation61_spill] sm:$0xff] }
 0x4a5   : > { %v6199_v60 = vcvt.s32.f32 %v1721_v28  ;;  %v6201_v27 = vsel %vm1628_vm10, %v1627_v25, %v1490_v43  ;;  %9209 = vst [vmem:[#allocation109_spill] sm:$0xff] %v6203_v6  ;;  %v1609_v11 = vsel %vm1608_vm12, %v1485_v17, %v1486_v45  ;;  %vm1464_vm14 = vcmp.eq.f32.partialorder %v5953_v33, %v6203_v6  ;;  %v6214_v25 = vpop.xlane.xlu1 %1412 }
 0x4a6   : > { %v1631_v13 = vshra.s32 %v6201_v27, 16  ;;  %vm1610_vm13 = vcmp.lt.s32.totalorder %v1609_v11, %v1487_v59  ;;  %vm1465_vm15 = vcmp.eq.f32.partialorder %v5960_v29, %v6203_v6  ;;  %vm1466_vm0 = vcmp.eq.f32.partialorder %v5971_v19, %v6203_v6  ;;  %9211 = vst [vmem:[#allocation110_spill] sm:$0xff] %v6214_v25 }
 0x4a7   : > { %1724 = vmin.xlane.f32.xlu1 %v6199_v60  ;;  %v6218_v43 = vsel %vm1610_vm13, %v1609_v11, %v1487_v59  ;;  %v1512_v17 = vsel %vm1464_vm14, %v5308_v51, 2147483647  ;;  %v1513_v45 = vsel %vm1465_vm15, %v5310_v1, 2147483647  ;;  %v1514_v33 = vsel %vm1466_vm0, %v9212_v0, 2147483647 }
 0x4a8   : > { %v6216_v28 = vcvt.s32.f32 %v1631_v13  ;;  %v1613_v34 = vshra.s32 %v6218_v43, 16  ;;  %vm1770_vm1 = vcmp.lt.s32.totalorder %v1512_v17, %v1513_v45  ;;  %vm1461_vm2 = vcmp.eq.f32.partialorder %v5969_v62, %v6214_v25  ;;  %v9214_v62 = vld [vmem:[#allocation59_spill] sm:$0xff] }
 0x4a9   : > { %v1771_v6 = vsel %vm1770_vm1, %v1512_v17, %v1513_v45  ;;  %vm1462_vm3 = vcmp.eq.f32.partialorder %v5974_v2, %v6214_v25  ;;  %vm1463_vm4 = vcmp.eq.f32.partialorder %v5982_v42, %v6214_v25  ;;  %v1509_v59 = vsel %vm1461_vm2, %v5308_v51, 2147483647  ;;  %v6235_v0 = vpop.xlane.xlu1 %1388 }
 0x4aa   : > { %1634 = vmin.xlane.f32.xlu0 %v6216_v28  ;;  %v6232_v11 = vcvt.s32.f32 %v1613_v34  ;;  %vm1772_vm5 = vcmp.lt.s32.totalorder %v1771_v6, %v1514_v33  ;;  %v1510_v13 = vsel %vm1462_vm3, %v5310_v1, 2147483647  ;;  %9213 = vst [vmem:[#allocation111_spill] sm:$0xff] %v6235_v0  ;;  %v1511_v29 = vsel %vm1463_vm4, %v9214_v62, 2147483647  ;;  %v9216_v62 = vld [vmem:[#allocation62_spill] sm:$0xff] }
 0x4ab   : > { %v6237_v19 = vsel %vm1772_vm5, %v1771_v6, %v1514_v33  ;;  %vm1752_vm6 = vcmp.lt.s32.totalorder %v1509_v59, %v1510_v13  ;;  %vm1443_vm7 = vcmp.eq.f32.partialorder %v5986_v53, %v6235_v0  ;;  %vm1444_vm8 = vcmp.eq.f32.partialorder %v5989_v16, %v6235_v0 }
 0x4ac   : > { %1616 = vmin.xlane.f32.xlu1 %v6232_v11  ;;  %v1775_v17 = vshra.s32 %v6237_v19, 16  ;;  %v1753_v45 = vsel %vm1752_vm6, %v1509_v59, %v1510_v13  ;;  %vm1445_vm10 = vcmp.eq.f32.partialorder %v5994_v32, %v6235_v0  ;;  %v1491_v33 = vsel %vm1443_vm7, %v5308_v51, 2147483647  ;;  %v9217_v0 = vld [vmem:[#allocation64_spill] sm:$0xff] }
 0x4ad   : > { %vm1754_vm9 = vcmp.lt.s32.totalorder %v1753_v45, %v1511_v29  ;;  %v1492_v34 = vsel %vm1444_vm8, %v5310_v1, 2147483647  ;;  %v6254_v59 = vpop.xlane.xlu1 %1420  ;;  %v1493_v53 = vsel %vm1445_vm10, %v9216_v62, 2147483647 }
 0x4ae   : > { %v6250_v6 = vcvt.s32.f32 %v1775_v17  ;;  %v6252_v25 = vsel %vm1754_vm9, %v1753_v45, %v1511_v29  ;;  %vm1644_vm11 = vcmp.lt.s32.totalorder %v1491_v33, %v1492_v34  ;;  %9215 = vst [vmem:[#allocation112_spill] sm:$0xff] %v6254_v59  ;;  %vm1467_vm13 = vcmp.eq.f32.partialorder %v6001_v40, %v6254_v59 }
 0x4af   : > { %v1757_v13 = vshra.s32 %v6252_v25, 16  ;;  %v1645_v16 = vsel %vm1644_vm11, %v1491_v33, %v1492_v34  ;;  %vm1468_vm14 = vcmp.eq.f32.partialorder %v6004_v41, %v6254_v59  ;;  %vm1469_vm15 = vcmp.eq.f32.partialorder %v6008_v4, %v6254_v59 }
 0x4b0   : > { %1778 = vmin.xlane.f32.xlu0 %v6250_v6  ;;  %vm1646_vm12 = vcmp.lt.s32.totalorder %v1645_v16, %v1493_v53  ;;  %v1515_v45 = vsel %vm1467_vm13, %v5308_v51, 2147483647  ;;  %v1516_v33 = vsel %vm1468_vm14, %v5310_v1, 2147483647  ;;  %v1517_v62 = vsel %vm1469_vm15, %v9217_v0, 2147483647 }
 0x4b1   : > { %v6265_v29 = vcvt.s32.f32 %v1757_v13  ;;  %v6267_v17 = vsel %vm1646_vm12, %v1645_v16, %v1493_v53  ;;  %vm1788_vm0 = vcmp.lt.s32.totalorder %v1515_v45, %v1516_v33  ;;  %v1522_v13 = vand.u32 65535, %v6030_v58 }
 0x4b2   : > { %v1649_v34 = vshra.s32 %v6267_v17, 16  ;;  %v1789_v40 = vsel %vm1788_vm0, %v1515_v45, %v1516_v33  ;;  %v1666_v45 = vand.u32 65535, %v6040_v49  ;;  %v1540_v49 = vand.u32 65535, %v6080_v50 }
 0x4b3   : > { %1760 = vmin.xlane.f32.xlu1 %v6265_v29  ;;  %vm1790_vm1 = vcmp.lt.s32.totalorder %v1789_v40, %v1517_v62  ;;  %v1524_v51 = vcvt.s32.f32 %v1522_v13 }
 0x4b4   : > { %v6274_v41 = vcvt.s32.f32 %v1649_v34  ;;  %v6276_v59 = vsel %vm1790_vm1, %v1789_v40, %v1517_v62  ;;  %v1668_v33 = vcvt.s32.f32 %v1666_v45  ;;  %v1542_v45 = vcvt.s32.f32 %v1540_v49 }
 0x4b5   : > { %v1793_v53 = vshra.s32 %v6276_v59, 16 }
 0x4b7   : > { %1652 = vmin.xlane.f32.xlu1 %v6274_v41  ;;  %v6280_v16 = vcvt.s32.f32 %v1793_v53  ;;  %v1558_v53 = vand.u32 65535, %v6064_v9  ;;  %v1684_v9 = vand.u32 65535, %v6118_v37 }
 0x4b9   : > { %v1560_v13 = vcvt.s32.f32 %v1558_v53 }
 0x4bb   : > { %1796 = vmin.xlane.f32.xlu1 %v6280_v16 }
 0x513   : > { %v6284_v1 = vpop.xlane.xlu0 %1526 }
 0x514   : > { %vm1528_vm2 = vcmp.eq.f32.partialorder %v6036_v22, %v6284_v1 }
 0x515   : > { %v1529_v62 = vsel %vm1528_vm2, %v1524_v51, inf  ;;  %vm1325_vm2 = vcmp.eq.s32.totalorder %v9127_v63, 0 }
 0x516   : > { %1530 = vmin.xlane.f32.xlu0 %v1529_v62  ;;  %v1702_v62 = vand.u32 65535, %v6102_v36  ;;  %v1686_v36 = vcvt.s32.f32 %v1684_v9 }
 0x517   : > { %v6289_v40 = vpop.xlane.xlu0 %1670 }
 0x518   : > { %vm1672_vm3 = vcmp.eq.f32.partialorder %v6052_v23, %v6289_v40  ;;  %v1704_v50 = vcvt.s32.f32 %v1702_v62 }
 0x519   : > { %v1673_v34 = vsel %vm1672_vm3, %v1668_v33, inf  ;;  %vm1934_vm3 = vcmp.eq.s32.totalorder %v9127_v63, 1 }
 0x51a   : > { %1674 = vmin.xlane.f32.xlu0 %v1673_v34  ;;  %v1594_v34 = vand.u32 65535, %v6135_v46  ;;  %v1738_v46 = vand.u32 65535, %v6165_v20  ;;  %v1630_v20 = vand.u32 65535, %v6201_v27 }
 0x51c   : > { %v6294_v58 = vpop.xlane.xlu0 %1562  ;;  %v1596_v49 = vcvt.s32.f32 %v1594_v34  ;;  %v1740_v62 = vcvt.s32.f32 %v1738_v46 }
 0x51d   : > { %vm1564_vm4 = vcmp.eq.f32.partialorder %v6072_v35, %v6294_v58 }
 0x51e   : > { %v1565_v51 = vsel %vm1564_vm4, %v1560_v13, inf  ;;  %v1576_v13 = vand.u32 65535, %v6150_v10 }
 0x51f   : > { %1566 = vmin.xlane.f32.xlu0 %v1565_v51 }
 0x520   : > { %v6299_v22 = vpop.xlane.xlu1 %1544 }
 0x521   : > { %vm1546_vm5 = vcmp.eq.f32.partialorder %v6098_v7, %v6299_v22 }
 0x522   : > { %v1547_v23 = vsel %vm1546_vm5, %v1542_v45, inf  ;;  %v1578_v45 = vcvt.s32.f32 %v1576_v13 }
 0x523   : > { %1548 = vmin.xlane.f32.xlu1 %v1547_v23  ;;  %v6305_v33 = vpop.xlane.xlu0 %1706  ;;  %v1720_v23 = vand.u32 65535, %v6186_v12  ;;  %v1632_v12 = vcvt.s32.f32 %v1630_v20  ;;  %v9219_v20 = vld [vmem:[#allocation33_spill] sm:$0xff] }
 0x524   : > { %vm1708_vm6 = vcmp.eq.f32.partialorder %v6116_v3, %v6305_v33 }
 0x525   : > { %v1709_v35 = vsel %vm1708_vm6, %v1704_v50, inf  ;;  %v1722_v50 = vcvt.s32.f32 %v1720_v23 }
 0x526   : > { %v6310_v53 = vpop.xlane.xlu1 %1688  ;;  %1710 = vmin.xlane.f32.xlu0 %v1709_v35  ;;  %v1612_v35 = vand.u32 65535, %v6218_v43  ;;  %v1756_v43 = vand.u32 65535, %v6252_v25 }
 0x527   : > { %vm1690_vm7 = vcmp.eq.f32.partialorder %v6133_v18, %v6310_v53 }
 0x528   : > { %v1691_v7 = vsel %vm1690_vm7, %v1686_v36, inf  ;;  %v1614_v27 = vcvt.s32.f32 %v1612_v35  ;;  %v1758_v46 = vcvt.s32.f32 %v1756_v43 }
 0x529   : > { %1692 = vmin.xlane.f32.xlu1 %v1691_v7  ;;  %v6315_v37 = vpop.xlane.xlu0 %1598  ;;  %v1774_v7 = vand.u32 65535, %v6237_v19  ;;  %v1648_v19 = vand.u32 65535, %v6267_v17 }
 0x52a   : > { %vm1600_vm8 = vcmp.eq.f32.partialorder %v6148_v8, %v6315_v37 }
 0x52b   : > { %v1601_v3 = vsel %vm1600_vm8, %v1596_v49, inf  ;;  %v1776_v49 = vcvt.s32.f32 %v1774_v7  ;;  %v1650_v25 = vcvt.s32.f32 %v1648_v19  ;;  %v9223_v7 = vld [vmem:[#allocation70_spill] sm:$0xff]  ;;  %v9225_v19 = vld [vmem:[#allocation73_spill] sm:$0xff] }
 0x52c   : > { %v6320_v51 = vpop.xlane.xlu1 %1580  ;;  %1602 = vmin.xlane.f32.xlu0 %v1601_v3 }
 0x52d   : > { %vm1582_vm9 = vcmp.eq.f32.partialorder %v6163_v38, %v6320_v51 }
 0x52e   : > { %v1583_v18 = vsel %vm1582_vm9, %v1578_v45, inf }
 0x52f   : > { %1584 = vmin.xlane.f32.xlu1 %v1583_v18  ;;  %v6324_v10 = vpop.xlane.xlu0 %1742  ;;  %v1792_v18 = vand.u32 65535, %v6276_v59  ;;  %v9221_v59 = vld [vmem:[#allocation20_spill] sm:$0xff] }
 0x530   : > { %vm1744_vm10 = vcmp.eq.f32.partialorder %v6180_v52, %v6324_v10 }
 0x531   : > { %v1745_v8 = vsel %vm1744_vm10, %v1740_v62, inf  ;;  %v1794_v23 = vcvt.s32.f32 %v1792_v18  ;;  %v9226_v18 = vld [vmem:[#allocation74_spill] sm:$0xff] }
 0x532   : > { %1746 = vmin.xlane.f32.xlu0 %v1745_v8 }
 0x534   : > { %v6330_v9 = vpop.xlane.xlu1 %1724 }
 0x535   : > { %vm1726_vm11 = vcmp.eq.f32.partialorder %v6199_v60, %v6330_v9 }
 0x536   : > { %v1727_v38 = vsel %vm1726_vm11, %v1722_v50, inf  ;;  %v1221_v50 = vand.u32 65535, %v9219_v20  ;;  %v9229_v20 = vld [vmem:[#allocation81_spill] sm:$0xff] }
 0x537   : > { %1728 = vmin.xlane.f32.xlu1 %v1727_v38  ;;  %v6335_v34 = vpop.xlane.xlu0 %1634  ;;  %v9220_v38 = vld [vmem:[#allocation19_spill] sm:$0xff] }
 0x538   : > { %vm1636_vm12 = vcmp.eq.f32.partialorder %v6216_v28, %v6335_v34  ;;  %v1215_v35 = vand.u32 65535, %v9220_v38  ;;  %v1350_v43 = vsel %vm1325_vm2, %v1221_v50, 0  ;;  %v1218_v50 = vand.u32 65535, %v9229_v20  ;;  %v9230_v38 = vld [vmem:[#allocation83_spill] sm:$0xff] }
 0x539   : > { %v1637_v52 = vsel %vm1636_vm12, %v1632_v12, inf  ;;  %v6339_v36 = vpop.xlane.xlu1 %1616  ;;  %v1214_v12 = vand.u32 65535, %v9221_v59  ;;  %v1226_v59 = vand.u32 65535, %v5923_v21  ;;  %v1551_v21 = vcvt.f32.s32 %v6299_v22 }
 0x53a   : > { %1638 = vmin.xlane.f32.xlu0 %v1637_v52  ;;  %vm1618_vm13 = vcmp.eq.f32.partialorder %v6232_v11, %v6339_v36 }
 0x53b   : > { %v1619_v60 = vsel %vm1618_vm13, %v1614_v27, inf  ;;  %v6432_v22 = vsel %vm1325_vm2, %v1226_v59, 0  ;;  %v1695_v59 = vcvt.f32.s32 %v6310_v53  ;;  %v1749_v53 = vcvt.f32.s32 %v6324_v10 }
 0x53c   : > { %1620 = vmin.xlane.f32.xlu1 %v1619_v60  ;;  %v1222_v60 = vand.u32 65535, %v9223_v7 }
 0x53d   : > { %v6345_v13 = vpop.xlane.xlu0 %1778 }
 0x53e   : > { %vm1780_vm14 = vcmp.eq.f32.partialorder %v6250_v6, %v6345_v13 }
 0x53f   : > { %v1781_v28 = vsel %vm1780_vm14, %v1776_v49, inf  ;;  %v6377_v49 = vsel %vm1325_vm2, %v1215_v35, 0  ;;  %v1227_v35 = vand.u32 65535, %v9230_v38 }
 0x540   : > { %v6349_v3 = vpop.xlane.xlu1 %1760  ;;  %1782 = vmin.xlane.f32.xlu0 %v1781_v28  ;;  %v9224_v28 = vld [vmem:[#allocation27_spill] sm:$0xff] }
 0x541   : > { %vm1762_vm15 = vcmp.eq.f32.partialorder %v6265_v29, %v6349_v3  ;;  %v9218_v29 = vld [vmem:[#allocation32_spill] sm:$0xff] }
 0x542   : > { %v1763_v11 = vsel %vm1762_vm15, %v1758_v46, inf  ;;  %v1213_v8 = vand.u32 65535, %v9218_v29  ;;  %v1217_v46 = vand.u32 65535, %v9224_v28  ;;  %v1677_v28 = vcvt.f32.s32 %v6289_v40 }
 0x543   : > { %1764 = vmin.xlane.f32.xlu1 %v1763_v11  ;;  %v1216_v11 = vand.u32 65535, %v9225_v19 }
 0x544   : > { %v6354_v45 = vpop.xlane.xlu1 %1652  ;;  %v1342_v27 = vsel %vm1325_vm2, %v1213_v8, 0 }
 0x545   : > { %vm1654_vm0 = vcmp.eq.f32.partialorder %v6274_v41, %v6354_v45  ;;  %v9222_v41 = vld [vmem:[#allocation22_spill] sm:$0xff] }
 0x546   : > { %v1655_v6 = vsel %vm1654_vm0, %v1650_v25, inf  ;;  %v1223_v52 = vand.u32 65535, %v9222_v41  ;;  %v6383_v25 = vsel %vm1325_vm2, %v1214_v12, 0  ;;  %v6397_v12 = vsel %vm1325_vm2, %v1222_v60, 0 }
 0x547   : > { %1656 = vmin.xlane.f32.xlu1 %v1655_v6  ;;  %v1225_v6 = vand.u32 65535, %v9226_v18  ;;  %v6402_v18 = vsel %vm1325_vm2, %v1217_v46, 0 }
 0x548   : > { %v6359_v62 = vpop.xlane.xlu1 %1796  ;;  %v6390_v8 = vsel %vm1325_vm2, %v1223_v52, 0  ;;  %v6406_v52 = vsel %vm1325_vm2, %v1216_v11, 0  ;;  %v6424_v11 = vsel %vm1325_vm2, %v1218_v50, 0  ;;  %v1713_v50 = vcvt.f32.s32 %v6305_v33 }
 0x549   : > { %vm1798_vm1 = vcmp.eq.f32.partialorder %v6280_v16, %v6359_v62  ;;  %v1533_v16 = vcvt.f32.s32 %v6284_v1  ;;  %v9228_v1 = vld [vmem:[#allocation79_spill] sm:$0xff]  ;;  %v6412_v60 = vsel %vm1325_vm2, %v1225_v6, 0 }
 0x54a   : > { %v1799_v17 = vsel %vm1798_vm1, %v1794_v23, inf  ;;  %v9227_v23 = vld [vmem:[#allocation77_spill] sm:$0xff]  ;;  %v1219_v29 = vand.u32 65535, %v9228_v1  ;;  %v1678_v1 = vshll.u32 %v1677_v28, 16 }
 0x54b   : > { %1800 = vmin.xlane.f32.xlu1 %v1799_v17  ;;  %v1224_v17 = vand.u32 65535, %v9227_v23  ;;  %v1534_v7 = vshll.u32 %v1533_v16, 16  ;;  %v1569_v23 = vcvt.f32.s32 %v6294_v58  ;;  %v6428_v58 = vsel %vm1325_vm2, %v1227_v35, 0 }
 0x54c   : > { %v6420_v16 = vsel %vm1325_vm2, %v1219_v29, 0 }
 0x54d   : > { %v6416_v40 = vsel %vm1325_vm2, %v1224_v17, 0 }
 0x5a3   : > { %v1531_v41 = vpop.xlane.xlu0 %1530 }
 0x5a4   : > { %v1532_v19 = vcvt.f32.s32 %v1531_v41  ;;  %v1570_v41 = vshll.u32 %v1569_v23, 16  ;;  %v9232_v23 = vld [vmem:[#allocation18_spill] sm:$0xff] }
 0x5a6   : > { %v1535_v46 = vadd.s32 %v1534_v7, %v1532_v19  ;;  %v1552_v7 = vshll.u32 %v1551_v21, 16  ;;  %v1605_v21 = vcvt.f32.s32 %v6315_v37 }
 0x5a7   : > { %v1675_v17 = vpop.xlane.xlu0 %1674 }
 0x5a8   : > { %v1806_v20 = vshra.s32 %v1535_v46, 16  ;;  %v1822_v29 = vand.u32 65535, %v1535_v46  ;;  %v1676_v38 = vcvt.f32.s32 %v1675_v17 }
 0x5aa   : > { %v6439_v35 = vsel %vm1934_vm3, %v1822_v29, %v1342_v27  ;;  %v1679_v19 = vadd.s32 %v1678_v1, %v1676_v38  ;;  %vm1838_vm4 = vcmp.eq.s32.totalorder %v9127_v63, %v1806_v20  ;;  %vm1839_vm5 = vcmp.eq.s32.totalorder %v9128_v39, %v1806_v20 }
 0x5ab   : > { %9231 = vst [vmem:[#allocation32_spill] sm:$0xff] %v6439_v35  ;;  %vm1840_vm6 = vcmp.eq.s32.totalorder %v9129_v47, %v1806_v20  ;;  %v6446_v28 = vsel %vm1838_vm4, -inf, %v5734_v57  ;;  %v6449_v33 = vsel %vm1839_vm5, -inf, %v9232_v23  ;;  %v1714_v1 = vshll.u32 %v1713_v50, 16  ;;  %v9233_v20 = vld [vmem:[#allocation34_spill] sm:$0xff] }
 0x5ac   : > { %v1814_v46 = vshra.s32 %v1679_v19, 16  ;;  %v1830_v27 = vand.u32 65535, %v1679_v19  ;;  %v1967_v17 = vmax.f32 %v6446_v28, %v6449_v33  ;;  %v1587_v29 = vcvt.f32.s32 %v6320_v51  ;;  %v1567_v38 = vpop.xlane.xlu0 %1566  ;;  %v9236_v51 = vld [vmem:[#allocation21_spill] sm:$0xff] }
 0x5ad   : > { %v6457_v6 = vsel %vm1840_vm6, -inf, %v9233_v20  ;;  %v1568_v23 = vcvt.f32.s32 %v1567_v38  ;;  %v1731_v19 = vcvt.f32.s32 %v6330_v9  ;;  %v1696_v50 = vshll.u32 %v1695_v59, 16 }
 0x5ae   : > { %9234 = vst [vmem:[#allocation33_spill] sm:$0xff] %v6457_v6  ;;  %v6461_v57 = vsel %vm1934_vm3, %v1830_v27, %v1350_v43  ;;  %v1968_v37 = vmax.f32 %v1967_v17, %v6457_v6  ;;  %vm1862_vm7 = vcmp.eq.s32.totalorder %v9127_v63, %v1814_v46  ;;  %vm1863_vm8 = vcmp.eq.s32.totalorder %v9128_v39, %v1814_v46  ;;  %v9238_v43 = vld [vmem:[#allocation23_spill] sm:$0xff] }
 0x5af   : > { %9235 = vst [vmem:[#allocation19_spill] sm:$0xff] %v6461_v57  ;;  %vm1864_vm9 = vcmp.eq.s32.totalorder %v9129_v47, %v1814_v46  ;;  %v6469_v10 = vsel %vm1862_vm7, -inf, %v9236_v51  ;;  %v1606_v20 = vshll.u32 %v1605_v21, 16  ;;  %v1571_v35 = vadd.s32 %v1570_v41, %v1568_v23 }
 0x5b0   : > { %9237 = vst [vmem:[#allocation20_spill] sm:$0xff] %v6469_v10  ;;  %1969 = vmax.xlane.f32.xlu0 %v1968_v37  ;;  %v6472_v27 = vsel %vm1863_vm8, -inf, %v9238_v43  ;;  %v6474_v38 = vshll.u32 %v1587_v29, 16  ;;  %v6476_v17 = vshll.u32 %v1749_v53, 16  ;;  %v1641_v9 = vcvt.f32.s32 %v6335_v34  ;;  %v1549_v57 = vpop.xlane.xlu1 %1548 }
 0x5b1   : > { %9239 = vst [vmem:[#allocation22_spill] sm:$0xff] %v6472_v27  ;;  %v1999_v46 = vmax.f32 %v6469_v10, %v6472_v27  ;;  %v1808_v0 = vshra.s32 %v1571_v35, 16  ;;  %v1824_v51 = vand.u32 65535, %v1571_v35  ;;  %v1550_v6 = vcvt.f32.s32 %v1549_v57 }
 0x5b2   : > { %v6482_v59 = vsel %vm1864_vm9, -inf, %v5763_v5  ;;  %v6484_v41 = vshll.u32 %v1731_v19, 16  ;;  %v1623_v21 = vcvt.f32.s32 %v6339_v36  ;;  %v1785_v29 = vcvt.f32.s32 %v6345_v13  ;;  %v9241_v13 = vld [vmem:[#allocation69_spill] sm:$0xff] }
 0x5b3   : > { %v2000_v53 = vmax.f32 %v1999_v46, %v6482_v59  ;;  %v6492_v34 = vsel %vm1934_vm3, %v1824_v51, %v6377_v49  ;;  %v1553_v23 = vadd.s32 %v1552_v7, %v1550_v6  ;;  %vm1844_vm10 = vcmp.eq.s32.totalorder %v9127_v63, %v1808_v0  ;;  %v1711_v35 = vpop.xlane.xlu0 %1710 }
 0x5b4   : > { %9240 = vst [vmem:[#allocation70_spill] sm:$0xff] %v6492_v34  ;;  %vm1845_vm11 = vcmp.eq.s32.totalorder %v9128_v39, %v1808_v0  ;;  %v6496_v5 = vshll.u32 %v1641_v9, 16  ;;  %vm1846_vm12 = vcmp.eq.s32.totalorder %v9129_v47, %v1808_v0  ;;  %v6500_v36 = vsel %vm1844_vm10, -inf, %v5777_v61  ;;  %v9242_v9 = vld [vmem:[#allocation71_spill] sm:$0xff] }
 0x5b5   : > { %2001 = vmax.xlane.f32.xlu0 %v2000_v53  ;;  %v6503_v57 = vsel %vm1845_vm11, -inf, %v9241_v13  ;;  %v1767_v49 = vcvt.f32.s32 %v6349_v3  ;;  %v1807_v37 = vshra.s32 %v1553_v23, 16  ;;  %v1823_v6 = vand.u32 65535, %v1553_v23  ;;  %v9244_v53 = vld [vmem:[#allocation26_spill] sm:$0xff] }
 0x5b6   : > { %v1712_v7 = vcvt.f32.s32 %v1711_v35  ;;  %v6506_v19 = vshll.u32 %v1623_v21, 16  ;;  %v6508_v43 = vshll.u32 %v1785_v29, 16  ;;  %v6511_v46 = vsel %vm1846_vm12, -inf, %v9242_v9  ;;  %v1693_v3 = vpop.xlane.xlu1 %1692 }
 0x5b7   : > { %v1975_v0 = vmax.f32 %v6500_v36, %v6503_v57  ;;  %v6518_v61 = vsel %vm1934_vm3, %v1823_v6, %v6383_v25  ;;  %vm1841_vm13 = vcmp.eq.s32.totalorder %v9127_v63, %v1807_v37  ;;  %vm1842_vm14 = vcmp.eq.s32.totalorder %v9128_v39, %v1807_v37 }
 0x5b8   : > { %9243 = vst [vmem:[#allocation27_spill] sm:$0xff] %v6518_v61  ;;  %v1715_v51 = vadd.s32 %v1714_v1, %v1712_v7  ;;  %v1694_v21 = vcvt.f32.s32 %v1693_v3  ;;  %vm1843_vm15 = vcmp.eq.s32.totalorder %v9129_v47, %v1807_v37  ;;  %v6525_v23 = vsel %vm1841_vm13, -inf, %v9244_v53  ;;  %v9247_v3 = vld [vmem:[#allocation72_spill] sm:$0xff] }
 0x5b9   : > { %v1976_v29 = vmax.f32 %v1975_v0, %v6511_v46  ;;  %9245 = vst [vmem:[#allocation73_spill] sm:$0xff] %v6525_v23  ;;  %v6527_v35 = vshll.u32 %v1767_v49, 16  ;;  %v6530_v25 = vsel %vm1842_vm14, -inf, %v5800_v54  ;;  %v1659_v1 = vcvt.f32.s32 %v6354_v45  ;;  %v1603_v7 = vpop.xlane.xlu0 %1602 }
 0x5ba   : > { %v1816_v13 = vshra.s32 %v1715_v51, 16  ;;  %v1832_v9 = vand.u32 65535, %v1715_v51  ;;  %9246 = vst [vmem:[#allocation74_spill] sm:$0xff] %v6530_v25  ;;  %v1697_v6 = vadd.s32 %v1696_v50, %v1694_v21  ;;  %v6534_v61 = vsel %vm1843_vm15, -inf, %v9247_v3  ;;  %v9251_v3 = vld [vmem:[#allocation29_spill] sm:$0xff] }
 0x5bb   : > { %1977 = vmax.xlane.f32.xlu0 %v1976_v29  ;;  %v1971_v37 = vmax.f32 %v6525_v23, %v6530_v25  ;;  %v1604_v0 = vcvt.f32.s32 %v1603_v7  ;;  %v9249_v29 = vld [vmem:[#allocation28_spill] sm:$0xff] }
 0x5bc   : > { %v6541_v49 = vsel %vm1934_vm3, %v1832_v9, %v6390_v8  ;;  %vm1868_vm0 = vcmp.eq.s32.totalorder %v9127_v63, %v1816_v13  ;;  %vm1869_vm1 = vcmp.eq.s32.totalorder %v9128_v39, %v1816_v13  ;;  %v1815_v54 = vshra.s32 %v1697_v6, 16  ;;  %v1585_v21 = vpop.xlane.xlu1 %1584  ;;  %v9253_v8 = vld [vmem:[#allocation24_spill] sm:$0xff] }
 0x5bd   : > { %9248 = vst [vmem:[#allocation77_spill] sm:$0xff] %v6541_v49  ;;  %v1831_v45 = vand.u32 65535, %v1697_v6  ;;  %v1972_v50 = vmax.f32 %v1971_v37, %v6534_v61  ;;  %vm1870_vm4 = vcmp.eq.s32.totalorder %v9129_v47, %v1816_v13  ;;  %v1607_v51 = vadd.s32 %v1606_v20, %v1604_v0 }
 0x5be   : > { %v6548_v53 = vsel %vm1868_vm0, -inf, %v9249_v29  ;;  %v6551_v34 = vsel %vm1869_vm1, -inf, %v9251_v3  ;;  %v6554_v9 = vsel %vm1870_vm4, -inf, %v9253_v8  ;;  %v1586_v6 = vcvt.f32.s32 %v1585_v21  ;;  %v9259_v21 = vld [vmem:[#allocation25_spill] sm:$0xff] }
 0x5bf   : > { %9250 = vst [vmem:[#allocation79_spill] sm:$0xff] %v6548_v53  ;;  %9252 = vst [vmem:[#allocation81_spill] sm:$0xff] %v6551_v34  ;;  %v6559_v7 = vsel %vm1934_vm3, %v1831_v45, %v6397_v12  ;;  %1973 = vmax.xlane.f32.xlu1 %v1972_v50  ;;  %v2007_v20 = vmax.f32 %v6548_v53, %v6551_v34  ;;  %vm1865_vm5 = vcmp.eq.s32.totalorder %v9127_v63, %v1815_v54  ;;  %v1747_v29 = vpop.xlane.xlu0 %1746 }
 0x5c0   : > { %9254 = vst [vmem:[#allocation83_spill] sm:$0xff] %v6554_v9  ;;  %9255 = vst [vmem:[#allocation18_spill] sm:$0xff] %v6559_v7  ;;  %v1810_v13 = vshra.s32 %v1607_v51, 16  ;;  %v1826_v37 = vand.u32 65535, %v1607_v51  ;;  %vm1866_vm6 = vcmp.eq.s32.totalorder %v9128_v39, %v1815_v54  ;;  %vm1867_vm7 = vcmp.eq.s32.totalorder %v9129_v47, %v1815_v54 }
 0x5c1   : > { %v1589_v0 = vadd.s32 %v6474_v38, %v1586_v6  ;;  %v2008_v3 = vmax.f32 %v2007_v20, %v6554_v9  ;;  %v6569_v12 = vsel %vm1865_vm5, -inf, %v5828_v56  ;;  %v6572_v45 = vsel %vm1866_vm6, -inf, %v5833_v26 }
 0x5c2   : > { %9256 = vst [vmem:[#allocation34_spill] sm:$0xff] %v6569_v12  ;;  %9257 = vst [vmem:[#allocation21_spill] sm:$0xff] %v6572_v45  ;;  %v6577_v50 = vsel %vm1934_vm3, %v1826_v37, %v6402_v18  ;;  %v1748_v51 = vcvt.f32.s32 %v1747_v29  ;;  %v6580_v8 = vsel %vm1867_vm7, -inf, %v9259_v21  ;;  %v2003_v38 = vmax.f32 %v6569_v12, %v6572_v45  ;;  %v9261_v18 = vld [vmem:[#allocation75_spill] sm:$0xff] }
 0x5c3   : > { %9258 = vst [vmem:[#allocation23_spill] sm:$0xff] %v6577_v50  ;;  %9260 = vst [vmem:[#allocation69_spill] sm:$0xff] %v6580_v8  ;;  %v1809_v54 = vshra.s32 %v1589_v0, 16  ;;  %v1825_v6 = vand.u32 65535, %v1589_v0  ;;  %2009 = vmax.xlane.f32.xlu0 %v2008_v3  ;;  %vm1850_vm8 = vcmp.eq.s32.totalorder %v9127_v63, %v1810_v13  ;;  %vm1851_vm9 = vcmp.eq.s32.totalorder %v9128_v39, %v1810_v13  ;;  %v9263_v3 = vld [vmem:[#allocation76_spill] sm:$0xff] }
 0x5c4   : > { %v1751_v26 = vadd.s32 %v6476_v17, %v1748_v51  ;;  %v2004_v56 = vmax.f32 %v2003_v38, %v6580_v8  ;;  %vm1852_vm10 = vcmp.eq.s32.totalorder %v9129_v47, %v1810_v13  ;;  %v6590_v20 = vsel %vm1850_vm8, -inf, %v9261_v18  ;;  %v1729_v29 = vpop.xlane.xlu1 %1728 }
 0x5c5   : > { %v6592_v37 = vshll.u32 %v1659_v1, 16  ;;  %v6597_v0 = vsel %vm1934_vm3, %v1825_v6, %v6406_v52  ;;  %v6600_v21 = vsel %vm1851_vm9, -inf, %v9263_v3  ;;  %vm1847_vm11 = vcmp.eq.s32.totalorder %v9127_v63, %v1809_v54 }
 0x5c6   : > { %9262 = vst [vmem:[#allocation71_spill] sm:$0xff] %v6597_v0  ;;  %v1818_v17 = vshra.s32 %v1751_v26, 16  ;;  %v1834_v51 = vand.u32 65535, %v1751_v26  ;;  %v1730_v38 = vcvt.f32.s32 %v1729_v29  ;;  %2005 = vmax.xlane.f32.xlu1 %v2004_v56  ;;  %v1983_v13 = vmax.f32 %v6590_v20, %v6600_v21  ;;  %v9267_v29 = vld [vmem:[#allocation78_spill] sm:$0xff] }
 0x5c7   : > { %v6606_v1 = vsel %vm1852_vm10, -inf, %v5859_v30  ;;  %vm1848_vm12 = vcmp.eq.s32.totalorder %v9128_v39, %v1809_v54  ;;  %vm1849_vm13 = vcmp.eq.s32.totalorder %v9129_v47, %v1809_v54  ;;  %v6611_v52 = vsel %vm1847_vm11, -inf, %v5866_v44  ;;  %v1639_v56 = vpop.xlane.xlu0 %1638 }
 0x5c8   : > { %9264 = vst [vmem:[#allocation26_spill] sm:$0xff] %v6606_v1  ;;  %9265 = vst [vmem:[#allocation72_spill] sm:$0xff] %v6611_v52  ;;  %v6616_v6 = vsel %vm1934_vm3, %v1834_v51, %v6412_v60  ;;  %v1733_v26 = vadd.s32 %v6484_v41, %v1730_v38  ;;  %v1984_v18 = vmax.f32 %v1983_v13, %v6606_v1  ;;  %v6621_v30 = vsel %vm1848_vm12, -inf, %v9267_v29  ;;  %v9270_v13 = vld [vmem:[#allocation80_spill] sm:$0xff] }
 0x5c9   : > { %9266 = vst [vmem:[#allocation28_spill] sm:$0xff] %v6616_v6  ;;  %9268 = vst [vmem:[#allocation29_spill] sm:$0xff] %v6621_v30  ;;  %v1640_v3 = vcvt.f32.s32 %v1639_v56  ;;  %v6624_v0 = vsel %vm1849_vm13, -inf, %v5879_v14  ;;  %v1979_v44 = vmax.f32 %v6611_v52, %v6621_v30  ;;  %vm1874_vm14 = vcmp.eq.s32.totalorder %v9127_v63, %v1818_v17  ;;  %v1621_v51 = vpop.xlane.xlu1 %1620  ;;  %v9271_v56 = vld [vmem:[#allocation31_spill] sm:$0xff] }
 0x5ca   : > { %9269 = vst [vmem:[#allocation24_spill] sm:$0xff] %v6624_v0  ;;  %v1817_v54 = vshra.s32 %v1733_v26, 16  ;;  %v1833_v60 = vand.u32 65535, %v1733_v26  ;;  %1985 = vmax.xlane.f32.xlu0 %v1984_v18  ;;  %vm1875_vm15 = vcmp.eq.s32.totalorder %v9128_v39, %v1818_v17  ;;  %vm1876_vm0 = vcmp.eq.s32.totalorder %v9129_v47, %v1818_v17 }
 0x5cb   : > { %v1643_v41 = vadd.s32 %v6496_v5, %v1640_v3  ;;  %v1980_v38 = vmax.f32 %v1979_v44, %v6624_v0  ;;  %v6634_v14 = vsel %vm1874_vm14, -inf, %v9270_v13  ;;  %v6637_v29 = vsel %vm1875_vm15, -inf, %v9271_v56 }
 0x5cc   : > { %9272 = vst [vmem:[#allocation25_spill] sm:$0xff] %v6637_v29  ;;  %v6642_v26 = vsel %vm1934_vm3, %v1833_v60, %v6416_v40  ;;  %v1622_v18 = vcvt.f32.s32 %v1621_v51  ;;  %v6645_v6 = vsel %vm1876_vm0, -inf, %v5896_v31  ;;  %v2015_v5 = vmax.f32 %v6634_v14, %v6637_v29  ;;  %v9274_v40 = vld [vmem:[#allocation82_spill] sm:$0xff] }
 0x5cd   : > { %9273 = vst [vmem:[#allocation75_spill] sm:$0xff] %v6642_v26  ;;  %v1812_v17 = vshra.s32 %v1643_v41, 16  ;;  %v1828_v3 = vand.u32 65535, %v1643_v41  ;;  %1981 = vmax.xlane.f32.xlu1 %v1980_v38  ;;  %vm1871_vm1 = vcmp.eq.s32.totalorder %v9127_v63, %v1817_v54  ;;  %vm1872_vm4 = vcmp.eq.s32.totalorder %v9128_v39, %v1817_v54  ;;  %v1783_v51 = vpop.xlane.xlu0 %1782  ;;  %v9277_v38 = vld [vmem:[#allocation30_spill] sm:$0xff] }
 0x5ce   : > { %v1625_v44 = vadd.s32 %v6506_v19, %v1622_v18  ;;  %v2016_v13 = vmax.f32 %v2015_v5, %v6645_v6  ;;  %vm1873_vm5 = vcmp.eq.s32.totalorder %v9129_v47, %v1817_v54  ;;  %v6655_v60 = vsel %vm1871_vm1, -inf, %v9274_v40 }
 0x5cf   : > { %9275 = vst [vmem:[#allocation76_spill] sm:$0xff] %v6655_v60  ;;  %v1803_v31 = vcvt.f32.s32 %v6359_v62  ;;  %v6661_v41 = vsel %vm1934_vm3, %v1828_v3, %v6420_v16  ;;  %v6664_v56 = vsel %vm1872_vm4, -inf, %v9277_v38  ;;  %vm1856_vm6 = vcmp.eq.s32.totalorder %v9127_v63, %v1812_v17  ;;  %v9280_v16 = vld [vmem:[#allocation84_spill] sm:$0xff]  ;;  %v9283_v38 = vld [vmem:[#allocation85_spill] sm:$0xff] }
 0x5d0   : > { %9276 = vst [vmem:[#allocation78_spill] sm:$0xff] %v6661_v41  ;;  %9278 = vst [vmem:[#allocation80_spill] sm:$0xff] %v6664_v56  ;;  %v1811_v19 = vshra.s32 %v1625_v44, 16  ;;  %v1827_v18 = vand.u32 65535, %v1625_v44  ;;  %v1784_v5 = vcvt.f32.s32 %v1783_v51  ;;  %2017 = vmax.xlane.f32.xlu0 %v2016_v13  ;;  %v2011_v54 = vmax.f32 %v6655_v60, %v6664_v56  ;;  %v1765_v13 = vpop.xlane.xlu1 %1764 }
 0x5d1   : > { %v6670_v62 = vsel %vm1873_vm5, -inf, %v5916_v24  ;;  %vm1857_vm7 = vcmp.eq.s32.totalorder %v9128_v39, %v1812_v17  ;;  %vm1858_vm8 = vcmp.eq.s32.totalorder %v9129_v47, %v1812_v17  ;;  %v6675_v3 = vsel %vm1856_vm6, -inf, %v9280_v16 }
 0x5d2   : > { %9279 = vst [vmem:[#allocation31_spill] sm:$0xff] %v6670_v62  ;;  %9281 = vst [vmem:[#allocation82_spill] sm:$0xff] %v6675_v3  ;;  %v6680_v40 = vsel %vm1934_vm3, %v1827_v18, %v6424_v11  ;;  %v1787_v44 = vadd.s32 %v6508_v43, %v1784_v5  ;;  %v2012_v51 = vmax.f32 %v2011_v54, %v6670_v62  ;;  %v6685_v24 = vsel %vm1857_vm7, -inf, %v9283_v38  ;;  %v9285_v5 = vld [vmem:[#allocation86_spill] sm:$0xff] }
 0x5d3   : > { %9282 = vst [vmem:[#allocation30_spill] sm:$0xff] %v6680_v40  ;;  %9284 = vst [vmem:[#allocation84_spill] sm:$0xff] %v6685_v24  ;;  %v1766_v41 = vcvt.f32.s32 %v1765_v13  ;;  %v6688_v26 = vsel %vm1858_vm8, -inf, %v5934_v55  ;;  %v1991_v17 = vmax.f32 %v6675_v3, %v6685_v24  ;;  %vm1853_vm9 = vcmp.eq.s32.totalorder %v9127_v63, %v1811_v19  ;;  %v9286_v55 = vld [vmem:[#allocation87_spill] sm:$0xff]  ;;  %v9291_v40 = vld [vmem:[#allocation89_spill] sm:$0xff] }
 0x5d4   : > { %v1820_v16 = vshra.s32 %v1787_v44, 16  ;;  %v1836_v11 = vand.u32 65535, %v1787_v44  ;;  %2013 = vmax.xlane.f32.xlu1 %v2012_v51  ;;  %vm1854_vm10 = vcmp.eq.s32.totalorder %v9128_v39, %v1811_v19  ;;  %vm1855_vm11 = vcmp.eq.s32.totalorder %v9129_v47, %v1811_v19  ;;  %v1657_v19 = vpop.xlane.xlu1 %1656 }
 0x5d5   : > { %v1769_v43 = vadd.s32 %v6527_v35, %v1766_v41  ;;  %v1992_v18 = vmax.f32 %v1991_v17, %v6688_v26  ;;  %v6698_v54 = vsel %vm1853_vm9, -inf, %v9285_v5  ;;  %v6701_v13 = vsel %vm1854_vm10, -inf, %v9286_v55 }
 0x5d6   : > { %v1804_v38 = vshll.u32 %v1803_v31, 16  ;;  %vm1880_vm12 = vcmp.eq.s32.totalorder %v9127_v63, %v1820_v16  ;;  %vm1881_vm13 = vcmp.eq.s32.totalorder %v9128_v39, %v1820_v16  ;;  %v6708_v44 = vsel %vm1934_vm3, %v1836_v11, %v6428_v58  ;;  %v9289_v31 = vld [vmem:[#allocation88_spill] sm:$0xff] }
 0x5d7   : > { %9287 = vst [vmem:[#allocation85_spill] sm:$0xff] %v6708_v44  ;;  %v1819_v35 = vshra.s32 %v1769_v43, 16  ;;  %v1835_v41 = vand.u32 65535, %v1769_v43  ;;  %v1658_v51 = vcvt.f32.s32 %v1657_v19  ;;  %1993 = vmax.xlane.f32.xlu0 %v1992_v18  ;;  %v1987_v17 = vmax.f32 %v6698_v54, %v6701_v13  ;;  %v9294_v18 = vld [vmem:[#allocation92_spill] sm:$0xff] }
 0x5d8   : > { %v6713_v5 = vsel %vm1855_vm11, -inf, %v5949_v48  ;;  %vm1882_vm14 = vcmp.eq.s32.totalorder %v9129_v47, %v1820_v16  ;;  %v6717_v55 = vsel %vm1880_vm12, -inf, %v9289_v31  ;;  %v6720_v50 = vsel %vm1881_vm13, -inf, %v9291_v40  ;;  %v1801_v19 = vpop.xlane.xlu1 %1800 }
 0x5d9   : > { %9288 = vst [vmem:[#allocation86_spill] sm:$0xff] %v6713_v5  ;;  %9290 = vst [vmem:[#allocation87_spill] sm:$0xff] %v6717_v55  ;;  %v6725_v58 = vsel %vm1934_vm3, %v1835_v41, %v6432_v22  ;;  %v1661_v11 = vadd.s32 %v6592_v37, %v1658_v51  ;;  %v1988_v43 = vmax.f32 %v1987_v17, %v6713_v5  ;;  %v6730_v48 = vsel %vm1882_vm14, -inf, %v9294_v18  ;;  %v9296_v37 = vld [vmem:[#allocation91_spill] sm:$0xff]  ;;  %v9298_v18 = vld [vmem:[#allocation90_spill] sm:$0xff] }
 0x5da   : > { %9292 = vst [vmem:[#allocation88_spill] sm:$0xff] %v6720_v50  ;;  %9293 = vst [vmem:[#allocation89_spill] sm:$0xff] %v6725_v58  ;;  %v2023_v16 = vmax.f32 %v6717_v55, %v6720_v50  ;;  %vm1877_vm15 = vcmp.eq.s32.totalorder %v9127_v63, %v1819_v35  ;;  %vm1878_vm0 = vcmp.eq.s32.totalorder %v9128_v39, %v1819_v35  ;;  %v1802_v41 = vcvt.f32.s32 %v1801_v19 }
 0x5db   : > { %9295 = vst [vmem:[#allocation92_spill] sm:$0xff] %v6730_v48  ;;  %vm1879_vm1 = vcmp.eq.s32.totalorder %v9129_v47, %v1819_v35  ;;  %v1813_v40 = vshra.s32 %v1661_v11, 16  ;;  %v1829_v22 = vand.u32 65535, %v1661_v11  ;;  %1989 = vmax.xlane.f32.xlu1 %v1988_v43  ;;  %v6738_v51 = vsel %vm1877_vm15, -inf, %v9296_v37 }
 0x5dc   : > { %v9297_v17 = vand.u32 65535, %v5944_v15  ;;  %v1228_v44 = vand.u32 65535, %v9298_v18  ;;  %v2024_v58 = vmax.f32 %v2023_v16, %v6730_v48  ;;  %v6747_v7 = vsel %vm1878_vm0, -inf, %v5974_v2  ;;  %v9302_v2 = vld [vmem:[#allocation93_spill] sm:$0xff] }
 0x5dd   : > { %9299 = vst [vmem:[#allocation91_spill] sm:$0xff] %v6747_v7  ;;  %v1805_v11 = vadd.s32 %v1804_v38, %v1802_v41  ;;  %v2019_v43 = vmax.f32 %v6738_v51, %v6747_v7  ;;  %vm1859_vm4 = vcmp.eq.s32.totalorder %v9127_v63, %v1813_v40  ;;  %v6757_v15 = vsel %vm1879_vm1, -inf, %v5982_v42  ;;  %v9303_v41 = vld [vmem:[#allocation94_spill] sm:$0xff] }
 0x5de   : > { %v1349_v31 = vsel %vm1325_vm2, %v9297_v17, 0  ;;  %2025 = vmax.xlane.f32.xlu0 %v2024_v58  ;;  %9301 = vst [vmem:[#allocation113_spill] sm:$0xff] %v6757_v15  ;;  %vm1860_vm5 = vcmp.eq.s32.totalorder %v9128_v39, %v1813_v40  ;;  %vm1861_vm6 = vcmp.eq.s32.totalorder %v9129_v47, %v1813_v40  ;;  %v6762_v19 = vsel %vm1859_vm4, -inf, %v9302_v2 }
 0x5df   : > { %v6751_v35 = vsel %vm1934_vm3, %v1829_v22, %v1349_v31  ;;  %v1821_v16 = vshra.s32 %v1805_v11, 16  ;;  %v1837_v22 = vand.u32 65535, %v1805_v11  ;;  %v2020_v38 = vmax.f32 %v2019_v43, %v6757_v15 }
 0x5e0   : > { %9300 = vst [vmem:[#allocation90_spill] sm:$0xff] %v6751_v35  ;;  %v6766_v37 = vsel %vm1860_vm5, -inf, %v9303_v41  ;;  %v1357_v58 = vsel %vm1325_vm2, %v1228_v44, 0  ;;  %v6771_v42 = vsel %vm1861_vm6, -inf, %v5994_v32  ;;  %v9306_v44 = vld [vmem:[#allocation95_spill] sm:$0xff]  ;;  %v9307_v32 = vld [vmem:[#allocation96_spill] sm:$0xff] }
 0x5e1   : > { %9304 = vst [vmem:[#allocation93_spill] sm:$0xff] %v6771_v42  ;;  %v1995_v17 = vmax.f32 %v6762_v19, %v6766_v37  ;;  %vm1883_vm7 = vcmp.eq.s32.totalorder %v9127_v63, %v1821_v16  ;;  %vm1884_vm8 = vcmp.eq.s32.totalorder %v9128_v39, %v1821_v16  ;;  %v6779_v40 = vsel %vm1934_vm3, %v1837_v22, %v1357_v58  ;;  %v9312_v41 = vld [vmem:[#allocation35_spill] sm:$0xff] }
 0x5e2   : > { %9305 = vst [vmem:[#allocation94_spill] sm:$0xff] %v6779_v40  ;;  %2021 = vmax.xlane.f32.xlu1 %v2020_v38  ;;  %vm1885_vm9 = vcmp.eq.s32.totalorder %v9129_v47, %v1821_v16  ;;  %v6784_v18 = vsel %vm1883_vm7, -inf, %v9306_v44  ;;  %v6787_v11 = vsel %vm1884_vm8, -inf, %v9307_v32  ;;  %v9311_v16 = vld [vmem:[#allocation33_spill] sm:$0xff] }
 0x5e3   : > { %v1996_v31 = vmax.f32 %v1995_v17, %v6771_v42  ;;  %9308 = vst [vmem:[#allocation95_spill] sm:$0xff] %v6787_v11  ;;  %v2027_v43 = vmax.f32 %v6784_v18, %v6787_v11  ;;  %v6792_v2 = vsel %vm1885_vm9, -inf, %v6008_v4  ;;  %v9313_v17 = vld [vmem:[#allocation36_spill] sm:$0xff] }
 0x5e4   : > { %9309 = vst [vmem:[#allocation96_spill] sm:$0xff] %v6792_v2 }
 0x5e5   : > { %v2028_v22 = vmax.f32 %v2027_v43, %v6792_v2 }
 0x5e6   : > { %1997 = vmax.xlane.f32.xlu1 %v1996_v31  ;;  %v9314_v31 = vld [vmem:[#allocation38_spill] sm:$0xff] }
 0x5ea   : > { %2029 = vmax.xlane.f32.xlu1 %v2028_v22 }
 0x63d   : > { %v6795_v38 = vpop.xlane.xlu0 %1969 }
 0x63e   : > { %9310 = vst [vmem:[#allocation114_spill] sm:$0xff] %v6795_v38  ;;  %vm2031_vm10 = vcmp.eq.f32.partialorder %v6446_v28, %v6795_v38  ;;  %vm2032_vm11 = vcmp.eq.f32.partialorder %v6449_v33, %v6795_v38  ;;  %vm2033_vm12 = vcmp.eq.f32.partialorder %v9311_v16, %v6795_v38 }
 0x63f   : > { %v2079_v58 = vsel %vm2031_vm10, %v9312_v41, 2147483647  ;;  %v2080_v4 = vsel %vm2032_vm11, %v9313_v17, 2147483647  ;;  %v2081_v44 = vsel %vm2033_vm12, %v9314_v31, 2147483647 }
 0x640   : > { %vm2127_vm13 = vcmp.lt.s32.totalorder %v2079_v58, %v2080_v4 }
 0x641   : > { %v2128_v32 = vsel %vm2127_vm13, %v2079_v58, %v2080_v4  ;;  %v9316_v4 = vld [vmem:[#allocation40_spill] sm:$0xff] }
 0x642   : > { %v6806_v43 = vpop.xlane.xlu0 %2001  ;;  %vm2129_vm14 = vcmp.lt.s32.totalorder %v2128_v32, %v2081_v44 }
 0x643   : > { %9315 = vst [vmem:[#allocation33_spill] sm:$0xff] %v6806_v43  ;;  %vm2055_vm15 = vcmp.eq.f32.partialorder %v6469_v10, %v6806_v43  ;;  %vm2056_vm0 = vcmp.eq.f32.partialorder %v6472_v27, %v6806_v43  ;;  %vm2057_vm1 = vcmp.eq.f32.partialorder %v6482_v59, %v6806_v43  ;;  %v6816_v40 = vsel %vm2129_vm14, %v2128_v32, %v2081_v44 }
 0x644   : > { %v2103_v22 = vsel %vm2055_vm15, %v9312_v41, 2147483647  ;;  %v2104_v38 = vsel %vm2056_vm0, %v9313_v17, 2147483647  ;;  %v2132_v58 = vshra.s32 %v6816_v40, 16 }
 0x645   : > { %vm2271_vm4 = vcmp.lt.s32.totalorder %v2103_v22, %v2104_v38  ;;  %v2105_v31 = vsel %vm2057_vm1, %v9316_v4, 2147483647 }
 0x646   : > { %v2272_v35 = vsel %vm2271_vm4, %v2103_v22, %v2104_v38  ;;  %v6820_v49 = vcvt.s32.f32 %v2132_v58  ;;  %v9319_v22 = vld [vmem:[#allocation44_spill] sm:$0xff] }
 0x647   : > { %vm2273_vm5 = vcmp.lt.s32.totalorder %v2272_v35, %v2105_v31 }
 0x648   : > { %v6822_v10 = vpop.xlane.xlu0 %1977  ;;  %v6824_v27 = vsel %vm2273_vm5, %v2272_v35, %v2105_v31  ;;  %2135 = vmin.xlane.f32.xlu0 %v6820_v49 }
 0x649   : > { %9317 = vst [vmem:[#allocation115_spill] sm:$0xff] %v6822_v10  ;;  %vm2037_vm6 = vcmp.eq.f32.partialorder %v6500_v36, %v6822_v10  ;;  %vm2038_vm7 = vcmp.eq.f32.partialorder %v6503_v57, %v6822_v10  ;;  %vm2039_vm8 = vcmp.eq.f32.partialorder %v6511_v46, %v6822_v10  ;;  %v2276_v32 = vshra.s32 %v6824_v27, 16 }
 0x64a   : > { %v2085_v38 = vsel %vm2037_vm6, %v9312_v41, 2147483647  ;;  %v2086_v44 = vsel %vm2038_vm7, %v9313_v17, 2147483647  ;;  %v2087_v58 = vsel %vm2039_vm8, %v9319_v22, 2147483647 }
 0x64b   : > { %vm2163_vm9 = vcmp.lt.s32.totalorder %v2085_v38, %v2086_v44  ;;  %v6847_v43 = vcvt.s32.f32 %v2276_v32 }
 0x64c   : > { %v6836_v35 = vpop.xlane.xlu1 %1973  ;;  %v2164_v31 = vsel %vm2163_vm9, %v2085_v38, %v2086_v44 }
 0x64d   : > { %9318 = vst [vmem:[#allocation116_spill] sm:$0xff] %v6836_v35  ;;  %vm2034_vm10 = vcmp.eq.f32.partialorder %v6525_v23, %v6836_v35  ;;  %vm2035_vm11 = vcmp.eq.f32.partialorder %v6530_v25, %v6836_v35  ;;  %vm2036_vm12 = vcmp.eq.f32.partialorder %v6534_v61, %v6836_v35  ;;  %vm2165_vm14 = vcmp.lt.s32.totalorder %v2164_v31, %v2087_v58  ;;  %v9321_v23 = vld [vmem:[#allocation43_spill] sm:$0xff] }
 0x64e   : > { %v2082_v10 = vsel %vm2034_vm10, %v9312_v41, 2147483647  ;;  %v2083_v4 = vsel %vm2035_vm11, %v9313_v17, 2147483647  ;;  %2279 = vmin.xlane.f32.xlu0 %v6847_v43  ;;  %v6852_v44 = vsel %vm2165_vm14, %v2164_v31, %v2087_v58  ;;  %v2084_v25 = vsel %vm2036_vm12, %v9321_v23, 2147483647 }
 0x64f   : > { %vm2145_vm13 = vcmp.lt.s32.totalorder %v2082_v10, %v2083_v4  ;;  %v9323_v58 = vld [vmem:[#allocation45_spill] sm:$0xff] }
 0x650   : > { %v6849_v38 = vpop.xlane.xlu0 %2009  ;;  %v2146_v22 = vsel %vm2145_vm13, %v2082_v10, %v2083_v4  ;;  %v2168_v10 = vshra.s32 %v6852_v44, 16 }
 0x651   : > { %9320 = vst [vmem:[#allocation117_spill] sm:$0xff] %v6849_v38  ;;  %vm2061_vm15 = vcmp.eq.f32.partialorder %v6548_v53, %v6849_v38  ;;  %vm2062_vm0 = vcmp.eq.f32.partialorder %v6551_v34, %v6849_v38  ;;  %vm2063_vm1 = vcmp.eq.f32.partialorder %v6554_v9, %v6849_v38  ;;  %vm2147_vm4 = vcmp.lt.s32.totalorder %v2146_v22, %v2084_v25 }
 0x652   : > { %v2109_v32 = vsel %vm2061_vm15, %v9312_v41, 2147483647  ;;  %v2110_v35 = vsel %vm2062_vm0, %v9313_v17, 2147483647  ;;  %v6866_v4 = vsel %vm2147_vm4, %v2146_v22, %v2084_v25  ;;  %v2111_v38 = vsel %vm2063_vm1, %v9323_v58, 2147483647 }
 0x653   : > { %vm2307_vm5 = vcmp.lt.s32.totalorder %v2109_v32, %v2110_v35  ;;  %v6863_v31 = vpop.xlane.xlu1 %2005  ;;  %v6875_v34 = vcvt.s32.f32 %v2168_v10  ;;  %v2150_v25 = vshra.s32 %v6866_v4, 16  ;;  %v9325_v10 = vld [vmem:[#allocation41_spill] sm:$0xff] }
 0x654   : > { %9322 = vst [vmem:[#allocation118_spill] sm:$0xff] %v6863_v31  ;;  %vm2058_vm6 = vcmp.eq.f32.partialorder %v6569_v12, %v6863_v31  ;;  %vm2059_vm7 = vcmp.eq.f32.partialorder %v6572_v45, %v6863_v31  ;;  %vm2060_vm8 = vcmp.eq.f32.partialorder %v6580_v8, %v6863_v31  ;;  %v2308_v22 = vsel %vm2307_vm5, %v2109_v32, %v2110_v35 }
 0x655   : > { %v2106_v23 = vsel %vm2058_vm6, %v9312_v41, 2147483647  ;;  %v2107_v9 = vsel %vm2059_vm7, %v9313_v17, 2147483647  ;;  %2171 = vmin.xlane.f32.xlu0 %v6875_v34  ;;  %vm2309_vm10 = vcmp.lt.s32.totalorder %v2308_v22, %v2111_v38  ;;  %v2108_v58 = vsel %vm2060_vm8, %v9325_v10, 2147483647 }
 0x656   : > { %vm2289_vm9 = vcmp.lt.s32.totalorder %v2106_v23, %v2107_v9  ;;  %v6890_v12 = vcvt.s32.f32 %v2150_v25  ;;  %v6894_v32 = vsel %vm2309_vm10, %v2308_v22, %v2111_v38 }
 0x657   : > { %v6880_v53 = vpop.xlane.xlu0 %1985  ;;  %v2290_v45 = vsel %vm2289_vm9, %v2106_v23, %v2107_v9  ;;  %v2312_v22 = vshra.s32 %v6894_v32, 16 }
 0x658   : > { %9324 = vst [vmem:[#allocation119_spill] sm:$0xff] %v6880_v53  ;;  %vm2043_vm11 = vcmp.eq.f32.partialorder %v6590_v20, %v6880_v53  ;;  %vm2044_vm12 = vcmp.eq.f32.partialorder %v6600_v21, %v6880_v53  ;;  %vm2291_vm14 = vcmp.lt.s32.totalorder %v2290_v45, %v2108_v58  ;;  %vm2045_vm15 = vcmp.eq.f32.partialorder %v6606_v1, %v6880_v53 }
 0x659   : > { %v2091_v31 = vsel %vm2043_vm11, %v9312_v41, 2147483647  ;;  %v2092_v8 = vsel %vm2044_vm12, %v9313_v17, 2147483647  ;;  %2153 = vmin.xlane.f32.xlu1 %v6890_v12  ;;  %v6907_v38 = vsel %vm2291_vm14, %v2290_v45, %v2108_v58  ;;  %v6924_v1 = vcvt.s32.f32 %v2312_v22 }
 0x65a   : > { %vm2199_vm13 = vcmp.lt.s32.totalorder %v2091_v31, %v2092_v8  ;;  %v6892_v35 = vpop.xlane.xlu1 %1981  ;;  %v2294_v53 = vshra.s32 %v6907_v38, 16 }
 0x65b   : > { %9326 = vst [vmem:[#allocation120_spill] sm:$0xff] %v6892_v35  ;;  %vm2040_vm0 = vcmp.eq.f32.partialorder %v6611_v52, %v6892_v35  ;;  %vm2041_vm1 = vcmp.eq.f32.partialorder %v6621_v30, %v6892_v35  ;;  %vm2042_vm4 = vcmp.eq.f32.partialorder %v6624_v0, %v6892_v35  ;;  %v2200_v10 = vsel %vm2199_vm13, %v2091_v31, %v2092_v8  ;;  %v9328_v30 = vld [vmem:[#allocation48_spill] sm:$0xff]  ;;  %v9329_v35 = vld [vmem:[#allocation49_spill] sm:$0xff] }
 0x65c   : > { %v2088_v23 = vsel %vm2040_vm0, %v9312_v41, 2147483647  ;;  %v2089_v9 = vsel %vm2041_vm1, %v9313_v17, 2147483647  ;;  %v2093_v52 = vsel %vm2045_vm15, %v9328_v30, 2147483647  ;;  %v6926_v8 = vcvt.s32.f32 %v2294_v53  ;;  %2315 = vmin.xlane.f32.xlu0 %v6924_v1 }
 0x65d   : > { %vm2181_vm5 = vcmp.lt.s32.totalorder %v2088_v23, %v2089_v9  ;;  %v6909_v25 = vpop.xlane.xlu0 %2017  ;;  %v2090_v0 = vsel %vm2042_vm4, %v9329_v35, 2147483647  ;;  %vm2201_vm10 = vcmp.lt.s32.totalorder %v2200_v10, %v2093_v52  ;;  %v9331_v53 = vld [vmem:[#allocation54_spill] sm:$0xff] }
 0x65e   : > { %9327 = vst [vmem:[#allocation121_spill] sm:$0xff] %v6909_v25  ;;  %vm2067_vm6 = vcmp.eq.f32.partialorder %v6634_v14, %v6909_v25  ;;  %vm2068_vm7 = vcmp.eq.f32.partialorder %v6637_v29, %v6909_v25  ;;  %vm2069_vm8 = vcmp.eq.f32.partialorder %v6645_v6, %v6909_v25  ;;  %v2182_v31 = vsel %vm2181_vm5, %v2088_v23, %v2089_v9 }
 0x65f   : > { %v2115_v45 = vsel %vm2067_vm6, %v9312_v41, 2147483647  ;;  %v2116_v58 = vsel %vm2068_vm7, %v9313_v17, 2147483647  ;;  %v6932_v30 = vsel %vm2201_vm10, %v2200_v10, %v2093_v52  ;;  %vm2183_vm11 = vcmp.lt.s32.totalorder %v2182_v31, %v2090_v0  ;;  %2297 = vmin.xlane.f32.xlu1 %v6926_v8 }
 0x660   : > { %vm2343_vm9 = vcmp.lt.s32.totalorder %v2115_v45, %v2116_v58  ;;  %v2117_v23 = vsel %vm2069_vm8, %v9331_v53, 2147483647  ;;  %v6947_v9 = vsel %vm2183_vm11, %v2182_v31, %v2090_v0 }
 0x661   : > { %v6929_v35 = vpop.xlane.xlu1 %2013  ;;  %v2344_v29 = vsel %vm2343_vm9, %v2115_v45, %v2116_v58  ;;  %v2204_v45 = vshra.s32 %v6932_v30, 16  ;;  %v2186_v58 = vshra.s32 %v6947_v9, 16 }
 0x662   : > { %9330 = vst [vmem:[#allocation122_spill] sm:$0xff] %v6929_v35  ;;  %vm2064_vm12 = vcmp.eq.f32.partialorder %v6655_v60, %v6929_v35  ;;  %vm2065_vm13 = vcmp.eq.f32.partialorder %v6664_v56, %v6929_v35  ;;  %vm2066_vm14 = vcmp.eq.f32.partialorder %v6670_v62, %v6929_v35  ;;  %vm2345_vm0 = vcmp.lt.s32.totalorder %v2344_v29, %v2117_v23  ;;  %v9333_v35 = vld [vmem:[#allocation53_spill] sm:$0xff] }
 0x663   : > { %v2112_v52 = vsel %vm2064_vm12, %v9312_v41, 2147483647  ;;  %v2113_v10 = vsel %vm2065_vm13, %v9313_v17, 2147483647  ;;  %v2114_v62 = vsel %vm2066_vm14, %v9333_v35, 2147483647  ;;  %v6962_v53 = vcvt.s32.f32 %v2204_v45 }
 0x664   : > { %vm2325_vm15 = vcmp.lt.s32.totalorder %v2112_v52, %v2113_v10  ;;  %v6949_v22 = vpop.xlane.xlu0 %1993  ;;  %v6964_v25 = vcvt.s32.f32 %v2186_v58  ;;  %v6966_v56 = vsel %vm2345_vm0, %v2344_v29, %v2117_v23  ;;  %v9335_v45 = vld [vmem:[#allocation58_spill] sm:$0xff] }
 0x665   : > { %9332 = vst [vmem:[#allocation123_spill] sm:$0xff] %v6949_v22  ;;  %vm2049_vm1 = vcmp.eq.f32.partialorder %v6675_v3, %v6949_v22  ;;  %vm2050_vm4 = vcmp.eq.f32.partialorder %v6685_v24, %v6949_v22  ;;  %vm2051_vm5 = vcmp.eq.f32.partialorder %v6688_v26, %v6949_v22  ;;  %v2326_v35 = vsel %vm2325_vm15, %v2112_v52, %v2113_v10 }
 0x666   : > { %v2097_v0 = vsel %vm2049_vm1, %v9312_v41, 2147483647  ;;  %v2098_v31 = vsel %vm2050_vm4, %v9313_v17, 2147483647  ;;  %2207 = vmin.xlane.f32.xlu0 %v6962_v53  ;;  %v2348_v24 = vshra.s32 %v6966_v56, 16  ;;  %vm2327_vm7 = vcmp.lt.s32.totalorder %v2326_v35, %v2114_v62  ;;  %2189 = vmin.xlane.f32.xlu1 %v6964_v25 }
 0x667   : > { %vm2235_vm6 = vcmp.lt.s32.totalorder %v2097_v0, %v2098_v31  ;;  %v2099_v29 = vsel %vm2051_vm5, %v9335_v45, 2147483647 }
 0x668   : > { %v6968_v60 = vpop.xlane.xlu1 %1989  ;;  %v2236_v3 = vsel %vm2235_vm6, %v2097_v0, %v2098_v31  ;;  %v6983_v10 = vcvt.s32.f32 %v2348_v24  ;;  %v6987_v0 = vsel %vm2327_vm7, %v2326_v35, %v2114_v62 }
 0x669   : > { %9334 = vst [vmem:[#allocation124_spill] sm:$0xff] %v6968_v60  ;;  %vm2046_vm8 = vcmp.eq.f32.partialorder %v6698_v54, %v6968_v60  ;;  %vm2047_vm9 = vcmp.eq.f32.partialorder %v6701_v13, %v6968_v60  ;;  %vm2237_vm11 = vcmp.lt.s32.totalorder %v2236_v3, %v2099_v29  ;;  %vm2048_vm12 = vcmp.eq.f32.partialorder %v6713_v5, %v6968_v60 }
 0x66a   : > { %v2094_v23 = vsel %vm2046_vm8, %v9312_v41, 2147483647  ;;  %v2095_v52 = vsel %vm2047_vm9, %v9313_v17, 2147483647  ;;  %2351 = vmin.xlane.f32.xlu0 %v6983_v10  ;;  %v7000_v35 = vsel %vm2237_vm11, %v2236_v3, %v2099_v29  ;;  %v2330_v60 = vshra.s32 %v6987_v0, 16 }
 0x66b   : > { %vm2217_vm10 = vcmp.lt.s32.totalorder %v2094_v23, %v2095_v52  ;;  %v6985_v58 = vpop.xlane.xlu0 %2025  ;;  %v2240_v45 = vshra.s32 %v7000_v35, 16 }
 0x66c   : > { %9336 = vst [vmem:[#allocation125_spill] sm:$0xff] %v6985_v58  ;;  %vm2073_vm13 = vcmp.eq.f32.partialorder %v6717_v55, %v6985_v58  ;;  %vm2074_vm14 = vcmp.eq.f32.partialorder %v6720_v50, %v6985_v58  ;;  %vm2075_vm15 = vcmp.eq.f32.partialorder %v6730_v48, %v6985_v58  ;;  %v2218_v22 = vsel %vm2217_vm10, %v2094_v23, %v2095_v52  ;;  %v9338_v50 = vld [vmem:[#allocation55_spill] sm:$0xff]  ;;  %v9339_v58 = vld [vmem:[#allocation61_spill] sm:$0xff] }
 0x66d   : > { %v2121_v24 = vsel %vm2073_vm13, %v9312_v41, 2147483647  ;;  %v2122_v62 = vsel %vm2074_vm14, %v9313_v17, 2147483647  ;;  %v2096_v55 = vsel %vm2048_vm12, %v9338_v50, 2147483647  ;;  %v7017_v5 = vcvt.s32.f32 %v2330_v60 }
 0x66e   : > { %vm2379_vm0 = vcmp.lt.s32.totalorder %v2121_v24, %v2122_v62  ;;  %v2123_v48 = vsel %vm2075_vm15, %v9339_v58, 2147483647  ;;  %v7019_v23 = vcvt.s32.f32 %v2240_v45  ;;  %vm2219_vm7 = vcmp.lt.s32.totalorder %v2218_v22, %v2096_v55 }
 0x66f   : > { %v7002_v31 = vpop.xlane.xlu1 %2021  ;;  %v2380_v52 = vsel %vm2379_vm0, %v2121_v24, %v2122_v62  ;;  %2333 = vmin.xlane.f32.xlu1 %v7017_v5  ;;  %v7025_v50 = vsel %vm2219_vm7, %v2218_v22, %v2096_v55 }
 0x670   : > { %9337 = vst [vmem:[#allocation126_spill] sm:$0xff] %v7002_v31  ;;  %vm2070_vm1 = vcmp.eq.f32.partialorder %v6738_v51, %v7002_v31  ;;  %vm2071_vm4 = vcmp.eq.f32.partialorder %v6747_v7, %v7002_v31  ;;  %vm2072_vm5 = vcmp.eq.f32.partialorder %v6757_v15, %v7002_v31  ;;  %vm2381_vm8 = vcmp.lt.s32.totalorder %v2380_v52, %v2123_v48  ;;  %v9341_v15 = vld [vmem:[#allocation59_spill] sm:$0xff] }
 0x671   : > { %v2118_v3 = vsel %vm2070_vm1, %v9312_v41, 2147483647  ;;  %v2119_v29 = vsel %vm2071_vm4, %v9313_v17, 2147483647  ;;  %v2120_v7 = vsel %vm2072_vm5, %v9341_v15, 2147483647  ;;  %2243 = vmin.xlane.f32.xlu0 %v7019_v23  ;;  %v7037_v22 = vsel %vm2381_vm8, %v2380_v52, %v2123_v48 }
 0x672   : > { %vm2361_vm6 = vcmp.lt.s32.totalorder %v2118_v3, %v2119_v29  ;;  %v2222_v45 = vshra.s32 %v7025_v50, 16  ;;  %v2384_v24 = vshra.s32 %v7037_v22, 16  ;;  %v9343_v48 = vld [vmem:[#allocation62_spill] sm:$0xff] }
 0x673   : > { %v7023_v58 = vpop.xlane.xlu1 %1997  ;;  %v2362_v31 = vsel %vm2361_vm6, %v2118_v3, %v2119_v29 }
 0x674   : > { %9340 = vst [vmem:[#allocation127_spill] sm:$0xff] %v7023_v58  ;;  %vm2052_vm9 = vcmp.eq.f32.partialorder %v6762_v19, %v7023_v58  ;;  %vm2053_vm10 = vcmp.eq.f32.partialorder %v6766_v37, %v7023_v58  ;;  %vm2054_vm11 = vcmp.eq.f32.partialorder %v6771_v42, %v7023_v58  ;;  %vm2363_vm13 = vcmp.lt.s32.totalorder %v2362_v31, %v2120_v7 }
 0x675   : > { %v2100_v60 = vsel %vm2052_vm9, %v9312_v41, 2147483647  ;;  %v2101_v55 = vsel %vm2053_vm10, %v9313_v17, 2147483647  ;;  %v7043_v3 = vsel %vm2363_vm13, %v2362_v31, %v2120_v7  ;;  %v7045_v15 = vcvt.s32.f32 %v2222_v45 }
 0x676   : > { %vm2253_vm12 = vcmp.lt.s32.totalorder %v2100_v60, %v2101_v55  ;;  %v2102_v52 = vsel %vm2054_vm11, %v9343_v48, 2147483647  ;;  %v7057_v7 = vcvt.s32.f32 %v2384_v24  ;;  %v2366_v31 = vshra.s32 %v7043_v3, 16 }
 0x677   : > { %v7041_v62 = vpop.xlane.xlu1 %2029  ;;  %v2254_v29 = vsel %vm2253_vm12, %v2100_v60, %v2101_v55  ;;  %2225 = vmin.xlane.f32.xlu1 %v7045_v15  ;;  %v9344_v60 = vld [vmem:[#allocation64_spill] sm:$0xff] }
 0x678   : > { %9342 = vst [vmem:[#allocation128_spill] sm:$0xff] %v7041_v62  ;;  %vm2076_vm14 = vcmp.eq.f32.partialorder %v6784_v18, %v7041_v62  ;;  %vm2077_vm15 = vcmp.eq.f32.partialorder %v6787_v11, %v7041_v62  ;;  %vm2078_vm0 = vcmp.eq.f32.partialorder %v6792_v2, %v7041_v62  ;;  %vm2255_vm4 = vcmp.lt.s32.totalorder %v2254_v29, %v2102_v52 }
 0x679   : > { %v2124_v58 = vsel %vm2076_vm14, %v9312_v41, 2147483647  ;;  %v2125_v42 = vsel %vm2077_vm15, %v9313_v17, 2147483647  ;;  %v2126_v55 = vsel %vm2078_vm0, %v9344_v60, 2147483647  ;;  %v7061_v45 = vsel %vm2255_vm4, %v2254_v29, %v2102_v52  ;;  %2387 = vmin.xlane.f32.xlu0 %v7057_v7 }
 0x67a   : > { %vm2397_vm1 = vcmp.lt.s32.totalorder %v2124_v58, %v2125_v42  ;;  %v7064_v48 = vcvt.s32.f32 %v2366_v31  ;;  %v2258_v62 = vshra.s32 %v7061_v45, 16  ;;  %v2149_v2 = vand.u32 65535, %v6866_v4 }
 0x67b   : > { %v2398_v11 = vsel %vm2397_vm1, %v2124_v58, %v2125_v42  ;;  %v2131_v42 = vand.u32 65535, %v6816_v40  ;;  %v2167_v40 = vand.u32 65535, %v6852_v44  ;;  %v2293_v44 = vand.u32 65535, %v6907_v38 }
 0x67c   : > { %vm2399_vm5 = vcmp.lt.s32.totalorder %v2398_v11, %v2126_v55  ;;  %2369 = vmin.xlane.f32.xlu1 %v7064_v48  ;;  %v7070_v24 = vcvt.s32.f32 %v2258_v62  ;;  %v2275_v62 = vand.u32 65535, %v6824_v27  ;;  %v2185_v38 = vand.u32 65535, %v6947_v9 }
 0x67d   : > { %v7067_v17 = vsel %vm2399_vm5, %v2398_v11, %v2126_v55  ;;  %v2133_v52 = vcvt.s32.f32 %v2131_v42  ;;  %v2169_v42 = vcvt.s32.f32 %v2167_v40 }
 0x67e   : > { %v2402_v41 = vshra.s32 %v7067_v17, 16  ;;  %v2277_v55 = vcvt.s32.f32 %v2275_v62 }
 0x680   : > { %2261 = vmin.xlane.f32.xlu1 %v7070_v24  ;;  %v7074_v29 = vcvt.s32.f32 %v2402_v41 }
 0x684   : > { %2405 = vmin.xlane.f32.xlu1 %v7074_v29 }
 0x6d5   : > { %v7078_v58 = vpop.xlane.xlu0 %2135 }
 0x6d6   : > { %vm2137_vm6 = vcmp.eq.f32.partialorder %v6820_v49, %v7078_v58 }
 0x6d7   : > { %v2138_v11 = vsel %vm2137_vm6, %v2133_v52, inf  ;;  %v2151_v52 = vcvt.s32.f32 %v2149_v2 }
 0x6d8   : > { %2139 = vmin.xlane.f32.xlu0 %v2138_v11  ;;  %v2311_v11 = vand.u32 65535, %v6894_v32  ;;  %v2203_v32 = vand.u32 65535, %v6932_v30 }
 0x6da   : > { %v2313_v4 = vcvt.s32.f32 %v2311_v11  ;;  %v2205_v40 = vcvt.s32.f32 %v2203_v32  ;;  %v2365_v32 = vand.u32 65535, %v7043_v3 }
 0x6db   : > { %v7083_v31 = vpop.xlane.xlu0 %2279 }
 0x6dc   : > { %vm2281_vm7 = vcmp.eq.f32.partialorder %v6847_v43, %v7083_v31 }
 0x6dd   : > { %v2282_v41 = vsel %vm2281_vm7, %v2277_v55, inf  ;;  %v2295_v55 = vcvt.s32.f32 %v2293_v44 }
 0x6de   : > { %2283 = vmin.xlane.f32.xlu0 %v2282_v41 }
 0x6e2   : > { %v7088_v60 = vpop.xlane.xlu0 %2171 }
 0x6e3   : > { %vm2173_vm8 = vcmp.eq.f32.partialorder %v6875_v34, %v7088_v60 }
 0x6e4   : > { %v2174_v49 = vsel %vm2173_vm8, %v2169_v42, inf  ;;  %v2347_v42 = vand.u32 65535, %v6966_v56  ;;  %vm2543_vm8 = vcmp.eq.s32.totalorder %v9127_v63, 2 }
 0x6e5   : > { %2175 = vmin.xlane.f32.xlu0 %v2174_v49  ;;  %v2187_v49 = vcvt.s32.f32 %v2185_v38 }
 0x6e6   : > { %v7093_v27 = vpop.xlane.xlu1 %2153  ;;  %v2349_v9 = vcvt.s32.f32 %v2347_v42  ;;  %v2257_v42 = vand.u32 65535, %v7061_v45  ;;  %v2142_v45 = vcvt.f32.s32 %v7078_v58 }
 0x6e7   : > { %vm2155_vm9 = vcmp.eq.f32.partialorder %v6890_v12, %v7093_v27 }
 0x6e8   : > { %v2156_v43 = vsel %vm2155_vm9, %v2151_v52, inf }
 0x6e9   : > { %2157 = vmin.xlane.f32.xlu1 %v2156_v43  ;;  %v7099_v62 = vpop.xlane.xlu0 %2315  ;;  %v2329_v43 = vand.u32 65535, %v6987_v0  ;;  %v2221_v0 = vand.u32 65535, %v7025_v50 }
 0x6ea   : > { %vm2317_vm10 = vcmp.eq.f32.partialorder %v6924_v1, %v7099_v62 }
 0x6eb   : > { %v2318_v2 = vsel %vm2317_vm10, %v2313_v4, inf  ;;  %v2331_v44 = vcvt.s32.f32 %v2329_v43  ;;  %v2143_v43 = vshll.u32 %v2142_v45, 16  ;;  %v2322_v45 = vcvt.f32.s32 %v7099_v62 }
 0x6ec   : > { %v7103_v34 = vpop.xlane.xlu1 %2297  ;;  %2319 = vmin.xlane.f32.xlu0 %v2318_v2 }
 0x6ed   : > { %vm2299_vm11 = vcmp.eq.f32.partialorder %v6926_v8, %v7103_v34 }
 0x6ee   : > { %v2300_v12 = vsel %vm2299_vm11, %v2295_v55, inf }
 0x6ef   : > { %2301 = vmin.xlane.f32.xlu1 %v2300_v12  ;;  %v2223_v12 = vcvt.s32.f32 %v2221_v0 }
 0x6f3   : > { %v7109_v41 = vpop.xlane.xlu0 %2207  ;;  %v7114_v1 = vpop.xlane.xlu1 %2189 }
 0x6f4   : > { %vm2209_vm12 = vcmp.eq.f32.partialorder %v6962_v53, %v7109_v41  ;;  %vm2191_vm13 = vcmp.eq.f32.partialorder %v6964_v25, %v7114_v1  ;;  %v2239_v53 = vand.u32 65535, %v7000_v35  ;;  %v2383_v35 = vand.u32 65535, %v7037_v22 }
 0x6f5   : > { %v2210_v8 = vsel %vm2209_vm12, %v2205_v40, inf  ;;  %v2192_v30 = vsel %vm2191_vm13, %v2187_v49, inf  ;;  %v2367_v22 = vcvt.s32.f32 %v2365_v32  ;;  %v2259_v49 = vcvt.s32.f32 %v2257_v42 }
 0x6f6   : > { %2211 = vmin.xlane.f32.xlu0 %v2210_v8  ;;  %2193 = vmin.xlane.f32.xlu1 %v2192_v30  ;;  %v2241_v4 = vcvt.s32.f32 %v2239_v53  ;;  %v2385_v40 = vcvt.s32.f32 %v2383_v35  ;;  %v2401_v8 = vand.u32 65535, %v7067_v17  ;;  %v2286_v17 = vcvt.f32.s32 %v7083_v31 }
 0x6f7   : > { %v7118_v52 = vpop.xlane.xlu0 %2351 }
 0x6f8   : > { %vm2353_vm14 = vcmp.eq.f32.partialorder %v6983_v10, %v7118_v52  ;;  %v2287_v58 = vshll.u32 %v2286_v17, 16 }
 0x6f9   : > { %v2354_v56 = vsel %vm2353_vm14, %v2349_v9, inf  ;;  %v2403_v9 = vcvt.s32.f32 %v2401_v8  ;;  %v9349_v8 = vld [vmem:[#allocation20_spill] sm:$0xff] }
 0x6fa   : > { %2355 = vmin.xlane.f32.xlu0 %v2354_v56 }
 0x6fc   : > { %v7124_v11 = vpop.xlane.xlu1 %2333 }
 0x6fd   : > { %vm2335_vm15 = vcmp.eq.f32.partialorder %v7017_v5, %v7124_v11 }
 0x6fe   : > { %v7128_v25 = vpop.xlane.xlu0 %2243  ;;  %v2336_v55 = vsel %vm2335_vm15, %v2331_v44, inf }
 0x6ff   : > { %vm2245_vm0 = vcmp.eq.f32.partialorder %v7019_v23, %v7128_v25  ;;  %2337 = vmin.xlane.f32.xlu1 %v2336_v55  ;;  %v9345_v55 = vld [vmem:[#allocation32_spill] sm:$0xff] }
 0x700   : > { %v2246_v10 = vsel %vm2245_vm0, %v2241_v4, inf }
 0x701   : > { %2247 = vmin.xlane.f32.xlu0 %v2246_v10 }
 0x704   : > { %v7134_v2 = vpop.xlane.xlu1 %2225 }
 0x705   : > { %vm2227_vm1 = vcmp.eq.f32.partialorder %v7045_v15, %v7134_v2 }
 0x706   : > { %v2228_v5 = vsel %vm2227_vm1, %v2223_v12, inf  ;;  %v7139_v38 = vpop.xlane.xlu0 %2387  ;;  %v2178_v12 = vcvt.f32.s32 %v7088_v60 }
 0x707   : > { %2229 = vmin.xlane.f32.xlu1 %v2228_v5  ;;  %vm2389_vm4 = vcmp.eq.f32.partialorder %v7057_v7, %v7139_v38 }
 0x708   : > { %v2390_v23 = vsel %vm2389_vm4, %v2385_v40, inf }
 0x709   : > { %v7143_v50 = vpop.xlane.xlu1 %2369  ;;  %2391 = vmin.xlane.f32.xlu0 %v2390_v23 }
 0x70a   : > { %vm2371_vm5 = vcmp.eq.f32.partialorder %v7064_v48, %v7143_v50 }
 0x70b   : > { %v2372_v3 = vsel %vm2371_vm5, %v2367_v22, inf }
 0x70c   : > { %2373 = vmin.xlane.f32.xlu1 %v2372_v3  ;;  %v2179_v3 = vshll.u32 %v2178_v12, 16  ;;  %v9351_v12 = vld [vmem:[#allocation70_spill] sm:$0xff] }
 0x70d   : > { %v7148_v15 = vpop.xlane.xlu1 %2261 }
 0x70e   : > { %vm2263_vm6 = vcmp.eq.f32.partialorder %v7070_v24, %v7148_v15 }
 0x70f   : > { %v2264_v7 = vsel %vm2263_vm6, %v2259_v49, inf }
 0x710   : > { %2265 = vmin.xlane.f32.xlu1 %v2264_v7 }
 0x711   : > { %v7153_v30 = vpop.xlane.xlu1 %2405 }
 0x712   : > { %vm2407_vm7 = vcmp.eq.f32.partialorder %v7074_v29, %v7153_v30 }
 0x713   : > { %v2408_v48 = vsel %vm2407_vm7, %v2403_v9, inf  ;;  %v9350_v9 = vld [vmem:[#allocation22_spill] sm:$0xff] }
 0x714   : > { %2409 = vmin.xlane.f32.xlu1 %v2408_v48 }
 0x765   : > { %v2140_v56 = vpop.xlane.xlu0 %2139 }
 0x766   : > { %v2141_v53 = vcvt.f32.s32 %v2140_v56  ;;  %v2304_v56 = vcvt.f32.s32 %v7103_v34  ;;  %v2196_v34 = vcvt.f32.s32 %v7114_v1  ;;  %v2358_v1 = vcvt.f32.s32 %v7118_v52 }
 0x768   : > { %v2144_v44 = vadd.s32 %v2143_v43, %v2141_v53  ;;  %v2305_v62 = vshll.u32 %v2304_v56, 16  ;;  %v2359_v56 = vshll.u32 %v2358_v1, 16 }
 0x76a   : > { %v2415_v4 = vshra.s32 %v2144_v44, 16  ;;  %v2431_v24 = vand.u32 65535, %v2144_v44 }
 0x76b   : > { %v2284_v29 = vpop.xlane.xlu0 %2283 }
 0x76c   : > { %v7163_v10 = vsel %vm2543_vm8, %v2431_v24, %v9345_v55  ;;  %vm2447_vm9 = vcmp.eq.s32.totalorder %v9127_v63, %v2415_v4  ;;  %vm2448_vm10 = vcmp.eq.s32.totalorder %v9128_v39, %v2415_v4  ;;  %vm2449_vm11 = vcmp.eq.s32.totalorder %v9129_v47, %v2415_v4 }
 0x76d   : > { %9346 = vst [vmem:[#allocation32_spill] sm:$0xff] %v7163_v10  ;;  %v2285_v0 = vcvt.f32.s32 %v2284_v29  ;;  %v7169_v31 = vsel %vm2447_vm9, -inf, %v6446_v28  ;;  %v7172_v35 = vsel %vm2448_vm10, -inf, %v6449_v33  ;;  %v7178_v40 = vsel %vm2449_vm11, -inf, %v9311_v16  ;;  %v9347_v28 = vld [vmem:[#allocation19_spill] sm:$0xff]  ;;  %v9439_v10 = vld [vmem:[#allocation44_spill] sm:$0xff] }
 0x76e   : > { %v2576_v32 = vmax.f32 %v7169_v31, %v7172_v35  ;;  %v2160_v16 = vcvt.f32.s32 %v7093_v27  ;;  %v2214_v27 = vcvt.f32.s32 %v7109_v41 }
 0x76f   : > { %v2288_v5 = vadd.s32 %v2287_v58, %v2285_v0  ;;  %v2323_v0 = vshll.u32 %v2322_v45, 16 }
 0x770   : > { %v2577_v23 = vmax.f32 %v2576_v32, %v7178_v40  ;;  %v2161_v24 = vshll.u32 %v2160_v16, 16  ;;  %v2215_v41 = vshll.u32 %v2214_v27, 16  ;;  %v2232_v16 = vcvt.f32.s32 %v7134_v2 }
 0x771   : > { %v2423_v22 = vshra.s32 %v2288_v5, 16  ;;  %v2439_v42 = vand.u32 65535, %v2288_v5 }
 0x772   : > { %2578 = vmax.xlane.f32.xlu0 %v2577_v23  ;;  %v2176_v49 = vpop.xlane.xlu0 %2175 }
 0x773   : > { %v7184_v33 = vsel %vm2543_vm8, %v2439_v42, %v9347_v28  ;;  %vm2471_vm12 = vcmp.eq.s32.totalorder %v9127_v63, %v2423_v22  ;;  %vm2472_vm13 = vcmp.eq.s32.totalorder %v9128_v39, %v2423_v22  ;;  %vm2473_vm14 = vcmp.eq.s32.totalorder %v9129_v47, %v2423_v22 }
 0x774   : > { %9348 = vst [vmem:[#allocation19_spill] sm:$0xff] %v7184_v33  ;;  %v2177_v60 = vcvt.f32.s32 %v2176_v49  ;;  %v7191_v7 = vsel %vm2471_vm12, -inf, %v9349_v8  ;;  %v7194_v48 = vsel %vm2472_vm13, -inf, %v9350_v9  ;;  %v7201_v44 = vsel %vm2473_vm14, -inf, %v6482_v59  ;;  %v9353_v8 = vld [vmem:[#allocation27_spill] sm:$0xff] }
 0x775   : > { %v2608_v43 = vmax.f32 %v7191_v7, %v7194_v48  ;;  %v2340_v28 = vcvt.f32.s32 %v7124_v11  ;;  %v2250_v49 = vcvt.f32.s32 %v7128_v25  ;;  %v9355_v25 = vld [vmem:[#allocation73_spill] sm:$0xff] }
 0x776   : > { %v2180_v53 = vadd.s32 %v2179_v3, %v2177_v60  ;;  %v2158_v17 = vpop.xlane.xlu1 %2157 }
 0x777   : > { %v2609_v4 = vmax.f32 %v2608_v43, %v7201_v44  ;;  %v2159_v58 = vcvt.f32.s32 %v2158_v17  ;;  %v7244_v17 = vshll.u32 %v2340_v28, 16 }
 0x778   : > { %v2417_v55 = vshra.s32 %v2180_v53, 16  ;;  %v2433_v29 = vand.u32 65535, %v2180_v53  ;;  %v9356_v53 = vld [vmem:[#allocation74_spill] sm:$0xff] }
 0x779   : > { %2610 = vmax.xlane.f32.xlu0 %v2609_v4  ;;  %v2162_v59 = vadd.s32 %v2161_v24, %v2159_v58  ;;  %v2320_v60 = vpop.xlane.xlu0 %2319  ;;  %v7246_v4 = vshll.u32 %v2250_v49, 16 }
 0x77a   : > { %v7209_v32 = vsel %vm2543_vm8, %v2433_v29, %v9351_v12  ;;  %vm2453_vm15 = vcmp.eq.s32.totalorder %v9127_v63, %v2417_v55  ;;  %vm2454_vm0 = vcmp.eq.s32.totalorder %v9128_v39, %v2417_v55  ;;  %vm2455_vm1 = vcmp.eq.s32.totalorder %v9129_v47, %v2417_v55 }
 0x77b   : > { %9352 = vst [vmem:[#allocation20_spill] sm:$0xff] %v7209_v32  ;;  %v7215_v5 = vsel %vm2453_vm15, -inf, %v6500_v36  ;;  %v7218_v23 = vsel %vm2454_vm0, -inf, %v6503_v57  ;;  %v2416_v22 = vshra.s32 %v2162_v59, 16  ;;  %v2432_v42 = vand.u32 65535, %v2162_v59 }
 0x77c   : > { %v2584_v3 = vmax.f32 %v7215_v5, %v7218_v23  ;;  %v7227_v36 = vsel %vm2455_vm1, -inf, %v6511_v46  ;;  %v2321_v52 = vcvt.f32.s32 %v2320_v60  ;;  %v2302_v9 = vpop.xlane.xlu1 %2301  ;;  %v2197_v46 = vshll.u32 %v2196_v34, 16 }
 0x77d   : > { %v7232_v57 = vsel %vm2543_vm8, %v2432_v42, %v9353_v8  ;;  %vm2450_vm4 = vcmp.eq.s32.totalorder %v9127_v63, %v2416_v22  ;;  %v2303_v11 = vcvt.f32.s32 %v2302_v9  ;;  %vm2451_vm5 = vcmp.eq.s32.totalorder %v9128_v39, %v2416_v22  ;;  %v9357_v42 = vld [vmem:[#allocation77_spill] sm:$0xff] }
 0x77e   : > { %9354 = vst [vmem:[#allocation22_spill] sm:$0xff] %v7232_v57  ;;  %v2585_v45 = vmax.f32 %v2584_v3, %v7227_v36  ;;  %vm2452_vm6 = vcmp.eq.s32.totalorder %v9129_v47, %v2416_v22  ;;  %v7239_v2 = vsel %vm2450_vm4, -inf, %v9355_v25  ;;  %v2324_v43 = vadd.s32 %v2323_v0, %v2321_v52  ;;  %v9362_v8 = vld [vmem:[#allocation81_spill] sm:$0xff] }
 0x77f   : > { %v7242_v27 = vsel %vm2451_vm5, -inf, %v9356_v53  ;;  %v2306_v24 = vadd.s32 %v2305_v62, %v2303_v11  ;;  %v7250_v29 = vshll.u32 %v2232_v16, 16  ;;  %v7253_v34 = vsel %vm2452_vm6, -inf, %v6534_v61  ;;  %v9359_v61 = vld [vmem:[#allocation18_spill] sm:$0xff]  ;;  %v9361_v16 = vld [vmem:[#allocation79_spill] sm:$0xff] }
 0x780   : > { %2586 = vmax.xlane.f32.xlu0 %v2585_v45  ;;  %v2580_v55 = vmax.f32 %v7239_v2, %v7242_v27  ;;  %v2425_v58 = vshra.s32 %v2324_v43, 16  ;;  %v2441_v12 = vand.u32 65535, %v2324_v43  ;;  %v2394_v0 = vcvt.f32.s32 %v7139_v38  ;;  %v9363_v45 = vld [vmem:[#allocation83_spill] sm:$0xff]  ;;  %v9364_v53 = vld [vmem:[#allocation34_spill] sm:$0xff] }
 0x781   : > { %v2424_v59 = vshra.s32 %v2306_v24, 16  ;;  %v2440_v1 = vand.u32 65535, %v2306_v24 }
 0x782   : > { %v2581_v22 = vmax.f32 %v2580_v55, %v7253_v34  ;;  %v7260_v62 = vsel %vm2543_vm8, %v2441_v12, %v9357_v42  ;;  %vm2477_vm7 = vcmp.eq.s32.totalorder %v9127_v63, %v2425_v58  ;;  %vm2478_vm9 = vcmp.eq.s32.totalorder %v9128_v39, %v2425_v58 }
 0x783   : > { %9358 = vst [vmem:[#allocation70_spill] sm:$0xff] %v7260_v62  ;;  %v2212_v3 = vpop.xlane.xlu0 %2211  ;;  %vm2479_vm10 = vcmp.eq.s32.totalorder %v9129_v47, %v2425_v58  ;;  %v7268_v38 = vsel %vm2543_vm8, %v2440_v1, %v9359_v61  ;;  %v2194_v49 = vpop.xlane.xlu1 %2193  ;;  %v7271_v60 = vsel %vm2477_vm7, -inf, %v9361_v16  ;;  %v7274_v52 = vsel %vm2478_vm9, -inf, %v9362_v8 }
 0x784   : > { %9360 = vst [vmem:[#allocation27_spill] sm:$0xff] %v7268_v38  ;;  %v2213_v28 = vcvt.f32.s32 %v2212_v3  ;;  %2582 = vmax.xlane.f32.xlu1 %v2581_v22  ;;  %v2195_v9 = vcvt.f32.s32 %v2194_v49  ;;  %v7277_v11 = vsel %vm2479_vm10, -inf, %v9363_v45  ;;  %v2616_v25 = vmax.f32 %v7271_v60, %v7274_v52  ;;  %v9365_v22 = vld [vmem:[#allocation21_spill] sm:$0xff] }
 0x785   : > { %vm2474_vm11 = vcmp.eq.s32.totalorder %v9127_v63, %v2424_v59  ;;  %vm2475_vm12 = vcmp.eq.s32.totalorder %v9128_v39, %v2424_v59  ;;  %vm2476_vm13 = vcmp.eq.s32.totalorder %v9129_v47, %v2424_v59  ;;  %v7287_v55 = vshll.u32 %v2394_v0, 16  ;;  %v9366_v0 = vld [vmem:[#allocation69_spill] sm:$0xff] }
 0x786   : > { %v2216_v43 = vadd.s32 %v2215_v41, %v2213_v28  ;;  %v7285_v24 = vsel %vm2474_vm11, -inf, %v9364_v53  ;;  %v2198_v58 = vadd.s32 %v2197_v46, %v2195_v9  ;;  %v2617_v1 = vmax.f32 %v2616_v25, %v7277_v11  ;;  %v9367_v46 = vld [vmem:[#allocation23_spill] sm:$0xff] }
 0x787   : > { %v2356_v12 = vpop.xlane.xlu0 %2355  ;;  %v7291_v42 = vsel %vm2475_vm12, -inf, %v9365_v22  ;;  %v2376_v59 = vcvt.f32.s32 %v7143_v50  ;;  %v7297_v8 = vsel %vm2476_vm13, -inf, %v9366_v0 }
 0x788   : > { %v2419_v3 = vshra.s32 %v2216_v43, 16  ;;  %v2435_v61 = vand.u32 65535, %v2216_v43  ;;  %v2357_v49 = vcvt.f32.s32 %v2356_v12  ;;  %v2612_v41 = vmax.f32 %v7285_v24, %v7291_v42  ;;  %2618 = vmax.xlane.f32.xlu0 %v2617_v1  ;;  %v9369_v43 = vld [vmem:[#allocation71_spill] sm:$0xff]  ;;  %v9371_v1 = vld [vmem:[#allocation26_spill] sm:$0xff] }
 0x789   : > { %v2418_v28 = vshra.s32 %v2198_v58, 16  ;;  %v2434_v16 = vand.u32 65535, %v2198_v58 }
 0x78a   : > { %v7302_v9 = vsel %vm2543_vm8, %v2435_v61, %v9367_v46  ;;  %v2360_v45 = vadd.s32 %v2359_v56, %v2357_v49  ;;  %v2613_v25 = vmax.f32 %v2612_v41, %v7297_v8  ;;  %vm2459_vm14 = vcmp.eq.s32.totalorder %v9127_v63, %v2419_v3  ;;  %v9375_v46 = vld [vmem:[#allocation29_spill] sm:$0xff] }
 0x78b   : > { %9368 = vst [vmem:[#allocation73_spill] sm:$0xff] %v7302_v9  ;;  %v7309_v50 = vsel %vm2543_vm8, %v2434_v16, %v9369_v43  ;;  %vm2460_vm15 = vcmp.eq.s32.totalorder %v9128_v39, %v2419_v3  ;;  %vm2461_vm0 = vcmp.eq.s32.totalorder %v9129_v47, %v2419_v3  ;;  %v7314_v53 = vsel %vm2459_vm14, -inf, %v6590_v20  ;;  %v9372_v20 = vld [vmem:[#allocation28_spill] sm:$0xff] }
 0x78c   : > { %9370 = vst [vmem:[#allocation74_spill] sm:$0xff] %v7309_v50  ;;  %v2427_v58 = vshra.s32 %v2360_v45, 16  ;;  %v2443_v12 = vand.u32 65535, %v2360_v45  ;;  %2614 = vmax.xlane.f32.xlu1 %v2613_v25  ;;  %v7317_v56 = vsel %vm2460_vm15, -inf, %v6600_v21  ;;  %v7320_v22 = vsel %vm2461_vm0, -inf, %v9371_v1  ;;  %v2338_v61 = vpop.xlane.xlu1 %2337  ;;  %v9374_v16 = vld [vmem:[#allocation72_spill] sm:$0xff] }
 0x78d   : > { %v2592_v49 = vmax.f32 %v7314_v53, %v7317_v56  ;;  %vm2456_vm1 = vcmp.eq.s32.totalorder %v9127_v63, %v2418_v28  ;;  %vm2457_vm4 = vcmp.eq.s32.totalorder %v9128_v39, %v2418_v28  ;;  %vm2458_vm5 = vcmp.eq.s32.totalorder %v9129_v47, %v2418_v28  ;;  %v9376_v1 = vld [vmem:[#allocation24_spill] sm:$0xff] }
 0x78e   : > { %v7330_v3 = vsel %vm2543_vm8, %v2443_v12, %v9372_v20  ;;  %v2339_v21 = vcvt.f32.s32 %v2338_v61  ;;  %v2248_v41 = vpop.xlane.xlu0 %2247  ;;  %v7333_v0 = vsel %vm2456_vm1, -inf, %v9374_v16  ;;  %v7336_v45 = vsel %vm2457_vm4, -inf, %v9375_v46 }
 0x78f   : > { %9373 = vst [vmem:[#allocation77_spill] sm:$0xff] %v7330_v3  ;;  %v2249_v25 = vcvt.f32.s32 %v2248_v41  ;;  %v2593_v43 = vmax.f32 %v2592_v49, %v7320_v22  ;;  %v7340_v50 = vsel %vm2458_vm5, -inf, %v9376_v1  ;;  %v2588_v28 = vmax.f32 %v7333_v0, %v7336_v45  ;;  %v9377_v41 = vld [vmem:[#allocation25_spill] sm:$0xff] }
 0x790   : > { %v2342_v12 = vadd.s32 %v7244_v17, %v2339_v21  ;;  %vm2483_vm6 = vcmp.eq.s32.totalorder %v9127_v63, %v2427_v58  ;;  %vm2484_vm7 = vcmp.eq.s32.totalorder %v9128_v39, %v2427_v58  ;;  %vm2485_vm9 = vcmp.eq.s32.totalorder %v9129_v47, %v2427_v58 }
 0x791   : > { %v2252_v61 = vadd.s32 %v7246_v4, %v2249_v25  ;;  %2594 = vmax.xlane.f32.xlu0 %v2593_v43  ;;  %v2589_v20 = vmax.f32 %v2588_v28, %v7340_v50  ;;  %v7351_v49 = vsel %vm2483_vm6, -inf, %v6634_v14  ;;  %v7354_v16 = vsel %vm2484_vm7, -inf, %v9377_v41  ;;  %v9378_v25 = vld [vmem:[#allocation75_spill] sm:$0xff]  ;;  %v9380_v28 = vld [vmem:[#allocation78_spill] sm:$0xff] }
 0x792   : > { %v2377_v46 = vshll.u32 %v2376_v59, 16  ;;  %v2426_v1 = vshra.s32 %v2342_v12, 16  ;;  %v2442_v17 = vand.u32 65535, %v2342_v12  ;;  %v2624_v21 = vmax.f32 %v7351_v49, %v7354_v16 }
 0x793   : > { %v2268_v3 = vcvt.f32.s32 %v7148_v15  ;;  %v2421_v58 = vshra.s32 %v2252_v61, 16  ;;  %v2437_v9 = vand.u32 65535, %v2252_v61  ;;  %2590 = vmax.xlane.f32.xlu1 %v2589_v20  ;;  %v7360_v4 = vsel %vm2485_vm9, -inf, %v6645_v6  ;;  %v9382_v6 = vld [vmem:[#allocation76_spill] sm:$0xff] }
 0x794   : > { %v7365_v14 = vsel %vm2543_vm8, %v2442_v17, %v9378_v25  ;;  %v2230_v43 = vpop.xlane.xlu1 %2229  ;;  %v2625_v59 = vmax.f32 %v2624_v21, %v7360_v4  ;;  %vm2480_vm10 = vcmp.eq.s32.totalorder %v9127_v63, %v2426_v1  ;;  %vm2481_vm11 = vcmp.eq.s32.totalorder %v9128_v39, %v2426_v1  ;;  %v9383_v17 = vld [vmem:[#allocation80_spill] sm:$0xff] }
 0x795   : > { %9379 = vst [vmem:[#allocation18_spill] sm:$0xff] %v7365_v14  ;;  %v7373_v15 = vsel %vm2543_vm8, %v2437_v9, %v9380_v28  ;;  %v2231_v12 = vcvt.f32.s32 %v2230_v43  ;;  %vm2482_vm12 = vcmp.eq.s32.totalorder %v9129_v47, %v2426_v1  ;;  %v7377_v61 = vsel %vm2480_vm10, -inf, %v9382_v6 }
 0x796   : > { %9381 = vst [vmem:[#allocation79_spill] sm:$0xff] %v7373_v15  ;;  %v2412_v20 = vcvt.f32.s32 %v7153_v30  ;;  %v2392_v41 = vpop.xlane.xlu0 %2391  ;;  %2626 = vmax.xlane.f32.xlu0 %v2625_v59  ;;  %v7381_v21 = vsel %vm2481_vm11, -inf, %v9383_v17  ;;  %vm2465_vm13 = vcmp.eq.s32.totalorder %v9127_v63, %v2421_v58  ;;  %vm2466_vm14 = vcmp.eq.s32.totalorder %v9128_v39, %v2421_v58  ;;  %v9384_v30 = vld [vmem:[#allocation31_spill] sm:$0xff]  ;;  %v9385_v59 = vld [vmem:[#allocation82_spill] sm:$0xff]  ;;  %v9386_v15 = vld [vmem:[#allocation84_spill] sm:$0xff] }
 0x797   : > { %v2234_v9 = vadd.s32 %v7250_v29, %v2231_v12  ;;  %v2393_v25 = vcvt.f32.s32 %v2392_v41  ;;  %v2620_v1 = vmax.f32 %v7377_v61, %v7381_v21  ;;  %vm2467_vm15 = vcmp.eq.s32.totalorder %v9129_v47, %v2421_v58 }
 0x798   : > { %v2269_v43 = vshll.u32 %v2268_v3, 16  ;;  %v7390_v6 = vsel %vm2482_vm12, -inf, %v9384_v30  ;;  %v7393_v17 = vsel %vm2465_vm13, -inf, %v9385_v59  ;;  %v7396_v14 = vsel %vm2466_vm14, -inf, %v9386_v15  ;;  %v9387_v30 = vld [vmem:[#allocation30_spill] sm:$0xff] }
 0x799   : > { %v2374_v28 = vpop.xlane.xlu1 %2373  ;;  %v2420_v38 = vshra.s32 %v2234_v9, 16  ;;  %v2436_v62 = vand.u32 65535, %v2234_v9  ;;  %v2396_v29 = vadd.s32 %v7287_v55, %v2393_v25  ;;  %v2413_v41 = vshll.u32 %v2412_v20, 16 }
 0x79a   : > { %v2375_v12 = vcvt.f32.s32 %v2374_v28  ;;  %v2621_v57 = vmax.f32 %v2620_v1, %v7390_v6  ;;  %v7401_v3 = vsel %vm2467_vm15, -inf, %v6688_v26  ;;  %v2600_v58 = vmax.f32 %v7393_v17, %v7396_v14  ;;  %v9390_v28 = vld [vmem:[#allocation89_spill] sm:$0xff] }
 0x79b   : > { %v7408_v59 = vsel %vm2543_vm8, %v2436_v62, %v9387_v30  ;;  %v2429_v15 = vshra.s32 %v2396_v29, 16  ;;  %v2445_v32 = vand.u32 65535, %v2396_v29  ;;  %vm2462_vm0 = vcmp.eq.s32.totalorder %v9127_v63, %v2420_v38  ;;  %v9392_v29 = vld [vmem:[#allocation87_spill] sm:$0xff] }
 0x79c   : > { %9388 = vst [vmem:[#allocation81_spill] sm:$0xff] %v7408_v59  ;;  %v2378_v9 = vadd.s32 %v2377_v46, %v2375_v12  ;;  %2622 = vmax.xlane.f32.xlu1 %v2621_v57  ;;  %v2601_v55 = vmax.f32 %v2600_v58, %v7401_v3  ;;  %vm2463_vm1 = vcmp.eq.s32.totalorder %v9128_v39, %v2420_v38  ;;  %v7415_v1 = vsel %vm2462_vm0, -inf, %v6698_v54  ;;  %v9389_v46 = vld [vmem:[#allocation86_spill] sm:$0xff]  ;;  %v9393_v58 = vld [vmem:[#allocation88_spill] sm:$0xff] }
 0x79d   : > { %v2266_v33 = vpop.xlane.xlu1 %2265  ;;  %vm2464_vm4 = vcmp.eq.s32.totalorder %v9129_v47, %v2420_v38  ;;  %v7418_v62 = vsel %vm2463_vm1, -inf, %v6701_v13  ;;  %vm2489_vm5 = vcmp.eq.s32.totalorder %v9127_v63, %v2429_v15  ;;  %vm2490_vm6 = vcmp.eq.s32.totalorder %v9128_v39, %v2429_v15 }
 0x79e   : > { %v2428_v26 = vshra.s32 %v2378_v9, 16  ;;  %v2444_v20 = vand.u32 65535, %v2378_v9  ;;  %v2267_v25 = vcvt.f32.s32 %v2266_v33  ;;  %2602 = vmax.xlane.f32.xlu0 %v2601_v55  ;;  %v7421_v57 = vsel %vm2464_vm4, -inf, %v9389_v46  ;;  %v9394_v9 = vld [vmem:[#allocation92_spill] sm:$0xff] }
 0x79f   : > { %v2596_v54 = vmax.f32 %v7415_v1, %v7418_v62  ;;  %vm2491_vm7 = vcmp.eq.s32.totalorder %v9129_v47, %v2429_v15  ;;  %v7434_v12 = vsel %vm2489_vm5, -inf, %v9392_v29  ;;  %v7437_v30 = vsel %vm2490_vm6, -inf, %v9393_v58  ;;  %v9395_v29 = vld [vmem:[#allocation90_spill] sm:$0xff] }
 0x7a0   : > { %v7428_v38 = vsel %vm2543_vm8, %v2444_v20, %v9390_v28  ;;  %v2270_v33 = vadd.s32 %v2269_v43, %v2267_v25  ;;  %v7440_v55 = vsel %vm2491_vm7, -inf, %v9394_v9  ;;  %vm2486_vm9 = vcmp.eq.s32.totalorder %v9127_v63, %v2428_v26 }
 0x7a1   : > { %9391 = vst [vmem:[#allocation83_spill] sm:$0xff] %v7428_v38  ;;  %v2410_v13 = vpop.xlane.xlu1 %2409  ;;  %v2597_v25 = vmax.f32 %v2596_v54, %v7421_v57  ;;  %v2632_v15 = vmax.f32 %v7434_v12, %v7437_v30  ;;  %vm2487_vm10 = vcmp.eq.s32.totalorder %v9128_v39, %v2428_v26  ;;  %vm2488_vm11 = vcmp.eq.s32.totalorder %v9129_v47, %v2428_v26  ;;  %v9398_v54 = vld [vmem:[#allocation113_spill] sm:$0xff] }
 0x7a2   : > { %v2422_v20 = vshra.s32 %v2270_v33, 16  ;;  %v2438_v46 = vand.u32 65535, %v2270_v33  ;;  %v2411_v43 = vcvt.f32.s32 %v2410_v13  ;;  %v7449_v28 = vsel %vm2486_vm9, -inf, %v6738_v51  ;;  %v9397_v33 = vld [vmem:[#allocation91_spill] sm:$0xff] }
 0x7a3   : > { %2598 = vmax.xlane.f32.xlu1 %v2597_v25  ;;  %v7457_v13 = vsel %vm2487_vm10, -inf, %v9397_v33  ;;  %v7460_v38 = vsel %vm2488_vm11, -inf, %v9398_v54  ;;  %v2633_v59 = vmax.f32 %v2632_v15, %v7440_v55  ;;  %v9399_v15 = vld [vmem:[#allocation85_spill] sm:$0xff]  ;;  %vm3040_vm4 = vcmp.eq.s32.totalorder %v9127_v63, 3 }
 0x7a4   : > { %v7454_v58 = vsel %vm2543_vm8, %v2438_v46, %v9395_v29  ;;  %v2414_v9 = vadd.s32 %v2413_v41, %v2411_v43  ;;  %v2628_v26 = vmax.f32 %v7449_v28, %v7457_v13  ;;  %vm2468_vm12 = vcmp.eq.s32.totalorder %v9127_v63, %v2422_v20  ;;  %v9401_v33 = vld [vmem:[#allocation93_spill] sm:$0xff] }
 0x7a5   : > { %9396 = vst [vmem:[#allocation34_spill] sm:$0xff] %v7454_v58  ;;  %vm2469_vm13 = vcmp.eq.s32.totalorder %v9128_v39, %v2422_v20  ;;  %vm2470_vm14 = vcmp.eq.s32.totalorder %v9129_v47, %v2422_v20  ;;  %v7469_v41 = vsel %vm2468_vm12, -inf, %v6762_v19  ;;  %2634 = vmax.xlane.f32.xlu0 %v2633_v59  ;;  %v7478_v29 = vsel %vm2543_vm8, %v2445_v32, %v9399_v15  ;;  %v9405_v32 = vld [vmem:[#allocation94_spill] sm:$0xff] }
 0x7a6   : > { %v2430_v51 = vshra.s32 %v2414_v9, 16  ;;  %v2446_v46 = vand.u32 65535, %v2414_v9  ;;  %v2629_v43 = vmax.f32 %v2628_v26, %v7460_v38  ;;  %v7473_v25 = vsel %vm2469_vm13, -inf, %v6766_v37  ;;  %9400 = vst [vmem:[#allocation21_spill] sm:$0xff] %v7478_v29  ;;  %v9403_v37 = vld [vmem:[#allocation95_spill] sm:$0xff] }
 0x7a7   : > { %v7481_v54 = vsel %vm2470_vm14, -inf, %v9401_v33  ;;  %v2604_v20 = vmax.f32 %v7469_v41, %v7473_v25 }
 0x7a8   : > { %vm2492_vm15 = vcmp.eq.s32.totalorder %v9127_v63, %v2430_v51  ;;  %vm2493_vm0 = vcmp.eq.s32.totalorder %v9128_v39, %v2430_v51  ;;  %2630 = vmax.xlane.f32.xlu1 %v2629_v43  ;;  %vm2494_vm1 = vcmp.eq.s32.totalorder %v9129_v47, %v2430_v51  ;;  %v7497_v9 = vsel %vm2543_vm8, %v2446_v46, %v9405_v32  ;;  %v9407_v39 = vld [vmem:[#allocation96_spill] sm:$0xff]  ;;  %v9410_v46 = vld [vmem:[#allocation97_spill] sm:$0xff] }
 0x7a9   : > { %v7489_v19 = vsel %vm2492_vm15, -inf, %v6784_v18  ;;  %v7492_v59 = vsel %vm2493_vm0, -inf, %v9403_v37  ;;  %9406 = vst [vmem:[#allocation71_spill] sm:$0xff] %v7497_v9  ;;  %v2605_v26 = vmax.f32 %v2604_v20, %v7481_v54  ;;  %v7503_v43 = vsel %vm2494_vm1, -inf, %v9407_v39  ;;  %v9409_v18 = vld [vmem:[#allocation37_spill] sm:$0xff]  ;;  %v9411_v20 = vld [vmem:[#allocation114_spill] sm:$0xff] }
 0x7aa   : > { %9402 = vst [vmem:[#allocation69_spill] sm:$0xff] %v7489_v19  ;;  %9404 = vst [vmem:[#allocation23_spill] sm:$0xff] %v7492_v59  ;;  %v2636_v15 = vmax.f32 %v7489_v19, %v7492_v59  ;;  %v1326_v51 = vsel %vm1325_vm2, %v9409_v18, -inf  ;;  %v9452_v19 = vld [vmem:[#allocation104_spill] sm:$0xff] }
 0x7ab   : > { %9408 = vst [vmem:[#allocation26_spill] sm:$0xff] %v7503_v43  ;;  %v1935_v33 = vsel %vm1934_vm3, %v9410_v46, %v1326_v51  ;;  %v9415_v51 = vld [vmem:[#allocation38_spill] sm:$0xff] }
 0x7ac   : > { %2606 = vmax.xlane.f32.xlu1 %v2605_v26  ;;  %v2637_v47 = vmax.f32 %v2636_v15, %v7503_v43  ;;  %v2544_v37 = vsel %vm2543_vm8, %v9411_v20, %v1935_v33  ;;  %v9413_v15 = vld [vmem:[#allocation35_spill] sm:$0xff]  ;;  %v9416_v20 = vld [vmem:[#allocation42_spill] sm:$0xff]  ;;  %v9442_v43 = vld [vmem:[#allocation116_spill] sm:$0xff] }
 0x7b0   : > { %2638 = vmax.xlane.f32.xlu1 %v2637_v47  ;;  %v9414_v47 = vld [vmem:[#allocation36_spill] sm:$0xff] }
 0x7ff   : > { %v2579_v32 = vpop.xlane.xlu0 %2578 }
 0x800   : > { %vm2640_vm5 = vcmp.eq.f32.partialorder %v7169_v31, %v2579_v32  ;;  %vm2641_vm6 = vcmp.eq.f32.partialorder %v7172_v35, %v2579_v32  ;;  %vm2642_vm7 = vcmp.eq.f32.partialorder %v7178_v40, %v2579_v32  ;;  %v7521_v26 = vsel %vm3040_vm4, %v2579_v32, %v2544_v37  ;;  %v9417_v35 = vld [vmem:[#allocation98_spill] sm:$0xff]  ;;  %v9419_v32 = vld [vmem:[#allocation33_spill] sm:$0xff] }
 0x801   : > { %9412 = vst [vmem:[#allocation28_spill] sm:$0xff] %v7521_v26  ;;  %v2688_v39 = vsel %vm2640_vm5, %v9413_v15, 2147483647  ;;  %v2689_v18 = vsel %vm2641_vm6, %v9414_v47, 2147483647  ;;  %3073 = vst [vmem:[#allocation3] sm:$0xff] %v7521_v26 }
 0x802   : > { %vm2736_vm9 = vcmp.lt.s32.totalorder %v2688_v39, %v2689_v18  ;;  %v2690_v46 = vsel %vm2642_vm7, %v9415_v51, 2147483647  ;;  %v1334_v31 = vsel %vm1325_vm2, %v9416_v20, -inf }
 0x803   : > { %v2737_v33 = vsel %vm2736_vm9, %v2688_v39, %v2689_v18  ;;  %v1943_v40 = vsel %vm1934_vm3, %v9417_v35, %v1334_v31  ;;  %v9425_v31 = vld [vmem:[#allocation46_spill] sm:$0xff]  ;;  %v9426_v35 = vld [vmem:[#allocation99_spill] sm:$0xff] }
 0x804   : > { %vm2738_vm10 = vcmp.lt.s32.totalorder %v2737_v33, %v2690_v46  ;;  %v2552_v9 = vsel %vm2543_vm8, %v9419_v32, %v1943_v40 }
 0x805   : > { %v7533_v37 = vsel %vm2738_vm10, %v2737_v33, %v2690_v46  ;;  %v9422_v33 = vld [vmem:[#allocation40_spill] sm:$0xff] }
 0x806   : > { %9418 = vst [vmem:[#allocation72_spill] sm:$0xff] %v7533_v37  ;;  %v2611_v26 = vpop.xlane.xlu0 %2610  ;;  %v2741_v58 = vshra.s32 %v7533_v37, 16 }
 0x807   : > { %vm2664_vm11 = vcmp.eq.f32.partialorder %v7191_v7, %v2611_v26  ;;  %vm2665_vm12 = vcmp.eq.f32.partialorder %v7194_v48, %v2611_v26  ;;  %vm2666_vm13 = vcmp.eq.f32.partialorder %v7201_v44, %v2611_v26  ;;  %v7544_v39 = vsel %vm3040_vm4, %v2611_v26, %v2552_v9  ;;  %v9423_v48 = vld [vmem:[#allocation47_spill] sm:$0xff] }
 0x808   : > { %9420 = vst [vmem:[#allocation29_spill] sm:$0xff] %v7544_v39  ;;  %v2712_v18 = vsel %vm2664_vm11, %v9413_v15, 2147483647  ;;  %v2713_v51 = vsel %vm2665_vm12, %v9414_v47, 2147483647  ;;  %3081 = vst [vmem:[#allocation3 + $0x40] sm:$0xff] %v7544_v39  ;;  %v7549_v46 = vcvt.s32.f32 %v2741_v58 }
 0x809   : > { %vm2880_vm14 = vcmp.lt.s32.totalorder %v2712_v18, %v2713_v51  ;;  %v2714_v20 = vsel %vm2666_vm13, %v9422_v33, 2147483647  ;;  %v1328_v44 = vsel %vm1325_vm2, %v9423_v48, -inf  ;;  %v9424_v9 = vld [vmem:[#allocation39_spill] sm:$0xff]  ;;  %v1327_v58 = vsel %vm1325_vm2, %v9425_v31, -inf }
 0x80a   : > { %9421 = vst [vmem:[#allocation24_spill] sm:$0xff] %v7549_v46  ;;  %2744 = vmin.xlane.f32.xlu0 %v7549_v46  ;;  %v2881_v7 = vsel %vm2880_vm14, %v2712_v18, %v2713_v51  ;;  %v1335_v26 = vsel %vm1325_vm2, %v9424_v9, -inf  ;;  %v1937_v40 = vsel %vm1934_vm3, %v9426_v35, %v1328_v44  ;;  %v9428_v18 = vld [vmem:[#allocation50_spill] sm:$0xff]  ;;  %v9429_v33 = vld [vmem:[#allocation51_spill] sm:$0xff] }
 0x80b   : > { %vm2882_vm15 = vcmp.lt.s32.totalorder %v2881_v7, %v2714_v20  ;;  %v1336_v51 = vsel %vm1325_vm2, %v9428_v18, -inf  ;;  %v1329_v48 = vsel %vm1325_vm2, %v9429_v33, -inf  ;;  %v9430_v39 = vld [vmem:[#allocation115_spill] sm:$0xff]  ;;  %v9436_v18 = vld [vmem:[#allocation60_spill] sm:$0xff] }
 0x80c   : > { %v7565_v32 = vsel %vm2882_vm15, %v2881_v7, %v2714_v20  ;;  %v2546_v9 = vsel %vm2543_vm8, %v9430_v39, %v1937_v40  ;;  %v9432_v7 = vld [vmem:[#allocation56_spill] sm:$0xff]  ;;  %v1331_v33 = vsel %vm1325_vm2, %v9436_v18, -inf  ;;  %v9441_v18 = vld [vmem:[#allocation66_spill] sm:$0xff] }
 0x80d   : > { %9427 = vst [vmem:[#allocation25_spill] sm:$0xff] %v7565_v32  ;;  %v2587_v29 = vpop.xlane.xlu0 %2586  ;;  %v2885_v31 = vshra.s32 %v7565_v32, 16  ;;  %v1337_v44 = vsel %vm1325_vm2, %v9432_v7, -inf  ;;  %v1340_v37 = vsel %vm1325_vm2, %v9441_v18, -inf }
 0x80e   : > { %vm2646_vm0 = vcmp.eq.f32.partialorder %v7215_v5, %v2587_v29  ;;  %vm2647_vm1 = vcmp.eq.f32.partialorder %v7218_v23, %v2587_v29  ;;  %vm2648_vm5 = vcmp.eq.f32.partialorder %v7227_v36, %v2587_v29  ;;  %v7582_v20 = vsel %vm3040_vm4, %v2587_v29, %v2546_v9  ;;  %v9434_v5 = vld [vmem:[#allocation52_spill] sm:$0xff]  ;;  %v9435_v36 = vld [vmem:[#allocation57_spill] sm:$0xff] }
 0x80f   : > { %9431 = vst [vmem:[#allocation75_spill] sm:$0xff] %v7582_v20  ;;  %v2694_v35 = vsel %vm2646_vm0, %v9413_v15, 2147483647  ;;  %v2695_v39 = vsel %vm2647_vm1, %v9414_v47, 2147483647  ;;  %3075 = vst [vmem:[#allocation3 + $0x10] sm:$0xff] %v7582_v20  ;;  %v7590_v40 = vcvt.s32.f32 %v2885_v31 }
 0x810   : > { %v1330_v23 = vsel %vm1325_vm2, %v9434_v5, -inf  ;;  %v1338_v29 = vsel %vm1325_vm2, %v9435_v36, -inf  ;;  %vm2772_vm6 = vcmp.lt.s32.totalorder %v2694_v35, %v2695_v39  ;;  %v9437_v9 = vld [vmem:[#allocation65_spill] sm:$0xff]  ;;  %v9438_v31 = vld [vmem:[#allocation100_spill] sm:$0xff]  ;;  %v2696_v5 = vsel %vm2648_vm5, %v9439_v10, 2147483647 }
 0x811   : > { %9433 = vst [vmem:[#allocation78_spill] sm:$0xff] %v7590_v40  ;;  %v7604_v7 = vsel %vm1325_vm2, %v9437_v9, -inf  ;;  %v1936_v20 = vsel %vm1934_vm3, %v9438_v31, %v1327_v58  ;;  %2888 = vmin.xlane.f32.xlu0 %v7590_v40  ;;  %v2773_v32 = vsel %vm2772_vm6, %v2694_v35, %v2695_v39  ;;  %v9440_v36 = vld [vmem:[#allocation63_spill] sm:$0xff]  ;;  %v2583_v59 = vpop.xlane.xlu1 %2582 }
 0x812   : > { %v1332_v46 = vsel %vm1325_vm2, %v9440_v36, -inf  ;;  %v2545_v9 = vsel %vm2543_vm8, %v9442_v43, %v1936_v20  ;;  %vm2774_vm7 = vcmp.lt.s32.totalorder %v2773_v32, %v2696_v5  ;;  %vm2643_vm9 = vcmp.eq.f32.partialorder %v7239_v2, %v2583_v59  ;;  %v9444_v58 = vld [vmem:[#allocation67_spill] sm:$0xff]  ;;  %v9448_v36 = vld [vmem:[#allocation102_spill] sm:$0xff] }
 0x813   : > { %vm2644_vm10 = vcmp.eq.f32.partialorder %v7242_v27, %v2583_v59  ;;  %vm2645_vm11 = vcmp.eq.f32.partialorder %v7253_v34, %v2583_v59  ;;  %v7625_v10 = vsel %vm3040_vm4, %v2583_v59, %v2545_v9  ;;  %v7630_v35 = vsel %vm1325_vm2, %v9444_v58, -inf  ;;  %v9446_v27 = vld [vmem:[#allocation68_spill] sm:$0xff]  ;;  %v9447_v59 = vld [vmem:[#allocation101_spill] sm:$0xff]  ;;  %v9449_v9 = vld [vmem:[#allocation103_spill] sm:$0xff] }
 0x814   : > { %9443 = vst [vmem:[#allocation76_spill] sm:$0xff] %v7625_v10  ;;  %v2691_v39 = vsel %vm2643_vm9, %v9413_v15, 2147483647  ;;  %v2692_v43 = vsel %vm2644_vm10, %v9414_v47, 2147483647  ;;  %3074 = vst [vmem:[#allocation3 + $0x8] sm:$0xff] %v7625_v10  ;;  %v7635_v2 = vsel %vm2774_vm7, %v2773_v32, %v2696_v5  ;;  %v1945_v20 = vsel %vm1934_vm3, %v9447_v59, %v1336_v51 }
 0x815   : > { %9445 = vst [vmem:[#allocation80_spill] sm:$0xff] %v7635_v2  ;;  %v7640_v34 = vsel %vm1325_vm2, %v9446_v27, -inf  ;;  %vm2754_vm12 = vcmp.lt.s32.totalorder %v2691_v39, %v2692_v43  ;;  %v2777_v31 = vshra.s32 %v7635_v2, 16  ;;  %v1944_v18 = vsel %vm1934_vm3, %v9448_v36, %v1335_v26  ;;  %v9450_v5 = vld [vmem:[#allocation43_spill] sm:$0xff]  ;;  %v9451_v27 = vld [vmem:[#allocation117_spill] sm:$0xff]  ;;  %v2619_v59 = vpop.xlane.xlu0 %2618 }
 0x816   : > { %v1939_v32 = vsel %vm1934_vm3, %v9449_v9, %v1330_v23  ;;  %v2693_v58 = vsel %vm2645_vm11, %v9450_v5, 2147483647  ;;  %v2755_v10 = vsel %vm2754_vm12, %v2691_v39, %v2692_v43  ;;  %v2554_v40 = vsel %vm2543_vm8, %v9451_v27, %v1945_v20  ;;  %v9453_v26 = vld [vmem:[#allocation105_spill] sm:$0xff]  ;;  %v9454_v39 = vld [vmem:[#allocation106_spill] sm:$0xff]  ;;  %v9456_v20 = vld [vmem:[#allocation107_spill] sm:$0xff] }
 0x817   : > { %v1938_v51 = vsel %vm1934_vm3, %v9452_v19, %v1329_v48  ;;  %v7659_v2 = vcvt.s32.f32 %v2777_v31  ;;  %vm2756_vm2 = vcmp.lt.s32.totalorder %v2755_v10, %v2693_v58  ;;  %v1947_v36 = vsel %vm1934_vm3, %v9453_v26, %v1338_v29  ;;  %v9458_v9 = vld [vmem:[#allocation45_spill] sm:$0xff] }
 0x818   : > { %vm2670_vm13 = vcmp.eq.f32.partialorder %v7271_v60, %v2619_v59  ;;  %vm2671_vm14 = vcmp.eq.f32.partialorder %v7274_v52, %v2619_v59  ;;  %v7668_v23 = vsel %vm3040_vm4, %v2619_v59, %v2554_v40  ;;  %v7673_v19 = vsel %vm1934_vm3, %v9454_v39, %v1337_v44  ;;  %v9455_v52 = vld [vmem:[#allocation118_spill] sm:$0xff]  ;;  %v9459_v27 = vld [vmem:[#allocation109_spill] sm:$0xff] }
 0x819   : > { %v2718_v48 = vsel %vm2670_vm13, %v9413_v15, 2147483647  ;;  %v2719_v43 = vsel %vm2671_vm14, %v9414_v47, 2147483647  ;;  %3083 = vst [vmem:[#allocation3 + $0x50] sm:$0xff] %v7668_v23  ;;  %2780 = vmin.xlane.f32.xlu0 %v7659_v2  ;;  %v7679_v60 = vsel %vm2756_vm2, %v2755_v10, %v2693_v58  ;;  %v2553_v40 = vsel %vm2543_vm8, %v9455_v52, %v1944_v18  ;;  %v2615_v29 = vpop.xlane.xlu1 %2614  ;;  %v9461_v52 = vld [vmem:[#allocation119_spill] sm:$0xff] }
 0x81a   : > { %vm2672_vm15 = vcmp.eq.f32.partialorder %v7277_v11, %v2619_v59  ;;  %vm2916_vm0 = vcmp.lt.s32.totalorder %v2718_v48, %v2719_v43  ;;  %v2759_v44 = vshra.s32 %v7679_v60, 16  ;;  %vm2667_vm1 = vcmp.eq.f32.partialorder %v7285_v24, %v2615_v29  ;;  %v9460_v59 = vld [vmem:[#allocation41_spill] sm:$0xff] }
 0x81b   : > { %vm2668_vm5 = vcmp.eq.f32.partialorder %v7291_v42, %v2615_v29  ;;  %vm2669_vm6 = vcmp.eq.f32.partialorder %v7297_v8, %v2615_v29  ;;  %v7691_v10 = vsel %vm3040_vm4, %v2615_v29, %v2553_v40  ;;  %v7696_v31 = vsel %vm1934_vm3, %v9456_v20, %v1332_v46  ;;  %v9457_v42 = vld [vmem:[#allocation108_spill] sm:$0xff] }
 0x81c   : > { %v2715_v11 = vsel %vm2667_vm1, %v9413_v15, 2147483647  ;;  %v2716_v18 = vsel %vm2668_vm5, %v9414_v47, 2147483647  ;;  %3082 = vst [vmem:[#allocation3 + $0x48] sm:$0xff] %v7691_v10  ;;  %v7701_v24 = vcvt.s32.f32 %v2759_v44  ;;  %v7706_v8 = vsel %vm1934_vm3, %v9457_v42, %v1331_v33  ;;  %v9462_v40 = vld [vmem:[#allocation120_spill] sm:$0xff] }
 0x81d   : > { %v2720_v5 = vsel %vm2672_vm15, %v9458_v9, 2147483647  ;;  %vm2898_vm7 = vcmp.lt.s32.totalorder %v2715_v11, %v2716_v18  ;;  %v2917_v58 = vsel %vm2916_vm0, %v2718_v48, %v2719_v43  ;;  %v7712_v46 = vsel %vm1934_vm3, %v9459_v27, %v1340_v37  ;;  %v9463_v48 = vld [vmem:[#allocation121_spill] sm:$0xff] }
 0x81e   : > { %v2717_v26 = vsel %vm2669_vm6, %v9460_v59, 2147483647  ;;  %2762 = vmin.xlane.f32.xlu1 %v7701_v24  ;;  %vm2918_vm9 = vcmp.lt.s32.totalorder %v2917_v58, %v2720_v5  ;;  %v2899_v39 = vsel %vm2898_vm7, %v2715_v11, %v2716_v18  ;;  %v2548_v33 = vsel %vm2543_vm8, %v9461_v52, %v1939_v32  ;;  %v2595_v37 = vpop.xlane.xlu0 %2594 }
 0x81f   : > { %v2547_v29 = vsel %vm2543_vm8, %v9462_v40, %v1938_v51  ;;  %v2556_v43 = vsel %vm2543_vm8, %v9463_v48, %v1947_v36  ;;  %vm2900_vm10 = vcmp.lt.s32.totalorder %v2899_v39, %v2717_v26  ;;  %vm2652_vm11 = vcmp.eq.f32.partialorder %v7314_v53, %v2595_v37  ;;  %v9464_v53 = vld [vmem:[#allocation48_spill] sm:$0xff] }
 0x820   : > { %vm2653_vm12 = vcmp.eq.f32.partialorder %v7317_v56, %v2595_v37  ;;  %vm2654_vm2 = vcmp.eq.f32.partialorder %v7320_v22, %v2595_v37  ;;  %v7730_v44 = vsel %vm3040_vm4, %v2595_v37, %v2548_v33  ;;  %v2700_v32 = vsel %vm2652_vm11, %v9413_v15, 2147483647  ;;  %v2591_v20 = vpop.xlane.xlu1 %2590 }
 0x821   : > { %v2701_v51 = vsel %vm2653_vm12, %v9414_v47, 2147483647  ;;  %3077 = vst [vmem:[#allocation3 + $0x20] sm:$0xff] %v7730_v44  ;;  %v7735_v36 = vsel %vm2918_vm9, %v2917_v58, %v2720_v5  ;;  %v7737_v11 = vsel %vm2900_vm10, %v2899_v39, %v2717_v26  ;;  %v2702_v18 = vsel %vm2654_vm2, %v9464_v53, 2147483647 }
 0x822   : > { %vm2808_vm13 = vcmp.lt.s32.totalorder %v2700_v32, %v2701_v51  ;;  %vm2649_vm14 = vcmp.eq.f32.partialorder %v7333_v0, %v2591_v20  ;;  %vm2650_vm15 = vcmp.eq.f32.partialorder %v7336_v45, %v2591_v20  ;;  %vm2651_vm0 = vcmp.eq.f32.partialorder %v7340_v50, %v2591_v20  ;;  %v9465_v45 = vld [vmem:[#allocation49_spill] sm:$0xff] }
 0x823   : > { %v2697_v56 = vsel %vm2649_vm14, %v9413_v15, 2147483647  ;;  %v2698_v22 = vsel %vm2650_vm15, %v9414_v47, 2147483647  ;;  %v7747_v42 = vsel %vm3040_vm4, %v2591_v20, %v2547_v29  ;;  %v2627_v9 = vpop.xlane.xlu0 %2626  ;;  %v2921_v5 = vshra.s32 %v7735_v36, 16  ;;  %v9467_v29 = vld [vmem:[#allocation110_spill] sm:$0xff] }
 0x824   : > { %vm2790_vm1 = vcmp.lt.s32.totalorder %v2697_v56, %v2698_v22  ;;  %3076 = vst [vmem:[#allocation3 + $0x18] sm:$0xff] %v7747_v42  ;;  %v2903_v0 = vshra.s32 %v7737_v11, 16  ;;  %v2809_v58 = vsel %vm2808_vm13, %v2700_v32, %v2701_v51  ;;  %vm2676_vm5 = vcmp.eq.f32.partialorder %v7351_v49, %v2627_v9  ;;  %v9468_v32 = vld [vmem:[#allocation122_spill] sm:$0xff]  ;;  %v9469_v20 = vld [vmem:[#allocation123_spill] sm:$0xff] }
 0x825   : > { %vm2677_vm6 = vcmp.eq.f32.partialorder %v7354_v16, %v2627_v9  ;;  %vm2678_vm7 = vcmp.eq.f32.partialorder %v7360_v4, %v2627_v9  ;;  %v7757_v50 = vsel %vm3040_vm4, %v2627_v9, %v2556_v43  ;;  %v2699_v27 = vsel %vm2651_vm0, %v9465_v45, 2147483647  ;;  %v9466_v4 = vld [vmem:[#allocation54_spill] sm:$0xff] }
 0x826   : > { %v2724_v59 = vsel %vm2676_vm5, %v9413_v15, 2147483647  ;;  %v2725_v26 = vsel %vm2677_vm6, %v9414_v47, 2147483647  ;;  %3085 = vst [vmem:[#allocation3 + $0x60] sm:$0xff] %v7757_v50  ;;  %v7763_v39 = vcvt.s32.f32 %v2921_v5  ;;  %v7765_v49 = vcvt.s32.f32 %v2903_v0 }
 0x827   : > { %vm2952_vm9 = vcmp.lt.s32.totalorder %v2724_v59, %v2725_v26  ;;  %vm2810_vm10 = vcmp.lt.s32.totalorder %v2809_v58, %v2702_v18  ;;  %v2791_v16 = vsel %vm2790_vm1, %v2697_v56, %v2698_v22  ;;  %v2726_v52 = vsel %vm2678_vm7, %v9466_v4, 2147483647 }
 0x828   : > { %2924 = vmin.xlane.f32.xlu0 %v7763_v39  ;;  %v7770_v33 = vsel %vm2810_vm10, %v2809_v58, %v2702_v18  ;;  %vm2792_vm11 = vcmp.lt.s32.totalorder %v2791_v16, %v2699_v27  ;;  %v2953_v40 = vsel %vm2952_vm9, %v2724_v59, %v2725_v26  ;;  %v1948_v48 = vsel %vm1934_vm3, %v9467_v29, %v7604_v7  ;;  %v9470_v18 = vld [vmem:[#allocation111_spill] sm:$0xff]  ;;  %v9473_v26 = vld [vmem:[#allocation58_spill] sm:$0xff] }
 0x829   : > { %2906 = vmin.xlane.f32.xlu1 %v7765_v49  ;;  %v2813_v43 = vshra.s32 %v7770_v33, 16  ;;  %v7778_v37 = vsel %vm2792_vm11, %v2791_v16, %v2699_v27  ;;  %vm2954_vm12 = vcmp.lt.s32.totalorder %v2953_v40, %v2726_v52  ;;  %v2555_v51 = vsel %vm2543_vm8, %v9468_v32, %v7673_v19  ;;  %v2623_v56 = vpop.xlane.xlu1 %2622  ;;  %v9472_v27 = vld [vmem:[#allocation112_spill] sm:$0xff] }
 0x82a   : > { %v2550_v53 = vsel %vm2543_vm8, %v9469_v20, %v7696_v31  ;;  %v7792_v7 = vsel %vm1934_vm3, %v9470_v18, %v7630_v35  ;;  %v2795_v22 = vshra.s32 %v7778_v37, 16  ;;  %vm2673_vm2 = vcmp.eq.f32.partialorder %v7377_v61, %v2623_v56  ;;  %v9471_v61 = vld [vmem:[#allocation53_spill] sm:$0xff]  ;;  %v9477_v18 = vld [vmem:[#allocation55_spill] sm:$0xff] }
 0x82b   : > { %vm2674_vm13 = vcmp.eq.f32.partialorder %v7381_v21, %v2623_v56  ;;  %vm2675_vm14 = vcmp.eq.f32.partialorder %v7390_v6, %v2623_v56  ;;  %v7800_v19 = vsel %vm3040_vm4, %v2623_v56, %v2555_v51  ;;  %v2721_v31 = vsel %vm2673_vm2, %v9413_v15, 2147483647  ;;  %v2603_v35 = vpop.xlane.xlu0 %2602 }
 0x82c   : > { %v2722_v9 = vsel %vm2674_vm13, %v9414_v47, 2147483647  ;;  %3084 = vst [vmem:[#allocation3 + $0x58] sm:$0xff] %v7800_v19  ;;  %v7805_v5 = vcvt.s32.f32 %v2813_v43  ;;  %v7807_v0 = vsel %vm2954_vm12, %v2953_v40, %v2726_v52  ;;  %vm2658_vm0 = vcmp.eq.f32.partialorder %v7393_v17, %v2603_v35  ;;  %v9474_v52 = vld [vmem:[#allocation124_spill] sm:$0xff] }
 0x82d   : > { %vm2934_vm15 = vcmp.lt.s32.totalorder %v2721_v31, %v2722_v9  ;;  %vm2659_vm1 = vcmp.eq.f32.partialorder %v7396_v14, %v2603_v35  ;;  %vm2660_vm5 = vcmp.eq.f32.partialorder %v7401_v3, %v2603_v35  ;;  %v2723_v21 = vsel %vm2675_vm14, %v9471_v61, 2147483647 }
 0x82e   : > { %v2706_v6 = vsel %vm2658_vm0, %v9413_v15, 2147483647  ;;  %v2707_v58 = vsel %vm2659_vm1, %v9414_v47, 2147483647  ;;  %v7817_v45 = vsel %vm3040_vm4, %v2603_v35, %v2550_v53  ;;  %2816 = vmin.xlane.f32.xlu0 %v7805_v5  ;;  %v7821_v17 = vcvt.s32.f32 %v2795_v22 }
 0x82f   : > { %vm2844_vm6 = vcmp.lt.s32.totalorder %v2706_v6, %v2707_v58  ;;  %3079 = vst [vmem:[#allocation3 + $0x30] sm:$0xff] %v7817_v45  ;;  %v2957_v14 = vshra.s32 %v7807_v0, 16  ;;  %v2935_v3 = vsel %vm2934_vm15, %v2721_v31, %v2722_v9  ;;  %v7828_v59 = vsel %vm1934_vm3, %v9472_v27, %v7640_v34 }
 0x830   : > { %v2708_v16 = vsel %vm2660_vm5, %v9473_v26, 2147483647  ;;  %vm2936_vm7 = vcmp.lt.s32.totalorder %v2935_v3, %v2723_v21  ;;  %v2845_v4 = vsel %vm2844_vm6, %v2706_v6, %v2707_v58  ;;  %v2549_v40 = vsel %vm2543_vm8, %v9474_v52, %v7706_v8  ;;  %v2599_v29 = vpop.xlane.xlu1 %2598  ;;  %2798 = vmin.xlane.f32.xlu1 %v7821_v17  ;;  %v9475_v8 = vld [vmem:[#allocation125_spill] sm:$0xff] }
 0x831   : > { %v7836_v43 = vcvt.s32.f32 %v2957_v14  ;;  %v7838_v32 = vsel %vm2936_vm7, %v2935_v3, %v2723_v21  ;;  %vm2846_vm9 = vcmp.lt.s32.totalorder %v2845_v4, %v2708_v16  ;;  %vm2655_vm3 = vcmp.eq.f32.partialorder %v7415_v1, %v2599_v29  ;;  %v9478_v6 = vld [vmem:[#allocation61_spill] sm:$0xff] }
 0x832   : > { %vm2656_vm10 = vcmp.eq.f32.partialorder %v7418_v62, %v2599_v29  ;;  %vm2657_vm11 = vcmp.eq.f32.partialorder %v7421_v57, %v2599_v29  ;;  %v7845_v34 = vsel %vm3040_vm4, %v2599_v29, %v2549_v40  ;;  %v2558_v51 = vsel %vm2543_vm8, %v9475_v8, %v7712_v46  ;;  %v9476_v62 = vld [vmem:[#allocation126_spill] sm:$0xff]  ;;  %v2635_v22 = vpop.xlane.xlu0 %2634  ;;  %v9481_v8 = vld [vmem:[#allocation128_spill] sm:$0xff] }
 0x833   : > { %v2703_v20 = vsel %vm2655_vm3, %v9413_v15, 2147483647  ;;  %v2704_v53 = vsel %vm2656_vm10, %v9414_v47, 2147483647  ;;  %3078 = vst [vmem:[#allocation3 + $0x28] sm:$0xff] %v7845_v34  ;;  %2960 = vmin.xlane.f32.xlu0 %v7836_v43  ;;  %v7855_v1 = vsel %vm2846_vm9, %v2845_v4, %v2708_v16  ;;  %v2557_v57 = vsel %vm2543_vm8, %v9476_v62, %v1948_v48  ;;  %v9480_v16 = vld [vmem:[#allocation59_spill] sm:$0xff] }
 0x834   : > { %v2705_v56 = vsel %vm2657_vm11, %v9477_v18, 2147483647  ;;  %v2939_v31 = vshra.s32 %v7838_v32, 16  ;;  %v2849_v46 = vshra.s32 %v7855_v1, 16  ;;  %vm2682_vm12 = vcmp.eq.f32.partialorder %v7434_v12, %v2635_v22 }
 0x835   : > { %vm2683_vm2 = vcmp.eq.f32.partialorder %v7437_v30, %v2635_v22  ;;  %vm2684_vm13 = vcmp.eq.f32.partialorder %v7440_v55, %v2635_v22  ;;  %v7868_v9 = vsel %vm3040_vm4, %v2635_v22, %v2558_v51  ;;  %vm2826_vm14 = vcmp.lt.s32.totalorder %v2703_v20, %v2704_v53  ;;  %v2631_v61 = vpop.xlane.xlu1 %2630  ;;  %v9483_v22 = vld [vmem:[#allocation23_spill] sm:$0xff] }
 0x836   : > { %v2730_v48 = vsel %vm2682_vm12, %v9413_v15, 2147483647  ;;  %v2731_v35 = vsel %vm2683_vm2, %v9414_v47, 2147483647  ;;  %3087 = vst [vmem:[#allocation3 + $0x70] sm:$0xff] %v7868_v9  ;;  %v7873_v21 = vcvt.s32.f32 %v2939_v31  ;;  %vm2679_vm0 = vcmp.eq.f32.partialorder %v7449_v28, %v2631_v61  ;;  %v9484_v31 = vld [vmem:[#allocation26_spill] sm:$0xff] }
 0x837   : > { %v2732_v12 = vsel %vm2684_vm13, %v9478_v6, 2147483647  ;;  %vm2988_vm15 = vcmp.lt.s32.totalorder %v2730_v48, %v2731_v35  ;;  %vm2680_vm1 = vcmp.eq.f32.partialorder %v7457_v13, %v2631_v61  ;;  %vm2681_vm5 = vcmp.eq.f32.partialorder %v7460_v38, %v2631_v61  ;;  %v9479_v38 = vld [vmem:[#allocation127_spill] sm:$0xff] }
 0x838   : > { %v2727_v30 = vsel %vm2679_vm0, %v9413_v15, 2147483647  ;;  %v2728_v55 = vsel %vm2680_vm1, %v9414_v47, 2147483647  ;;  %v7883_v58 = vsel %vm3040_vm4, %v2631_v61, %v2557_v57  ;;  %2942 = vmin.xlane.f32.xlu1 %v7873_v21  ;;  %v7887_v14 = vcvt.s32.f32 %v2849_v46  ;;  %v9485_v46 = vld [vmem:[#allocation62_spill] sm:$0xff] }
 0x839   : > { %vm2970_vm6 = vcmp.lt.s32.totalorder %v2727_v30, %v2728_v55  ;;  %3086 = vst [vmem:[#allocation3 + $0x68] sm:$0xff] %v7883_v58  ;;  %v2827_v28 = vsel %vm2826_vm14, %v2703_v20, %v2704_v53  ;;  %v2989_v13 = vsel %vm2988_vm15, %v2730_v48, %v2731_v35  ;;  %v2551_v3 = vsel %vm2543_vm8, %v9479_v38, %v7792_v7  ;;  %v2607_v27 = vpop.xlane.xlu1 %2606 }
 0x83a   : > { %vm2828_vm7 = vcmp.lt.s32.totalorder %v2827_v28, %v2705_v56  ;;  %vm2990_vm9 = vcmp.lt.s32.totalorder %v2989_v13, %v2732_v12  ;;  %v2971_v26 = vsel %vm2970_vm6, %v2727_v30, %v2728_v55  ;;  %v2729_v4 = vsel %vm2681_vm5, %v9480_v16, 2147483647  ;;  %2852 = vmin.xlane.f32.xlu0 %v7887_v14 }
 0x83b   : > { %vm2661_vm3 = vcmp.eq.f32.partialorder %v7469_v41, %v2607_v27  ;;  %vm2662_vm10 = vcmp.eq.f32.partialorder %v7473_v25, %v2607_v27  ;;  %v7899_v52 = vsel %vm3040_vm4, %v2607_v27, %v2551_v3  ;;  %vm2663_vm11 = vcmp.eq.f32.partialorder %v7481_v54, %v2607_v27  ;;  %v9486_v54 = vld [vmem:[#allocation64_spill] sm:$0xff] }
 0x83c   : > { %v2709_v7 = vsel %vm2661_vm3, %v9413_v15, 2147483647  ;;  %v2710_v40 = vsel %vm2662_vm10, %v9414_v47, 2147483647  ;;  %3080 = vst [vmem:[#allocation3 + $0x38] sm:$0xff] %v7899_v52  ;;  %v7906_v29 = vsel %vm2828_vm7, %v2827_v28, %v2705_v56  ;;  %v7909_v25 = vsel %vm2990_vm9, %v2989_v13, %v2732_v12  ;;  %v9482_v56 = vld [vmem:[#allocation69_spill] sm:$0xff] }
 0x83d   : > { %vm2862_vm12 = vcmp.lt.s32.totalorder %v2709_v7, %v2710_v40  ;;  %v2831_v41 = vshra.s32 %v7906_v29, 16  ;;  %vm2972_vm2 = vcmp.lt.s32.totalorder %v2971_v26, %v2729_v4  ;;  %v2559_v51 = vsel %vm2543_vm8, %v9481_v8, %v7828_v59  ;;  %v2639_v20 = vpop.xlane.xlu1 %2638  ;;  %v9489_v8 = vld [vmem:[#allocation25_spill] sm:$0xff] }
 0x83e   : > { %v2993_v53 = vshra.s32 %v7909_v25, 16  ;;  %v7916_v62 = vsel %vm2972_vm2, %v2971_v26, %v2729_v4  ;;  %v2863_v57 = vsel %vm2862_vm12, %v2709_v7, %v2710_v40  ;;  %vm2685_vm13 = vcmp.eq.f32.partialorder %v9482_v56, %v2639_v20  ;;  %v9487_v26 = vld [vmem:[#allocation72_spill] sm:$0xff] }
 0x83f   : > { %v7918_v18 = vcvt.s32.f32 %v2831_v41  ;;  %vm2686_vm14 = vcmp.eq.f32.partialorder %v9483_v22, %v2639_v20  ;;  %vm2687_vm15 = vcmp.eq.f32.partialorder %v9484_v31, %v2639_v20  ;;  %v2711_v48 = vsel %vm2663_vm11, %v9485_v46, 2147483647  ;;  %v9488_v40 = vld [vmem:[#allocation24_spill] sm:$0xff] }
 0x840   : > { %v2733_v59 = vsel %vm2685_vm13, %v9413_v15, 2147483647  ;;  %v2734_v35 = vsel %vm2686_vm14, %v9414_v47, 2147483647  ;;  %v7930_v61 = vsel %vm3040_vm4, %v2639_v20, %v2559_v51  ;;  %v7934_v6 = vcvt.s32.f32 %v2993_v53  ;;  %v9491_v22 = vld [vmem:[#allocation80_spill] sm:$0xff] }
 0x841   : > { %2834 = vmin.xlane.f32.xlu1 %v7918_v18  ;;  %vm3006_vm8 = vcmp.lt.s32.totalorder %v2733_v59, %v2734_v35  ;;  %3088 = vst [vmem:[#allocation3 + $0x78] sm:$0xff] %v7930_v61  ;;  %v2975_v12 = vshra.s32 %v7916_v62, 16  ;;  %vm2864_vm0 = vcmp.lt.s32.totalorder %v2863_v57, %v2711_v48  ;;  %v2735_v30 = vsel %vm2687_vm15, %v9486_v54, 2147483647 }
 0x842   : > { %v7938_v55 = vsel %vm2864_vm0, %v2863_v57, %v2711_v48  ;;  %v3007_v15 = vsel %vm3006_vm8, %v2733_v59, %v2734_v35  ;;  %2996 = vmin.xlane.f32.xlu0 %v7934_v6  ;;  %v2740_v16 = vand.u32 65535, %v9487_v26  ;;  %v2884_v51 = vand.u32 65535, %v9489_v8  ;;  %v9490_v57 = vld [vmem:[#allocation78_spill] sm:$0xff] }
 0x843   : > { %v7941_v47 = vcvt.s32.f32 %v2975_v12  ;;  %v2867_v28 = vshra.s32 %v7938_v55, 16  ;;  %vm3008_vm1 = vcmp.lt.s32.totalorder %v3007_v15, %v2735_v30  ;;  %v2776_v31 = vand.u32 65535, %v9491_v22 }
 0x844   : > { %v7944_v13 = vsel %vm3008_vm1, %v3007_v15, %v2735_v30  ;;  %v2742_v7 = vcvt.s32.f32 %v2740_v16  ;;  %v2886_v53 = vcvt.s32.f32 %v2884_v51  ;;  %v2758_v59 = vand.u32 65535, %v7679_v60 }
 0x845   : > { %2978 = vmin.xlane.f32.xlu1 %v7941_v47  ;;  %v7947_v38 = vcvt.s32.f32 %v2867_v28  ;;  %v3011_v3 = vshra.s32 %v7944_v13, 16  ;;  %v2778_v48 = vcvt.s32.f32 %v2776_v31  ;;  %v2920_v15 = vand.u32 65535, %v7735_v36 }
 0x846   : > { %v2760_v54 = vcvt.s32.f32 %v2758_v59  ;;  %v2902_v28 = vand.u32 65535, %v7737_v11  ;;  %v2794_v36 = vand.u32 65535, %v7778_v37 }
 0x847   : > { %v7951_v27 = vcvt.s32.f32 %v3011_v3  ;;  %v2922_v26 = vcvt.s32.f32 %v2920_v15  ;;  %v2866_v15 = vand.u32 65535, %v7938_v55 }
 0x848   : > { %v2904_v60 = vcvt.s32.f32 %v2902_v28 }
 0x849   : > { %2870 = vmin.xlane.f32.xlu1 %v7947_v38  ;;  %v2868_v28 = vcvt.s32.f32 %v2866_v15  ;;  %v9495_v15 = vld [vmem:[#allocation22_spill] sm:$0xff] }
 0x84d   : > { %3014 = vmin.xlane.f32.xlu1 %v7951_v27 }
 0x897   : > { %v7955_v4 = vpop.xlane.xlu0 %2744 }
 0x898   : > { %vm2746_vm5 = vcmp.eq.f32.partialorder %v9488_v40, %v7955_v4 }
 0x899   : > { %v2747_v41 = vsel %vm2746_vm5, %v2742_v7, inf }
 0x89a   : > { %2748 = vmin.xlane.f32.xlu0 %v2747_v41 }
 0x89e   : > { %v7960_v20 = vpop.xlane.xlu0 %2888 }
 0x89f   : > { %vm2890_vm6 = vcmp.eq.f32.partialorder %v9490_v57, %v7960_v20 }
 0x8a0   : > { %v2891_v56 = vsel %vm2890_vm6, %v2886_v53, inf }
 0x8a1   : > { %2892 = vmin.xlane.f32.xlu0 %v2891_v56 }
 0x8a6   : > { %v7965_v46 = vpop.xlane.xlu0 %2780 }
 0x8a7   : > { %vm2782_vm7 = vcmp.eq.f32.partialorder %v7659_v2, %v7965_v46 }
 0x8a8   : > { %v2783_v35 = vsel %vm2782_vm7, %v2778_v48, inf }
 0x8a9   : > { %2784 = vmin.xlane.f32.xlu0 %v2783_v35  ;;  %v2974_v35 = vand.u32 65535, %v7916_v62 }
 0x8ab   : > { %v7970_v12 = vpop.xlane.xlu1 %2762 }
 0x8ac   : > { %vm2764_vm9 = vcmp.eq.f32.partialorder %v7701_v24, %v7970_v12  ;;  %v2812_v24 = vand.u32 65535, %v7770_v33 }
 0x8ad   : > { %v2765_v30 = vsel %vm2764_vm9, %v2760_v54, inf }
 0x8ae   : > { %2766 = vmin.xlane.f32.xlu1 %v2765_v30  ;;  %v2814_v40 = vcvt.s32.f32 %v2812_v24 }
 0x8b5   : > { %v7976_v3 = vpop.xlane.xlu0 %2924 }
 0x8b6   : > { %vm2926_vm3 = vcmp.eq.f32.partialorder %v7763_v39, %v7976_v3  ;;  %v7980_v2 = vpop.xlane.xlu1 %2906  ;;  %v2956_v39 = vand.u32 65535, %v7807_v0  ;;  %v2848_v0 = vand.u32 65535, %v7855_v1  ;;  %v2992_v1 = vand.u32 65535, %v7909_v25 }
 0x8b7   : > { %vm2908_vm10 = vcmp.eq.f32.partialorder %v7765_v49, %v7980_v2  ;;  %v2927_v16 = vsel %vm2926_vm3, %v2922_v26, inf  ;;  %v2796_v49 = vcvt.s32.f32 %v2794_v36  ;;  %v2976_v25 = vcvt.s32.f32 %v2974_v35 }
 0x8b8   : > { %2928 = vmin.xlane.f32.xlu0 %v2927_v16  ;;  %v2909_v7 = vsel %vm2908_vm10, %v2904_v60, inf  ;;  %v2958_v37 = vcvt.s32.f32 %v2956_v39  ;;  %v2850_v31 = vcvt.s32.f32 %v2848_v0  ;;  %v2994_v30 = vcvt.s32.f32 %v2992_v1 }
 0x8b9   : > { %2910 = vmin.xlane.f32.xlu1 %v2909_v7  ;;  %v3010_v26 = vand.u32 65535, %v7944_v13  ;;  %v2895_v13 = vcvt.f32.s32 %v7960_v20 }
 0x8bb   : > { %v7986_v11 = vpop.xlane.xlu0 %2816  ;;  %v3012_v16 = vcvt.s32.f32 %v3010_v26 }
 0x8bc   : > { %vm2818_vm11 = vcmp.eq.f32.partialorder %v7805_v5, %v7986_v11  ;;  %v2938_v5 = vand.u32 65535, %v7838_v32  ;;  %v2830_v32 = vand.u32 65535, %v7906_v29 }
 0x8bd   : > { %v2819_v41 = vsel %vm2818_vm11, %v2814_v40, inf  ;;  %v7991_v8 = vpop.xlane.xlu1 %2798 }
 0x8be   : > { %2820 = vmin.xlane.f32.xlu0 %v2819_v41  ;;  %vm2800_vm12 = vcmp.eq.f32.partialorder %v7821_v17, %v7991_v8  ;;  %v2940_v56 = vcvt.s32.f32 %v2938_v5  ;;  %v2832_v59 = vcvt.s32.f32 %v2830_v32 }
 0x8bf   : > { %v2801_v33 = vsel %vm2800_vm12, %v2796_v49, inf }
 0x8c0   : > { %v7995_v51 = vpop.xlane.xlu0 %2960  ;;  %2802 = vmin.xlane.f32.xlu1 %v2801_v33  ;;  %v2896_v33 = vshll.u32 %v2895_v13, 16 }
 0x8c1   : > { %vm2962_vm2 = vcmp.eq.f32.partialorder %v7836_v43, %v7995_v51 }
 0x8c2   : > { %v2963_v53 = vsel %vm2962_vm2, %v2958_v37, inf }
 0x8c3   : > { %2964 = vmin.xlane.f32.xlu0 %v2963_v53  ;;  %v9493_v53 = vld [vmem:[#allocation19_spill] sm:$0xff] }
 0x8c5   : > { %v8001_v57 = vpop.xlane.xlu1 %2942 }
 0x8c6   : > { %vm2944_vm13 = vcmp.eq.f32.partialorder %v7873_v21, %v8001_v57 }
 0x8c7   : > { %v2945_v17 = vsel %vm2944_vm13, %v2940_v56, inf  ;;  %v8005_v22 = vpop.xlane.xlu0 %2852 }
 0x8c8   : > { %2946 = vmin.xlane.f32.xlu1 %v2945_v17  ;;  %vm2854_vm14 = vcmp.eq.f32.partialorder %v7887_v14, %v8005_v22 }
 0x8c9   : > { %v2855_v43 = vsel %vm2854_vm14, %v2850_v31, inf  ;;  %v2769_v31 = vcvt.f32.s32 %v7970_v12 }
 0x8ca   : > { %2856 = vmin.xlane.f32.xlu0 %v2855_v43 }
 0x8ce   : > { %v8011_v48 = vpop.xlane.xlu1 %2834 }
 0x8cf   : > { %vm2836_vm15 = vcmp.eq.f32.partialorder %v7918_v18, %v8011_v48  ;;  %v8016_v54 = vpop.xlane.xlu0 %2996 }
 0x8d0   : > { %v2837_v21 = vsel %vm2836_vm15, %v2832_v59, inf  ;;  %vm2998_vm8 = vcmp.eq.f32.partialorder %v7934_v6, %v8016_v54  ;;  %v2770_v59 = vshll.u32 %v2769_v31, 16 }
 0x8d1   : > { %2838 = vmin.xlane.f32.xlu1 %v2837_v21  ;;  %v2999_v29 = vsel %vm2998_vm8, %v2994_v30, inf  ;;  %v9494_v21 = vld [vmem:[#allocation20_spill] sm:$0xff] }
 0x8d2   : > { %v8020_v14 = vpop.xlane.xlu1 %2978  ;;  %3000 = vmin.xlane.f32.xlu0 %v2999_v29 }
 0x8d3   : > { %vm2980_vm0 = vcmp.eq.f32.partialorder %v7941_v47, %v8020_v14  ;;  %v2751_v47 = vcvt.f32.s32 %v7955_v4  ;;  %v2787_v4 = vcvt.f32.s32 %v7965_v46 }
 0x8d4   : > { %v2981_v62 = vsel %vm2980_vm0, %v2976_v25, inf  ;;  %v2931_v25 = vcvt.f32.s32 %v7976_v3 }
 0x8d5   : > { %2982 = vmin.xlane.f32.xlu1 %v2981_v62  ;;  %v2752_v7 = vshll.u32 %v2751_v47, 16  ;;  %v2788_v56 = vshll.u32 %v2787_v4, 16  ;;  %v2913_v62 = vcvt.f32.s32 %v7980_v2 }
 0x8d6   : > { %v8025_v18 = vpop.xlane.xlu1 %2870  ;;  %v2932_v26 = vshll.u32 %v2931_v25, 16 }
 0x8d7   : > { %vm2872_vm1 = vcmp.eq.f32.partialorder %v7947_v38, %v8025_v18  ;;  %v9492_v38 = vld [vmem:[#allocation32_spill] sm:$0xff] }
 0x8d8   : > { %v2873_v6 = vsel %vm2872_vm1, %v2868_v28, inf }
 0x8d9   : > { %2874 = vmin.xlane.f32.xlu1 %v2873_v6 }
 0x8da   : > { %v8030_v60 = vpop.xlane.xlu1 %3014 }
 0x8db   : > { %vm3016_vm5 = vcmp.eq.f32.partialorder %v7951_v27, %v8030_v60 }
 0x8dc   : > { %v3017_v55 = vsel %vm3016_vm5, %v3012_v16, inf }
 0x8dd   : > { %3018 = vmin.xlane.f32.xlu1 %v3017_v55  ;;  %v2914_v55 = vshll.u32 %v2913_v62, 16 }
 0x927   : > { %v2749_v24 = vpop.xlane.xlu0 %2748 }
 0x928   : > { %v2750_v36 = vcvt.f32.s32 %v2749_v24  ;;  %v2823_v24 = vcvt.f32.s32 %v7986_v11 }
 0x92a   : > { %v2753_v40 = vadd.s32 %v2752_v7, %v2750_v36 }
 0x92c   : > { %v3024_v39 = vand.u32 65535, %v2753_v40  ;;  %v2805_v40 = vcvt.f32.s32 %v7991_v8 }
 0x92e   : > { %v8039_v41 = vsel %vm3040_vm4, %v3024_v39, %v9492_v38  ;;  %v2893_v49 = vpop.xlane.xlu0 %2892  ;;  %v2824_v38 = vshll.u32 %v2823_v24, 16  ;;  %v2841_v24 = vcvt.f32.s32 %v8011_v48 }
 0x92f   : > { %3089 = vst [vmem:[#allocation4] sm:$0xff] %v8039_v41  ;;  %v2894_v27 = vcvt.f32.s32 %v2893_v49  ;;  %v9496_v49 = vld [vmem:[#allocation70_spill] sm:$0xff] }
 0x931   : > { %v2897_v37 = vadd.s32 %v2896_v33, %v2894_v27  ;;  %v2967_v27 = vcvt.f32.s32 %v7995_v51  ;;  %v2949_v51 = vcvt.f32.s32 %v8001_v57 }
 0x933   : > { %v3032_v5 = vand.u32 65535, %v2897_v37  ;;  %v9497_v37 = vld [vmem:[#allocation27_spill] sm:$0xff]  ;;  %v2950_v62 = vshll.u32 %v2949_v51, 16 }
 0x935   : > { %v8046_v0 = vsel %vm3040_vm4, %v3032_v5, %v9493_v53  ;;  %v2806_v5 = vshll.u32 %v2805_v40, 16  ;;  %v3003_v40 = vcvt.f32.s32 %v8016_v54  ;;  %v2877_v54 = vcvt.f32.s32 %v8025_v18 }
 0x936   : > { %3097 = vst [vmem:[#allocation4 + $0x40] sm:$0xff] %v8046_v0  ;;  %v2785_v20 = vpop.xlane.xlu0 %2784 }
 0x937   : > { %v2786_v17 = vcvt.f32.s32 %v2785_v20 }
 0x939   : > { %v2789_v43 = vadd.s32 %v2788_v56, %v2786_v17  ;;  %v2968_v17 = vshll.u32 %v2967_v27, 16 }
 0x93b   : > { %v3026_v32 = vand.u32 65535, %v2789_v43  ;;  %v2767_v1 = vpop.xlane.xlu1 %2766 }
 0x93c   : > { %v2768_v35 = vcvt.f32.s32 %v2767_v1 }
 0x93d   : > { %v8053_v46 = vsel %vm3040_vm4, %v3026_v32, %v9494_v21  ;;  %v9498_v32 = vld [vmem:[#allocation73_spill] sm:$0xff]  ;;  %v2859_v21 = vcvt.f32.s32 %v8005_v22 }
 0x93e   : > { %3091 = vst [vmem:[#allocation4 + $0x10] sm:$0xff] %v8053_v46  ;;  %v2771_v30 = vadd.s32 %v2770_v59, %v2768_v35 }
 0x940   : > { %v3025_v29 = vand.u32 65535, %v2771_v30  ;;  %v9499_v30 = vld [vmem:[#allocation74_spill] sm:$0xff] }
 0x942   : > { %v8060_v12 = vsel %vm3040_vm4, %v3025_v29, %v9495_v15 }
 0x943   : > { %3090 = vst [vmem:[#allocation4 + $0x8] sm:$0xff] %v8060_v12 }
 0x945   : > { %v2929_v28 = vpop.xlane.xlu0 %2928 }
 0x946   : > { %v2930_v6 = vcvt.f32.s32 %v2929_v28  ;;  %v2911_v16 = vpop.xlane.xlu1 %2910  ;;  %v9500_v28 = vld [vmem:[#allocation77_spill] sm:$0xff] }
 0x947   : > { %v2912_v47 = vcvt.f32.s32 %v2911_v16  ;;  %v2860_v16 = vshll.u32 %v2859_v21, 16  ;;  %v3021_v21 = vcvt.f32.s32 %v8030_v60 }
 0x948   : > { %v2933_v7 = vadd.s32 %v2932_v26, %v2930_v6 }
 0x949   : > { %v2915_v36 = vadd.s32 %v2914_v55, %v2912_v47 }
 0x94a   : > { %v3034_v3 = vand.u32 65535, %v2933_v7 }
 0x94b   : > { %v3033_v13 = vand.u32 65535, %v2915_v36  ;;  %v2821_v39 = vpop.xlane.xlu0 %2820  ;;  %v9501_v36 = vld [vmem:[#allocation18_spill] sm:$0xff] }
 0x94c   : > { %v8069_v2 = vsel %vm3040_vm4, %v3034_v3, %v9496_v49  ;;  %v2822_v33 = vcvt.f32.s32 %v2821_v39  ;;  %v2985_v49 = vcvt.f32.s32 %v8020_v14  ;;  %v9503_v14 = vld [vmem:[#allocation81_spill] sm:$0xff] }
 0x94d   : > { %3099 = vst [vmem:[#allocation4 + $0x50] sm:$0xff] %v8069_v2  ;;  %v8076_v11 = vsel %vm3040_vm4, %v3033_v13, %v9497_v37  ;;  %v2803_v4 = vpop.xlane.xlu1 %2802 }
 0x94e   : > { %3098 = vst [vmem:[#allocation4 + $0x48] sm:$0xff] %v8076_v11  ;;  %v2825_v8 = vadd.s32 %v2824_v38, %v2822_v33  ;;  %v2804_v53 = vcvt.f32.s32 %v2803_v4  ;;  %v2842_v38 = vshll.u32 %v2841_v24, 16  ;;  %v9502_v33 = vld [vmem:[#allocation79_spill] sm:$0xff] }
 0x950   : > { %v3028_v20 = vand.u32 65535, %v2825_v8  ;;  %v2965_v56 = vpop.xlane.xlu0 %2964  ;;  %v2807_v31 = vadd.s32 %v2806_v5, %v2804_v53  ;;  %v3004_v8 = vshll.u32 %v3003_v40, 16 }
 0x951   : > { %v2966_v43 = vcvt.f32.s32 %v2965_v56 }
 0x952   : > { %v8083_v1 = vsel %vm3040_vm4, %v3028_v20, %v9498_v32  ;;  %v3027_v59 = vand.u32 65535, %v2807_v31  ;;  %v2986_v20 = vshll.u32 %v2985_v49, 16 }
 0x953   : > { %3093 = vst [vmem:[#allocation4 + $0x20] sm:$0xff] %v8083_v1  ;;  %v2969_v35 = vadd.s32 %v2968_v17, %v2966_v43 }
 0x954   : > { %v8090_v29 = vsel %vm3040_vm4, %v3027_v59, %v9499_v30  ;;  %v2878_v59 = vshll.u32 %v2877_v54, 16  ;;  %v9504_v30 = vld [vmem:[#allocation21_spill] sm:$0xff] }
 0x955   : > { %v3036_v25 = vand.u32 65535, %v2969_v35  ;;  %v2947_v15 = vpop.xlane.xlu1 %2946  ;;  %3092 = vst [vmem:[#allocation4 + $0x18] sm:$0xff] %v8090_v29 }
 0x956   : > { %v2948_v57 = vcvt.f32.s32 %v2947_v15 }
 0x957   : > { %v8096_v26 = vsel %vm3040_vm4, %v3036_v25, %v9500_v28  ;;  %v2857_v22 = vpop.xlane.xlu0 %2856 }
 0x958   : > { %3101 = vst [vmem:[#allocation4 + $0x60] sm:$0xff] %v8096_v26  ;;  %v2951_v6 = vadd.s32 %v2950_v62, %v2948_v57  ;;  %v2858_v55 = vcvt.f32.s32 %v2857_v22  ;;  %v9505_v62 = vld [vmem:[#allocation83_spill] sm:$0xff]  ;;  %v3022_v22 = vshll.u32 %v3021_v21, 16 }
 0x95a   : > { %v3035_v47 = vand.u32 65535, %v2951_v6  ;;  %v2861_v7 = vadd.s32 %v2860_v16, %v2858_v55  ;;  %v9506_v55 = vld [vmem:[#allocation34_spill] sm:$0xff] }
 0x95c   : > { %v8103_v3 = vsel %vm3040_vm4, %v3035_v47, %v9501_v36  ;;  %v3030_v13 = vand.u32 65535, %v2861_v7  ;;  %v9507_v36 = vld [vmem:[#allocation71_spill] sm:$0xff] }
 0x95d   : > { %3100 = vst [vmem:[#allocation4 + $0x58] sm:$0xff] %v8103_v3 }
 0x95e   : > { %v2839_v39 = vpop.xlane.xlu1 %2838  ;;  %v8111_v27 = vsel %vm3040_vm4, %v3030_v13, %v9502_v33 }
 0x95f   : > { %v2840_v48 = vcvt.f32.s32 %v2839_v39  ;;  %3095 = vst [vmem:[#allocation4 + $0x30] sm:$0xff] %v8111_v27  ;;  %v3001_v37 = vpop.xlane.xlu0 %3000 }
 0x960   : > { %v3002_v5 = vcvt.f32.s32 %v3001_v37 }
 0x961   : > { %v2843_v4 = vadd.s32 %v2842_v38, %v2840_v48 }
 0x962   : > { %v2983_v53 = vpop.xlane.xlu1 %2982  ;;  %v3005_v17 = vadd.s32 %v3004_v8, %v3002_v5 }
 0x963   : > { %v3029_v56 = vand.u32 65535, %v2843_v4  ;;  %v2984_v31 = vcvt.f32.s32 %v2983_v53 }
 0x964   : > { %v3038_v51 = vand.u32 65535, %v3005_v17 }
 0x965   : > { %v8118_v43 = vsel %vm3040_vm4, %v3029_v56, %v9503_v14  ;;  %v2987_v32 = vadd.s32 %v2986_v20, %v2984_v31 }
 0x966   : > { %3094 = vst [vmem:[#allocation4 + $0x28] sm:$0xff] %v8118_v43  ;;  %v2875_v35 = vpop.xlane.xlu1 %2874  ;;  %v8125_v18 = vsel %vm3040_vm4, %v3038_v51, %v9504_v30 }
 0x967   : > { %v3037_v25 = vand.u32 65535, %v2987_v32  ;;  %v2876_v15 = vcvt.f32.s32 %v2875_v35  ;;  %3103 = vst [vmem:[#allocation4 + $0x70] sm:$0xff] %v8125_v18 }
 0x969   : > { %v8131_v57 = vsel %vm3040_vm4, %v3037_v25, %v9505_v62  ;;  %v2879_v28 = vadd.s32 %v2878_v59, %v2876_v15 }
 0x96a   : > { %3102 = vst [vmem:[#allocation4 + $0x68] sm:$0xff] %v8131_v57  ;;  %v3019_v6 = vpop.xlane.xlu1 %3018 }
 0x96b   : > { %v3031_v60 = vand.u32 65535, %v2879_v28  ;;  %v3020_v16 = vcvt.f32.s32 %v3019_v6 }
 0x96c   : > { %3108 = sbr.rel (%p4184_p13) target bundleno = 2976 (0xba0), region = 48 }
 0x96d   : > { %v8137_v47 = vsel %vm3040_vm4, %v3031_v60, %v9506_v55  ;;  %v3023_v24 = vadd.s32 %v3022_v22, %v3020_v16 }
 0x96e   : > { %3096 = vst [vmem:[#allocation4 + $0x38] sm:$0xff] %v8137_v47 }
 0x96f   : > { %v3039_v7 = vand.u32 65535, %v3023_v24 }
 0x971   : > { %v8143_v40 = vsel %vm3040_vm4, %v3039_v7, %v9507_v36 }
 0x972   : > { %3104 = vst [vmem:[#allocation4 + $0x78] sm:$0xff] %v8143_v40 }
 0x973   : > { %v9508_v13 = vld [vmem:[#allocation75_spill] sm:$0xff]  ;;  %v9509_v38 = vld [vmem:[#allocation28_spill] sm:$0xff]  ;;  %v4667_v33 = vmov 0   ;;  %v3112_v48 = vmul.f32 14.285714, %v7747_v42  ;;  %v9511_v53 = vld [vmem:[#allocation29_spill] sm:$0xff] }
 0x974   : > { %v3111_v39 = vmul.f32 14.285714, %v9508_v13  ;;  %v3109_v49 = vmul.f32 14.285714, %v9509_v38  ;;  %4400 = vset.pattern.permute.xlu1 %v4667_v33  ;;  %4399 = vset.pattern.permute.xlu0 %v4667_v33  ;;  %v9510_v37 = vld [vmem:[#allocation76_spill] sm:$0xff] }
 0x975   : > { %v3110_v63 = vmul.f32 14.285714, %v9510_v37  ;;  %v8152_v8 = vmul.f32 14.285714, %v7845_v34  ;;  %v3113_v4 = vmul.f32 14.285714, %v7730_v44 }
 0x976   : > { %3137 = vperm.xlu1 %4400, %v3111_v39   ;;  %3127 = vperm.xlu0 %4399, %v3109_v49   ;;  %v8157_v5 = vmul.f32 14.285714, %v7899_v52  ;;  %v3115_v54 = vmul.f32 14.285714, %v7817_v45  ;;  %v8162_v42 = vmul.f32 14.285714, %v7691_v10 }
 0x977   : > { %v8165_v20 = vmul.f32 14.285714, %v9511_v53  ;;  %v8170_v44 = vmul.f32 14.285714, %v7800_v19  ;;  %v8173_v34 = vmul.f32 14.285714, %v7668_v23 }
 0x978   : > { %v8178_v10 = vmul.f32 14.285714, %v7883_v58  ;;  %v8181_v45 = vmul.f32 14.285714, %v7757_v50  ;;  %v8186_v19 = vmul.f32 14.285714, %v7930_v61 }
 0x979   : > { %v8189_v23 = vmul.f32 14.285714, %v7868_v9 }
 0x97a   : > { %3142 = vperm.xlu1 %4400, %v3112_v48   ;;  %3132 = vperm.xlu0 %4399, %v3110_v63  }
 0x97e   : > { %3152 = vperm.xlu1 %4400, %v8152_v8   ;;  %3147 = vperm.xlu0 %4399, %v3113_v4  }
 0x982   : > { %3162 = vperm.xlu1 %4400, %v8157_v5   ;;  %3157 = vperm.xlu0 %4399, %v3115_v54  }
 0x986   : > { %3172 = vperm.xlu1 %4400, %v8162_v42   ;;  %3167 = vperm.xlu0 %4399, %v8165_v20  }
 0x98a   : > { %3182 = vperm.xlu1 %4400, %v8170_v44   ;;  %3177 = vperm.xlu0 %4399, %v8173_v34  }
 0x98e   : > { %3192 = vperm.xlu1 %4400, %v8178_v10   ;;  %3187 = vperm.xlu0 %4399, %v8181_v45  }
 0x992   : > { %3202 = vperm.xlu1 %4400, %v8186_v19   ;;  %3197 = vperm.xlu0 %4399, %v8189_v23  }
 0x996   : > { %3286 = vperm.xlu1 %4400, %v8039_v41   ;;  %3289 = vperm.xlu0 %4399, %v8060_v12  }
 0x99a   : > { %3292 = vperm.xlu1 %4400, %v8053_v46   ;;  %3298 = vperm.xlu0 %4399, %v8083_v1  }
 0x99e   : > { %3295 = vperm.xlu1 %4400, %v8090_v29   ;;  %3304 = vperm.xlu0 %4399, %v8111_v27  }
 0x9a2   : > { %3301 = vperm.xlu1 %4400, %v8118_v43   ;;  %3310 = vperm.xlu0 %4399, %v8046_v0  }
 0x9a6   : > { %3307 = vperm.xlu1 %4400, %v8137_v47   ;;  %3316 = vperm.xlu0 %4399, %v8069_v2  }
 0x9aa   : > { %3313 = vperm.xlu1 %4400, %v8076_v11   ;;  %3322 = vperm.xlu0 %4399, %v8096_v26  }
 0x9ae   : > { %3319 = vperm.xlu1 %4400, %v8103_v3   ;;  %3328 = vperm.xlu0 %4399, %v8125_v18  }
 0x9b2   : > { %3325 = vperm.xlu1 %4400, %v8131_v57  }
 0x9b6   : > { %3331 = vperm.xlu1 %4400, %v8143_v40  }
 0x9f5   : > { %v3138_v50 = vpop.permute.xlu1 %3137  ;;  %v3128_v9 = vpop.permute.xlu0 %3127 }
 0x9f6   : > { %v3207_v58 = vsub.f32 %v3111_v39, %v3138_v50  ;;  %v3205_v52 = vsub.f32 %v3109_v49, %v3128_v9 }
 0x9f8   : > { %v3221_v61 = vmul.f32 1.442695, %v3205_v52  ;;  %v3225_v56 = vmul.f32 1.442695, %v3207_v58 }
 0x9f9   : > { %v3143_v17 = vpop.permute.xlu1 %3142  ;;  %v3133_v31 = vpop.permute.xlu0 %3132 }
 0x9fa   : > { %v3208_v14 = vsub.f32 %v3112_v48, %v3143_v17  ;;  %v3206_v51 = vsub.f32 %v3110_v63, %v3133_v31  ;;  %4407 = vpow2.f32 %v3221_v61 }
 0x9fb   : > { %4409 = vpow2.f32 %v3225_v56 }
 0x9fc   : > { %v3223_v32 = vmul.f32 1.442695, %v3206_v51  ;;  %v3227_v21 = vmul.f32 1.442695, %v3208_v14 }
 0x9fd   : > { %v3153_v59 = vpop.permute.xlu1 %3152  ;;  %v3148_v35 = vpop.permute.xlu0 %3147 }
 0x9fe   : > { %v3210_v30 = vsub.f32 %v8152_v8, %v3153_v59  ;;  %v3209_v25 = vsub.f32 %v3113_v4, %v3148_v35  ;;  %4411 = vpow2.f32 %v3223_v32 }
 0x9ff   : > { %4413 = vpow2.f32 %v3227_v21 }
 0xa00   : > { %v3229_v15 = vmul.f32 1.442695, %v3209_v25  ;;  %v3231_v6 = vmul.f32 1.442695, %v3210_v30 }
 0xa01   : > { %v3163_v62 = vpop.permute.xlu1 %3162  ;;  %v3158_v28 = vpop.permute.xlu0 %3157 }
 0xa02   : > { %v3212_v22 = vsub.f32 %v8157_v5, %v3163_v62  ;;  %v3211_v60 = vsub.f32 %v3115_v54, %v3158_v28  ;;  %4415 = vpow2.f32 %v3229_v15  ;;  %v4668_v15 = vmov 1  }
 0xa03   : > { %4417 = vpow2.f32 %v3231_v6 }
 0xa04   : > { %v3233_v16 = vmul.f32 1.442695, %v3211_v60  ;;  %v8211_v55 = vpop.eup %4407  ;;  %v3235_v36 = vmul.f32 1.442695, %v3212_v22 }
 0xa05   : > { %v3173_v24 = vpop.permute.xlu1 %3172  ;;  %v3168_v7 = vpop.permute.xlu0 %3167  ;;  %3253 = vadd.xlane.f32.xlu0 %v8211_v55 }
 0xa06   : > { %v3214_v13 = vsub.f32 %v8162_v42, %v3173_v24  ;;  %v3213_v39 = vsub.f32 %v8165_v20, %v3168_v7  ;;  %v8216_v38 = vpop.eup %4409  ;;  %4419 = vpow2.f32 %v3233_v16 }
 0xa07   : > { %4421 = vpow2.f32 %v3235_v36 }
 0xa08   : > { %v3237_v49 = vmul.f32 1.442695, %v3213_v39  ;;  %v8218_v33 = vpop.eup %4411  ;;  %v3239_v63 = vmul.f32 1.442695, %v3214_v13 }
 0xa09   : > { %v3183_v48 = vpop.permute.xlu1 %3182  ;;  %v3178_v37 = vpop.permute.xlu0 %3177  ;;  %3257 = vadd.xlane.f32.xlu0 %v8216_v38  ;;  %3255 = vadd.xlane.f32.xlu1 %v8218_v33 }
 0xa0a   : > { %v3216_v8 = vsub.f32 %v8170_v44, %v3183_v48  ;;  %v3215_v4 = vsub.f32 %v8173_v34, %v3178_v37  ;;  %4423 = vpow2.f32 %v3237_v49  ;;  %v8224_v5 = vpop.eup %4413 }
 0xa0b   : > { %4425 = vpow2.f32 %v3239_v63 }
 0xa0c   : > { %v3241_v54 = vmul.f32 1.442695, %v3215_v4  ;;  %v8226_v42 = vpop.eup %4415  ;;  %v3243_v50 = vmul.f32 1.442695, %v3216_v8 }
 0xa0d   : > { %v3193_v53 = vpop.permute.xlu1 %3192  ;;  %v3188_v20 = vpop.permute.xlu0 %3187  ;;  %3259 = vadd.xlane.f32.xlu0 %v8224_v5  ;;  %3261 = vadd.xlane.f32.xlu1 %v8226_v42 }
 0xa0e   : > { %v3218_v9 = vsub.f32 %v8178_v10, %v3193_v53  ;;  %v3217_v44 = vsub.f32 %v8181_v45, %v3188_v20  ;;  %4427 = vpow2.f32 %v3241_v54  ;;  %v8232_v34 = vpop.eup %4417  ;;  %v4669_v54 = vmov 2  }
 0xa0f   : > { %4429 = vpow2.f32 %v3243_v50 }
 0xa10   : > { %v3245_v58 = vmul.f32 1.442695, %v3217_v44  ;;  %v8234_v52 = vpop.eup %4419  ;;  %v3247_v17 = vmul.f32 1.442695, %v3218_v9 }
 0xa11   : > { %v3203_v61 = vpop.permute.xlu1 %3202  ;;  %v3198_v56 = vpop.permute.xlu0 %3197  ;;  %3263 = vadd.xlane.f32.xlu0 %v8232_v34  ;;  %3265 = vadd.xlane.f32.xlu1 %v8234_v52 }
 0xa12   : > { %v3219_v10 = vsub.f32 %v8189_v23, %v3198_v56  ;;  %4431 = vpow2.f32 %v3245_v58  ;;  %v3220_v31 = vsub.f32 %v8186_v19, %v3203_v61  ;;  %v8240_v45 = vpop.eup %4421 }
 0xa13   : > { %4433 = vpow2.f32 %v3247_v17 }
 0xa14   : > { %v3249_v14 = vmul.f32 1.442695, %v3219_v10  ;;  %v8242_v51 = vpop.eup %4423  ;;  %v3251_v32 = vmul.f32 1.442695, %v3220_v31 }
 0xa15   : > { %3267 = vadd.xlane.f32.xlu0 %v8240_v45  ;;  %3269 = vadd.xlane.f32.xlu1 %v8242_v51  ;;  %v8246_v59 = vpop.eup %4425  ;;  %v8289_v62 = vpop.permute.xlu1 %3286 }
 0xa16   : > { %4435 = vpow2.f32 %v3249_v14  ;;  %v8297_v6 = vpop.permute.xlu0 %3289 }
 0xa17   : > { %4437 = vpow2.f32 %v3251_v32 }
 0xa18   : > { %v8248_v35 = vpop.eup %4427 }
 0xa19   : > { %3271 = vadd.xlane.f32.xlu0 %v8246_v59  ;;  %3273 = vadd.xlane.f32.xlu1 %v8248_v35  ;;  %v8252_v19 = vpop.eup %4429  ;;  %v8294_v28 = vpop.permute.xlu1 %3292 }
 0xa1a   : > { %v8304_v60 = vpop.permute.xlu0 %3298 }
 0xa1c   : > { %v8254_v23 = vpop.eup %4431 }
 0xa1d   : > { %3275 = vadd.xlane.f32.xlu0 %v8252_v19  ;;  %3277 = vadd.xlane.f32.xlu1 %v8254_v23  ;;  %v8258_v21 = vpop.eup %4433  ;;  %v8301_v22 = vpop.permute.xlu1 %3295 }
 0xa1e   : > { %v8311_v24 = vpop.permute.xlu0 %3304 }
 0xa20   : > { %v8260_v30 = vpop.eup %4435 }
 0xa21   : > { %3279 = vadd.xlane.f32.xlu0 %v8258_v21  ;;  %3281 = vadd.xlane.f32.xlu1 %v8260_v30  ;;  %v8264_v25 = vpop.eup %4437  ;;  %v8308_v16 = vpop.permute.xlu1 %3301 }
 0xa22   : > { %v8318_v36 = vpop.permute.xlu0 %3310 }
 0xa25   : > { %3283 = vadd.xlane.f32.xlu0 %v8264_v25  ;;  %v8315_v7 = vpop.permute.xlu1 %3307 }
 0xa26   : > { %v8325_v39 = vpop.permute.xlu0 %3316 }
 0xa27   : > { %9512 = vst [vmem:[#allocation129_spill] sm:$0xff] %v8325_v39 }
 0xa29   : > { %v8322_v13 = vpop.permute.xlu1 %3313 }
 0xa2a   : > { %v8332_v48 = vpop.permute.xlu0 %3322 }
 0xa2d   : > { %v8329_v49 = vpop.permute.xlu1 %3319 }
 0xa2e   : > { %9513 = vst [vmem:[#allocation130_spill] sm:$0xff] %v8329_v49  ;;  %v8339_v63 = vpop.permute.xlu0 %3328 }
 0xa31   : > { %v8336_v37 = vpop.permute.xlu1 %3325 }
 0xa32   : > { %3356 = vperm.xlu1 %4400, %v8218_v33   ;;  %9514 = vst [vmem:[#allocation131_spill] sm:$0xff] %v8336_v37  ;;  %v4670_v37 = vmov 3  }
 0xa35   : > { %v8343_v8 = vpop.permute.xlu1 %3331 }
 0xa36   : > { %3366 = vperm.xlu1 %4400, %v8224_v5   ;;  %9515 = vst [vmem:[#allocation132_spill] sm:$0xff] %v8343_v8 }
 0xa3a   : > { %3376 = vperm.xlu1 %4400, %v8232_v34  }
 0xa3b   : > { %3351 = vperm.xlu0 %4399, %v8211_v55  }
 0xa3e   : > { %3386 = vperm.xlu1 %4400, %v8240_v45  }
 0xa3f   : > { %3361 = vperm.xlu0 %4399, %v8216_v38  }
 0xa42   : > { %3396 = vperm.xlu1 %4400, %v8246_v59  }
 0xa43   : > { %3371 = vperm.xlu0 %4399, %v8226_v42  }
 0xa46   : > { %3406 = vperm.xlu1 %4400, %v8252_v19  }
 0xa47   : > { %3381 = vperm.xlu0 %4399, %v8234_v52  }
 0xa4a   : > { %3416 = vperm.xlu1 %4400, %v8258_v21  }
 0xa4b   : > { %3391 = vperm.xlu0 %4399, %v8242_v51  }
 0xa4e   : > { %3426 = vperm.xlu1 %4400, %v8264_v25  }
 0xa4f   : > { %3401 = vperm.xlu0 %4399, %v8248_v35  }
 0xa52   : > { %4402 = vset.pattern.permute.xlu1 %v4668_v15 }
 0xa53   : > { %3411 = vperm.xlu0 %4399, %v8254_v23   ;;  %3465 = vperm.xlu1 %4402, %v8060_v12  }
 0xa57   : > { %3421 = vperm.xlu0 %4399, %v8260_v30   ;;  %3468 = vperm.xlu1 %4402, %v8053_v46  }
 0xa5b   : > { %4401 = vset.pattern.permute.xlu0 %v4668_v15  ;;  %3474 = vperm.xlu1 %4402, %v8083_v1  }
 0xa5c   : > { %3462 = vperm.xlu0 %4401, %v8039_v41  }
 0xa5f   : > { %3480 = vperm.xlu1 %4402, %v8111_v27  }
 0xa60   : > { %3471 = vperm.xlu0 %4401, %v8090_v29  }
 0xa63   : > { %3486 = vperm.xlu1 %4402, %v8046_v0  }
 0xa64   : > { %3477 = vperm.xlu0 %4401, %v8118_v43  }
 0xa67   : > { %3492 = vperm.xlu1 %4402, %v8069_v2  }
 0xa68   : > { %3483 = vperm.xlu0 %4401, %v8137_v47  }
 0xa6b   : > { %3498 = vperm.xlu1 %4402, %v8096_v26  }
 0xa6c   : > { %3489 = vperm.xlu0 %4401, %v8076_v11  }
 0xa6f   : > { %3504 = vperm.xlu1 %4402, %v8125_v18  }
 0xa70   : > { %3495 = vperm.xlu0 %4401, %v8103_v3  }
 0xa73   : > { %3526 = vperm.xlu1 %4402, %v8211_v55  }
 0xa74   : > { %3501 = vperm.xlu0 %4401, %v8131_v57  }
 0xa77   : > { %3534 = vperm.xlu1 %4402, %v8216_v38  }
 0xa78   : > { %3507 = vperm.xlu0 %4401, %v8143_v40  }
 0xa7b   : > { %3542 = vperm.xlu1 %4402, %v8226_v42  }
 0xa7c   : > { %3530 = vperm.xlu0 %4401, %v8218_v33  }
 0xa7f   : > { %3550 = vperm.xlu1 %4402, %v8234_v52  }
 0xa80   : > { %3538 = vperm.xlu0 %4401, %v8224_v5  }
 0xa83   : > { %3558 = vperm.xlu1 %4402, %v8242_v51  }
 0xa84   : > { %3546 = vperm.xlu0 %4401, %v8232_v34  }
 0xa87   : > { %3566 = vperm.xlu1 %4402, %v8248_v35  }
 0xa88   : > { %3554 = vperm.xlu0 %4401, %v8240_v45  }
 0xa8b   : > { %3574 = vperm.xlu1 %4402, %v8254_v23  }
 0xa8c   : > { %3562 = vperm.xlu0 %4401, %v8246_v59  }
 0xa8f   : > { %3582 = vperm.xlu1 %4402, %v8260_v30  }
 0xa90   : > { %3570 = vperm.xlu0 %4401, %v8252_v19  }
 0xa92   : > { %v8345_v4 = vpop.xlane.xlu0 %3253 }
 0xa93   : > { %9516 = vst [vmem:[#allocation133_spill] sm:$0xff] %v8345_v4  ;;  %4403 = vset.pattern.permute.xlu1 %v4669_v54 }
 0xa94   : > { %3578 = vperm.xlu0 %4401, %v8258_v21   ;;  %3622 = vperm.xlu1 %4403, %v8039_v41  }
 0xa96   : > { %v8349_v53 = vpop.xlane.xlu1 %3255  ;;  %v8351_v20 = vpop.xlane.xlu0 %3257 }
 0xa97   : > { %9517 = vst [vmem:[#allocation134_spill] sm:$0xff] %v8349_v53  ;;  %9518 = vst [vmem:[#allocation135_spill] sm:$0xff] %v8351_v20 }
 0xa98   : > { %3586 = vperm.xlu0 %4401, %v8264_v25   ;;  %3628 = vperm.xlu1 %4403, %v8053_v46  }
 0xa9a   : > { %v8355_v50 = vpop.xlane.xlu1 %3261  ;;  %v8357_v9 = vpop.xlane.xlu0 %3259 }
 0xa9b   : > { %9519 = vst [vmem:[#allocation136_spill] sm:$0xff] %v8355_v50  ;;  %9520 = vst [vmem:[#allocation137_spill] sm:$0xff] %v8357_v9 }
 0xa9c   : > { %4404 = vset.pattern.permute.xlu0 %v4669_v54  ;;  %3631 = vperm.xlu1 %4403, %v8090_v29  }
 0xa9d   : > { %3625 = vperm.xlu0 %4404, %v8060_v12  }
 0xa9e   : > { %v8361_v44 = vpop.xlane.xlu1 %3265  ;;  %v8363_v58 = vpop.xlane.xlu0 %3263 }
 0xa9f   : > { %9521 = vst [vmem:[#allocation138_spill] sm:$0xff] %v8361_v44  ;;  %9522 = vst [vmem:[#allocation139_spill] sm:$0xff] %v8363_v58 }
 0xaa0   : > { %3637 = vperm.xlu1 %4403, %v8118_v43  }
 0xaa1   : > { %3634 = vperm.xlu0 %4404, %v8083_v1  }
 0xaa2   : > { %v8367_v61 = vpop.xlane.xlu1 %3269  ;;  %v8369_v56 = vpop.xlane.xlu0 %3267 }
 0xaa3   : > { %9523 = vst [vmem:[#allocation140_spill] sm:$0xff] %v8367_v61  ;;  %9524 = vst [vmem:[#allocation141_spill] sm:$0xff] %v8369_v56 }
 0xaa4   : > { %3643 = vperm.xlu1 %4403, %v8137_v47  }
 0xaa5   : > { %3640 = vperm.xlu0 %4404, %v8111_v27  }
 0xaa6   : > { %v8373_v17 = vpop.xlane.xlu1 %3273  ;;  %v8375_v10 = vpop.xlane.xlu0 %3271 }
 0xaa7   : > { %9525 = vst [vmem:[#allocation142_spill] sm:$0xff] %v8373_v17  ;;  %9526 = vst [vmem:[#allocation143_spill] sm:$0xff] %v8375_v10 }
 0xaa8   : > { %3649 = vperm.xlu1 %4403, %v8076_v11  }
 0xaa9   : > { %3646 = vperm.xlu0 %4404, %v8046_v0  }
 0xaaa   : > { %v8379_v31 = vpop.xlane.xlu1 %3277  ;;  %v8381_v14 = vpop.xlane.xlu0 %3275 }
 0xaab   : > { %9527 = vst [vmem:[#allocation144_spill] sm:$0xff] %v8379_v31  ;;  %9528 = vst [vmem:[#allocation145_spill] sm:$0xff] %v8381_v14 }
 0xaac   : > { %3655 = vperm.xlu1 %4403, %v8103_v3  }
 0xaad   : > { %3652 = vperm.xlu0 %4404, %v8069_v2  }
 0xaae   : > { %v8385_v32 = vpop.xlane.xlu1 %3281  ;;  %v8387_v15 = vpop.xlane.xlu0 %3279 }
 0xaaf   : > { %9529 = vst [vmem:[#allocation146_spill] sm:$0xff] %v8385_v32  ;;  %9530 = vst [vmem:[#allocation147_spill] sm:$0xff] %v8387_v15 }
 0xab0   : > { %3661 = vperm.xlu1 %4403, %v8131_v57  }
 0xab1   : > { %3658 = vperm.xlu0 %4404, %v8096_v26  }
 0xab2   : > { %v8391_v54 = vpop.permute.xlu1 %3356  ;;  %v8395_v31 = vpop.xlane.xlu0 %3283 }
 0xab3   : > { %9531 = vst [vmem:[#allocation148_spill] sm:$0xff] %v8395_v31 }
 0xab4   : > { %3667 = vperm.xlu1 %4403, %v8143_v40  }
 0xab5   : > { %3664 = vperm.xlu0 %4404, %v8125_v18  }
 0xab6   : > { %v8397_v14 = vpop.permute.xlu1 %3366 }
 0xab8   : > { %3690 = vperm.xlu1 %4403, %v8218_v33  }
 0xab9   : > { %3686 = vperm.xlu0 %4404, %v8211_v55  }
 0xaba   : > { %v8401_v32 = vpop.permute.xlu1 %3376  ;;  %v8403_v15 = vpop.permute.xlu0 %3351 }
 0xabc   : > { %3698 = vperm.xlu1 %4403, %v8224_v5  }
 0xabd   : > { %3694 = vperm.xlu0 %4404, %v8216_v38  }
 0xabe   : > { %v8407_v17 = vpop.permute.xlu1 %3386  ;;  %v8409_v10 = vpop.permute.xlu0 %3361 }
 0xac0   : > { %3706 = vperm.xlu1 %4403, %v8232_v34  }
 0xac1   : > { %3702 = vperm.xlu0 %4404, %v8226_v42  }
 0xac2   : > { %v8413_v31 = vpop.permute.xlu1 %3396  ;;  %v8415_v61 = vpop.permute.xlu0 %3371 }
 0xac4   : > { %3714 = vperm.xlu1 %4403, %v8240_v45  }
 0xac5   : > { %3710 = vperm.xlu0 %4404, %v8234_v52  }
 0xac6   : > { %v8419_v56 = vpop.permute.xlu1 %3406  ;;  %v8421_v44 = vpop.permute.xlu0 %3381 }
 0xac7   : > { %9532 = vst [vmem:[#allocation149_spill] sm:$0xff] %v8419_v56 }
 0xac8   : > { %3722 = vperm.xlu1 %4403, %v8246_v59  }
 0xac9   : > { %3718 = vperm.xlu0 %4404, %v8242_v51  }
 0xaca   : > { %v8425_v58 = vpop.permute.xlu1 %3416  ;;  %v8427_v50 = vpop.permute.xlu0 %3391 }
 0xacb   : > { %9533 = vst [vmem:[#allocation150_spill] sm:$0xff] %v8425_v58  ;;  %9534 = vst [vmem:[#allocation151_spill] sm:$0xff] %v8427_v50 }
 0xacc   : > { %3730 = vperm.xlu1 %4403, %v8252_v19  }
 0xacd   : > { %3726 = vperm.xlu0 %4404, %v8248_v35  }
 0xace   : > { %v8431_v9 = vpop.permute.xlu1 %3426  ;;  %v8433_v20 = vpop.permute.xlu0 %3401 }
 0xacf   : > { %9535 = vst [vmem:[#allocation152_spill] sm:$0xff] %v8431_v9  ;;  %9536 = vst [vmem:[#allocation153_spill] sm:$0xff] %v8433_v20 }
 0xad0   : > { %3738 = vperm.xlu1 %4403, %v8258_v21  }
 0xad1   : > { %3734 = vperm.xlu0 %4404, %v8254_v23  }
 0xad2   : > { %v3466_v53 = vpop.permute.xlu1 %3465  ;;  %v8437_v4 = vpop.permute.xlu0 %3411 }
 0xad4   : > { %3746 = vperm.xlu1 %4403, %v8264_v25  }
 0xad5   : > { %3742 = vperm.xlu0 %4404, %v8260_v30  }
 0xad6   : > { %v3469_v8 = vpop.permute.xlu1 %3468  ;;  %v8441_v58 = vpop.permute.xlu0 %3421 }
 0xad8   : > { %4406 = vset.pattern.permute.xlu1 %v4670_v37 }
 0xad9   : > { %3785 = vperm.xlu1 %4406, %v8060_v12   ;;  %4405 = vset.pattern.permute.xlu0 %v4670_v37 }
 0xada   : > { %v3475_v9 = vpop.permute.xlu1 %3474  ;;  %3782 = vperm.xlu0 %4405, %v8039_v41  }
 0xadb   : > { %v3463_v20 = vpop.permute.xlu0 %3462 }
 0xadd   : > { %3788 = vperm.xlu1 %4406, %v8053_v46  }
 0xade   : > { %v3481_v56 = vpop.permute.xlu1 %3480  ;;  %3791 = vperm.xlu0 %4405, %v8090_v29  }
 0xadf   : > { %v3472_v39 = vpop.permute.xlu0 %3471 }
 0xae1   : > { %3794 = vperm.xlu1 %4406, %v8083_v1  }
 0xae2   : > { %v3487_v49 = vpop.permute.xlu1 %3486  ;;  %3797 = vperm.xlu0 %4405, %v8118_v43  }
 0xae3   : > { %v3478_v50 = vpop.permute.xlu0 %3477 }
 0xae5   : > { %3800 = vperm.xlu1 %4406, %v8111_v27   ;;  %v9537_v27 = vld [vmem:[#allocation17_spill] sm:$0xff] }
 0xae6   : > { %v3493_v12 = vpop.permute.xlu1 %3492  ;;  %3803 = vperm.xlu0 %4405, %v8137_v47   ;;  %vm3509_vm4 = vcmp.eq.s32.totalorder %v9537_v27, %v3463_v20  ;;  %vm3511_vm6 = vcmp.eq.s32.totalorder %v9537_v27, %v3469_v8  ;;  %vm3513_vm7 = vcmp.eq.s32.totalorder %v9537_v27, %v3475_v9  ;;  %vm3510_vm9 = vcmp.eq.s32.totalorder %v9537_v27, %v3466_v53 }
 0xae7   : > { %v3484_v37 = vpop.permute.xlu0 %3483  ;;  %vm3515_vm3 = vcmp.eq.s32.totalorder %v9537_v27, %v3481_v56  ;;  %vm3512_vm10 = vcmp.eq.s32.totalorder %v9537_v27, %v3472_v39  ;;  %vm3517_vm11 = vcmp.eq.s32.totalorder %v9537_v27, %v3487_v49  ;;  %vm3514_vm12 = vcmp.eq.s32.totalorder %v9537_v27, %v3478_v50 }
 0xae8   : > { %vm3519_vm2 = vcmp.eq.s32.totalorder %v9537_v27, %v3493_v12  ;;  %vm3516_vm13 = vcmp.eq.s32.totalorder %v9537_v27, %v3484_v37  ;;  %vm3345_vm14 = vcmp.eq.s32.totalorder %v9537_v27, %v8332_v48  ;;  %vm3347_vm0 = vcmp.eq.s32.totalorder %v9537_v27, %v8339_v63 }
 0xae9   : > { %3806 = vperm.xlu1 %4406, %v8046_v0   ;;  %v3441_v50 = vsel %vm3345_vm14, %v8437_v4, 0.0  ;;  %vm3338_vm14 = vcmp.eq.s32.totalorder %v9537_v27, %v8308_v16 }
 0xaea   : > { %v3499_v41 = vpop.permute.xlu1 %3498  ;;  %3809 = vperm.xlu0 %4405, %v8076_v11  }
 0xaeb   : > { %v3490_v46 = vpop.permute.xlu0 %3489  ;;  %vm3521_vm15 = vcmp.eq.s32.totalorder %v9537_v27, %v3499_v41 }
 0xaec   : > { %vm3518_vm8 = vcmp.eq.s32.totalorder %v9537_v27, %v3490_v46 }
 0xaed   : > { %3812 = vperm.xlu1 %4406, %v8069_v2  }
 0xaee   : > { %v8454_v29 = vpop.permute.xlu1 %3504  ;;  %3815 = vperm.xlu0 %4405, %v8103_v3  }
 0xaef   : > { %v8457_v1 = vpop.permute.xlu0 %3495  ;;  %vm3523_vm1 = vcmp.eq.s32.totalorder %v9537_v27, %v8454_v29 }
 0xaf0   : > { %vm3520_vm5 = vcmp.eq.s32.totalorder %v9537_v27, %v8457_v1 }
 0xaf1   : > { %3818 = vperm.xlu1 %4406, %v8096_v26  }
 0xaf2   : > { %v3527_v43 = vpop.permute.xlu1 %3526  ;;  %3821 = vperm.xlu0 %4405, %v8131_v57  }
 0xaf3   : > { %v8462_v0 = vsel %vm3509_vm4, %v3527_v43, 0.0  ;;  %v8464_v47 = vpop.permute.xlu0 %3501 }
 0xaf4   : > { %vm3522_vm4 = vcmp.eq.s32.totalorder %v9537_v27, %v8464_v47 }
 0xaf5   : > { %3824 = vperm.xlu1 %4406, %v8125_v18  }
 0xaf6   : > { %v3535_v2 = vpop.permute.xlu1 %3534  ;;  %3827 = vperm.xlu0 %4405, %v8143_v40  }
 0xaf7   : > { %v8469_v11 = vsel %vm3511_vm6, %v3535_v2, 0.0  ;;  %v8471_v3 = vpop.permute.xlu0 %3507 }
 0xaf8   : > { %vm3524_vm6 = vcmp.eq.s32.totalorder %v9537_v27, %v8471_v3 }
 0xaf9   : > { %3846 = vperm.xlu1 %4406, %v8211_v55  }
 0xafa   : > { %v3543_v26 = vpop.permute.xlu1 %3542  ;;  %3850 = vperm.xlu0 %4405, %v8218_v33  }
 0xafb   : > { %v8477_v57 = vsel %vm3513_vm7, %v3543_v26, 0.0  ;;  %v3531_v18 = vpop.permute.xlu0 %3530  ;;  %vm3334_vm7 = vcmp.eq.s32.totalorder %v9537_v27, %v8297_v6 }
 0xafc   : > { %v8479_v8 = vsel %vm3510_vm9, %v3531_v18, 0.0  ;;  %vm3333_vm9 = vcmp.eq.s32.totalorder %v9537_v27, %v8289_v62 }
 0xafd   : > { %3854 = vperm.xlu1 %4406, %v8216_v38  }
 0xafe   : > { %v3551_v40 = vpop.permute.xlu1 %3550  ;;  %3858 = vperm.xlu0 %4405, %v8224_v5  }
 0xaff   : > { %v8485_v55 = vsel %vm3515_vm3, %v3551_v40, 0.0  ;;  %v3539_v20 = vpop.permute.xlu0 %3538 }
 0xb00   : > { %v8487_v33 = vsel %vm3512_vm10, %v3539_v20, 0.0 }
 0xb01   : > { %3862 = vperm.xlu1 %4406, %v8226_v42  }
 0xb02   : > { %v3559_v53 = vpop.permute.xlu1 %3558  ;;  %3866 = vperm.xlu0 %4405, %v8232_v34  }
 0xb03   : > { %v8493_v38 = vsel %vm3517_vm11, %v3559_v53, 0.0  ;;  %v3547_v9 = vpop.permute.xlu0 %3546  ;;  %vm3336_vm11 = vcmp.eq.s32.totalorder %v9537_v27, %v8301_v22 }
 0xb04   : > { %v8495_v5 = vsel %vm3514_vm12, %v3547_v9, 0.0  ;;  %vm3335_vm12 = vcmp.eq.s32.totalorder %v9537_v27, %v8294_v28 }
 0xb05   : > { %3870 = vperm.xlu1 %4406, %v8234_v52  }
 0xb06   : > { %v3567_v39 = vpop.permute.xlu1 %3566  ;;  %3874 = vperm.xlu0 %4405, %v8240_v45  }
 0xb07   : > { %v8501_v42 = vsel %vm3519_vm2, %v3567_v39, 0.0  ;;  %v3555_v49 = vpop.permute.xlu0 %3554  ;;  %v3430_v39 = vsel %vm3334_vm7, %v8391_v54, 0.0  ;;  %vm3342_vm7 = vcmp.eq.s32.totalorder %v9537_v27, %v8322_v13 }
 0xb08   : > { %v8503_v34 = vsel %vm3516_vm13, %v3555_v49, 0.0  ;;  %v3429_v49 = vsel %vm3333_vm9, %v8403_v15, 0.0  ;;  %v3432_v15 = vsel %vm3336_vm11, %v8397_v14, 0.0  ;;  %vm3341_vm9 = vcmp.eq.s32.totalorder %v9537_v27, %v8318_v36  ;;  %v9539_v36 = vld [vmem:[#allocation130_spill] sm:$0xff] }
 0xb09   : > { %3878 = vperm.xlu1 %4406, %v8242_v51   ;;  %vm3344_vm11 = vcmp.eq.s32.totalorder %v9537_v27, %v9539_v36 }
 0xb0a   : > { %v3575_v52 = vpop.permute.xlu1 %3574  ;;  %3882 = vperm.xlu0 %4405, %v8246_v59   ;;  %v3443_v59 = vsel %vm3347_vm0, %v8441_v58, 0.0 }
 0xb0b   : > { %v3601_v45 = vsel %vm3521_vm15, %v3575_v52, 0.0  ;;  %v3563_v56 = vpop.permute.xlu0 %3562  ;;  %v3606_v52 = vadd.f32 %v8479_v8, %v3430_v39  ;;  %v3431_v8 = vsel %vm3335_vm12, %v8409_v10, 0.0  ;;  %vm3337_vm15 = vcmp.eq.s32.totalorder %v9537_v27, %v8304_v60 }
 0xb0c   : > { %v8512_v12 = vadd.f32 %v3601_v45, %v3441_v50  ;;  %v8514_v37 = vsel %vm3518_vm8, %v3563_v56, 0.0  ;;  %v3605_v45 = vadd.f32 %v8462_v0, %v3429_v49  ;;  %v3608_v0 = vadd.f32 %v8487_v33, %v3432_v15 }
 0xb0d   : > { %3886 = vperm.xlu1 %4406, %v8248_v35   ;;  %v3434_v10 = vsel %vm3338_vm14, %v8401_v32, 0.0 }
 0xb0e   : > { %v3583_v51 = vpop.permute.xlu1 %3582  ;;  %3890 = vperm.xlu0 %4405, %v8252_v19  }
 0xb0f   : > { %v3603_v48 = vsel %vm3523_vm1, %v3583_v51, 0.0  ;;  %v3571_v4 = vpop.permute.xlu0 %3570  ;;  %vm3340_vm1 = vcmp.eq.s32.totalorder %v9537_v27, %v8315_v7 }
 0xb10   : > { %v8525_v41 = vadd.f32 %v3603_v48, %v3443_v59  ;;  %v8527_v46 = vsel %vm3520_vm5, %v3571_v4, 0.0  ;;  %v3607_v48 = vadd.f32 %v8469_v11, %v3431_v8  ;;  %v3610_v11 = vadd.f32 %v8495_v5, %v3434_v10 }
 0xb11   : > { %3894 = vperm.xlu1 %4406, %v8254_v23   ;;  %vm3339_vm5 = vcmp.eq.s32.totalorder %v9537_v27, %v8311_v24 }
 0xb12   : > { %3898 = vperm.xlu0 %4405, %v8258_v21  }
 0xb13   : > { %v3623_v35 = vpop.permute.xlu1 %3622  ;;  %v3579_v19 = vpop.permute.xlu0 %3578 }
 0xb14   : > { %v8533_v63 = vsel %vm3522_vm4, %v3579_v19, 0.0  ;;  %vm3669_vm10 = vcmp.eq.s32.totalorder %v9537_v27, %v3623_v35  ;;  %v3433_v35 = vsel %vm3337_vm15, %v8415_v61, 0.0  ;;  %v3436_v61 = vsel %vm3340_vm1, %v8407_v17, 0.0 }
 0xb15   : > { %3902 = vperm.xlu1 %4406, %v8260_v30  }
 0xb16   : > { %3906 = vperm.xlu0 %4405, %v8264_v25  }
 0xb17   : > { %v3629_v58 = vpop.permute.xlu1 %3628  ;;  %v3587_v29 = vpop.permute.xlu0 %3586 }
 0xb18   : > { %v8539_v1 = vsel %vm3524_vm6, %v3587_v29, 0.0  ;;  %vm3671_vm13 = vcmp.eq.s32.totalorder %v9537_v27, %v3629_v58  ;;  %v3609_v58 = vadd.f32 %v8477_v57, %v3433_v35  ;;  %v3612_v57 = vadd.f32 %v8503_v34, %v3436_v61  ;;  %v9545_v35 = vld [vmem:[#allocation132_spill] sm:$0xff] }
 0xb1b   : > { %v3632_v23 = vpop.permute.xlu1 %3631 }
 0xb1c   : > { %v3626_v21 = vpop.permute.xlu0 %3625  ;;  %vm3672_vm2 = vcmp.eq.s32.totalorder %v9537_v27, %v3632_v23  ;;  %v3435_v23 = vsel %vm3339_vm5, %v8421_v44, 0.0  ;;  %v3438_v44 = vsel %vm3342_vm7, %v8413_v31, 0.0 }
 0xb1d   : > { %vm3670_vm3 = vcmp.eq.s32.totalorder %v9537_v27, %v3626_v21  ;;  %v3614_v39 = vadd.f32 %v8514_v37, %v3438_v44  ;;  %v9541_v37 = vld [vmem:[#allocation149_spill] sm:$0xff] }
 0xb1f   : > { %v3638_v43 = vpop.permute.xlu1 %3637 }
 0xb20   : > { %v3635_v2 = vpop.permute.xlu0 %3634  ;;  %vm3674_vm8 = vcmp.eq.s32.totalorder %v9537_v27, %v3638_v43  ;;  %v3611_v43 = vadd.f32 %v8485_v55, %v3435_v23 }
 0xb21   : > { %vm3673_vm0 = vcmp.eq.s32.totalorder %v9537_v27, %v3635_v2 }
 0xb23   : > { %v3644_v47 = vpop.permute.xlu1 %3643 }
 0xb24   : > { %v8541_v26 = vpop.permute.xlu0 %3640  ;;  %vm3676_vm4 = vcmp.eq.s32.totalorder %v9537_v27, %v3644_v47  ;;  %v9538_v47 = vld [vmem:[#allocation151_spill] sm:$0xff] }
 0xb25   : > { %vm3675_vm6 = vcmp.eq.s32.totalorder %v9537_v27, %v8541_v26  ;;  %v3437_v55 = vsel %vm3341_vm9, %v9538_v47, 0.0 }
 0xb26   : > { %v3613_v13 = vadd.f32 %v8493_v38, %v3437_v55 }
 0xb27   : > { %v8543_v18 = vpop.permute.xlu1 %3649 }
 0xb28   : > { %v8545_v40 = vpop.permute.xlu0 %3646 }
 0xb2b   : > { %v8547_v30 = vpop.permute.xlu1 %3655 }
 0xb2c   : > { %v8549_v25 = vpop.permute.xlu0 %3652 }
 0xb2f   : > { %v8551_v3 = vpop.permute.xlu1 %3661 }
 0xb30   : > { %v8553_v20 = vpop.permute.xlu0 %3658  ;;  %vm3682_vm15 = vcmp.eq.s32.totalorder %v9537_v27, %v8551_v3 }
 0xb33   : > { %v8555_v53 = vpop.permute.xlu1 %3667 }
 0xb34   : > { %v8557_v9 = vpop.permute.xlu0 %3664  ;;  %vm3684_vm1 = vcmp.eq.s32.totalorder %v9537_v27, %v8555_v53 }
 0xb35   : > { %vm3683_vm5 = vcmp.eq.s32.totalorder %v9537_v27, %v8557_v9 }
 0xb37   : > { %v3691_v50 = vpop.permute.xlu1 %3690 }
 0xb38   : > { %v3750_v56 = vsel %vm3670_vm3, %v3691_v50, 0.0  ;;  %v3687_v51 = vpop.permute.xlu0 %3686  ;;  %vm3678_vm3 = vcmp.eq.s32.totalorder %v9537_v27, %v8543_v18 }
 0xb39   : > { %v8571_v6 = vadd.f32 %v3750_v56, %v3606_v52  ;;  %v3749_v62 = vsel %vm3669_vm10, %v3687_v51, 0.0  ;;  %vm3677_vm10 = vcmp.eq.s32.totalorder %v9537_v27, %v8545_v40  ;;  %v3440_v56 = vsel %vm3344_vm11, %v9541_v37, 0.0  ;;  %v9542_v51 = vld [vmem:[#allocation153_spill] sm:$0xff]  ;;  %v9551_v37 = vld [vmem:[#allocation136_spill] sm:$0xff] }
 0xb3a   : > { %v8576_v54 = vadd.f32 %v3749_v62, %v3605_v45  ;;  %v9540_v45 = vld [vmem:[#allocation129_spill] sm:$0xff]  ;;  %v3616_v62 = vadd.f32 %v8527_v46, %v3440_v56 }
 0xb3b   : > { %v3699_v59 = vpop.permute.xlu1 %3698  ;;  %vm3343_vm12 = vcmp.eq.s32.totalorder %v9537_v27, %v9540_v45 }
 0xb3c   : > { %v3752_v22 = vsel %vm3672_vm2, %v3699_v59, 0.0  ;;  %v3695_v4 = vpop.permute.xlu0 %3694  ;;  %v3439_v38 = vsel %vm3343_vm12, %v9542_v51, 0.0  ;;  %vm3680_vm2 = vcmp.eq.s32.totalorder %v9537_v27, %v8547_v30  ;;  %v9543_v59 = vld [vmem:[#allocation131_spill] sm:$0xff] }
 0xb3d   : > { %v8585_v28 = vadd.f32 %v3752_v22, %v3608_v0  ;;  %v3751_v14 = vsel %vm3671_vm13, %v3695_v4, 0.0  ;;  %v3615_v15 = vadd.f32 %v8501_v42, %v3439_v38  ;;  %vm3679_vm13 = vcmp.eq.s32.totalorder %v9537_v27, %v8549_v25  ;;  %v9544_v4 = vld [vmem:[#allocation150_spill] sm:$0xff]  ;;  %v9552_v38 = vld [vmem:[#allocation139_spill] sm:$0xff] }
 0xb3e   : > { %v8590_v33 = vadd.f32 %v3751_v14, %v3607_v48  ;;  %vm3346_vm14 = vcmp.eq.s32.totalorder %v9537_v27, %v9543_v59 }
 0xb3f   : > { %v3707_v19 = vpop.permute.xlu1 %3706  ;;  %v3442_v14 = vsel %vm3346_vm14, %v9544_v4, 0.0  ;;  %v9553_v4 = vld [vmem:[#allocation138_spill] sm:$0xff] }
 0xb40   : > { %v3754_v16 = vsel %vm3674_vm8, %v3707_v19, 0.0  ;;  %v3703_v29 = vpop.permute.xlu0 %3702  ;;  %v3618_v30 = vadd.f32 %v8533_v63, %v3442_v14  ;;  %vm3681_vm8 = vcmp.eq.s32.totalorder %v9537_v27, %v8553_v20 }
 0xb41   : > { %v8599_v60 = vadd.f32 %v3754_v16, %v3610_v11  ;;  %v3753_v32 = vsel %vm3673_vm0, %v3703_v29, 0.0  ;;  %vm3348_vm0 = vcmp.eq.s32.totalorder %v9537_v27, %v9545_v35 }
 0xb42   : > { %v8604_v5 = vadd.f32 %v3753_v32, %v3609_v58  ;;  %v9546_v58 = vld [vmem:[#allocation152_spill] sm:$0xff] }
 0xb43   : > { %v3715_v21 = vpop.permute.xlu1 %3714  ;;  %v3444_v16 = vsel %vm3348_vm0, %v9546_v58, 0.0 }
 0xb44   : > { %v3756_v7 = vsel %vm3676_vm4, %v3715_v21, 0.0  ;;  %v3711_v2 = vpop.permute.xlu0 %3710  ;;  %v3620_v63 = vadd.f32 %v8539_v1, %v3444_v16 }
 0xb45   : > { %v8614_v24 = vadd.f32 %v3756_v7, %v3612_v57  ;;  %v3755_v17 = vsel %vm3675_vm6, %v3711_v2, 0.0 }
 0xb46   : > { %v8619_v34 = vadd.f32 %v3755_v17, %v3611_v43 }
 0xb47   : > { %v3723_v26 = vpop.permute.xlu1 %3722 }
 0xb48   : > { %v3758_v49 = vsel %vm3678_vm3, %v3723_v26, 0.0  ;;  %v3719_v52 = vpop.permute.xlu0 %3718 }
 0xb49   : > { %v8630_v31 = vadd.f32 %v3758_v49, %v3614_v39  ;;  %v3757_v50 = vsel %vm3677_vm10, %v3719_v52, 0.0  ;;  %v9547_v39 = vld [vmem:[#allocation133_spill] sm:$0xff]  ;;  %v9549_v52 = vld [vmem:[#allocation135_spill] sm:$0xff] }
 0xb4a   : > { %v8635_v18 = vadd.f32 %v3757_v50, %v3613_v13  ;;  %4439 = vrcp.f32 %v9547_v39  ;;  %v9548_v13 = vld [vmem:[#allocation134_spill] sm:$0xff]  ;;  %v9550_v50 = vld [vmem:[#allocation137_spill] sm:$0xff] }
 0xb4b   : > { %v3731_v40 = vpop.permute.xlu1 %3730  ;;  %4441 = vrcp.f32 %v9548_v13 }
 0xb4c   : > { %v3760_v8 = vsel %vm3680_vm2, %v3731_v40, 0.0  ;;  %v3727_v0 = vpop.permute.xlu0 %3726  ;;  %4443 = vrcp.f32 %v9549_v52 }
 0xb4d   : > { %v8646_v48 = vadd.f32 %v3760_v8, %v3616_v62  ;;  %v3759_v22 = vsel %vm3679_vm13, %v3727_v0, 0.0  ;;  %4445 = vrcp.f32 %v9550_v50 }
 0xb4e   : > { %v8649_v46 = vadd.f32 %v3759_v22, %v3615_v15  ;;  %4447 = vrcp.f32 %v9551_v37 }
 0xb4f   : > { %v3739_v42 = vpop.permute.xlu1 %3738  ;;  %4449 = vrcp.f32 %v9552_v38 }
 0xb50   : > { %v3762_v25 = vsel %vm3682_vm15, %v3739_v42, 0.0  ;;  %v3735_v10 = vpop.permute.xlu0 %3734  ;;  %4451 = vrcp.f32 %v9553_v4  ;;  %v9559_v4 = vld [vmem:[#allocation144_spill] sm:$0xff] }
 0xb51   : > { %v8658_v11 = vadd.f32 %v3762_v25, %v3618_v30  ;;  %v3761_v19 = vsel %vm3681_vm8, %v3735_v10, 0.0  ;;  %v9554_v25 = vld [vmem:[#allocation141_spill] sm:$0xff] }
 0xb52   : > { %v8662_v29 = vadd.f32 %v3761_v19, %v8512_v12  ;;  %4453 = vrcp.f32 %v9554_v25 }
 0xb53   : > { %v3747_v3 = vpop.permute.xlu1 %3746 }
 0xb54   : > { %v3764_v20 = vsel %vm3684_vm1, %v3747_v3, 0.0  ;;  %v3743_v32 = vpop.permute.xlu0 %3742  ;;  %v4440_v15 = vpop.eup %4439 }
 0xb55   : > { %v8669_v61 = vadd.f32 %v3764_v20, %v3620_v63  ;;  %v3763_v23 = vsel %vm3683_vm5, %v3743_v32, 0.0  ;;  %v4442_v0 = vpop.eup %4441  ;;  %v9555_v63 = vld [vmem:[#allocation140_spill] sm:$0xff] }
 0xb56   : > { %v8672_v57 = vadd.f32 %v3763_v23, %v8525_v41  ;;  %4455 = vrcp.f32 %v9555_v63  ;;  %v9561_v63 = vld [vmem:[#allocation146_spill] sm:$0xff] }
 0xb58   : > { %v3786_v21 = vpop.permute.xlu1 %3785 }
 0xb59   : > { %v3783_v12 = vpop.permute.xlu0 %3782  ;;  %vm3830_vm6 = vcmp.eq.s32.totalorder %v9537_v27, %v3786_v21 }
 0xb5a   : > { %vm3829_vm4 = vcmp.eq.s32.totalorder %v9537_v27, %v3783_v12 }
 0xb5c   : > { %v3789_v43 = vpop.permute.xlu1 %3788 }
 0xb5d   : > { %v3792_v7 = vpop.permute.xlu0 %3791  ;;  %vm3831_vm7 = vcmp.eq.s32.totalorder %v9537_v27, %v3789_v43  ;;  %v9556_v43 = vld [vmem:[#allocation143_spill] sm:$0xff] }
 0xb5e   : > { %vm3832_vm9 = vcmp.eq.s32.totalorder %v9537_v27, %v3792_v7  ;;  %4457 = vrcp.f32 %v9556_v43 }
 0xb60   : > { %v3795_v1 = vpop.permute.xlu1 %3794 }
 0xb61   : > { %v3798_v2 = vpop.permute.xlu0 %3797  ;;  %vm3833_vm3 = vcmp.eq.s32.totalorder %v9537_v27, %v3795_v1 }
 0xb62   : > { %vm3834_vm10 = vcmp.eq.s32.totalorder %v9537_v27, %v3798_v2 }
 0xb64   : > { %v8674_v17 = vpop.permute.xlu1 %3800 }
 0xb65   : > { %v8676_v53 = vpop.permute.xlu0 %3803  ;;  %vm3835_vm11 = vcmp.eq.s32.totalorder %v9537_v27, %v8674_v17 }
 0xb66   : > { %vm3836_vm12 = vcmp.eq.s32.totalorder %v9537_v27, %v8676_v53 }
 0xb68   : > { %v8678_v44 = vpop.permute.xlu1 %3806 }
 0xb69   : > { %v8680_v9 = vpop.permute.xlu0 %3809  ;;  %vm3837_vm2 = vcmp.eq.s32.totalorder %v9537_v27, %v8678_v44 }
 0xb6a   : > { %vm3838_vm13 = vcmp.eq.s32.totalorder %v9537_v27, %v8680_v9 }
 0xb6c   : > { %v8682_v47 = vpop.permute.xlu1 %3812 }
 0xb6d   : > { %v8684_v55 = vpop.permute.xlu0 %3815  ;;  %vm3839_vm14 = vcmp.eq.s32.totalorder %v9537_v27, %v8682_v47 }
 0xb6e   : > { %vm3840_vm15 = vcmp.eq.s32.totalorder %v9537_v27, %v8684_v55 }
 0xb70   : > { %v8686_v41 = vpop.permute.xlu1 %3818 }
 0xb71   : > { %v8689_v26 = vpop.permute.xlu0 %3821  ;;  %vm3841_vm8 = vcmp.eq.s32.totalorder %v9537_v27, %v8686_v41 }
 0xb72   : > { %vm3842_vm0 = vcmp.eq.s32.totalorder %v9537_v27, %v8689_v26 }
 0xb74   : > { %v8692_v49 = vpop.permute.xlu1 %3824 }
 0xb75   : > { %v8695_v36 = vpop.permute.xlu0 %3827  ;;  %vm3843_vm1 = vcmp.eq.s32.totalorder %v9537_v27, %v8692_v49 }
 0xb76   : > { %vm3844_vm5 = vcmp.eq.s32.totalorder %v9537_v27, %v8695_v36 }
 0xb78   : > { %v3847_v45 = vpop.permute.xlu1 %3846 }
 0xb79   : > { %v3909_v56 = vsel %vm3829_vm4, %v3847_v45, 0.0  ;;  %v3851_v51 = vpop.permute.xlu0 %3850  ;;  %v9557_v45 = vld [vmem:[#allocation142_spill] sm:$0xff] }
 0xb7a   : > { %v3925_v62 = vadd.f32 %v3909_v56, %v8576_v54  ;;  %v3910_v40 = vsel %vm3830_vm6, %v3851_v51, 0.0  ;;  %4459 = vrcp.f32 %v9557_v45 }
 0xb7b   : > { %v3926_v8 = vadd.f32 %v3910_v40, %v8571_v6  ;;  %v4444_v6 = vpop.eup %4443  ;;  %v9558_v40 = vld [vmem:[#allocation145_spill] sm:$0xff] }
 0xb7c   : > { %v3942_v59 = vmul.f32 %v4440_v15, %v3925_v62  ;;  %v3855_v22 = vpop.permute.xlu1 %3854  ;;  %v4446_v16 = vpop.eup %4445  ;;  %4461 = vrcp.f32 %v9558_v40 }
 0xb7d   : > { %v3944_v14 = vmul.f32 %v4442_v0, %v3926_v8  ;;  %v3911_v30 = vsel %vm3831_vm7, %v3855_v22, 0.0  ;;  %v3859_v42 = vpop.permute.xlu0 %3858  ;;  %v4448_v13 = vpop.eup %4447  ;;  %4463 = vrcp.f32 %v9559_v4 }
 0xb7e   : > { %v3973_v10 = vadd.f32 1e-05, %v3942_v59  ;;  %v3927_v54 = vadd.f32 %v3911_v30, %v8590_v33  ;;  %v3912_v35 = vsel %vm3832_vm9, %v3859_v42, 0.0  ;;  %v4450_v50 = vpop.eup %4449 }
 0xb7f   : > { %v3974_v19 = vadd.f32 1e-05, %v3944_v14  ;;  %v3928_v58 = vadd.f32 %v3912_v35, %v8585_v28  ;;  %v4452_v0 = vpop.eup %4451  ;;  %v9560_v35 = vld [vmem:[#allocation147_spill] sm:$0xff] }
 0xb80   : > { %v3989_v3 = vmin.f32 %v3973_v10, 1.0  ;;  %v3946_v20 = vmul.f32 %v4444_v6, %v3927_v54  ;;  %v3863_v32 = vpop.permute.xlu1 %3862  ;;  %v4454_v22 = vpop.eup %4453  ;;  %4465 = vrcp.f32 %v9560_v35 }
 0xb81   : > { %v3990_v23 = vmin.f32 %v3974_v19, 1.0  ;;  %v3948_v21 = vmul.f32 %v4446_v16, %v3928_v58  ;;  %v3913_v33 = vsel %vm3833_vm3, %v3863_v32, 0.0  ;;  %v3867_v12 = vpop.permute.xlu0 %3866  ;;  %v4456_v54 = vpop.eup %4455  ;;  %4467 = vrcp.f32 %v9561_v63 }
 0xb82   : > { %4005 = vst [vmem:[%s4948_s10] sm:$0xff] %v3989_v3  ;;  %v3975_v7 = vadd.f32 1e-05, %v3946_v20  ;;  %v3929_v28 = vadd.f32 %v3913_v33, %v8604_v5  ;;  %v3914_v39 = vsel %vm3834_vm10, %v3867_v12, 0.0  ;;  %v4458_v16 = vpop.eup %4457  ;;  %v9562_v12 = vld [vmem:[#allocation148_spill] sm:$0xff] }
 0xb83   : > { %4006 = vst [vmem:[%s4948_s10 + $0x8] sm:$0xff] %v3990_v23  ;;  %v3976_v1 = vadd.f32 1e-05, %v3948_v21  ;;  %v3930_v52 = vadd.f32 %v3914_v39, %v8599_v60  ;;  %4469 = vrcp.f32 %v9562_v12 }
 0xb84   : > { %v3991_v2 = vmin.f32 %v3975_v7, 1.0  ;;  %v3950_v37 = vmul.f32 %v4448_v13, %v3929_v28  ;;  %v3871_v56 = vpop.permute.xlu1 %3870  ;;  %v4460_v33 = vpop.eup %4459 }
 0xb85   : > { %v3992_v5 = vmin.f32 %v3976_v1, 1.0  ;;  %v3952_v51 = vmul.f32 %v4450_v50, %v3930_v52  ;;  %v3915_v38 = vsel %vm3835_vm11, %v3871_v56, 0.0  ;;  %v3875_v62 = vpop.permute.xlu0 %3874 }
 0xb86   : > { %4007 = vst [vmem:[%s4948_s10 + $0x10] sm:$0xff] %v3991_v2  ;;  %v3977_v60 = vadd.f32 1e-05, %v3950_v37  ;;  %v3931_v15 = vadd.f32 %v3915_v38, %v8619_v34  ;;  %v3916_v8 = vsel %vm3836_vm12, %v3875_v62, 0.0  ;;  %v4462_v39 = vpop.eup %4461 }
 0xb87   : > { %4008 = vst [vmem:[%s4948_s10 + $0x18] sm:$0xff] %v3992_v5  ;;  %v3978_v17 = vadd.f32 1e-05, %v3952_v51  ;;  %v3932_v59 = vadd.f32 %v3916_v8, %v8614_v24  ;;  %v4464_v2 = vpop.eup %4463 }
 0xb88   : > { %v3993_v53 = vmin.f32 %v3977_v60, 1.0  ;;  %v3954_v14 = vmul.f32 %v4452_v0, %v3931_v15  ;;  %v3879_v30 = vpop.permute.xlu1 %3878 }
 0xb89   : > { %v3994_v34 = vmin.f32 %v3978_v17, 1.0  ;;  %v3956_v42 = vmul.f32 %v4454_v22, %v3932_v59  ;;  %v3917_v25 = vsel %vm3837_vm2, %v3879_v30, 0.0  ;;  %v3883_v10 = vpop.permute.xlu0 %3882 }
 0xb8a   : > { %4009 = vst [vmem:[%s4948_s10 + $0x20] sm:$0xff] %v3993_v53  ;;  %v3979_v24 = vadd.f32 1e-05, %v3954_v14  ;;  %v3933_v6 = vadd.f32 %v3917_v25, %v8635_v18  ;;  %v3918_v19 = vsel %vm3838_vm13, %v3883_v10, 0.0  ;;  %v4466_v51 = vpop.eup %4465 }
 0xb8b   : > { %4010 = vst [vmem:[%s4948_s10 + $0x28] sm:$0xff] %v3994_v34  ;;  %v3980_v44 = vadd.f32 1e-05, %v3956_v42  ;;  %v3934_v58 = vadd.f32 %v3918_v19, %v8630_v31  ;;  %v4468_v8 = vpop.eup %4467 }
 0xb8c   : > { %v3995_v9 = vmin.f32 %v3979_v24, 1.0  ;;  %v3958_v3 = vmul.f32 %v4456_v54, %v3933_v6  ;;  %v3887_v20 = vpop.permute.xlu1 %3886 }
 0xb8d   : > { %v3996_v18 = vmin.f32 %v3980_v44, 1.0  ;;  %v3960_v32 = vmul.f32 %v4458_v16, %v3934_v58  ;;  %v3919_v23 = vsel %vm3839_vm14, %v3887_v20, 0.0  ;;  %v3891_v21 = vpop.permute.xlu0 %3890  ;;  %v4470_v22 = vpop.eup %4469 }
 0xb8e   : > { %4011 = vst [vmem:[%s4948_s10 + $0x30] sm:$0xff] %v3995_v9  ;;  %v3981_v31 = vadd.f32 1e-05, %v3958_v3  ;;  %v3935_v43 = vadd.f32 %v3919_v23, %v8649_v46  ;;  %v3920_v7 = vsel %vm3840_vm15, %v3891_v21, 0.0 }
 0xb8f   : > { %4012 = vst [vmem:[%s4948_s10 + $0x38] sm:$0xff] %v3996_v18  ;;  %v3982_v47 = vadd.f32 1e-05, %v3960_v32  ;;  %v3936_v28 = vadd.f32 %v3920_v7, %v8646_v48 }
 0xb90   : > { %v3997_v55 = vmin.f32 %v3981_v31, 1.0  ;;  %v3962_v13 = vmul.f32 %v4460_v33, %v3935_v43  ;;  %v3895_v1 = vpop.permute.xlu1 %3894 }
 0xb91   : > { %v3998_v52 = vmin.f32 %v3982_v47, 1.0  ;;  %v3964_v50 = vmul.f32 %v4462_v39, %v3936_v28  ;;  %v3921_v46 = vsel %vm3841_vm8, %v3895_v1, 0.0  ;;  %v3899_v45 = vpop.permute.xlu0 %3898 }
 0xb92   : > { %4013 = vst [vmem:[%s4948_s10 + $0x40] sm:$0xff] %v3997_v55  ;;  %v3983_v37 = vadd.f32 1e-05, %v3962_v13  ;;  %v3937_v48 = vadd.f32 %v3921_v46, %v8662_v29  ;;  %v3922_v56 = vsel %vm3842_vm0, %v3899_v45, 0.0 }
 0xb93   : > { %4014 = vst [vmem:[%s4948_s10 + $0x48] sm:$0xff] %v3998_v52  ;;  %v3984_v5 = vadd.f32 1e-05, %v3964_v50  ;;  %v3938_v41 = vadd.f32 %v3922_v56, %v8658_v11 }
 0xb94   : > { %v3999_v26 = vmin.f32 %v3983_v37, 1.0  ;;  %v3966_v38 = vmul.f32 %v4464_v2, %v3937_v48  ;;  %v3903_v62 = vpop.permute.xlu1 %3902 }
 0xb95   : > { %v4000_v40 = vmin.f32 %v3984_v5, 1.0  ;;  %v3968_v60 = vmul.f32 %v4466_v51, %v3938_v41  ;;  %v3923_v29 = vsel %vm3843_vm1, %v3903_v62, 0.0  ;;  %v3907_v15 = vpop.permute.xlu0 %3906 }
 0xb96   : > { %4015 = vst [vmem:[%s4948_s10 + $0x50] sm:$0xff] %v3999_v26  ;;  %v3985_v11 = vadd.f32 1e-05, %v3966_v38  ;;  %v3939_v0 = vadd.f32 %v3923_v29, %v8672_v57  ;;  %v3924_v17 = vsel %vm3844_vm5, %v3907_v15, 0.0 }
 0xb97   : > { %4016 = vst [vmem:[%s4948_s10 + $0x58] sm:$0xff] %v4000_v40  ;;  %v3986_v49 = vadd.f32 1e-05, %v3968_v60  ;;  %v3940_v59 = vadd.f32 %v3924_v17, %v8669_v61 }
 0xb98   : > { %v4001_v27 = vmin.f32 %v3985_v11, 1.0  ;;  %v3970_v36 = vmul.f32 %v4468_v8, %v3939_v0 }
 0xb99   : > { %v4002_v4 = vmin.f32 %v3986_v49, 1.0  ;;  %v3972_v53 = vmul.f32 %v4470_v22, %v3940_v59 }
 0xb9a   : > { %4017 = vst [vmem:[%s4948_s10 + $0x60] sm:$0xff] %v4001_v27  ;;  %v3987_v14 = vadd.f32 1e-05, %v3970_v36 }
 0xb9b   : > { %4018 = vst [vmem:[%s4948_s10 + $0x68] sm:$0xff] %v4002_v4  ;;  %v3988_v30 = vadd.f32 1e-05, %v3972_v53 }
 0xb9c   : > { %v4003_v34 = vmin.f32 %v3987_v14, 1.0 }
 0xb9d   : > { %v4004_v42 = vmin.f32 %v3988_v30, 1.0 }
 0xb9e   : > { %4019 = vst [vmem:[%s4948_s10 + $0x70] sm:$0xff] %v4003_v34 }
 0xb9f   : > { %4020 = vst [vmem:[%s4948_s10 + $0x78] sm:$0xff] %v4004_v42 }
 0xba0 PF: > { %s4192_s18 = sshll.u32 %s4645_s19, 11  ;;  %s4035_s11 = sshll.u32 %s4948_s10, 4  ;;  %s8775_s11 = int_to_ptr.vmem [resolvable:$true] %s4035_s11 }
 0xba1   : > { %s8772_s15 = scalar_lea.hbm %s8841_s3, %s4192_s18  ;;  %s4022_s27 = scalar_lea.sflag [#allocation7], %s4924_s9 }
 0xba2   : > { %s4531_s28 = scalar_lea.vmem %s8775_s11, 2048  ;;  %p9563_p0 = scmp.ne.s32.totalorder %s9054_s30, 0 }
 0xba3   : > { %p4532_p12 = scmp.ne.s32.totalorder %s8775_s11, %s4531_s28  ;;  %s4671_s8 = smov [#allocation10]  }
 0xba4   : > { %s4535_s29 = sshll.u32 %s4671_s8, 4  ;;  %s4536_s29 = int_to_ptr.vmem [resolvable:$false] %s4535_s29 }
 0xba5   : > { %p4533_p5 = pnand %p4532_p12, %p9563_p0  ;;  %s4537_s19 = scalar_lea.vmem %s4536_s29, 4096 }
 0xba6   : > { %p4538_p1 = scmp.lt.s32.totalorder %s8775_s11, %s4536_s29  ;;  %p4539_p9 = scmp.lt.s32.totalorder %s4537_s19, %s4531_s28 }
 0xba7   : > { %p4534_p3 = pneg %p4533_p5 }
 0xba8   : > { %p4540_p2 = por %p4539_p9, %p4538_p1 }
 0xbaa   : > { %p4541_p11 = pnand %p4540_p2, %p4534_p3 }
 0xbac   : > { %4544 = shalt.err (!%p4541_p11)
}
 0xbad   : > { %s4545_s5 = scalar_lea.hbm %s8772_s15, 2048  ;;  %s4549_s23 = scalar_lea.hbm %s8841_s3, 4096 }
 0xbae   : > { %p4546_p7 = scmp.ne.s32.totalorder %s8772_s15, %s4545_s5  ;;  %p4550_p10 = scmp.lt.u32.totalorder %s8772_s15, %s8841_s3 }
 0xbaf   : > { %p4551_p6 = scmp.lt.u32.totalorder %s4549_s23, %s4545_s5  ;;  %p4553_p12 = scmp.lt.u32.totalorder %s4545_s5, %s8772_s15 }
 0xbb0   : > { %p4547_p4 = pnand %p4546_p7, %p9563_p0 }
 0xbb1   : > { %p4552_p13 = por %p4551_p6, %p4550_p10 }
 0xbb2   : > { %p4548_p8 = pneg %p4547_p4 }
 0xbb3   : > { %p4554_p5 = por %p4553_p12, %p4552_p13 }
 0xbb5   : > { %p4555_p3 = pnand %p4554_p5, %p4548_p8 }
 0xbb7   : > { %4558 = shalt.err (!%p4555_p3)
}
 0xbb8   : > { %s4672_s18 = smov 128   ;;  %s4673_s26 = smov 8  }
 0xbb9   : > { %4213 = dma.vmem_to_hbm [thread:$0]  (%p9563_p0), %s8775_s11, 2048, %s8772_s15, %s4022_s27, %s4672_s18, %s4672_s18, %s4673_s26  }
 0xbba PF: > { %s9564_s4 = sld [smem:[#allocation14_spill]]  ;;  %s9565_s28 = sld [smem:[#allocation15_spill]] }
 0xbbb   : > { %p4227_p1 = scmp.ge.s32.totalorder %s4657_s22, 2 }
 0xbc0   : > { %s4050_s8 = sand.u32 1, %s9564_s4   ;;  %p9566_p9 = scmp.ne.s32.totalorder %s9565_s28, 0 }
 0xbc1   : > { %s4051_s29 = scalar_lea.sflag [#allocation7], %s4050_s8 }
 0xbc2   : > { %p4223_p2 = pnand %p4227_p1, %p9566_p9 }
 0xbc4   : > { %4612 = dma.done.wait (!%p4223_p2), %s4051_s29, 2048  }
 0xbc5   : > { %4614 = vsyncadd (!%p4223_p2), %s4051_s29, 4294965248  ;;  %s22_s22 = sadd.s32 1, %s4657_s22   ;;  %s9567_s30 = sld [smem:[#allocation16_spill]] }
 0xbc6   : > { %p19_p11 = scmp.ge.s32.totalorder %s22_s22, 8   ;;  %s9568_s12 = smov %s4621_s13 }
 0xbc7   : > { %s9569_s13 = smov %s4625_s14  ;;  %s9570_s14 = smov %s4866_s24 }
 0xbc8   : > { %s9571_s15 = smov %s4633_s16  ;;  %s9572_s16 = smov %s4637_s17 }
 0xbc9   : > { %s9573_s17 = smov %s4874_s0  ;;  %s9574_s18 = smov %s4649_s20 }
 0xbca   : > { %s9575_s19 = smov %s4653_s21  ;;  %s9577_s21 = smov %s9583_s25 }
 0xbcb   : > { %s9576_s20 = smov %s9567_s30  ;;  %21 = sbr.rel (!%p19_p11) target bundleno = 13 (0xd), region = 101 }
 0xbd2   :  { %4056 = vsyncpa [#allocation6], 1 }
 0xbd3   :  { %4058 = vsyncpa [#allocation6 + $0x1], 1 }
 0xbd4   :  { %4059 = vsyncpa [#allocation9], 1 }
 0xbd5   :  { %4061 = vsyncpa [#allocation9 + $0x1], 1 }
 0xbd6   :  { %4062 = vsyncpa [#allocation7], 1 }
 0xbd7   :  { %4064 = vsyncpa [#allocation7 + $0x1], 1 }

</bundles_post_ra>
